<compile_context>
chip_gen: v7x
topology: tpu7x:2x2x1
jax: 0.10.0
libtpu: 0.0.40
codegen_flags: <defaults>
</compile_context>

<pallas_src>
import functools

import numpy as np

import jax
import jax.numpy as jnp
from jax.experimental import pallas as pl
from jax.experimental.pallas import tpu as pltpu


# ---------------- Pallas kernels ----------------

def _conv_ln_relu_kernel(p_ref, w_ref, b_ref, g_ref, be_ref, o_ref):
    # p_ref : (B, K, P)   bf16 im2col patches (channels-major rows)
    # w_ref : (Cout, K)   bf16 flattened conv weight
    # b_ref : (Cout, 1)   f32 conv bias
    # g_ref / be_ref : (Cout, P) f32 LayerNorm affine (PyTorch (C,H,W) reshaped)
    # o_ref : (B, Cout, P) bf16
    eps = 1e-5
    tb = p_ref.shape[0]
    cout, pn = g_ref.shape
    inv_n = 1.0 / float(cout * pn)

    # hoisted sample-invariant reads / broadcasts (JAX does not CSE broadcast_in_dim)
    w = w_ref[...]
    g = g_ref[...]
    be = be_ref[...]
    bf = jnp.broadcast_to(b_ref[...], (cout, pn))

    for s in range(tb):                              # B is small & static
        y = jnp.dot(w, p_ref[s], preferred_element_type=jnp.float32) + bf   # (Cout, P)
        # two-pass LayerNorm over all (C,H,W) elements of this sample
        mu = jnp.sum(y) * inv_n
        cen = y - mu
        var = jnp.sum(cen * cen) * inv_n
        z = cen * jax.lax.rsqrt(var + eps) * g + be
        o_ref[s] = jnp.maximum(z, 0.0).astype(o_ref.dtype)                  # ReLU


def _fused_tail_kernel(scale, p2_ref, w2_ref, b2_ref, g2_ref, be2_ref,
                       w3_ref, b3_ref, g3w_ref, be3w_ref, mask_ref,
                       w1_ref, b1_ref, wf2_ref, bf2_ref, wf3_ref, bf3_ref,
                       o_ref, z2_scr, feat_scr):
    # conv2 + LN2 + ReLU + conv3 (shifted matmuls) + LN3 + ReLU + flatten + MLP head.
    eps = 1e-5
    tb = p2_ref.shape[0]
    c2, p2n = g2_ref.shape            # (64, 81)  -- conv2 output channels / 9*9
    c3, wq = g3w_ref.shape            # (64, 61)  -- conv3 output channels / wide grid

    # hoisted weight reads / broadcasts
    w2 = w2_ref[...]
    g2 = g2_ref[...]
    be2 = be2_ref[...]
    b2f = jnp.broadcast_to(b2_ref[...], (c2, p2n))
    g3w = g3w_ref[...]
    be3w = be3w_ref[...]
    b3f = jnp.broadcast_to(b3_ref[...], (c3, wq))
    mask = mask_ref[...]                              # (1, wq): 1 at real 7x7 positions
    n2 = float(c2 * p2n)                              # LayerNorm([64,9,9]) element count
    n3 = jnp.sum(mask) * c3                           # LayerNorm([64,7,7]) element count

    for s in range(tb):
        # ---- conv2 (32->64, k=4, s=2) + LayerNorm([64,9,9]) + ReLU ----------------
        y2 = jnp.dot(w2, p2_ref[s], preferred_element_type=jnp.float32) + b2f
        mu2 = jnp.sum(y2) / n2
        cen2 = y2 - mu2
        var2 = jnp.sum(cen2 * cen2) / n2
        z2 = cen2 * jax.lax.rsqrt(var2 + eps) * g2 + be2
        z2_scr[...] = jnp.maximum(z2, 0.0)                                # (64, 81) f32

        # ---- conv3 (64->64, k=3, s=1) as 9 shifted matmuls on the flat 9x9 grid ---
        y3 = b3f
        for k in range(9):
            off = 9 * (k // 3) + (k % 3)
            lhs = w3_ref[k]                                               # (64, 64) bf16
            rhs = z2_scr[:, pl.ds(off, wq)].astype(jnp.bfloat16)          # (64, 61)
            y3 = y3 + jnp.dot(lhs, rhs, preferred_element_type=jnp.float32)

        # ---- LayerNorm([64,7,7]) + ReLU (mask kills the 12 wrap-around columns) ---
        mu3 = jnp.sum(y3 * mask) / n3
        cen3 = (y3 - mu3) * mask
        var3 = jnp.sum(cen3 * cen3) / n3
        z3 = cen3 * jax.lax.rsqrt(var3 + eps) * g3w + be3w                # 0 at invalid
        h = jnp.maximum(z3, 0.0)                                          # (64, 61) f32

        # ---- channels-major flatten into the fc1 feature row ----------------------
        for ci in range(c3):
            feat_scr[pl.ds(s, 1), pl.ds(ci * wq, wq)] = h[ci:ci + 1, :]

    # ---- MLP head: fc1 -> ReLU -> fc2 -> ReLU -> fc3 -> tanh * 0.8*max_action -----
    feat = feat_scr[...].astype(jnp.bfloat16)                             # (tb, 64*61)
    a1 = jnp.dot(feat, w1_ref[...], preferred_element_type=jnp.float32) + b1_ref[...]
    a1 = jnp.maximum(a1, 0.0)                                             # drop1: identity
    a2 = jnp.dot(a1.astype(jnp.bfloat16), wf2_ref[...],
                 preferred_element_type=jnp.float32) + bf2_ref[...]
    a2 = jnp.maximum(a2, 0.0)                                             # drop2: identity
    raw = jnp.dot(a2.astype(jnp.bfloat16), wf3_ref[...],
                  preferred_element_type=jnp.float32) + bf3_ref[...]
    o_ref[:, 0, :] = jnp.tanh(raw) * scale


# ---------------- kernel wrappers ----------------

def conv1_ln_relu(patches, w, b, g, be):
    B, K, P = patches.shape
    Cout = w.shape[0]
    flops = int(B * (2 * Cout * K * P + 8 * Cout * P))
    bytes_accessed = int(patches.size * 2 + B * Cout * P * 2 + w.size * 2
                         + (b.size + g.size + be.size) * 4)
    return pl.pallas_call(
        _conv_ln_relu_kernel,
        out_shape=jax.ShapeDtypeStruct((B, Cout, P), jnp.bfloat16),
        grid=(1,),                                        # single step: whole batch
        in_specs=[
            pl.BlockSpec((B, K, P), lambda i: (0, 0, 0)),
            pl.BlockSpec((Cout, K), lambda i: (0, 0)),
            pl.BlockSpec((Cout, 1), lambda i: (0, 0)),
            pl.BlockSpec((Cout, P), lambda i: (0, 0)),
            pl.BlockSpec((Cout, P), lambda i: (0, 0)),
        ],
        out_specs=pl.BlockSpec((B, Cout, P), lambda i: (0, 0, 0)),
        compiler_params=pltpu.CompilerParams(dimension_semantics=("arbitrary",)),
        cost_estimate=pl.CostEstimate(flops=flops, transcendentals=B,
                                      bytes_accessed=bytes_accessed),
    )(patches, w, b, g, be)


def conv_tail_mlp(p2, pp, max_action, tb):
    B, K2, P2 = p2.shape
    C2 = pp["w2c"].shape[0]
    C3, WQ = pp["g3w"].shape
    F = pp["w1w"].shape[0]
    H = pp["w_fc2"].shape[0]
    A = pp["w_fc3"].shape[1]
    assert B % tb == 0
    kernel = functools.partial(_fused_tail_kernel, float(max_action) * 0.8)

    flops = int(B * (2 * C2 * K2 * P2 + 9 * 2 * C3 * C2 * WQ
                     + 2 * F * H + 2 * H * H + 2 * H * A + 16 * C3 * WQ))
    bytes_accessed = int(
        p2.size * 2 + B * A * 4
        + (pp["w2c"].size + pp["w3s"].size + pp["w1w"].size
           + pp["w_fc2"].size + pp["w_fc3"].size) * 2
        + (pp["g2"].size + pp["be2"].size + pp["g3w"].size + pp["be3w"].size) * 4)

    out = pl.pallas_call(
        kernel,
        out_shape=jax.ShapeDtypeStruct((B, 1, A), jnp.float32),
        grid=(B // tb,),
        in_specs=[
            pl.BlockSpec((tb, K2, P2), lambda i: (i, 0, 0)),
            pl.BlockSpec((C2, K2), lambda i: (0, 0)),
            pl.BlockSpec((C2, 1), lambda i: (0, 0)),
            pl.BlockSpec((C2, P2), lambda i: (0, 0)),
            pl.BlockSpec((C2, P2), lambda i: (0, 0)),
            pl.BlockSpec((9, C3, C2), lambda i: (0, 0, 0)),
            pl.BlockSpec((C3, 1), lambda i: (0, 0)),
            pl.BlockSpec((C3, WQ), lambda i: (0, 0)),
            pl.BlockSpec((C3, WQ), lambda i: (0, 0)),
            pl.BlockSpec((1, WQ), lambda i: (0, 0)),
            pl.BlockSpec((F, H), lambda i: (0, 0)),
            pl.BlockSpec((1, H), lambda i: (0, 0)),
            pl.BlockSpec((H, H), lambda i: (0, 0)),
            pl.BlockSpec((1, H), lambda i: (0, 0)),
            pl.BlockSpec((H, A), lambda i: (0, 0)),
            pl.BlockSpec((1, A), lambda i: (0, 0)),
        ],
        out_specs=pl.BlockSpec((tb, 1, A), lambda i: (i, 0, 0)),
        scratch_shapes=[pltpu.VMEM((C2, P2), jnp.float32),      # z2 (conv2 output)
                        pltpu.VMEM((tb, F), jnp.float32)],      # flattened fc1 features
        compiler_params=pltpu.CompilerParams(dimension_semantics=("parallel",)),
        cost_estimate=pl.CostEstimate(flops=flops, transcendentals=int(B * (A + 4)),
                                      bytes_accessed=bytes_accessed),
    )(p2, pp["w2c"], pp["b2c"], pp["g2"], pp["be2"],
      pp["w3s"], pp["b3c"], pp["g3w"], pp["be3w"], pp["maskw"],
      pp["w1w"], pp["b_fc1"], pp["w_fc2"], pp["b_fc2"], pp["w_fc3"], pp["b_fc3"])
    return out[:, 0, :]


# ---------------- JAX glue ----------------

def im2col(x, kh, kw, stride):
    """x: (B, C, H, W) -> channels-major patches (B, C*KH*KW, OH*OW).

    Row index c*(KH*KW) + i*KW + j matches PyTorch weight.reshape(Cout, -1)."""
    B, C, H, W = x.shape
    oh = (H - kh) // stride + 1
    ow = (W - kw) // stride + 1
    cols = []
    for i in range(kh):
        for j in range(kw):
            cols.append(x[:, :, i:i + stride * oh:stride, j:j + stride * ow:stride])
    p = jnp.stack(cols, axis=2)                       # (B, C, KH*KW, OH, OW)
    return p.reshape(B, C * kh * kw, oh * ow), oh, ow


def _fused_batch_tile(B):
    # v7x has 2 TensorCores/chip: give each core half the batch of the fused kernel
    # (it carries several us of work per sample). Single-TC chips (v5e/v6e) run the
    # whole batch in one grid step to avoid per-step overhead.
    try:
        kind = jax.devices()[0].device_kind.lower()
    except Exception:
        kind = ""
    if "7" in kind and B % 2 == 0:
        return B // 2
    return B


def init_actor_params(key, in_channels, action_dim, hidden_dim=256):
    """PyTorch-layout f32 parameters (as nn.Module would hold them)."""
    ks = jax.random.split(key, 10)

    def w(k, shape, fan_in):
        return jax.random.normal(k, shape, jnp.float32) / jnp.sqrt(float(fan_in))

    feat = 64 * 7 * 7
    return {
        "w_conv1": w(ks[0], (32, in_channels, 8, 8), in_channels * 8 * 8),
        "b_conv1": w(ks[1], (32,), in_channels * 8 * 8),
        "w_conv2": w(ks[2], (64, 32, 4, 4), 32 * 4 * 4),
        "b_conv2": w(ks[3], (64,), 32 * 4 * 4),
        "w_conv3": w(ks[4], (64, 64, 3, 3), 64 * 3 * 3),
        "b_conv3": w(ks[5], (64,), 64 * 3 * 3),
        "g1": jnp.ones((32, 20, 20), jnp.float32), "be1": jnp.zeros((32, 20, 20), jnp.float32),
        "g2": jnp.ones((64, 9, 9), jnp.float32),  "be2": jnp.zeros((64, 9, 9), jnp.float32),
        "g3": jnp.ones((64, 7, 7), jnp.float32),  "be3": jnp.zeros((64, 7, 7), jnp.float32),
        # fc weights stored transposed to (in, out)  (== PyTorch weight.T)
        "w_fc1": w(ks[6], (feat, hidden_dim), feat),
        "b_fc1": jnp.zeros((1, hidden_dim), jnp.float32),
        "w_fc2": w(ks[7], (hidden_dim, hidden_dim), hidden_dim),
        "b_fc2": jnp.zeros((1, hidden_dim), jnp.float32),
        "w_fc3": w(ks[8], (hidden_dim, action_dim), hidden_dim),
        "b_fc3": jnp.zeros((1, action_dim), jnp.float32),
    }


def prepare_actor_params(params):
    """One-time conversion to kernel-ready layout (bf16 MXU weights, wide conv3 scatter)."""
    oh3, ow3, in9 = 7, 7, 9
    wq = (oh3 - 1) * in9 + ow3                     # 61: width of the wide conv3 grid
    c3 = params["w_conv3"].shape[0]                # 64
    hid = params["w_fc1"].shape[1]

    # wide-grid scatter: output pixel (oh, ow) lives at wide column q = oh*9 + ow
    q_of = np.array([oh * in9 + ow for oh in range(oh3) for ow in range(ow3)], np.int32)

    g3 = params["g3"].reshape(c3, oh3 * ow3)
    be3 = params["be3"].reshape(c3, oh3 * ow3)
    g3w = jnp.zeros((c3, wq), jnp.float32).at[:, q_of].set(g3)
    be3w = jnp.zeros((c3, wq), jnp.float32).at[:, q_of].set(be3)
    maskw = jnp.zeros((1, wq), jnp.float32).at[0, q_of].set(1.0)

    rows = np.asarray((np.arange(c3, dtype=np.int32)[:, None] * wq
                       + q_of[None, :]).reshape(-1), np.int32)          # (3136,)
    w1w = (jnp.zeros((c3 * wq, hid), jnp.float32)
           .at[rows].set(params["w_fc1"]).astype(jnp.bfloat16))         # (3904, 256)

    # conv3 weight as 9 (Cout, Cin) matrices, one per kernel tap (i, j)
    w3s = (jnp.transpose(params["w_conv3"], (2, 3, 0, 1))
           .reshape(9, c3, c3).astype(jnp.bfloat16))

    return {
        "w1c": params["w_conv1"].reshape(32, -1).astype(jnp.bfloat16),
        "b1c": params["b_conv1"].reshape(32, 1),
        "g1": params["g1"].reshape(32, -1),
        "be1": params["be1"].reshape(32, -1),
        "w2c": params["w_conv2"].reshape(64, -1).astype(jnp.bfloat16),
        "b2c": params["b_conv2"].reshape(64, 1),
        "g2": params["g2"].reshape(64, -1),
        "be2": params["be2"].reshape(64, -1),
        "w3s": w3s,
        "b3c": params["b_conv3"].reshape(64, 1),
        "g3w": g3w, "be3w": be3w, "maskw": maskw,
        "w1w": w1w,
        "b_fc1": params["b_fc1"],
        "w_fc2": params["w_fc2"].astype(jnp.bfloat16),
        "b_fc2": params["b_fc2"],
        "w_fc3": params["w_fc3"].astype(jnp.bfloat16),
        "b_fc3": params["b_fc3"],
    }


def actor_forward(p, x, max_action=1.0):
    B = x.shape[0]
    xb = x.astype(jnp.bfloat16)

    # conv1 (Cin->32, k=8, s=4) + LayerNorm([32,20,20]) + ReLU      (kernel A)
    p1, oh1, ow1 = im2col(xb, 8, 8, 4)                               # (B, Cin*64, 400)
    x1 = conv1_ln_relu(p1, p["w1c"], p["b1c"], p["g1"], p["be1"])    # (B, 32, 400)
    x1 = x1.reshape(B, 32, oh1, ow1)

    # conv2 patches, then fused conv2+LN2+ReLU+conv3+LN3+ReLU+MLP   (kernel B)
    p2, _, _ = im2col(x1, 4, 4, 2)                                   # (B, 512, 81)
    return conv_tail_mlp(p2, p, max_action, tb=_fused_batch_tile(B))


def actor_forward_reference(params, x, max_action=1.0):
    """Pure-JAX f32 reference (independent of the Pallas path)."""
    def conv(h, w, b, stride):
        y = jax.lax.conv_general_dilated(
            h, w, window_strides=(stride, stride), padding="VALID",
            dimension_numbers=("NCHW", "OIHW", "NCHW"))
        return y + b.reshape(1, -1, 1, 1)

    def ln(h, g, be):
        mu = jnp.mean(h, axis=(1, 2, 3), keepdims=True)
        var = jnp.mean((h - mu) ** 2, axis=(1, 2, 3), keepdims=True)
        return (h - mu) * jax.lax.rsqrt(var + 1e-5) * g[None] + be[None]

    h = jax.nn.relu(ln(conv(x, params["w_conv1"], params["b_conv1"], 4),
                       params["g1"], params["be1"]))
    h = jax.nn.relu(ln(conv(h, params["w_conv2"], params["b_conv2"], 2),
                       params["g2"], params["be2"]))
    h = jax.nn.relu(ln(conv(h, params["w_conv3"], params["b_conv3"], 1),
                       params["g3"], params["be3"]))
    f = h.reshape(x.shape[0], -1)
    a1 = jax.nn.relu(f @ params["w_fc1"] + params["b_fc1"])
    a2 = jax.nn.relu(a1 @ params["w_fc2"] + params["b_fc2"])
    raw = a2 @ params["w_fc3"] + params["b_fc3"]
    return jnp.tanh(raw) * (max_action * 0.8)


if __name__ == "__main__":
    key = jax.random.PRNGKey(0)
    kx, kp = jax.random.split(key)

    # The module's hardcoded LayerNorm shapes ([32,20,20], ...) imply 84x84 inputs.
    B, C, Himg, Wimg = 2, 4, 84, 84
    action_dim = 4
    x = jax.random.normal(kx, (B, C, Himg, Wimg), jnp.float32)
    params = init_actor_params(kp, C, action_dim=action_dim, hidden_dim=256)
    prepped = prepare_actor_params(params)

    fwd = jax.jit(functools.partial(actor_forward, max_action=1.0))
    out = fwd(prepped, x)
    jax.block_until_ready(out)

    assert out.shape == (B, action_dim), out.shape
    assert bool(jnp.all(jnp.isfinite(out)))
    assert bool(jnp.all(jnp.abs(out) <= 0.8 + 1e-3))     # tanh * 0.8*max_action bound

    with jax.default_matmul_precision("float32"):
        ref = actor_forward_reference(params, x, max_action=1.0)
    err = float(jnp.max(jnp.abs(out - ref)))
    assert err < 8e-2, f"max |pallas - reference| = {err}"
    print("KERNEL_OK")
</pallas_src>

<mosaic_0001>
module attributes {stable_mosaic.version = 11 : i64} {
  func.func @_conv_ln_relu_kernel(%arg0: i32, %arg1: memref<2x256x400xbf16, #tpu.memory_space<vmem>>, %arg2: memref<32x256xbf16, #tpu.memory_space<vmem>>, %arg3: memref<32x1xf32, #tpu.memory_space<vmem>>, %arg4: memref<32x400xf32, #tpu.memory_space<vmem>>, %arg5: memref<32x400xf32, #tpu.memory_space<vmem>>, %arg6: memref<2x32x400xbf16, #tpu.memory_space<vmem>>) attributes {dimension_semantics = [#tpu.dimension_semantics<arbitrary>], iteration_bounds = array<i64: 1>, scalar_prefetch = 0 : i64, scratch_operands = 0 : i64, tpu.core_type = #tpu.core_type<tc>, window_params = [{pipeline_mode = #tpu.pipeline_mode<synchronous>, transform_indices = @transform_0, window_bounds = array<i64: 2, 256, 400>}, {pipeline_mode = #tpu.pipeline_mode<synchronous>, transform_indices = @transform_1, window_bounds = array<i64: 32, 256>}, {pipeline_mode = #tpu.pipeline_mode<synchronous>, transform_indices = @transform_2, window_bounds = array<i64: 32, 1>}, {pipeline_mode = #tpu.pipeline_mode<synchronous>, transform_indices = @transform_3, window_bounds = array<i64: 32, 400>}, {pipeline_mode = #tpu.pipeline_mode<synchronous>, transform_indices = @transform_4, window_bounds = array<i64: 32, 400>}, {pipeline_mode = #tpu.pipeline_mode<synchronous>, transform_indices = @transform_5, window_bounds = array<i64: 2, 32, 400>}]} {
    %c0 = arith.constant 0 : index
    %c0_0 = arith.constant 0 : index
    %0 = vector.load %arg2[%c0, %c0_0] : memref<32x256xbf16, #tpu.memory_space<vmem>>, vector<32x256xbf16>
    %c0_1 = arith.constant 0 : index
    %c0_2 = arith.constant 0 : index
    %1 = vector.load %arg4[%c0_1, %c0_2] : memref<32x400xf32, #tpu.memory_space<vmem>>, vector<32x400xf32>
    %c0_3 = arith.constant 0 : index
    %c0_4 = arith.constant 0 : index
    %2 = vector.load %arg5[%c0_3, %c0_4] : memref<32x400xf32, #tpu.memory_space<vmem>>, vector<32x400xf32>
    %c0_5 = arith.constant 0 : index
    %c0_6 = arith.constant 0 : index
    %3 = vector.load %arg3[%c0_5, %c0_6] : memref<32x1xf32, #tpu.memory_space<vmem>>, vector<32x1xf32>
    %4 = vector.shape_cast %3 : vector<32x1xf32> to vector<32x1xf32>
    %5 = vector.broadcast %4 : vector<32x1xf32> to vector<32x400xf32>
    %c0_7 = arith.constant 0 : index
    %c0_8 = arith.constant 0 : index
    %c0_9 = arith.constant 0 : index
    %6 = vector.load %arg1[%c0_7, %c0_8, %c0_9] : memref<2x256x400xbf16, #tpu.memory_space<vmem>>, vector<1x256x400xbf16>
    %7 = vector.shape_cast %6 : vector<1x256x400xbf16> to vector<256x400xbf16>
    %cst = arith.constant dense<0.000000e+00> : vector<32x400xf32>
    %8 = tpu.matmul %0, %7, %cst {dimension_numbers = #tpu.dot_dimension_numbers<[1], [0], [0], [1], [0, 0, 1, 1], [], []>} : vector<32x256xbf16>, vector<256x400xbf16>, vector<32x400xf32> -> vector<32x400xf32>
    %9 = arith.addf %8, %5 : vector<32x400xf32>
    %10 = vector.shape_cast %9 : vector<32x400xf32> to vector<1x32x400xf32>
    %cst_10 = arith.constant dense<0.000000e+00> : vector<1xf32>
    %11 = vector.multi_reduction <add>, %10, %cst_10 [1, 2] : vector<1x32x400xf32> to vector<1xf32>
    %12 = vector.shape_cast %11 : vector<1xf32> to vector<1x1x1xf32>
    %13 = vector.extract %12[0, 0, 0] : f32 from vector<1x1x1xf32>
    %cst_11 = arith.constant 7.812500e-05 : f32
    %14 = arith.mulf %13, %cst_11 : f32
    %15 = vector.broadcast %14 : f32 to vector<32x400xf32>
    %16 = arith.subf %9, %15 : vector<32x400xf32>
    %17 = arith.mulf %16, %16 : vector<32x400xf32>
    %18 = vector.shape_cast %17 : vector<32x400xf32> to vector<1x32x400xf32>
    %cst_12 = arith.constant dense<0.000000e+00> : vector<1xf32>
    %19 = vector.multi_reduction <add>, %18, %cst_12 [1, 2] : vector<1x32x400xf32> to vector<1xf32>
    %20 = vector.shape_cast %19 : vector<1xf32> to vector<1x1x1xf32>
    %21 = vector.extract %20[0, 0, 0] : f32 from vector<1x1x1xf32>
    %cst_13 = arith.constant 7.812500e-05 : f32
    %22 = arith.mulf %21, %cst_13 : f32
    %cst_14 = arith.constant 9.99999974E-6 : f32
    %23 = arith.addf %22, %cst_14 : f32
    %24 = math.rsqrt %23 : f32
    %25 = vector.broadcast %24 : f32 to vector<32x400xf32>
    %26 = arith.mulf %16, %25 : vector<32x400xf32>
    %27 = arith.mulf %26, %1 : vector<32x400xf32>
    %28 = arith.addf %27, %2 : vector<32x400xf32>
    %cst_15 = arith.constant 0.000000e+00 : f32
    %29 = vector.broadcast %cst_15 : f32 to vector<32x400xf32>
    %30 = arith.maximumf %28, %29 : vector<32x400xf32>
    %31 = arith.truncf %30 : vector<32x400xf32> to vector<32x400xbf16>
    %c0_16 = arith.constant 0 : index
    %c0_17 = arith.constant 0 : index
    %c0_18 = arith.constant 0 : index
    %32 = vector.load %arg6[%c0_16, %c0_17, %c0_18] : memref<2x32x400xbf16, #tpu.memory_space<vmem>>, vector<1x32x400xbf16>
    %33 = vector.shape_cast %32 : vector<1x32x400xbf16> to vector<32x400xbf16>
    %34 = vector.shape_cast %31 : vector<32x400xbf16> to vector<1x32x400xbf16>
    tpu.vector_store %arg6[%c0_16, %c0_17, %c0_18], %34 {strides = array<i32>} : memref<2x32x400xbf16, #tpu.memory_space<vmem>>, vector<1x32x400xbf16>,
    %c1 = arith.constant 1 : index
    %c0_19 = arith.constant 0 : index
    %c0_20 = arith.constant 0 : index
    %35 = vector.load %arg1[%c1, %c0_19, %c0_20] : memref<2x256x400xbf16, #tpu.memory_space<vmem>>, vector<1x256x400xbf16>
    %36 = vector.shape_cast %35 : vector<1x256x400xbf16> to vector<256x400xbf16>
    %cst_21 = arith.constant dense<0.000000e+00> : vector<32x400xf32>
    %37 = tpu.matmul %0, %36, %cst_21 {dimension_numbers = #tpu.dot_dimension_numbers<[1], [0], [0], [1], [0, 0, 1, 1], [], []>} : vector<32x256xbf16>, vector<256x400xbf16>, vector<32x400xf32> -> vector<32x400xf32>
    %38 = arith.addf %37, %5 : vector<32x400xf32>
    %39 = vector.shape_cast %38 : vector<32x400xf32> to vector<1x32x400xf32>
    %cst_22 = arith.constant dense<0.000000e+00> : vector<1xf32>
    %40 = vector.multi_reduction <add>, %39, %cst_22 [1, 2] : vector<1x32x400xf32> to vector<1xf32>
    %41 = vector.shape_cast %40 : vector<1xf32> to vector<1x1x1xf32>
    %42 = vector.extract %41[0, 0, 0] : f32 from vector<1x1x1xf32>
    %cst_23 = arith.constant 7.812500e-05 : f32
    %43 = arith.mulf %42, %cst_23 : f32
    %44 = vector.broadcast %43 : f32 to vector<32x400xf32>
    %45 = arith.subf %38, %44 : vector<32x400xf32>
    %46 = arith.mulf %45, %45 : vector<32x400xf32>
    %47 = vector.shape_cast %46 : vector<32x400xf32> to vector<1x32x400xf32>
    %cst_24 = arith.constant dense<0.000000e+00> : vector<1xf32>
    %48 = vector.multi_reduction <add>, %47, %cst_24 [1, 2] : vector<1x32x400xf32> to vector<1xf32>
    %49 = vector.shape_cast %48 : vector<1xf32> to vector<1x1x1xf32>
    %50 = vector.extract %49[0, 0, 0] : f32 from vector<1x1x1xf32>
    %cst_25 = arith.constant 7.812500e-05 : f32
    %51 = arith.mulf %50, %cst_25 : f32
    %cst_26 = arith.constant 9.99999974E-6 : f32
    %52 = arith.addf %51, %cst_26 : f32
    %53 = math.rsqrt %52 : f32
    %54 = vector.broadcast %53 : f32 to vector<32x400xf32>
    %55 = arith.mulf %45, %54 : vector<32x400xf32>
    %56 = arith.mulf %55, %1 : vector<32x400xf32>
    %57 = arith.addf %56, %2 : vector<32x400xf32>
    %cst_27 = arith.constant 0.000000e+00 : f32
    %58 = vector.broadcast %cst_27 : f32 to vector<32x400xf32>
    %59 = arith.maximumf %57, %58 : vector<32x400xf32>
    %60 = arith.truncf %59 : vector<32x400xf32> to vector<32x400xbf16>
    %c1_28 = arith.constant 1 : index
    %c0_29 = arith.constant 0 : index
    %c0_30 = arith.constant 0 : index
    %61 = vector.load %arg6[%c1_28, %c0_29, %c0_30] : memref<2x32x400xbf16, #tpu.memory_space<vmem>>, vector<1x32x400xbf16>
    %62 = vector.shape_cast %61 : vector<1x32x400xbf16> to vector<32x400xbf16>
    %63 = vector.shape_cast %60 : vector<32x400xbf16> to vector<1x32x400xbf16>
    tpu.vector_store %arg6[%c1_28, %c0_29, %c0_30], %63 {strides = array<i32>} : memref<2x32x400xbf16, #tpu.memory_space<vmem>>, vector<1x32x400xbf16>,
    return
  }
  func.func @transform_0(%arg0: i32) -> (i32, i32, i32) {
    %c0_i32 = arith.constant 0 : i32
    %c0_i32_0 = arith.constant 0 : i32
    %c0_i32_1 = arith.constant 0 : i32
    %c0_i32_2 = arith.constant 0 : i32
    return %c0_i32, %c0_i32_0, %c0_i32_1 : i32, i32, i32
  }
  func.func @transform_1(%arg0: i32) -> (i32, i32) {
    %c0_i32 = arith.constant 0 : i32
    %c0_i32_0 = arith.constant 0 : i32
    %c0_i32_1 = arith.constant 0 : i32
    return %c0_i32, %c0_i32_0 : i32, i32
  }
  func.func @transform_2(%arg0: i32) -> (i32, i32) {
    %c0_i32 = arith.constant 0 : i32
    %c0_i32_0 = arith.constant 0 : i32
    %c0_i32_1 = arith.constant 0 : i32
    return %c0_i32, %c0_i32_0 : i32, i32
  }
  func.func @transform_3(%arg0: i32) -> (i32, i32) {
    %c0_i32 = arith.constant 0 : i32
    %c0_i32_0 = arith.constant 0 : i32
    %c0_i32_1 = arith.constant 0 : i32
    return %c0_i32, %c0_i32_0 : i32, i32
  }
  func.func @transform_4(%arg0: i32) -> (i32, i32) {
    %c0_i32 = arith.constant 0 : i32
    %c0_i32_0 = arith.constant 0 : i32
    %c0_i32_1 = arith.constant 0 : i32
    return %c0_i32, %c0_i32_0 : i32, i32
  }
  func.func @transform_5(%arg0: i32) -> (i32, i32, i32) {
    %c0_i32 = arith.constant 0 : i32
    %c0_i32_0 = arith.constant 0 : i32
    %c0_i32_1 = arith.constant 0 : i32
    %c0_i32_2 = arith.constant 0 : i32
    return %c0_i32, %c0_i32_0, %c0_i32_1 : i32, i32, i32
  }
}

module attributes {stable_mosaic.version = 11 : i64} {
  func.func @_fused_tail_kernel(%arg0: i32, %arg1: memref<2x512x81xbf16, #tpu.memory_space<vmem>>, %arg2: memref<64x512xbf16, #tpu.memory_space<vmem>>, %arg3: memref<64x1xf32, #tpu.memory_space<vmem>>, %arg4: memref<64x81xf32, #tpu.memory_space<vmem>>, %arg5: memref<64x81xf32, #tpu.memory_space<vmem>>, %arg6: memref<9x64x64xbf16, #tpu.memory_space<vmem>>, %arg7: memref<64x1xf32, #tpu.memory_space<vmem>>, %arg8: memref<64x61xf32, #tpu.memory_space<vmem>>, %arg9: memref<64x61xf32, #tpu.memory_space<vmem>>, %arg10: memref<1x61xf32, #tpu.memory_space<vmem>>, %arg11: memref<3904x256xbf16, #tpu.memory_space<vmem>>, %arg12: memref<1x256xf32, #tpu.memory_space<vmem>>, %arg13: memref<256x256xbf16, #tpu.memory_space<vmem>>, %arg14: memref<1x256xf32, #tpu.memory_space<vmem>>, %arg15: memref<256x4xbf16, #tpu.memory_space<vmem>>, %arg16: memref<1x4xf32, #tpu.memory_space<vmem>>, %arg17: memref<2x1x4xf32, #tpu.memory_space<vmem>>, %arg18: memref<64x81xf32, #tpu.memory_space<vmem>>, %arg19: memref<2x3904xf32, #tpu.memory_space<vmem>>) attributes {dimension_semantics = [#tpu.dimension_semantics<parallel>], iteration_bounds = array<i64: 1>, scalar_prefetch = 0 : i64, scratch_operands = 2 : i64, tpu.core_type = #tpu.core_type<tc>, window_params = [{transform_indices = @transform_0, window_bounds = array<i64: 2, 512, 81>}, {pipeline_mode = #tpu.pipeline_mode<synchronous>, transform_indices = @transform_1, window_bounds = array<i64: 64, 512>}, {pipeline_mode = #tpu.pipeline_mode<synchronous>, transform_indices = @transform_2, window_bounds = array<i64: 64, 1>}, {pipeline_mode = #tpu.pipeline_mode<synchronous>, transform_indices = @transform_3, window_bounds = array<i64: 64, 81>}, {pipeline_mode = #tpu.pipeline_mode<synchronous>, transform_indices = @transform_4, window_bounds = array<i64: 64, 81>}, {pipeline_mode = #tpu.pipeline_mode<synchronous>, transform_indices = @transform_5, window_bounds = array<i64: 9, 64, 64>}, {pipeline_mode = #tpu.pipeline_mode<synchronous>, transform_indices = @transform_6, window_bounds = array<i64: 64, 1>}, {pipeline_mode = #tpu.pipeline_mode<synchronous>, transform_indices = @transform_7, window_bounds = array<i64: 64, 61>}, {pipeline_mode = #tpu.pipeline_mode<synchronous>, transform_indices = @transform_8, window_bounds = array<i64: 64, 61>}, {pipeline_mode = #tpu.pipeline_mode<synchronous>, transform_indices = @transform_9, window_bounds = array<i64: 1, 61>}, {pipeline_mode = #tpu.pipeline_mode<synchronous>, transform_indices = @transform_10, window_bounds = array<i64: 3904, 256>}, {pipeline_mode = #tpu.pipeline_mode<synchronous>, transform_indices = @transform_11, window_bounds = array<i64: 1, 256>}, {pipeline_mode = #tpu.pipeline_mode<synchronous>, transform_indices = @transform_12, window_bounds = array<i64: 256, 256>}, {pipeline_mode = #tpu.pipeline_mode<synchronous>, transform_indices = @transform_13, window_bounds = array<i64: 1, 256>}, {pipeline_mode = #tpu.pipeline_mode<synchronous>, transform_indices = @transform_14, window_bounds = array<i64: 256, 4>}, {pipeline_mode = #tpu.pipeline_mode<synchronous>, transform_indices = @transform_15, window_bounds = array<i64: 1, 4>}, {transform_indices = @transform_16, window_bounds = array<i64: 2, 1, 4>}]} {
    %c0 = arith.constant 0 : index
    %c0_0 = arith.constant 0 : index
    %0 = vector.load %arg2[%c0, %c0_0] : memref<64x512xbf16, #tpu.memory_space<vmem>>, vector<64x512xbf16>
    %c0_1 = arith.constant 0 : index
    %c0_2 = arith.constant 0 : index
    %1 = vector.load %arg4[%c0_1, %c0_2] : memref<64x81xf32, #tpu.memory_space<vmem>>, vector<64x81xf32>
    %c0_3 = arith.constant 0 : index
    %c0_4 = arith.constant 0 : index
    %2 = vector.load %arg5[%c0_3, %c0_4] : memref<64x81xf32, #tpu.memory_space<vmem>>, vector<64x81xf32>
    %c0_5 = arith.constant 0 : index
    %c0_6 = arith.constant 0 : index
    %3 = vector.load %arg3[%c0_5, %c0_6] : memref<64x1xf32, #tpu.memory_space<vmem>>, vector<64x1xf32>
    %4 = vector.shape_cast %3 : vector<64x1xf32> to vector<64x1xf32>
    %5 = vector.broadcast %4 : vector<64x1xf32> to vector<64x81xf32>
    %c0_7 = arith.constant 0 : index
    %c0_8 = arith.constant 0 : index
    %6 = vector.load %arg8[%c0_7, %c0_8] : memref<64x61xf32, #tpu.memory_space<vmem>>, vector<64x61xf32>
    %c0_9 = arith.constant 0 : index
    %c0_10 = arith.constant 0 : index
    %7 = vector.load %arg9[%c0_9, %c0_10] : memref<64x61xf32, #tpu.memory_space<vmem>>, vector<64x61xf32>
    %c0_11 = arith.constant 0 : index
    %c0_12 = arith.constant 0 : index
    %8 = vector.load %arg7[%c0_11, %c0_12] : memref<64x1xf32, #tpu.memory_space<vmem>>, vector<64x1xf32>
    %9 = vector.shape_cast %8 : vector<64x1xf32> to vector<64x1xf32>
    %10 = vector.broadcast %9 : vector<64x1xf32> to vector<64x61xf32>
    %c0_13 = arith.constant 0 : index
    %c0_14 = arith.constant 0 : index
    %11 = vector.load %arg10[%c0_13, %c0_14] : memref<1x61xf32, #tpu.memory_space<vmem>>, vector<1x61xf32>
    %12 = vector.shape_cast %11 : vector<1x61xf32> to vector<1x1x61xf32>
    %cst = arith.constant dense<0.000000e+00> : vector<1xf32>
    %13 = vector.multi_reduction <add>, %12, %cst [1, 2] : vector<1x1x61xf32> to vector<1xf32>
    %14 = vector.shape_cast %13 : vector<1xf32> to vector<1x1x1xf32>
    %15 = vector.extract %14[0, 0, 0] : f32 from vector<1x1x1xf32>
    %cst_15 = arith.constant 6.400000e+01 : f32
    %16 = arith.mulf %15, %cst_15 : f32
    %c0_16 = arith.constant 0 : index
    %c0_17 = arith.constant 0 : index
    %c0_18 = arith.constant 0 : index
    %17 = vector.load %arg1[%c0_16, %c0_17, %c0_18] : memref<2x512x81xbf16, #tpu.memory_space<vmem>>, vector<1x512x81xbf16>
    %18 = vector.shape_cast %17 : vector<1x512x81xbf16> to vector<512x81xbf16>
    %cst_19 = arith.constant dense<0.000000e+00> : vector<64x81xf32>
    %19 = tpu.matmul %0, %18, %cst_19 {dimension_numbers = #tpu.dot_dimension_numbers<[1], [0], [0], [1], [0, 0, 1, 1], [], []>} : vector<64x512xbf16>, vector<512x81xbf16>, vector<64x81xf32> -> vector<64x81xf32>
    %20 = arith.addf %19, %5 : vector<64x81xf32>
    %21 = vector.shape_cast %20 : vector<64x81xf32> to vector<1x64x81xf32>
    %cst_20 = arith.constant dense<0.000000e+00> : vector<1xf32>
    %22 = vector.multi_reduction <add>, %21, %cst_20 [1, 2] : vector<1x64x81xf32> to vector<1xf32>
    %23 = vector.shape_cast %22 : vector<1xf32> to vector<1x1x1xf32>
    %24 = vector.extract %23[0, 0, 0] : f32 from vector<1x1x1xf32>
    %cst_21 = arith.constant 5.184000e+03 : f32
    %25 = arith.divf %24, %cst_21 : f32
    %26 = vector.broadcast %25 : f32 to vector<64x81xf32>
    %27 = arith.subf %20, %26 : vector<64x81xf32>
    %28 = arith.mulf %27, %27 : vector<64x81xf32>
    %29 = vector.shape_cast %28 : vector<64x81xf32> to vector<1x64x81xf32>
    %cst_22 = arith.constant dense<0.000000e+00> : vector<1xf32>
    %30 = vector.multi_reduction <add>, %29, %cst_22 [1, 2] : vector<1x64x81xf32> to vector<1xf32>
    %31 = vector.shape_cast %30 : vector<1xf32> to vector<1x1x1xf32>
    %32 = vector.extract %31[0, 0, 0] : f32 from vector<1x1x1xf32>
    %cst_23 = arith.constant 5.184000e+03 : f32
    %33 = arith.divf %32, %cst_23 : f32
    %cst_24 = arith.constant 9.99999974E-6 : f32
    %34 = arith.addf %33, %cst_24 : f32
    %35 = math.rsqrt %34 : f32
    %36 = vector.broadcast %35 : f32 to vector<64x81xf32>
    %37 = arith.mulf %27, %36 : vector<64x81xf32>
    %38 = arith.mulf %37, %1 : vector<64x81xf32>
    %39 = arith.addf %38, %2 : vector<64x81xf32>
    %cst_25 = arith.constant 0.000000e+00 : f32
    %40 = vector.broadcast %cst_25 : f32 to vector<64x81xf32>
    %41 = arith.maximumf %39, %40 : vector<64x81xf32>
    %c0_26 = arith.constant 0 : index
    %c0_27 = arith.constant 0 : index
    %42 = vector.load %arg18[%c0_26, %c0_27] : memref<64x81xf32, #tpu.memory_space<vmem>>, vector<64x81xf32>
    tpu.vector_store %arg18[%c0_26, %c0_27], %41 {strides = array<i32>} : memref<64x81xf32, #tpu.memory_space<vmem>>, vector<64x81xf32>,
    %c0_28 = arith.constant 0 : index
    %c0_29 = arith.constant 0 : index
    %c0_30 = arith.constant 0 : index
    %43 = vector.load %arg6[%c0_28, %c0_29, %c0_30] : memref<9x64x64xbf16, #tpu.memory_space<vmem>>, vector<1x64x64xbf16>
    %44 = vector.shape_cast %43 : vector<1x64x64xbf16> to vector<64x64xbf16>
    %c0_31 = arith.constant 0 : index
    %c0_32 = arith.constant 0 : index
    %45 = vector.load %arg18[%c0_31, %c0_32] : memref<64x81xf32, #tpu.memory_space<vmem>>, vector<64x61xf32>
    %46 = arith.truncf %45 : vector<64x61xf32> to vector<64x61xbf16>
    %cst_33 = arith.constant dense<0.000000e+00> : vector<64x61xf32>
    %47 = tpu.matmul %44, %46, %cst_33 {dimension_numbers = #tpu.dot_dimension_numbers<[1], [0], [0], [1], [0, 0, 1, 1], [], []>} : vector<64x64xbf16>, vector<64x61xbf16>, vector<64x61xf32> -> vector<64x61xf32>
    %48 = arith.addf %10, %47 : vector<64x61xf32>
    %c1 = arith.constant 1 : index
    %c0_34 = arith.constant 0 : index
    %c0_35 = arith.constant 0 : index
    %49 = vector.load %arg6[%c1, %c0_34, %c0_35] : memref<9x64x64xbf16, #tpu.memory_space<vmem>>, vector<1x64x64xbf16>
    %50 = vector.shape_cast %49 : vector<1x64x64xbf16> to vector<64x64xbf16>
    %c0_36 = arith.constant 0 : index
    %c1_37 = arith.constant 1 : index
    %51 = vector.load %arg18[%c0_36, %c1_37] : memref<64x81xf32, #tpu.memory_space<vmem>>, vector<64x61xf32>
    %52 = arith.truncf %51 : vector<64x61xf32> to vector<64x61xbf16>
    %cst_38 = arith.constant dense<0.000000e+00> : vector<64x61xf32>
    %53 = tpu.matmul %50, %52, %cst_38 {dimension_numbers = #tpu.dot_dimension_numbers<[1], [0], [0], [1], [0, 0, 1, 1], [], []>} : vector<64x64xbf16>, vector<64x61xbf16>, vector<64x61xf32> -> vector<64x61xf32>
    %54 = arith.addf %48, %53 : vector<64x61xf32>
    %c2 = arith.constant 2 : index
    %c0_39 = arith.constant 0 : index
    %c0_40 = arith.constant 0 : index
    %55 = vector.load %arg6[%c2, %c0_39, %c0_40] : memref<9x64x64xbf16, #tpu.memory_space<vmem>>, vector<1x64x64xbf16>
    %56 = vector.shape_cast %55 : vector<1x64x64xbf16> to vector<64x64xbf16>
    %c0_41 = arith.constant 0 : index
    %c2_42 = arith.constant 2 : index
    %57 = vector.load %arg18[%c0_41, %c2_42] : memref<64x81xf32, #tpu.memory_space<vmem>>, vector<64x61xf32>
    %58 = arith.truncf %57 : vector<64x61xf32> to vector<64x61xbf16>
    %cst_43 = arith.constant dense<0.000000e+00> : vector<64x61xf32>
    %59 = tpu.matmul %56, %58, %cst_43 {dimension_numbers = #tpu.dot_dimension_numbers<[1], [0], [0], [1], [0, 0, 1, 1], [], []>} : vector<64x64xbf16>, vector<64x61xbf16>, vector<64x61xf32> -> vector<64x61xf32>
    %60 = arith.addf %54, %59 : vector<64x61xf32>
    %c3 = arith.constant 3 : index
    %c0_44 = arith.constant 0 : index
    %c0_45 = arith.constant 0 : index
    %61 = vector.load %arg6[%c3, %c0_44, %c0_45] : memref<9x64x64xbf16, #tpu.memory_space<vmem>>, vector<1x64x64xbf16>
    %62 = vector.shape_cast %61 : vector<1x64x64xbf16> to vector<64x64xbf16>
    %c0_46 = arith.constant 0 : index
    %c9 = arith.constant 9 : index
    %63 = vector.load %arg18[%c0_46, %c9] : memref<64x81xf32, #tpu.memory_space<vmem>>, vector<64x61xf32>
    %64 = arith.truncf %63 : vector<64x61xf32> to vector<64x61xbf16>
    %cst_47 = arith.constant dense<0.000000e+00> : vector<64x61xf32>
    %65 = tpu.matmul %62, %64, %cst_47 {dimension_numbers = #tpu.dot_dimension_numbers<[1], [0], [0], [1], [0, 0, 1, 1], [], []>} : vector<64x64xbf16>, vector<64x61xbf16>, vector<64x61xf32> -> vector<64x61xf32>
    %66 = arith.addf %60, %65 : vector<64x61xf32>
    %c4 = arith.constant 4 : index
    %c0_48 = arith.constant 0 : index
    %c0_49 = arith.constant 0 : index
    %67 = vector.load %arg6[%c4, %c0_48, %c0_49] : memref<9x64x64xbf16, #tpu.memory_space<vmem>>, vector<1x64x64xbf16>
    %68 = vector.shape_cast %67 : vector<1x64x64xbf16> to vector<64x64xbf16>
    %c0_50 = arith.constant 0 : index
    %c10 = arith.constant 10 : index
    %69 = vector.load %arg18[%c0_50, %c10] : memref<64x81xf32, #tpu.memory_space<vmem>>, vector<64x61xf32>
    %70 = arith.truncf %69 : vector<64x61xf32> to vector<64x61xbf16>
    %cst_51 = arith.constant dense<0.000000e+00> : vector<64x61xf32>
    %71 = tpu.matmul %68, %70, %cst_51 {dimension_numbers = #tpu.dot_dimension_numbers<[1], [0], [0], [1], [0, 0, 1, 1], [], []>} : vector<64x64xbf16>, vector<64x61xbf16>, vector<64x61xf32> -> vector<64x61xf32>
    %72 = arith.addf %66, %71 : vector<64x61xf32>
    %c5 = arith.constant 5 : index
    %c0_52 = arith.constant 0 : index
    %c0_53 = arith.constant 0 : index
    %73 = vector.load %arg6[%c5, %c0_52, %c0_53] : memref<9x64x64xbf16, #tpu.memory_space<vmem>>, vector<1x64x64xbf16>
    %74 = vector.shape_cast %73 : vector<1x64x64xbf16> to vector<64x64xbf16>
    %c0_54 = arith.constant 0 : index
    %c11 = arith.constant 11 : index
    %75 = vector.load %arg18[%c0_54, %c11] : memref<64x81xf32, #tpu.memory_space<vmem>>, vector<64x61xf32>
    %76 = arith.truncf %75 : vector<64x61xf32> to vector<64x61xbf16>
    %cst_55 = arith.constant dense<0.000000e+00> : vector<64x61xf32>
    %77 = tpu.matmul %74, %76, %cst_55 {dimension_numbers = #tpu.dot_dimension_numbers<[1], [0], [0], [1], [0, 0, 1, 1], [], []>} : vector<64x64xbf16>, vector<64x61xbf16>, vector<64x61xf32> -> vector<64x61xf32>
    %78 = arith.addf %72, %77 : vector<64x61xf32>
    %c6 = arith.constant 6 : index
    %c0_56 = arith.constant 0 : index
    %c0_57 = arith.constant 0 : index
    %79 = vector.load %arg6[%c6, %c0_56, %c0_57] : memref<9x64x64xbf16, #tpu.memory_space<vmem>>, vector<1x64x64xbf16>
    %80 = vector.shape_cast %79 : vector<1x64x64xbf16> to vector<64x64xbf16>
    %c0_58 = arith.constant 0 : index
    %c18 = arith.constant 18 : index
    %81 = vector.load %arg18[%c0_58, %c18] : memref<64x81xf32, #tpu.memory_space<vmem>>, vector<64x61xf32>
    %82 = arith.truncf %81 : vector<64x61xf32> to vector<64x61xbf16>
    %cst_59 = arith.constant dense<0.000000e+00> : vector<64x61xf32>
    %83 = tpu.matmul %80, %82, %cst_59 {dimension_numbers = #tpu.dot_dimension_numbers<[1], [0], [0], [1], [0, 0, 1, 1], [], []>} : vector<64x64xbf16>, vector<64x61xbf16>, vector<64x61xf32> -> vector<64x61xf32>
    %84 = arith.addf %78, %83 : vector<64x61xf32>
    %c7 = arith.constant 7 : index
    %c0_60 = arith.constant 0 : index
    %c0_61 = arith.constant 0 : index
    %85 = vector.load %arg6[%c7, %c0_60, %c0_61] : memref<9x64x64xbf16, #tpu.memory_space<vmem>>, vector<1x64x64xbf16>
    %86 = vector.shape_cast %85 : vector<1x64x64xbf16> to vector<64x64xbf16>
    %c0_62 = arith.constant 0 : index
    %c19 = arith.constant 19 : index
    %87 = vector.load %arg18[%c0_62, %c19] : memref<64x81xf32, #tpu.memory_space<vmem>>, vector<64x61xf32>
    %88 = arith.truncf %87 : vector<64x61xf32> to vector<64x61xbf16>
    %cst_63 = arith.constant dense<0.000000e+00> : vector<64x61xf32>
    %89 = tpu.matmul %86, %88, %cst_63 {dimension_numbers = #tpu.dot_dimension_numbers<[1], [0], [0], [1], [0, 0, 1, 1], [], []>} : vector<64x64xbf16>, vector<64x61xbf16>, vector<64x61xf32> -> vector<64x61xf32>
    %90 = arith.addf %84, %89 : vector<64x61xf32>
    %c8 = arith.constant 8 : index
    %c0_64 = arith.constant 0 : index
    %c0_65 = arith.constant 0 : index
    %91 = vector.load %arg6[%c8, %c0_64, %c0_65] : memref<9x64x64xbf16, #tpu.memory_space<vmem>>, vector<1x64x64xbf16>
    %92 = vector.shape_cast %91 : vector<1x64x64xbf16> to vector<64x64xbf16>
    %c0_66 = arith.constant 0 : index
    %c20 = arith.constant 20 : index
    %93 = vector.load %arg18[%c0_66, %c20] : memref<64x81xf32, #tpu.memory_space<vmem>>, vector<64x61xf32>
    %94 = arith.truncf %93 : vector<64x61xf32> to vector<64x61xbf16>
    %cst_67 = arith.constant dense<0.000000e+00> : vector<64x61xf32>
    %95 = tpu.matmul %92, %94, %cst_67 {dimension_numbers = #tpu.dot_dimension_numbers<[1], [0], [0], [1], [0, 0, 1, 1], [], []>} : vector<64x64xbf16>, vector<64x61xbf16>, vector<64x61xf32> -> vector<64x61xf32>
    %96 = arith.addf %90, %95 : vector<64x61xf32>
    %97 = vector.broadcast %11 : vector<1x61xf32> to vector<64x61xf32>
    %98 = arith.mulf %96, %97 : vector<64x61xf32>
    %99 = vector.shape_cast %98 : vector<64x61xf32> to vector<1x64x61xf32>
    %cst_68 = arith.constant dense<0.000000e+00> : vector<1xf32>
    %100 = vector.multi_reduction <add>, %99, %cst_68 [1, 2] : vector<1x64x61xf32> to vector<1xf32>
    %101 = vector.shape_cast %100 : vector<1xf32> to vector<1x1x1xf32>
    %102 = vector.extract %101[0, 0, 0] : f32 from vector<1x1x1xf32>
    %103 = arith.divf %102, %16 : f32
    %104 = vector.broadcast %103 : f32 to vector<64x61xf32>
    %105 = arith.subf %96, %104 : vector<64x61xf32>
    %106 = vector.broadcast %11 : vector<1x61xf32> to vector<64x61xf32>
    %107 = arith.mulf %105, %106 : vector<64x61xf32>
    %108 = arith.mulf %107, %107 : vector<64x61xf32>
    %109 = vector.shape_cast %108 : vector<64x61xf32> to vector<1x64x61xf32>
    %cst_69 = arith.constant dense<0.000000e+00> : vector<1xf32>
    %110 = vector.multi_reduction <add>, %109, %cst_69 [1, 2] : vector<1x64x61xf32> to vector<1xf32>
    %111 = vector.shape_cast %110 : vector<1xf32> to vector<1x1x1xf32>
    %112 = vector.extract %111[0, 0, 0] : f32 from vector<1x1x1xf32>
    %113 = arith.divf %112, %16 : f32
    %cst_70 = arith.constant 9.99999974E-6 : f32
    %114 = arith.addf %113, %cst_70 : f32
    %115 = math.rsqrt %114 : f32
    %116 = vector.broadcast %115 : f32 to vector<64x61xf32>
    %117 = arith.mulf %107, %116 : vector<64x61xf32>
    %118 = arith.mulf %117, %6 : vector<64x61xf32>
    %119 = arith.addf %118, %7 : vector<64x61xf32>
    %cst_71 = arith.constant 0.000000e+00 : f32
    %120 = vector.broadcast %cst_71 : f32 to vector<64x61xf32>
    %121 = arith.maximumf %119, %120 : vector<64x61xf32>
    %122 = vector.extract_strided_slice %121 {offsets = [0, 0], sizes = [1, 61], strides = [1, 1]} : vector<64x61xf32> to vector<1x61xf32>
    %c0_72 = arith.constant 0 : index
    %c0_73 = arith.constant 0 : index
    %123 = vector.load %arg19[%c0_72, %c0_73] : memref<2x3904xf32, #tpu.memory_space<vmem>>, vector<1x61xf32>
    tpu.vector_store %arg19[%c0_72, %c0_73], %122 {strides = array<i32>} : memref<2x3904xf32, #tpu.memory_space<vmem>>, vector<1x61xf32>,
    %124 = vector.extract_strided_slice %121 {offsets = [1, 0], sizes = [1, 61], strides = [1, 1]} : vector<64x61xf32> to vector<1x61xf32>
    %c0_74 = arith.constant 0 : index
    %c61 = arith.constant 61 : index
    %125 = vector.load %arg19[%c0_74, %c61] : memref<2x3904xf32, #tpu.memory_space<vmem>>, vector<1x61xf32>
    tpu.vector_store %arg19[%c0_74, %c61], %124 {strides = array<i32>} : memref<2x3904xf32, #tpu.memory_space<vmem>>, vector<1x61xf32>,
    %126 = vector.extract_strided_slice %121 {offsets = [2, 0], sizes = [1, 61], strides = [1, 1]} : vector<64x61xf32> to vector<1x61xf32>
    %c0_75 = arith.constant 0 : index
    %c122 = arith.constant 122 : index
    %127 = vector.load %arg19[%c0_75, %c122] : memref<2x3904xf32, #tpu.memory_space<vmem>>, vector<1x61xf32>
    tpu.vector_store %arg19[%c0_75, %c122], %126 {strides = array<i32>} : memref<2x3904xf32, #tpu.memory_space<vmem>>, vector<1x61xf32>,
    %128 = vector.extract_strided_slice %121 {offsets = [3, 0], sizes = [1, 61], strides = [1, 1]} : vector<64x61xf32> to vector<1x61xf32>
    %c0_76 = arith.constant 0 : index
    %c183 = arith.constant 183 : index
    %129 = vector.load %arg19[%c0_76, %c183] : memref<2x3904xf32, #tpu.memory_space<vmem>>, vector<1x61xf32>
    tpu.vector_store %arg19[%c0_76, %c183], %128 {strides = array<i32>} : memref<2x3904xf32, #tpu.memory_space<vmem>>, vector<1x61xf32>,
    %130 = vector.extract_strided_slice %121 {offsets = [4, 0], sizes = [1, 61], strides = [1, 1]} : vector<64x61xf32> to vector<1x61xf32>
    %c0_77 = arith.constant 0 : index
    %c244 = arith.constant 244 : index
    %131 = vector.load %arg19[%c0_77, %c244] : memref<2x3904xf32, #tpu.memory_space<vmem>>, vector<1x61xf32>
    tpu.vector_store %arg19[%c0_77, %c244], %130 {strides = array<i32>} : memref<2x3904xf32, #tpu.memory_space<vmem>>, vector<1x61xf32>,
    %132 = vector.extract_strided_slice %121 {offsets = [5, 0], sizes = [1, 61], strides = [1, 1]} : vector<64x61xf32> to vector<1x61xf32>
    %c0_78 = arith.constant 0 : index
    %c305 = arith.constant 305 : index
    %133 = vector.load %arg19[%c0_78, %c305] : memref<2x3904xf32, #tpu.memory_space<vmem>>, vector<1x61xf32>
    tpu.vector_store %arg19[%c0_78, %c305], %132 {strides = array<i32>} : memref<2x3904xf32, #tpu.memory_space<vmem>>, vector<1x61xf32>,
    %134 = vector.extract_strided_slice %121 {offsets = [6, 0], sizes = [1, 61], strides = [1, 1]} : vector<64x61xf32> to vector<1x61xf32>
    %c0_79 = arith.constant 0 : index
    %c366 = arith.constant 366 : index
    %135 = vector.load %arg19[%c0_79, %c366] : memref<2x3904xf32, #tpu.memory_space<vmem>>, vector<1x61xf32>
    tpu.vector_store %arg19[%c0_79, %c366], %134 {strides = array<i32>} : memref<2x3904xf32, #tpu.memory_space<vmem>>, vector<1x61xf32>,
    %136 = vector.extract_strided_slice %121 {offsets = [7, 0], sizes = [1, 61], strides = [1, 1]} : vector<64x61xf32> to vector<1x61xf32>
    %c0_80 = arith.constant 0 : index
    %c427 = arith.constant 427 : index
    %137 = vector.load %arg19[%c0_80, %c427] : memref<2x3904xf32, #tpu.memory_space<vmem>>, vector<1x61xf32>
    tpu.vector_store %arg19[%c0_80, %c427], %136 {strides = array<i32>} : memref<2x3904xf32, #tpu.memory_space<vmem>>, vector<1x61xf32>,
    %138 = vector.extract_strided_slice %121 {offsets = [8, 0], sizes = [1, 61], strides = [1, 1]} : vector<64x61xf32> to vector<1x61xf32>
    %c0_81 = arith.constant 0 : index
    %c488 = arith.constant 488 : index
    %139 = vector.load %arg19[%c0_81, %c488] : memref<2x3904xf32, #tpu.memory_space<vmem>>, vector<1x61xf32>
    tpu.vector_store %arg19[%c0_81, %c488], %138 {strides = array<i32>} : memref<2x3904xf32, #tpu.memory_space<vmem>>, vector<1x61xf32>,
    %140 = vector.extract_strided_slice %121 {offsets = [9, 0], sizes = [1, 61], strides = [1, 1]} : vector<64x61xf32> to vector<1x61xf32>
    %c0_82 = arith.constant 0 : index
    %c549 = arith.constant 549 : index
    %141 = vector.load %arg19[%c0_82, %c549] : memref<2x3904xf32, #tpu.memory_space<vmem>>, vector<1x61xf32>
    tpu.vector_store %arg19[%c0_82, %c549], %140 {strides = array<i32>} : memref<2x3904xf32, #tpu.memory_space<vmem>>, vector<1x61xf32>,
    %142 = vector.extract_strided_slice %121 {offsets = [10, 0], sizes = [1, 61], strides = [1, 1]} : vector<64x61xf32> to vector<1x61xf32>
    %c0_83 = arith.constant 0 : index
    %c610 = arith.constant 610 : index
    %143 = vector.load %arg19[%c0_83, %c610] : memref<2x3904xf32, #tpu.memory_space<vmem>>, vector<1x61xf32>
    tpu.vector_store %arg19[%c0_83, %c610], %142 {strides = array<i32>} : memref<2x3904xf32, #tpu.memory_space<vmem>>, vector<1x61xf32>,
    %144 = vector.extract_strided_slice %121 {offsets = [11, 0], sizes = [1, 61], strides = [1, 1]} : vector<64x61xf32> to vector<1x61xf32>
    %c0_84 = arith.constant 0 : index
    %c671 = arith.constant 671 : index
    %145 = vector.load %arg19[%c0_84, %c671] : memref<2x3904xf32, #tpu.memory_space<vmem>>, vector<1x61xf32>
    tpu.vector_store %arg19[%c0_84, %c671], %144 {strides = array<i32>} : memref<2x3904xf32, #tpu.memory_space<vmem>>, vector<1x61xf32>,
    %146 = vector.extract_strided_slice %121 {offsets = [12, 0], sizes = [1, 61], strides = [1, 1]} : vector<64x61xf32> to vector<1x61xf32>
    %c0_85 = arith.constant 0 : index
    %c732 = arith.constant 732 : index
    %147 = vector.load %arg19[%c0_85, %c732] : memref<2x3904xf32, #tpu.memory_space<vmem>>, vector<1x61xf32>
    tpu.vector_store %arg19[%c0_85, %c732], %146 {strides = array<i32>} : memref<2x3904xf32, #tpu.memory_space<vmem>>, vector<1x61xf32>,
    %148 = vector.extract_strided_slice %121 {offsets = [13, 0], sizes = [1, 61], strides = [1, 1]} : vector<64x61xf32> to vector<1x61xf32>
    %c0_86 = arith.constant 0 : index
    %c793 = arith.constant 793 : index
    %149 = vector.load %arg19[%c0_86, %c793] : memref<2x3904xf32, #tpu.memory_space<vmem>>, vector<1x61xf32>
    tpu.vector_store %arg19[%c0_86, %c793], %148 {strides = array<i32>} : memref<2x3904xf32, #tpu.memory_space<vmem>>, vector<1x61xf32>,
    %150 = vector.extract_strided_slice %121 {offsets = [14, 0], sizes = [1, 61], strides = [1, 1]} : vector<64x61xf32> to vector<1x61xf32>
    %c0_87 = arith.constant 0 : index
    %c854 = arith.constant 854 : index
    %151 = vector.load %arg19[%c0_87, %c854] : memref<2x3904xf32, #tpu.memory_space<vmem>>, vector<1x61xf32>
    tpu.vector_store %arg19[%c0_87, %c854], %150 {strides = array<i32>} : memref<2x3904xf32, #tpu.memory_space<vmem>>, vector<1x61xf32>,
    %152 = vector.extract_strided_slice %121 {offsets = [15, 0], sizes = [1, 61], strides = [1, 1]} : vector<64x61xf32> to vector<1x61xf32>
    %c0_88 = arith.constant 0 : index
    %c915 = arith.constant 915 : index
    %153 = vector.load %arg19[%c0_88, %c915] : memref<2x3904xf32, #tpu.memory_space<vmem>>, vector<1x61xf32>
    tpu.vector_store %arg19[%c0_88, %c915], %152 {strides = array<i32>} : memref<2x3904xf32, #tpu.memory_space<vmem>>, vector<1x61xf32>,
    %154 = vector.extract_strided_slice %121 {offsets = [16, 0], sizes = [1, 61], strides = [1, 1]} : vector<64x61xf32> to vector<1x61xf32>
    %c0_89 = arith.constant 0 : index
    %c976 = arith.constant 976 : index
    %155 = vector.load %arg19[%c0_89, %c976] : memref<2x3904xf32, #tpu.memory_space<vmem>>, vector<1x61xf32>
    tpu.vector_store %arg19[%c0_89, %c976], %154 {strides = array<i32>} : memref<2x3904xf32, #tpu.memory_space<vmem>>, vector<1x61xf32>,
    %156 = vector.extract_strided_slice %121 {offsets = [17, 0], sizes = [1, 61], strides = [1, 1]} : vector<64x61xf32> to vector<1x61xf32>
    %c0_90 = arith.constant 0 : index
    %c1037 = arith.constant 1037 : index
    %157 = vector.load %arg19[%c0_90, %c1037] : memref<2x3904xf32, #tpu.memory_space<vmem>>, vector<1x61xf32>
    tpu.vector_store %arg19[%c0_90, %c1037], %156 {strides = array<i32>} : memref<2x3904xf32, #tpu.memory_space<vmem>>, vector<1x61xf32>,
    %158 = vector.extract_strided_slice %121 {offsets = [18, 0], sizes = [1, 61], strides = [1, 1]} : vector<64x61xf32> to vector<1x61xf32>
    %c0_91 = arith.constant 0 : index
    %c1098 = arith.constant 1098 : index
    %159 = vector.load %arg19[%c0_91, %c1098] : memref<2x3904xf32, #tpu.memory_space<vmem>>, vector<1x61xf32>
    tpu.vector_store %arg19[%c0_91, %c1098], %158 {strides = array<i32>} : memref<2x3904xf32, #tpu.memory_space<vmem>>, vector<1x61xf32>,
    %160 = vector.extract_strided_slice %121 {offsets = [19, 0], sizes = [1, 61], strides = [1, 1]} : vector<64x61xf32> to vector<1x61xf32>
    %c0_92 = arith.constant 0 : index
    %c1159 = arith.constant 1159 : index
    %161 = vector.load %arg19[%c0_92, %c1159] : memref<2x3904xf32, #tpu.memory_space<vmem>>, vector<1x61xf32>
    tpu.vector_store %arg19[%c0_92, %c1159], %160 {strides = array<i32>} : memref<2x3904xf32, #tpu.memory_space<vmem>>, vector<1x61xf32>,
    %162 = vector.extract_strided_slice %121 {offsets = [20, 0], sizes = [1, 61], strides = [1, 1]} : vector<64x61xf32> to vector<1x61xf32>
    %c0_93 = arith.constant 0 : index
    %c1220 = arith.constant 1220 : index
    %163 = vector.load %arg19[%c0_93, %c1220] : memref<2x3904xf32, #tpu.memory_space<vmem>>, vector<1x61xf32>
    tpu.vector_store %arg19[%c0_93, %c1220], %162 {strides = array<i32>} : memref<2x3904xf32, #tpu.memory_space<vmem>>, vector<1x61xf32>,
    %164 = vector.extract_strided_slice %121 {offsets = [21, 0], sizes = [1, 61], strides = [1, 1]} : vector<64x61xf32> to vector<1x61xf32>
    %c0_94 = arith.constant 0 : index
    %c1281 = arith.constant 1281 : index
    %165 = vector.load %arg19[%c0_94, %c1281] : memref<2x3904xf32, #tpu.memory_space<vmem>>, vector<1x61xf32>
    tpu.vector_store %arg19[%c0_94, %c1281], %164 {strides = array<i32>} : memref<2x3904xf32, #tpu.memory_space<vmem>>, vector<1x61xf32>,
    %166 = vector.extract_strided_slice %121 {offsets = [22, 0], sizes = [1, 61], strides = [1, 1]} : vector<64x61xf32> to vector<1x61xf32>
    %c0_95 = arith.constant 0 : index
    %c1342 = arith.constant 1342 : index
    %167 = vector.load %arg19[%c0_95, %c1342] : memref<2x3904xf32, #tpu.memory_space<vmem>>, vector<1x61xf32>
    tpu.vector_store %arg19[%c0_95, %c1342], %166 {strides = array<i32>} : memref<2x3904xf32, #tpu.memory_space<vmem>>, vector<1x61xf32>,
    %168 = vector.extract_strided_slice %121 {offsets = [23, 0], sizes = [1, 61], strides = [1, 1]} : vector<64x61xf32> to vector<1x61xf32>
    %c0_96 = arith.constant 0 : index
    %c1403 = arith.constant 1403 : index
    %169 = vector.load %arg19[%c0_96, %c1403] : memref<2x3904xf32, #tpu.memory_space<vmem>>, vector<1x61xf32>
    tpu.vector_store %arg19[%c0_96, %c1403], %168 {strides = array<i32>} : memref<2x3904xf32, #tpu.memory_space<vmem>>, vector<1x61xf32>,
    %170 = vector.extract_strided_slice %121 {offsets = [24, 0], sizes = [1, 61], strides = [1, 1]} : vector<64x61xf32> to vector<1x61xf32>
    %c0_97 = arith.constant 0 : index
    %c1464 = arith.constant 1464 : index
    %171 = vector.load %arg19[%c0_97, %c1464] : memref<2x3904xf32, #tpu.memory_space<vmem>>, vector<1x61xf32>
    tpu.vector_store %arg19[%c0_97, %c1464], %170 {strides = array<i32>} : memref<2x3904xf32, #tpu.memory_space<vmem>>, vector<1x61xf32>,
    %172 = vector.extract_strided_slice %121 {offsets = [25, 0], sizes = [1, 61], strides = [1, 1]} : vector<64x61xf32> to vector<1x61xf32>
    %c0_98 = arith.constant 0 : index
    %c1525 = arith.constant 1525 : index
    %173 = vector.load %arg19[%c0_98, %c1525] : memref<2x3904xf32, #tpu.memory_space<vmem>>, vector<1x61xf32>
    tpu.vector_store %arg19[%c0_98, %c1525], %172 {strides = array<i32>} : memref<2x3904xf32, #tpu.memory_space<vmem>>, vector<1x61xf32>,
    %174 = vector.extract_strided_slice %121 {offsets = [26, 0], sizes = [1, 61], strides = [1, 1]} : vector<64x61xf32> to vector<1x61xf32>
    %c0_99 = arith.constant 0 : index
    %c1586 = arith.constant 1586 : index
    %175 = vector.load %arg19[%c0_99, %c1586] : memref<2x3904xf32, #tpu.memory_space<vmem>>, vector<1x61xf32>
    tpu.vector_store %arg19[%c0_99, %c1586], %174 {strides = array<i32>} : memref<2x3904xf32, #tpu.memory_space<vmem>>, vector<1x61xf32>,
    %176 = vector.extract_strided_slice %121 {offsets = [27, 0], sizes = [1, 61], strides = [1, 1]} : vector<64x61xf32> to vector<1x61xf32>
    %c0_100 = arith.constant 0 : index
    %c1647 = arith.constant 1647 : index
    %177 = vector.load %arg19[%c0_100, %c1647] : memref<2x3904xf32, #tpu.memory_space<vmem>>, vector<1x61xf32>
    tpu.vector_store %arg19[%c0_100, %c1647], %176 {strides = array<i32>} : memref<2x3904xf32, #tpu.memory_space<vmem>>, vector<1x61xf32>,
    %178 = vector.extract_strided_slice %121 {offsets = [28, 0], sizes = [1, 61], strides = [1, 1]} : vector<64x61xf32> to vector<1x61xf32>
    %c0_101 = arith.constant 0 : index
    %c1708 = arith.constant 1708 : index
    %179 = vector.load %arg19[%c0_101, %c1708] : memref<2x3904xf32, #tpu.memory_space<vmem>>, vector<1x61xf32>
    tpu.vector_store %arg19[%c0_101, %c1708], %178 {strides = array<i32>} : memref<2x3904xf32, #tpu.memory_space<vmem>>, vector<1x61xf32>,
    %180 = vector.extract_strided_slice %121 {offsets = [29, 0], sizes = [1, 61], strides = [1, 1]} : vector<64x61xf32> to vector<1x61xf32>
    %c0_102 = arith.constant 0 : index
    %c1769 = arith.constant 1769 : index
    %181 = vector.load %arg19[%c0_102, %c1769] : memref<2x3904xf32, #tpu.memory_space<vmem>>, vector<1x61xf32>
    tpu.vector_store %arg19[%c0_102, %c1769], %180 {strides = array<i32>} : memref<2x3904xf32, #tpu.memory_space<vmem>>, vector<1x61xf32>,
    %182 = vector.extract_strided_slice %121 {offsets = [30, 0], sizes = [1, 61], strides = [1, 1]} : vector<64x61xf32> to vector<1x61xf32>
    %c0_103 = arith.constant 0 : index
    %c1830 = arith.constant 1830 : index
    %183 = vector.load %arg19[%c0_103, %c1830] : memref<2x3904xf32, #tpu.memory_space<vmem>>, vector<1x61xf32>
    tpu.vector_store %arg19[%c0_103, %c1830], %182 {strides = array<i32>} : memref<2x3904xf32, #tpu.memory_space<vmem>>, vector<1x61xf32>,
    %184 = vector.extract_strided_slice %121 {offsets = [31, 0], sizes = [1, 61], strides = [1, 1]} : vector<64x61xf32> to vector<1x61xf32>
    %c0_104 = arith.constant 0 : index
    %c1891 = arith.constant 1891 : index
    %185 = vector.load %arg19[%c0_104, %c1891] : memref<2x3904xf32, #tpu.memory_space<vmem>>, vector<1x61xf32>
    tpu.vector_store %arg19[%c0_104, %c1891], %184 {strides = array<i32>} : memref<2x3904xf32, #tpu.memory_space<vmem>>, vector<1x61xf32>,
    %186 = vector.extract_strided_slice %121 {offsets = [32, 0], sizes = [1, 61], strides = [1, 1]} : vector<64x61xf32> to vector<1x61xf32>
    %c0_105 = arith.constant 0 : index
    %c1952 = arith.constant 1952 : index
    %187 = vector.load %arg19[%c0_105, %c1952] : memref<2x3904xf32, #tpu.memory_space<vmem>>, vector<1x61xf32>
    tpu.vector_store %arg19[%c0_105, %c1952], %186 {strides = array<i32>} : memref<2x3904xf32, #tpu.memory_space<vmem>>, vector<1x61xf32>,
    %188 = vector.extract_strided_slice %121 {offsets = [33, 0], sizes = [1, 61], strides = [1, 1]} : vector<64x61xf32> to vector<1x61xf32>
    %c0_106 = arith.constant 0 : index
    %c2013 = arith.constant 2013 : index
    %189 = vector.load %arg19[%c0_106, %c2013] : memref<2x3904xf32, #tpu.memory_space<vmem>>, vector<1x61xf32>
    tpu.vector_store %arg19[%c0_106, %c2013], %188 {strides = array<i32>} : memref<2x3904xf32, #tpu.memory_space<vmem>>, vector<1x61xf32>,
    %190 = vector.extract_strided_slice %121 {offsets = [34, 0], sizes = [1, 61], strides = [1, 1]} : vector<64x61xf32> to vector<1x61xf32>
    %c0_107 = arith.constant 0 : index
    %c2074 = arith.constant 2074 : index
    %191 = vector.load %arg19[%c0_107, %c2074] : memref<2x3904xf32, #tpu.memory_space<vmem>>, vector<1x61xf32>
    tpu.vector_store %arg19[%c0_107, %c2074], %190 {strides = array<i32>} : memref<2x3904xf32, #tpu.memory_space<vmem>>, vector<1x61xf32>,
    %192 = vector.extract_strided_slice %121 {offsets = [35, 0], sizes = [1, 61], strides = [1, 1]} : vector<64x61xf32> to vector<1x61xf32>
    %c0_108 = arith.constant 0 : index
    %c2135 = arith.constant 2135 : index
    %193 = vector.load %arg19[%c0_108, %c2135] : memref<2x3904xf32, #tpu.memory_space<vmem>>, vector<1x61xf32>
    tpu.vector_store %arg19[%c0_108, %c2135], %192 {strides = array<i32>} : memref<2x3904xf32, #tpu.memory_space<vmem>>, vector<1x61xf32>,
    %194 = vector.extract_strided_slice %121 {offsets = [36, 0], sizes = [1, 61], strides = [1, 1]} : vector<64x61xf32> to vector<1x61xf32>
    %c0_109 = arith.constant 0 : index
    %c2196 = arith.constant 2196 : index
    %195 = vector.load %arg19[%c0_109, %c2196] : memref<2x3904xf32, #tpu.memory_space<vmem>>, vector<1x61xf32>
    tpu.vector_store %arg19[%c0_109, %c2196], %194 {strides = array<i32>} : memref<2x3904xf32, #tpu.memory_space<vmem>>, vector<1x61xf32>,
    %196 = vector.extract_strided_slice %121 {offsets = [37, 0], sizes = [1, 61], strides = [1, 1]} : vector<64x61xf32> to vector<1x61xf32>
    %c0_110 = arith.constant 0 : index
    %c2257 = arith.constant 2257 : index
    %197 = vector.load %arg19[%c0_110, %c2257] : memref<2x3904xf32, #tpu.memory_space<vmem>>, vector<1x61xf32>
    tpu.vector_store %arg19[%c0_110, %c2257], %196 {strides = array<i32>} : memref<2x3904xf32, #tpu.memory_space<vmem>>, vector<1x61xf32>,
    %198 = vector.extract_strided_slice %121 {offsets = [38, 0], sizes = [1, 61], strides = [1, 1]} : vector<64x61xf32> to vector<1x61xf32>
    %c0_111 = arith.constant 0 : index
    %c2318 = arith.constant 2318 : index
    %199 = vector.load %arg19[%c0_111, %c2318] : memref<2x3904xf32, #tpu.memory_space<vmem>>, vector<1x61xf32>
    tpu.vector_store %arg19[%c0_111, %c2318], %198 {strides = array<i32>} : memref<2x3904xf32, #tpu.memory_space<vmem>>, vector<1x61xf32>,
    %200 = vector.extract_strided_slice %121 {offsets = [39, 0], sizes = [1, 61], strides = [1, 1]} : vector<64x61xf32> to vector<1x61xf32>
    %c0_112 = arith.constant 0 : index
    %c2379 = arith.constant 2379 : index
    %201 = vector.load %arg19[%c0_112, %c2379] : memref<2x3904xf32, #tpu.memory_space<vmem>>, vector<1x61xf32>
    tpu.vector_store %arg19[%c0_112, %c2379], %200 {strides = array<i32>} : memref<2x3904xf32, #tpu.memory_space<vmem>>, vector<1x61xf32>,
    %202 = vector.extract_strided_slice %121 {offsets = [40, 0], sizes = [1, 61], strides = [1, 1]} : vector<64x61xf32> to vector<1x61xf32>
    %c0_113 = arith.constant 0 : index
    %c2440 = arith.constant 2440 : index
    %203 = vector.load %arg19[%c0_113, %c2440] : memref<2x3904xf32, #tpu.memory_space<vmem>>, vector<1x61xf32>
    tpu.vector_store %arg19[%c0_113, %c2440], %202 {strides = array<i32>} : memref<2x3904xf32, #tpu.memory_space<vmem>>, vector<1x61xf32>,
    %204 = vector.extract_strided_slice %121 {offsets = [41, 0], sizes = [1, 61], strides = [1, 1]} : vector<64x61xf32> to vector<1x61xf32>
    %c0_114 = arith.constant 0 : index
    %c2501 = arith.constant 2501 : index
    %205 = vector.load %arg19[%c0_114, %c2501] : memref<2x3904xf32, #tpu.memory_space<vmem>>, vector<1x61xf32>
    tpu.vector_store %arg19[%c0_114, %c2501], %204 {strides = array<i32>} : memref<2x3904xf32, #tpu.memory_space<vmem>>, vector<1x61xf32>,
    %206 = vector.extract_strided_slice %121 {offsets = [42, 0], sizes = [1, 61], strides = [1, 1]} : vector<64x61xf32> to vector<1x61xf32>
    %c0_115 = arith.constant 0 : index
    %c2562 = arith.constant 2562 : index
    %207 = vector.load %arg19[%c0_115, %c2562] : memref<2x3904xf32, #tpu.memory_space<vmem>>, vector<1x61xf32>
    tpu.vector_store %arg19[%c0_115, %c2562], %206 {strides = array<i32>} : memref<2x3904xf32, #tpu.memory_space<vmem>>, vector<1x61xf32>,
    %208 = vector.extract_strided_slice %121 {offsets = [43, 0], sizes = [1, 61], strides = [1, 1]} : vector<64x61xf32> to vector<1x61xf32>
    %c0_116 = arith.constant 0 : index
    %c2623 = arith.constant 2623 : index
    %209 = vector.load %arg19[%c0_116, %c2623] : memref<2x3904xf32, #tpu.memory_space<vmem>>, vector<1x61xf32>
    tpu.vector_store %arg19[%c0_116, %c2623], %208 {strides = array<i32>} : memref<2x3904xf32, #tpu.memory_space<vmem>>, vector<1x61xf32>,
    %210 = vector.extract_strided_slice %121 {offsets = [44, 0], sizes = [1, 61], strides = [1, 1]} : vector<64x61xf32> to vector<1x61xf32>
    %c0_117 = arith.constant 0 : index
    %c2684 = arith.constant 2684 : index
    %211 = vector.load %arg19[%c0_117, %c2684] : memref<2x3904xf32, #tpu.memory_space<vmem>>, vector<1x61xf32>
    tpu.vector_store %arg19[%c0_117, %c2684], %210 {strides = array<i32>} : memref<2x3904xf32, #tpu.memory_space<vmem>>, vector<1x61xf32>,
    %212 = vector.extract_strided_slice %121 {offsets = [45, 0], sizes = [1, 61], strides = [1, 1]} : vector<64x61xf32> to vector<1x61xf32>
    %c0_118 = arith.constant 0 : index
    %c2745 = arith.constant 2745 : index
    %213 = vector.load %arg19[%c0_118, %c2745] : memref<2x3904xf32, #tpu.memory_space<vmem>>, vector<1x61xf32>
    tpu.vector_store %arg19[%c0_118, %c2745], %212 {strides = array<i32>} : memref<2x3904xf32, #tpu.memory_space<vmem>>, vector<1x61xf32>,
    %214 = vector.extract_strided_slice %121 {offsets = [46, 0], sizes = [1, 61], strides = [1, 1]} : vector<64x61xf32> to vector<1x61xf32>
    %c0_119 = arith.constant 0 : index
    %c2806 = arith.constant 2806 : index
    %215 = vector.load %arg19[%c0_119, %c2806] : memref<2x3904xf32, #tpu.memory_space<vmem>>, vector<1x61xf32>
    tpu.vector_store %arg19[%c0_119, %c2806], %214 {strides = array<i32>} : memref<2x3904xf32, #tpu.memory_space<vmem>>, vector<1x61xf32>,
    %216 = vector.extract_strided_slice %121 {offsets = [47, 0], sizes = [1, 61], strides = [1, 1]} : vector<64x61xf32> to vector<1x61xf32>
    %c0_120 = arith.constant 0 : index
    %c2867 = arith.constant 2867 : index
    %217 = vector.load %arg19[%c0_120, %c2867] : memref<2x3904xf32, #tpu.memory_space<vmem>>, vector<1x61xf32>
    tpu.vector_store %arg19[%c0_120, %c2867], %216 {strides = array<i32>} : memref<2x3904xf32, #tpu.memory_space<vmem>>, vector<1x61xf32>,
    %218 = vector.extract_strided_slice %121 {offsets = [48, 0], sizes = [1, 61], strides = [1, 1]} : vector<64x61xf32> to vector<1x61xf32>
    %c0_121 = arith.constant 0 : index
    %c2928 = arith.constant 2928 : index
    %219 = vector.load %arg19[%c0_121, %c2928] : memref<2x3904xf32, #tpu.memory_space<vmem>>, vector<1x61xf32>
    tpu.vector_store %arg19[%c0_121, %c2928], %218 {strides = array<i32>} : memref<2x3904xf32, #tpu.memory_space<vmem>>, vector<1x61xf32>,
    %220 = vector.extract_strided_slice %121 {offsets = [49, 0], sizes = [1, 61], strides = [1, 1]} : vector<64x61xf32> to vector<1x61xf32>
    %c0_122 = arith.constant 0 : index
    %c2989 = arith.constant 2989 : index
    %221 = vector.load %arg19[%c0_122, %c2989] : memref<2x3904xf32, #tpu.memory_space<vmem>>, vector<1x61xf32>
    tpu.vector_store %arg19[%c0_122, %c2989], %220 {strides = array<i32>} : memref<2x3904xf32, #tpu.memory_space<vmem>>, vector<1x61xf32>,
    %222 = vector.extract_strided_slice %121 {offsets = [50, 0], sizes = [1, 61], strides = [1, 1]} : vector<64x61xf32> to vector<1x61xf32>
    %c0_123 = arith.constant 0 : index
    %c3050 = arith.constant 3050 : index
    %223 = vector.load %arg19[%c0_123, %c3050] : memref<2x3904xf32, #tpu.memory_space<vmem>>, vector<1x61xf32>
    tpu.vector_store %arg19[%c0_123, %c3050], %222 {strides = array<i32>} : memref<2x3904xf32, #tpu.memory_space<vmem>>, vector<1x61xf32>,
    %224 = vector.extract_strided_slice %121 {offsets = [51, 0], sizes = [1, 61], strides = [1, 1]} : vector<64x61xf32> to vector<1x61xf32>
    %c0_124 = arith.constant 0 : index
    %c3111 = arith.constant 3111 : index
    %225 = vector.load %arg19[%c0_124, %c3111] : memref<2x3904xf32, #tpu.memory_space<vmem>>, vector<1x61xf32>
    tpu.vector_store %arg19[%c0_124, %c3111], %224 {strides = array<i32>} : memref<2x3904xf32, #tpu.memory_space<vmem>>, vector<1x61xf32>,
    %226 = vector.extract_strided_slice %121 {offsets = [52, 0], sizes = [1, 61], strides = [1, 1]} : vector<64x61xf32> to vector<1x61xf32>
    %c0_125 = arith.constant 0 : index
    %c3172 = arith.constant 3172 : index
    %227 = vector.load %arg19[%c0_125, %c3172] : memref<2x3904xf32, #tpu.memory_space<vmem>>, vector<1x61xf32>
    tpu.vector_store %arg19[%c0_125, %c3172], %226 {strides = array<i32>} : memref<2x3904xf32, #tpu.memory_space<vmem>>, vector<1x61xf32>,
    %228 = vector.extract_strided_slice %121 {offsets = [53, 0], sizes = [1, 61], strides = [1, 1]} : vector<64x61xf32> to vector<1x61xf32>
    %c0_126 = arith.constant 0 : index
    %c3233 = arith.constant 3233 : index
    %229 = vector.load %arg19[%c0_126, %c3233] : memref<2x3904xf32, #tpu.memory_space<vmem>>, vector<1x61xf32>
    tpu.vector_store %arg19[%c0_126, %c3233], %228 {strides = array<i32>} : memref<2x3904xf32, #tpu.memory_space<vmem>>, vector<1x61xf32>,
    %230 = vector.extract_strided_slice %121 {offsets = [54, 0], sizes = [1, 61], strides = [1, 1]} : vector<64x61xf32> to vector<1x61xf32>
    %c0_127 = arith.constant 0 : index
    %c3294 = arith.constant 3294 : index
    %231 = vector.load %arg19[%c0_127, %c3294] : memref<2x3904xf32, #tpu.memory_space<vmem>>, vector<1x61xf32>
    tpu.vector_store %arg19[%c0_127, %c3294], %230 {strides = array<i32>} : memref<2x3904xf32, #tpu.memory_space<vmem>>, vector<1x61xf32>,
    %232 = vector.extract_strided_slice %121 {offsets = [55, 0], sizes = [1, 61], strides = [1, 1]} : vector<64x61xf32> to vector<1x61xf32>
    %c0_128 = arith.constant 0 : index
    %c3355 = arith.constant 3355 : index
    %233 = vector.load %arg19[%c0_128, %c3355] : memref<2x3904xf32, #tpu.memory_space<vmem>>, vector<1x61xf32>
    tpu.vector_store %arg19[%c0_128, %c3355], %232 {strides = array<i32>} : memref<2x3904xf32, #tpu.memory_space<vmem>>, vector<1x61xf32>,
    %234 = vector.extract_strided_slice %121 {offsets = [56, 0], sizes = [1, 61], strides = [1, 1]} : vector<64x61xf32> to vector<1x61xf32>
    %c0_129 = arith.constant 0 : index
    %c3416 = arith.constant 3416 : index
    %235 = vector.load %arg19[%c0_129, %c3416] : memref<2x3904xf32, #tpu.memory_space<vmem>>, vector<1x61xf32>
    tpu.vector_store %arg19[%c0_129, %c3416], %234 {strides = array<i32>} : memref<2x3904xf32, #tpu.memory_space<vmem>>, vector<1x61xf32>,
    %236 = vector.extract_strided_slice %121 {offsets = [57, 0], sizes = [1, 61], strides = [1, 1]} : vector<64x61xf32> to vector<1x61xf32>
    %c0_130 = arith.constant 0 : index
    %c3477 = arith.constant 3477 : index
    %237 = vector.load %arg19[%c0_130, %c3477] : memref<2x3904xf32, #tpu.memory_space<vmem>>, vector<1x61xf32>
    tpu.vector_store %arg19[%c0_130, %c3477], %236 {strides = array<i32>} : memref<2x3904xf32, #tpu.memory_space<vmem>>, vector<1x61xf32>,
    %238 = vector.extract_strided_slice %121 {offsets = [58, 0], sizes = [1, 61], strides = [1, 1]} : vector<64x61xf32> to vector<1x61xf32>
    %c0_131 = arith.constant 0 : index
    %c3538 = arith.constant 3538 : index
    %239 = vector.load %arg19[%c0_131, %c3538] : memref<2x3904xf32, #tpu.memory_space<vmem>>, vector<1x61xf32>
    tpu.vector_store %arg19[%c0_131, %c3538], %238 {strides = array<i32>} : memref<2x3904xf32, #tpu.memory_space<vmem>>, vector<1x61xf32>,
    %240 = vector.extract_strided_slice %121 {offsets = [59, 0], sizes = [1, 61], strides = [1, 1]} : vector<64x61xf32> to vector<1x61xf32>
    %c0_132 = arith.constant 0 : index
    %c3599 = arith.constant 3599 : index
    %241 = vector.load %arg19[%c0_132, %c3599] : memref<2x3904xf32, #tpu.memory_space<vmem>>, vector<1x61xf32>
    tpu.vector_store %arg19[%c0_132, %c3599], %240 {strides = array<i32>} : memref<2x3904xf32, #tpu.memory_space<vmem>>, vector<1x61xf32>,
    %242 = vector.extract_strided_slice %121 {offsets = [60, 0], sizes = [1, 61], strides = [1, 1]} : vector<64x61xf32> to vector<1x61xf32>
    %c0_133 = arith.constant 0 : index
    %c3660 = arith.constant 3660 : index
    %243 = vector.load %arg19[%c0_133, %c3660] : memref<2x3904xf32, #tpu.memory_space<vmem>>, vector<1x61xf32>
    tpu.vector_store %arg19[%c0_133, %c3660], %242 {strides = array<i32>} : memref<2x3904xf32, #tpu.memory_space<vmem>>, vector<1x61xf32>,
    %244 = vector.extract_strided_slice %121 {offsets = [61, 0], sizes = [1, 61], strides = [1, 1]} : vector<64x61xf32> to vector<1x61xf32>
    %c0_134 = arith.constant 0 : index
    %c3721 = arith.constant 3721 : index
    %245 = vector.load %arg19[%c0_134, %c3721] : memref<2x3904xf32, #tpu.memory_space<vmem>>, vector<1x61xf32>
    tpu.vector_store %arg19[%c0_134, %c3721], %244 {strides = array<i32>} : memref<2x3904xf32, #tpu.memory_space<vmem>>, vector<1x61xf32>,
    %246 = vector.extract_strided_slice %121 {offsets = [62, 0], sizes = [1, 61], strides = [1, 1]} : vector<64x61xf32> to vector<1x61xf32>
    %c0_135 = arith.constant 0 : index
    %c3782 = arith.constant 3782 : index
    %247 = vector.load %arg19[%c0_135, %c3782] : memref<2x3904xf32, #tpu.memory_space<vmem>>, vector<1x61xf32>
    tpu.vector_store %arg19[%c0_135, %c3782], %246 {strides = array<i32>} : memref<2x3904xf32, #tpu.memory_space<vmem>>, vector<1x61xf32>,
    %248 = vector.extract_strided_slice %121 {offsets = [63, 0], sizes = [1, 61], strides = [1, 1]} : vector<64x61xf32> to vector<1x61xf32>
    %c0_136 = arith.constant 0 : index
    %c3843 = arith.constant 3843 : index
    %249 = vector.load %arg19[%c0_136, %c3843] : memref<2x3904xf32, #tpu.memory_space<vmem>>, vector<1x61xf32>
    tpu.vector_store %arg19[%c0_136, %c3843], %248 {strides = array<i32>} : memref<2x3904xf32, #tpu.memory_space<vmem>>, vector<1x61xf32>,
    %c1_137 = arith.constant 1 : index
    %c0_138 = arith.constant 0 : index
    %c0_139 = arith.constant 0 : index
    %250 = vector.load %arg1[%c1_137, %c0_138, %c0_139] : memref<2x512x81xbf16, #tpu.memory_space<vmem>>, vector<1x512x81xbf16>
    %251 = vector.shape_cast %250 : vector<1x512x81xbf16> to vector<512x81xbf16>
    %cst_140 = arith.constant dense<0.000000e+00> : vector<64x81xf32>
    %252 = tpu.matmul %0, %251, %cst_140 {dimension_numbers = #tpu.dot_dimension_numbers<[1], [0], [0], [1], [0, 0, 1, 1], [], []>} : vector<64x512xbf16>, vector<512x81xbf16>, vector<64x81xf32> -> vector<64x81xf32>
    %253 = arith.addf %252, %5 : vector<64x81xf32>
    %254 = vector.shape_cast %253 : vector<64x81xf32> to vector<1x64x81xf32>
    %cst_141 = arith.constant dense<0.000000e+00> : vector<1xf32>
    %255 = vector.multi_reduction <add>, %254, %cst_141 [1, 2] : vector<1x64x81xf32> to vector<1xf32>
    %256 = vector.shape_cast %255 : vector<1xf32> to vector<1x1x1xf32>
    %257 = vector.extract %256[0, 0, 0] : f32 from vector<1x1x1xf32>
    %cst_142 = arith.constant 5.184000e+03 : f32
    %258 = arith.divf %257, %cst_142 : f32
    %259 = vector.broadcast %258 : f32 to vector<64x81xf32>
    %260 = arith.subf %253, %259 : vector<64x81xf32>
    %261 = arith.mulf %260, %260 : vector<64x81xf32>
    %262 = vector.shape_cast %261 : vector<64x81xf32> to vector<1x64x81xf32>
    %cst_143 = arith.constant dense<0.000000e+00> : vector<1xf32>
    %263 = vector.multi_reduction <add>, %262, %cst_143 [1, 2] : vector<1x64x81xf32> to vector<1xf32>
    %264 = vector.shape_cast %263 : vector<1xf32> to vector<1x1x1xf32>
    %265 = vector.extract %264[0, 0, 0] : f32 from vector<1x1x1xf32>
    %cst_144 = arith.constant 5.184000e+03 : f32
    %266 = arith.divf %265, %cst_144 : f32
    %cst_145 = arith.constant 9.99999974E-6 : f32
    %267 = arith.addf %266, %cst_145 : f32
    %268 = math.rsqrt %267 : f32
    %269 = vector.broadcast %268 : f32 to vector<64x81xf32>
    %270 = arith.mulf %260, %269 : vector<64x81xf32>
    %271 = arith.mulf %270, %1 : vector<64x81xf32>
    %272 = arith.addf %271, %2 : vector<64x81xf32>
    %cst_146 = arith.constant 0.000000e+00 : f32
    %273 = vector.broadcast %cst_146 : f32 to vector<64x81xf32>
    %274 = arith.maximumf %272, %273 : vector<64x81xf32>
    %c0_147 = arith.constant 0 : index
    %c0_148 = arith.constant 0 : index
    %275 = vector.load %arg18[%c0_147, %c0_148] : memref<64x81xf32, #tpu.memory_space<vmem>>, vector<64x81xf32>
    tpu.vector_store %arg18[%c0_147, %c0_148], %274 {strides = array<i32>} : memref<64x81xf32, #tpu.memory_space<vmem>>, vector<64x81xf32>,
    %c0_149 = arith.constant 0 : index
    %c0_150 = arith.constant 0 : index
    %c0_151 = arith.constant 0 : index
    %276 = vector.load %arg6[%c0_149, %c0_150, %c0_151] : memref<9x64x64xbf16, #tpu.memory_space<vmem>>, vector<1x64x64xbf16>
    %277 = vector.shape_cast %276 : vector<1x64x64xbf16> to vector<64x64xbf16>
    %c0_152 = arith.constant 0 : index
    %c0_153 = arith.constant 0 : index
    %278 = vector.load %arg18[%c0_152, %c0_153] : memref<64x81xf32, #tpu.memory_space<vmem>>, vector<64x61xf32>
    %279 = arith.truncf %278 : vector<64x61xf32> to vector<64x61xbf16>
    %cst_154 = arith.constant dense<0.000000e+00> : vector<64x61xf32>
    %280 = tpu.matmul %277, %279, %cst_154 {dimension_numbers = #tpu.dot_dimension_numbers<[1], [0], [0], [1], [0, 0, 1, 1], [], []>} : vector<64x64xbf16>, vector<64x61xbf16>, vector<64x61xf32> -> vector<64x61xf32>
    %281 = arith.addf %10, %280 : vector<64x61xf32>
    %c1_155 = arith.constant 1 : index
    %c0_156 = arith.constant 0 : index
    %c0_157 = arith.constant 0 : index
    %282 = vector.load %arg6[%c1_155, %c0_156, %c0_157] : memref<9x64x64xbf16, #tpu.memory_space<vmem>>, vector<1x64x64xbf16>
    %283 = vector.shape_cast %282 : vector<1x64x64xbf16> to vector<64x64xbf16>
    %c0_158 = arith.constant 0 : index
    %c1_159 = arith.constant 1 : index
    %284 = vector.load %arg18[%c0_158, %c1_159] : memref<64x81xf32, #tpu.memory_space<vmem>>, vector<64x61xf32>
    %285 = arith.truncf %284 : vector<64x61xf32> to vector<64x61xbf16>
    %cst_160 = arith.constant dense<0.000000e+00> : vector<64x61xf32>
    %286 = tpu.matmul %283, %285, %cst_160 {dimension_numbers = #tpu.dot_dimension_numbers<[1], [0], [0], [1], [0, 0, 1, 1], [], []>} : vector<64x64xbf16>, vector<64x61xbf16>, vector<64x61xf32> -> vector<64x61xf32>
    %287 = arith.addf %281, %286 : vector<64x61xf32>
    %c2_161 = arith.constant 2 : index
    %c0_162 = arith.constant 0 : index
    %c0_163 = arith.constant 0 : index
    %288 = vector.load %arg6[%c2_161, %c0_162, %c0_163] : memref<9x64x64xbf16, #tpu.memory_space<vmem>>, vector<1x64x64xbf16>
    %289 = vector.shape_cast %288 : vector<1x64x64xbf16> to vector<64x64xbf16>
    %c0_164 = arith.constant 0 : index
    %c2_165 = arith.constant 2 : index
    %290 = vector.load %arg18[%c0_164, %c2_165] : memref<64x81xf32, #tpu.memory_space<vmem>>, vector<64x61xf32>
    %291 = arith.truncf %290 : vector<64x61xf32> to vector<64x61xbf16>
    %cst_166 = arith.constant dense<0.000000e+00> : vector<64x61xf32>
    %292 = tpu.matmul %289, %291, %cst_166 {dimension_numbers = #tpu.dot_dimension_numbers<[1], [0], [0], [1], [0, 0, 1, 1], [], []>} : vector<64x64xbf16>, vector<64x61xbf16>, vector<64x61xf32> -> vector<64x61xf32>
    %293 = arith.addf %287, %292 : vector<64x61xf32>
    %c3_167 = arith.constant 3 : index
    %c0_168 = arith.constant 0 : index
    %c0_169 = arith.constant 0 : index
    %294 = vector.load %arg6[%c3_167, %c0_168, %c0_169] : memref<9x64x64xbf16, #tpu.memory_space<vmem>>, vector<1x64x64xbf16>
    %295 = vector.shape_cast %294 : vector<1x64x64xbf16> to vector<64x64xbf16>
    %c0_170 = arith.constant 0 : index
    %c9_171 = arith.constant 9 : index
    %296 = vector.load %arg18[%c0_170, %c9_171] : memref<64x81xf32, #tpu.memory_space<vmem>>, vector<64x61xf32>
    %297 = arith.truncf %296 : vector<64x61xf32> to vector<64x61xbf16>
    %cst_172 = arith.constant dense<0.000000e+00> : vector<64x61xf32>
    %298 = tpu.matmul %295, %297, %cst_172 {dimension_numbers = #tpu.dot_dimension_numbers<[1], [0], [0], [1], [0, 0, 1, 1], [], []>} : vector<64x64xbf16>, vector<64x61xbf16>, vector<64x61xf32> -> vector<64x61xf32>
    %299 = arith.addf %293, %298 : vector<64x61xf32>
    %c4_173 = arith.constant 4 : index
    %c0_174 = arith.constant 0 : index
    %c0_175 = arith.constant 0 : index
    %300 = vector.load %arg6[%c4_173, %c0_174, %c0_175] : memref<9x64x64xbf16, #tpu.memory_space<vmem>>, vector<1x64x64xbf16>
    %301 = vector.shape_cast %300 : vector<1x64x64xbf16> to vector<64x64xbf16>
    %c0_176 = arith.constant 0 : index
    %c10_177 = arith.constant 10 : index
    %302 = vector.load %arg18[%c0_176, %c10_177] : memref<64x81xf32, #tpu.memory_space<vmem>>, vector<64x61xf32>
    %303 = arith.truncf %302 : vector<64x61xf32> to vector<64x61xbf16>
    %cst_178 = arith.constant dense<0.000000e+00> : vector<64x61xf32>
    %304 = tpu.matmul %301, %303, %cst_178 {dimension_numbers = #tpu.dot_dimension_numbers<[1], [0], [0], [1], [0, 0, 1, 1], [], []>} : vector<64x64xbf16>, vector<64x61xbf16>, vector<64x61xf32> -> vector<64x61xf32>
    %305 = arith.addf %299, %304 : vector<64x61xf32>
    %c5_179 = arith.constant 5 : index
    %c0_180 = arith.constant 0 : index
    %c0_181 = arith.constant 0 : index
    %306 = vector.load %arg6[%c5_179, %c0_180, %c0_181] : memref<9x64x64xbf16, #tpu.memory_space<vmem>>, vector<1x64x64xbf16>
    %307 = vector.shape_cast %306 : vector<1x64x64xbf16> to vector<64x64xbf16>
    %c0_182 = arith.constant 0 : index
    %c11_183 = arith.constant 11 : index
    %308 = vector.load %arg18[%c0_182, %c11_183] : memref<64x81xf32, #tpu.memory_space<vmem>>, vector<64x61xf32>
    %309 = arith.truncf %308 : vector<64x61xf32> to vector<64x61xbf16>
    %cst_184 = arith.constant dense<0.000000e+00> : vector<64x61xf32>
    %310 = tpu.matmul %307, %309, %cst_184 {dimension_numbers = #tpu.dot_dimension_numbers<[1], [0], [0], [1], [0, 0, 1, 1], [], []>} : vector<64x64xbf16>, vector<64x61xbf16>, vector<64x61xf32> -> vector<64x61xf32>
    %311 = arith.addf %305, %310 : vector<64x61xf32>
    %c6_185 = arith.constant 6 : index
    %c0_186 = arith.constant 0 : index
    %c0_187 = arith.constant 0 : index
    %312 = vector.load %arg6[%c6_185, %c0_186, %c0_187] : memref<9x64x64xbf16, #tpu.memory_space<vmem>>, vector<1x64x64xbf16>
    %313 = vector.shape_cast %312 : vector<1x64x64xbf16> to vector<64x64xbf16>
    %c0_188 = arith.constant 0 : index
    %c18_189 = arith.constant 18 : index
    %314 = vector.load %arg18[%c0_188, %c18_189] : memref<64x81xf32, #tpu.memory_space<vmem>>, vector<64x61xf32>
    %315 = arith.truncf %314 : vector<64x61xf32> to vector<64x61xbf16>
    %cst_190 = arith.constant dense<0.000000e+00> : vector<64x61xf32>
    %316 = tpu.matmul %313, %315, %cst_190 {dimension_numbers = #tpu.dot_dimension_numbers<[1], [0], [0], [1], [0, 0, 1, 1], [], []>} : vector<64x64xbf16>, vector<64x61xbf16>, vector<64x61xf32> -> vector<64x61xf32>
    %317 = arith.addf %311, %316 : vector<64x61xf32>
    %c7_191 = arith.constant 7 : index
    %c0_192 = arith.constant 0 : index
    %c0_193 = arith.constant 0 : index
    %318 = vector.load %arg6[%c7_191, %c0_192, %c0_193] : memref<9x64x64xbf16, #tpu.memory_space<vmem>>, vector<1x64x64xbf16>
    %319 = vector.shape_cast %318 : vector<1x64x64xbf16> to vector<64x64xbf16>
    %c0_194 = arith.constant 0 : index
    %c19_195 = arith.constant 19 : index
    %320 = vector.load %arg18[%c0_194, %c19_195] : memref<64x81xf32, #tpu.memory_space<vmem>>, vector<64x61xf32>
    %321 = arith.truncf %320 : vector<64x61xf32> to vector<64x61xbf16>
    %cst_196 = arith.constant dense<0.000000e+00> : vector<64x61xf32>
    %322 = tpu.matmul %319, %321, %cst_196 {dimension_numbers = #tpu.dot_dimension_numbers<[1], [0], [0], [1], [0, 0, 1, 1], [], []>} : vector<64x64xbf16>, vector<64x61xbf16>, vector<64x61xf32> -> vector<64x61xf32>
    %323 = arith.addf %317, %322 : vector<64x61xf32>
    %c8_197 = arith.constant 8 : index
    %c0_198 = arith.constant 0 : index
    %c0_199 = arith.constant 0 : index
    %324 = vector.load %arg6[%c8_197, %c0_198, %c0_199] : memref<9x64x64xbf16, #tpu.memory_space<vmem>>, vector<1x64x64xbf16>
    %325 = vector.shape_cast %324 : vector<1x64x64xbf16> to vector<64x64xbf16>
    %c0_200 = arith.constant 0 : index
    %c20_201 = arith.constant 20 : index
    %326 = vector.load %arg18[%c0_200, %c20_201] : memref<64x81xf32, #tpu.memory_space<vmem>>, vector<64x61xf32>
    %327 = arith.truncf %326 : vector<64x61xf32> to vector<64x61xbf16>
    %cst_202 = arith.constant dense<0.000000e+00> : vector<64x61xf32>
    %328 = tpu.matmul %325, %327, %cst_202 {dimension_numbers = #tpu.dot_dimension_numbers<[1], [0], [0], [1], [0, 0, 1, 1], [], []>} : vector<64x64xbf16>, vector<64x61xbf16>, vector<64x61xf32> -> vector<64x61xf32>
    %329 = arith.addf %323, %328 : vector<64x61xf32>
    %330 = vector.broadcast %11 : vector<1x61xf32> to vector<64x61xf32>
    %331 = arith.mulf %329, %330 : vector<64x61xf32>
    %332 = vector.shape_cast %331 : vector<64x61xf32> to vector<1x64x61xf32>
    %cst_203 = arith.constant dense<0.000000e+00> : vector<1xf32>
    %333 = vector.multi_reduction <add>, %332, %cst_203 [1, 2] : vector<1x64x61xf32> to vector<1xf32>
    %334 = vector.shape_cast %333 : vector<1xf32> to vector<1x1x1xf32>
    %335 = vector.extract %334[0, 0, 0] : f32 from vector<1x1x1xf32>
    %336 = arith.divf %335, %16 : f32
    %337 = vector.broadcast %336 : f32 to vector<64x61xf32>
    %338 = arith.subf %329, %337 : vector<64x61xf32>
    %339 = vector.broadcast %11 : vector<1x61xf32> to vector<64x61xf32>
    %340 = arith.mulf %338, %339 : vector<64x61xf32>
    %341 = arith.mulf %340, %340 : vector<64x61xf32>
    %342 = vector.shape_cast %341 : vector<64x61xf32> to vector<1x64x61xf32>
    %cst_204 = arith.constant dense<0.000000e+00> : vector<1xf32>
    %343 = vector.multi_reduction <add>, %342, %cst_204 [1, 2] : vector<1x64x61xf32> to vector<1xf32>
    %344 = vector.shape_cast %343 : vector<1xf32> to vector<1x1x1xf32>
    %345 = vector.extract %344[0, 0, 0] : f32 from vector<1x1x1xf32>
    %346 = arith.divf %345, %16 : f32
    %cst_205 = arith.constant 9.99999974E-6 : f32
    %347 = arith.addf %346, %cst_205 : f32
    %348 = math.rsqrt %347 : f32
    %349 = vector.broadcast %348 : f32 to vector<64x61xf32>
    %350 = arith.mulf %340, %349 : vector<64x61xf32>
    %351 = arith.mulf %350, %6 : vector<64x61xf32>
    %352 = arith.addf %351, %7 : vector<64x61xf32>
    %cst_206 = arith.constant 0.000000e+00 : f32
    %353 = vector.broadcast %cst_206 : f32 to vector<64x61xf32>
    %354 = arith.maximumf %352, %353 : vector<64x61xf32>
    %355 = vector.extract_strided_slice %354 {offsets = [0, 0], sizes = [1, 61], strides = [1, 1]} : vector<64x61xf32> to vector<1x61xf32>
    %c1_207 = arith.constant 1 : index
    %c0_208 = arith.constant 0 : index
    %356 = vector.load %arg19[%c1_207, %c0_208] : memref<2x3904xf32, #tpu.memory_space<vmem>>, vector<1x61xf32>
    tpu.vector_store %arg19[%c1_207, %c0_208], %355 {strides = array<i32>} : memref<2x3904xf32, #tpu.memory_space<vmem>>, vector<1x61xf32>,
    %357 = vector.extract_strided_slice %354 {offsets = [1, 0], sizes = [1, 61], strides = [1, 1]} : vector<64x61xf32> to vector<1x61xf32>
    %c1_209 = arith.constant 1 : index
    %c61_210 = arith.constant 61 : index
    %358 = vector.load %arg19[%c1_209, %c61_210] : memref<2x3904xf32, #tpu.memory_space<vmem>>, vector<1x61xf32>
    tpu.vector_store %arg19[%c1_209, %c61_210], %357 {strides = array<i32>} : memref<2x3904xf32, #tpu.memory_space<vmem>>, vector<1x61xf32>,
    %359 = vector.extract_strided_slice %354 {offsets = [2, 0], sizes = [1, 61], strides = [1, 1]} : vector<64x61xf32> to vector<1x61xf32>
    %c1_211 = arith.constant 1 : index
    %c122_212 = arith.constant 122 : index
    %360 = vector.load %arg19[%c1_211, %c122_212] : memref<2x3904xf32, #tpu.memory_space<vmem>>, vector<1x61xf32>
    tpu.vector_store %arg19[%c1_211, %c122_212], %359 {strides = array<i32>} : memref<2x3904xf32, #tpu.memory_space<vmem>>, vector<1x61xf32>,
    %361 = vector.extract_strided_slice %354 {offsets = [3, 0], sizes = [1, 61], strides = [1, 1]} : vector<64x61xf32> to vector<1x61xf32>
    %c1_213 = arith.constant 1 : index
    %c183_214 = arith.constant 183 : index
    %362 = vector.load %arg19[%c1_213, %c183_214] : memref<2x3904xf32, #tpu.memory_space<vmem>>, vector<1x61xf32>
    tpu.vector_store %arg19[%c1_213, %c183_214], %361 {strides = array<i32>} : memref<2x3904xf32, #tpu.memory_space<vmem>>, vector<1x61xf32>,
    %363 = vector.extract_strided_slice %354 {offsets = [4, 0], sizes = [1, 61], strides = [1, 1]} : vector<64x61xf32> to vector<1x61xf32>
    %c1_215 = arith.constant 1 : index
    %c244_216 = arith.constant 244 : index
    %364 = vector.load %arg19[%c1_215, %c244_216] : memref<2x3904xf32, #tpu.memory_space<vmem>>, vector<1x61xf32>
    tpu.vector_store %arg19[%c1_215, %c244_216], %363 {strides = array<i32>} : memref<2x3904xf32, #tpu.memory_space<vmem>>, vector<1x61xf32>,
    %365 = vector.extract_strided_slice %354 {offsets = [5, 0], sizes = [1, 61], strides = [1, 1]} : vector<64x61xf32> to vector<1x61xf32>
    %c1_217 = arith.constant 1 : index
    %c305_218 = arith.constant 305 : index
    %366 = vector.load %arg19[%c1_217, %c305_218] : memref<2x3904xf32, #tpu.memory_space<vmem>>, vector<1x61xf32>
    tpu.vector_store %arg19[%c1_217, %c305_218], %365 {strides = array<i32>} : memref<2x3904xf32, #tpu.memory_space<vmem>>, vector<1x61xf32>,
    %367 = vector.extract_strided_slice %354 {offsets = [6, 0], sizes = [1, 61], strides = [1, 1]} : vector<64x61xf32> to vector<1x61xf32>
    %c1_219 = arith.constant 1 : index
    %c366_220 = arith.constant 366 : index
    %368 = vector.load %arg19[%c1_219, %c366_220] : memref<2x3904xf32, #tpu.memory_space<vmem>>, vector<1x61xf32>
    tpu.vector_store %arg19[%c1_219, %c366_220], %367 {strides = array<i32>} : memref<2x3904xf32, #tpu.memory_space<vmem>>, vector<1x61xf32>,
    %369 = vector.extract_strided_slice %354 {offsets = [7, 0], sizes = [1, 61], strides = [1, 1]} : vector<64x61xf32> to vector<1x61xf32>
    %c1_221 = arith.constant 1 : index
    %c427_222 = arith.constant 427 : index
    %370 = vector.load %arg19[%c1_221, %c427_222] : memref<2x3904xf32, #tpu.memory_space<vmem>>, vector<1x61xf32>
    tpu.vector_store %arg19[%c1_221, %c427_222], %369 {strides = array<i32>} : memref<2x3904xf32, #tpu.memory_space<vmem>>, vector<1x61xf32>,
    %371 = vector.extract_strided_slice %354 {offsets = [8, 0], sizes = [1, 61], strides = [1, 1]} : vector<64x61xf32> to vector<1x61xf32>
    %c1_223 = arith.constant 1 : index
    %c488_224 = arith.constant 488 : index
    %372 = vector.load %arg19[%c1_223, %c488_224] : memref<2x3904xf32, #tpu.memory_space<vmem>>, vector<1x61xf32>
    tpu.vector_store %arg19[%c1_223, %c488_224], %371 {strides = array<i32>} : memref<2x3904xf32, #tpu.memory_space<vmem>>, vector<1x61xf32>,
    %373 = vector.extract_strided_slice %354 {offsets = [9, 0], sizes = [1, 61], strides = [1, 1]} : vector<64x61xf32> to vector<1x61xf32>
    %c1_225 = arith.constant 1 : index
    %c549_226 = arith.constant 549 : index
    %374 = vector.load %arg19[%c1_225, %c549_226] : memref<2x3904xf32, #tpu.memory_space<vmem>>, vector<1x61xf32>
    tpu.vector_store %arg19[%c1_225, %c549_226], %373 {strides = array<i32>} : memref<2x3904xf32, #tpu.memory_space<vmem>>, vector<1x61xf32>,
    %375 = vector.extract_strided_slice %354 {offsets = [10, 0], sizes = [1, 61], strides = [1, 1]} : vector<64x61xf32> to vector<1x61xf32>
    %c1_227 = arith.constant 1 : index
    %c610_228 = arith.constant 610 : index
    %376 = vector.load %arg19[%c1_227, %c610_228] : memref<2x3904xf32, #tpu.memory_space<vmem>>, vector<1x61xf32>
    tpu.vector_store %arg19[%c1_227, %c610_228], %375 {strides = array<i32>} : memref<2x3904xf32, #tpu.memory_space<vmem>>, vector<1x61xf32>,
    %377 = vector.extract_strided_slice %354 {offsets = [11, 0], sizes = [1, 61], strides = [1, 1]} : vector<64x61xf32> to vector<1x61xf32>
    %c1_229 = arith.constant 1 : index
    %c671_230 = arith.constant 671 : index
    %378 = vector.load %arg19[%c1_229, %c671_230] : memref<2x3904xf32, #tpu.memory_space<vmem>>, vector<1x61xf32>
    tpu.vector_store %arg19[%c1_229, %c671_230], %377 {strides = array<i32>} : memref<2x3904xf32, #tpu.memory_space<vmem>>, vector<1x61xf32>,
    %379 = vector.extract_strided_slice %354 {offsets = [12, 0], sizes = [1, 61], strides = [1, 1]} : vector<64x61xf32> to vector<1x61xf32>
    %c1_231 = arith.constant 1 : index
    %c732_232 = arith.constant 732 : index
    %380 = vector.load %arg19[%c1_231, %c732_232] : memref<2x3904xf32, #tpu.memory_space<vmem>>, vector<1x61xf32>
    tpu.vector_store %arg19[%c1_231, %c732_232], %379 {strides = array<i32>} : memref<2x3904xf32, #tpu.memory_space<vmem>>, vector<1x61xf32>,
    %381 = vector.extract_strided_slice %354 {offsets = [13, 0], sizes = [1, 61], strides = [1, 1]} : vector<64x61xf32> to vector<1x61xf32>
    %c1_233 = arith.constant 1 : index
    %c793_234 = arith.constant 793 : index
    %382 = vector.load %arg19[%c1_233, %c793_234] : memref<2x3904xf32, #tpu.memory_space<vmem>>, vector<1x61xf32>
    tpu.vector_store %arg19[%c1_233, %c793_234], %381 {strides = array<i32>} : memref<2x3904xf32, #tpu.memory_space<vmem>>, vector<1x61xf32>,
    %383 = vector.extract_strided_slice %354 {offsets = [14, 0], sizes = [1, 61], strides = [1, 1]} : vector<64x61xf32> to vector<1x61xf32>
    %c1_235 = arith.constant 1 : index
    %c854_236 = arith.constant 854 : index
    %384 = vector.load %arg19[%c1_235, %c854_236] : memref<2x3904xf32, #tpu.memory_space<vmem>>, vector<1x61xf32>
    tpu.vector_store %arg19[%c1_235, %c854_236], %383 {strides = array<i32>} : memref<2x3904xf32, #tpu.memory_space<vmem>>, vector<1x61xf32>,
    %385 = vector.extract_strided_slice %354 {offsets = [15, 0], sizes = [1, 61], strides = [1, 1]} : vector<64x61xf32> to vector<1x61xf32>
    %c1_237 = arith.constant 1 : index
    %c915_238 = arith.constant 915 : index
    %386 = vector.load %arg19[%c1_237, %c915_238] : memref<2x3904xf32, #tpu.memory_space<vmem>>, vector<1x61xf32>
    tpu.vector_store %arg19[%c1_237, %c915_238], %385 {strides = array<i32>} : memref<2x3904xf32, #tpu.memory_space<vmem>>, vector<1x61xf32>,
    %387 = vector.extract_strided_slice %354 {offsets = [16, 0], sizes = [1, 61], strides = [1, 1]} : vector<64x61xf32> to vector<1x61xf32>
    %c1_239 = arith.constant 1 : index
    %c976_240 = arith.constant 976 : index
    %388 = vector.load %arg19[%c1_239, %c976_240] : memref<2x3904xf32, #tpu.memory_space<vmem>>, vector<1x61xf32>
    tpu.vector_store %arg19[%c1_239, %c976_240], %387 {strides = array<i32>} : memref<2x3904xf32, #tpu.memory_space<vmem>>, vector<1x61xf32>,
    %389 = vector.extract_strided_slice %354 {offsets = [17, 0], sizes = [1, 61], strides = [1, 1]} : vector<64x61xf32> to vector<1x61xf32>
    %c1_241 = arith.constant 1 : index
    %c1037_242 = arith.constant 1037 : index
    %390 = vector.load %arg19[%c1_241, %c1037_242] : memref<2x3904xf32, #tpu.memory_space<vmem>>, vector<1x61xf32>
    tpu.vector_store %arg19[%c1_241, %c1037_242], %389 {strides = array<i32>} : memref<2x3904xf32, #tpu.memory_space<vmem>>, vector<1x61xf32>,
    %391 = vector.extract_strided_slice %354 {offsets = [18, 0], sizes = [1, 61], strides = [1, 1]} : vector<64x61xf32> to vector<1x61xf32>
    %c1_243 = arith.constant 1 : index
    %c1098_244 = arith.constant 1098 : index
    %392 = vector.load %arg19[%c1_243, %c1098_244] : memref<2x3904xf32, #tpu.memory_space<vmem>>, vector<1x61xf32>
    tpu.vector_store %arg19[%c1_243, %c1098_244], %391 {strides = array<i32>} : memref<2x3904xf32, #tpu.memory_space<vmem>>, vector<1x61xf32>,
    %393 = vector.extract_strided_slice %354 {offsets = [19, 0], sizes = [1, 61], strides = [1, 1]} : vector<64x61xf32> to vector<1x61xf32>
    %c1_245 = arith.constant 1 : index
    %c1159_246 = arith.constant 1159 : index
    %394 = vector.load %arg19[%c1_245, %c1159_246] : memref<2x3904xf32, #tpu.memory_space<vmem>>, vector<1x61xf32>
    tpu.vector_store %arg19[%c1_245, %c1159_246], %393 {strides = array<i32>} : memref<2x3904xf32, #tpu.memory_space<vmem>>, vector<1x61xf32>,
    %395 = vector.extract_strided_slice %354 {offsets = [20, 0], sizes = [1, 61], strides = [1, 1]} : vector<64x61xf32> to vector<1x61xf32>
    %c1_247 = arith.constant 1 : index
    %c1220_248 = arith.constant 1220 : index
    %396 = vector.load %arg19[%c1_247, %c1220_248] : memref<2x3904xf32, #tpu.memory_space<vmem>>, vector<1x61xf32>
    tpu.vector_store %arg19[%c1_247, %c1220_248], %395 {strides = array<i32>} : memref<2x3904xf32, #tpu.memory_space<vmem>>, vector<1x61xf32>,
    %397 = vector.extract_strided_slice %354 {offsets = [21, 0], sizes = [1, 61], strides = [1, 1]} : vector<64x61xf32> to vector<1x61xf32>
    %c1_249 = arith.constant 1 : index
    %c1281_250 = arith.constant 1281 : index
    %398 = vector.load %arg19[%c1_249, %c1281_250] : memref<2x3904xf32, #tpu.memory_space<vmem>>, vector<1x61xf32>
    tpu.vector_store %arg19[%c1_249, %c1281_250], %397 {strides = array<i32>} : memref<2x3904xf32, #tpu.memory_space<vmem>>, vector<1x61xf32>,
    %399 = vector.extract_strided_slice %354 {offsets = [22, 0], sizes = [1, 61], strides = [1, 1]} : vector<64x61xf32> to vector<1x61xf32>
    %c1_251 = arith.constant 1 : index
    %c1342_252 = arith.constant 1342 : index
    %400 = vector.load %arg19[%c1_251, %c1342_252] : memref<2x3904xf32, #tpu.memory_space<vmem>>, vector<1x61xf32>
    tpu.vector_store %arg19[%c1_251, %c1342_252], %399 {strides = array<i32>} : memref<2x3904xf32, #tpu.memory_space<vmem>>, vector<1x61xf32>,
    %401 = vector.extract_strided_slice %354 {offsets = [23, 0], sizes = [1, 61], strides = [1, 1]} : vector<64x61xf32> to vector<1x61xf32>
    %c1_253 = arith.constant 1 : index
    %c1403_254 = arith.constant 1403 : index
    %402 = vector.load %arg19[%c1_253, %c1403_254] : memref<2x3904xf32, #tpu.memory_space<vmem>>, vector<1x61xf32>
    tpu.vector_store %arg19[%c1_253, %c1403_254], %401 {strides = array<i32>} : memref<2x3904xf32, #tpu.memory_space<vmem>>, vector<1x61xf32>,
    %403 = vector.extract_strided_slice %354 {offsets = [24, 0], sizes = [1, 61], strides = [1, 1]} : vector<64x61xf32> to vector<1x61xf32>
    %c1_255 = arith.constant 1 : index
    %c1464_256 = arith.constant 1464 : index
    %404 = vector.load %arg19[%c1_255, %c1464_256] : memref<2x3904xf32, #tpu.memory_space<vmem>>, vector<1x61xf32>
    tpu.vector_store %arg19[%c1_255, %c1464_256], %403 {strides = array<i32>} : memref<2x3904xf32, #tpu.memory_space<vmem>>, vector<1x61xf32>,
    %405 = vector.extract_strided_slice %354 {offsets = [25, 0], sizes = [1, 61], strides = [1, 1]} : vector<64x61xf32> to vector<1x61xf32>
    %c1_257 = arith.constant 1 : index
    %c1525_258 = arith.constant 1525 : index
    %406 = vector.load %arg19[%c1_257, %c1525_258] : memref<2x3904xf32, #tpu.memory_space<vmem>>, vector<1x61xf32>
    tpu.vector_store %arg19[%c1_257, %c1525_258], %405 {strides = array<i32>} : memref<2x3904xf32, #tpu.memory_space<vmem>>, vector<1x61xf32>,
    %407 = vector.extract_strided_slice %354 {offsets = [26, 0], sizes = [1, 61], strides = [1, 1]} : vector<64x61xf32> to vector<1x61xf32>
    %c1_259 = arith.constant 1 : index
    %c1586_260 = arith.constant 1586 : index
    %408 = vector.load %arg19[%c1_259, %c1586_260] : memref<2x3904xf32, #tpu.memory_space<vmem>>, vector<1x61xf32>
    tpu.vector_store %arg19[%c1_259, %c1586_260], %407 {strides = array<i32>} : memref<2x3904xf32, #tpu.memory_space<vmem>>, vector<1x61xf32>,
    %409 = vector.extract_strided_slice %354 {offsets = [27, 0], sizes = [1, 61], strides = [1, 1]} : vector<64x61xf32> to vector<1x61xf32>
    %c1_261 = arith.constant 1 : index
    %c1647_262 = arith.constant 1647 : index
    %410 = vector.load %arg19[%c1_261, %c1647_262] : memref<2x3904xf32, #tpu.memory_space<vmem>>, vector<1x61xf32>
    tpu.vector_store %arg19[%c1_261, %c1647_262], %409 {strides = array<i32>} : memref<2x3904xf32, #tpu.memory_space<vmem>>, vector<1x61xf32>,
    %411 = vector.extract_strided_slice %354 {offsets = [28, 0], sizes = [1, 61], strides = [1, 1]} : vector<64x61xf32> to vector<1x61xf32>
    %c1_263 = arith.constant 1 : index
    %c1708_264 = arith.constant 1708 : index
    %412 = vector.load %arg19[%c1_263, %c1708_264] : memref<2x3904xf32, #tpu.memory_space<vmem>>, vector<1x61xf32>
    tpu.vector_store %arg19[%c1_263, %c1708_264], %411 {strides = array<i32>} : memref<2x3904xf32, #tpu.memory_space<vmem>>, vector<1x61xf32>,
    %413 = vector.extract_strided_slice %354 {offsets = [29, 0], sizes = [1, 61], strides = [1, 1]} : vector<64x61xf32> to vector<1x61xf32>
    %c1_265 = arith.constant 1 : index
    %c1769_266 = arith.constant 1769 : index
    %414 = vector.load %arg19[%c1_265, %c1769_266] : memref<2x3904xf32, #tpu.memory_space<vmem>>, vector<1x61xf32>
    tpu.vector_store %arg19[%c1_265, %c1769_266], %413 {strides = array<i32>} : memref<2x3904xf32, #tpu.memory_space<vmem>>, vector<1x61xf32>,
    %415 = vector.extract_strided_slice %354 {offsets = [30, 0], sizes = [1, 61], strides = [1, 1]} : vector<64x61xf32> to vector<1x61xf32>
    %c1_267 = arith.constant 1 : index
    %c1830_268 = arith.constant 1830 : index
    %416 = vector.load %arg19[%c1_267, %c1830_268] : memref<2x3904xf32, #tpu.memory_space<vmem>>, vector<1x61xf32>
    tpu.vector_store %arg19[%c1_267, %c1830_268], %415 {strides = array<i32>} : memref<2x3904xf32, #tpu.memory_space<vmem>>, vector<1x61xf32>,
    %417 = vector.extract_strided_slice %354 {offsets = [31, 0], sizes = [1, 61], strides = [1, 1]} : vector<64x61xf32> to vector<1x61xf32>
    %c1_269 = arith.constant 1 : index
    %c1891_270 = arith.constant 1891 : index
    %418 = vector.load %arg19[%c1_269, %c1891_270] : memref<2x3904xf32, #tpu.memory_space<vmem>>, vector<1x61xf32>
    tpu.vector_store %arg19[%c1_269, %c1891_270], %417 {strides = array<i32>} : memref<2x3904xf32, #tpu.memory_space<vmem>>, vector<1x61xf32>,
    %419 = vector.extract_strided_slice %354 {offsets = [32, 0], sizes = [1, 61], strides = [1, 1]} : vector<64x61xf32> to vector<1x61xf32>
    %c1_271 = arith.constant 1 : index
    %c1952_272 = arith.constant 1952 : index
    %420 = vector.load %arg19[%c1_271, %c1952_272] : memref<2x3904xf32, #tpu.memory_space<vmem>>, vector<1x61xf32>
    tpu.vector_store %arg19[%c1_271, %c1952_272], %419 {strides = array<i32>} : memref<2x3904xf32, #tpu.memory_space<vmem>>, vector<1x61xf32>,
    %421 = vector.extract_strided_slice %354 {offsets = [33, 0], sizes = [1, 61], strides = [1, 1]} : vector<64x61xf32> to vector<1x61xf32>
    %c1_273 = arith.constant 1 : index
    %c2013_274 = arith.constant 2013 : index
    %422 = vector.load %arg19[%c1_273, %c2013_274] : memref<2x3904xf32, #tpu.memory_space<vmem>>, vector<1x61xf32>
    tpu.vector_store %arg19[%c1_273, %c2013_274], %421 {strides = array<i32>} : memref<2x3904xf32, #tpu.memory_space<vmem>>, vector<1x61xf32>,
    %423 = vector.extract_strided_slice %354 {offsets = [34, 0], sizes = [1, 61], strides = [1, 1]} : vector<64x61xf32> to vector<1x61xf32>
    %c1_275 = arith.constant 1 : index
    %c2074_276 = arith.constant 2074 : index
    %424 = vector.load %arg19[%c1_275, %c2074_276] : memref<2x3904xf32, #tpu.memory_space<vmem>>, vector<1x61xf32>
    tpu.vector_store %arg19[%c1_275, %c2074_276], %423 {strides = array<i32>} : memref<2x3904xf32, #tpu.memory_space<vmem>>, vector<1x61xf32>,
    %425 = vector.extract_strided_slice %354 {offsets = [35, 0], sizes = [1, 61], strides = [1, 1]} : vector<64x61xf32> to vector<1x61xf32>
    %c1_277 = arith.constant 1 : index
    %c2135_278 = arith.constant 2135 : index
    %426 = vector.load %arg19[%c1_277, %c2135_278] : memref<2x3904xf32, #tpu.memory_space<vmem>>, vector<1x61xf32>
    tpu.vector_store %arg19[%c1_277, %c2135_278], %425 {strides = array<i32>} : memref<2x3904xf32, #tpu.memory_space<vmem>>, vector<1x61xf32>,
    %427 = vector.extract_strided_slice %354 {offsets = [36, 0], sizes = [1, 61], strides = [1, 1]} : vector<64x61xf32> to vector<1x61xf32>
    %c1_279 = arith.constant 1 : index
    %c2196_280 = arith.constant 2196 : index
    %428 = vector.load %arg19[%c1_279, %c2196_280] : memref<2x3904xf32, #tpu.memory_space<vmem>>, vector<1x61xf32>
    tpu.vector_store %arg19[%c1_279, %c2196_280], %427 {strides = array<i32>} : memref<2x3904xf32, #tpu.memory_space<vmem>>, vector<1x61xf32>,
    %429 = vector.extract_strided_slice %354 {offsets = [37, 0], sizes = [1, 61], strides = [1, 1]} : vector<64x61xf32> to vector<1x61xf32>
    %c1_281 = arith.constant 1 : index
    %c2257_282 = arith.constant 2257 : index
    %430 = vector.load %arg19[%c1_281, %c2257_282] : memref<2x3904xf32, #tpu.memory_space<vmem>>, vector<1x61xf32>
    tpu.vector_store %arg19[%c1_281, %c2257_282], %429 {strides = array<i32>} : memref<2x3904xf32, #tpu.memory_space<vmem>>, vector<1x61xf32>,
    %431 = vector.extract_strided_slice %354 {offsets = [38, 0], sizes = [1, 61], strides = [1, 1]} : vector<64x61xf32> to vector<1x61xf32>
    %c1_283 = arith.constant 1 : index
    %c2318_284 = arith.constant 2318 : index
    %432 = vector.load %arg19[%c1_283, %c2318_284] : memref<2x3904xf32, #tpu.memory_space<vmem>>, vector<1x61xf32>
    tpu.vector_store %arg19[%c1_283, %c2318_284], %431 {strides = array<i32>} : memref<2x3904xf32, #tpu.memory_space<vmem>>, vector<1x61xf32>,
    %433 = vector.extract_strided_slice %354 {offsets = [39, 0], sizes = [1, 61], strides = [1, 1]} : vector<64x61xf32> to vector<1x61xf32>
    %c1_285 = arith.constant 1 : index
    %c2379_286 = arith.constant 2379 : index
    %434 = vector.load %arg19[%c1_285, %c2379_286] : memref<2x3904xf32, #tpu.memory_space<vmem>>, vector<1x61xf32>
    tpu.vector_store %arg19[%c1_285, %c2379_286], %433 {strides = array<i32>} : memref<2x3904xf32, #tpu.memory_space<vmem>>, vector<1x61xf32>,
    %435 = vector.extract_strided_slice %354 {offsets = [40, 0], sizes = [1, 61], strides = [1, 1]} : vector<64x61xf32> to vector<1x61xf32>
    %c1_287 = arith.constant 1 : index
    %c2440_288 = arith.constant 2440 : index
    %436 = vector.load %arg19[%c1_287, %c2440_288] : memref<2x3904xf32, #tpu.memory_space<vmem>>, vector<1x61xf32>
    tpu.vector_store %arg19[%c1_287, %c2440_288], %435 {strides = array<i32>} : memref<2x3904xf32, #tpu.memory_space<vmem>>, vector<1x61xf32>,
    %437 = vector.extract_strided_slice %354 {offsets = [41, 0], sizes = [1, 61], strides = [1, 1]} : vector<64x61xf32> to vector<1x61xf32>
    %c1_289 = arith.constant 1 : index
    %c2501_290 = arith.constant 2501 : index
    %438 = vector.load %arg19[%c1_289, %c2501_290] : memref<2x3904xf32, #tpu.memory_space<vmem>>, vector<1x61xf32>
    tpu.vector_store %arg19[%c1_289, %c2501_290], %437 {strides = array<i32>} : memref<2x3904xf32, #tpu.memory_space<vmem>>, vector<1x61xf32>,
    %439 = vector.extract_strided_slice %354 {offsets = [42, 0], sizes = [1, 61], strides = [1, 1]} : vector<64x61xf32> to vector<1x61xf32>
    %c1_291 = arith.constant 1 : index
    %c2562_292 = arith.constant 2562 : index
    %440 = vector.load %arg19[%c1_291, %c2562_292] : memref<2x3904xf32, #tpu.memory_space<vmem>>, vector<1x61xf32>
    tpu.vector_store %arg19[%c1_291, %c2562_292], %439 {strides = array<i32>} : memref<2x3904xf32, #tpu.memory_space<vmem>>, vector<1x61xf32>,
    %441 = vector.extract_strided_slice %354 {offsets = [43, 0], sizes = [1, 61], strides = [1, 1]} : vector<64x61xf32> to vector<1x61xf32>
    %c1_293 = arith.constant 1 : index
    %c2623_294 = arith.constant 2623 : index
    %442 = vector.load %arg19[%c1_293, %c2623_294] : memref<2x3904xf32, #tpu.memory_space<vmem>>, vector<1x61xf32>
    tpu.vector_store %arg19[%c1_293, %c2623_294], %441 {strides = array<i32>} : memref<2x3904xf32, #tpu.memory_space<vmem>>, vector<1x61xf32>,
    %443 = vector.extract_strided_slice %354 {offsets = [44, 0], sizes = [1, 61], strides = [1, 1]} : vector<64x61xf32> to vector<1x61xf32>
    %c1_295 = arith.constant 1 : index
    %c2684_296 = arith.constant 2684 : index
    %444 = vector.load %arg19[%c1_295, %c2684_296] : memref<2x3904xf32, #tpu.memory_space<vmem>>, vector<1x61xf32>
    tpu.vector_store %arg19[%c1_295, %c2684_296], %443 {strides = array<i32>} : memref<2x3904xf32, #tpu.memory_space<vmem>>, vector<1x61xf32>,
    %445 = vector.extract_strided_slice %354 {offsets = [45, 0], sizes = [1, 61], strides = [1, 1]} : vector<64x61xf32> to vector<1x61xf32>
    %c1_297 = arith.constant 1 : index
    %c2745_298 = arith.constant 2745 : index
    %446 = vector.load %arg19[%c1_297, %c2745_298] : memref<2x3904xf32, #tpu.memory_space<vmem>>, vector<1x61xf32>
    tpu.vector_store %arg19[%c1_297, %c2745_298], %445 {strides = array<i32>} : memref<2x3904xf32, #tpu.memory_space<vmem>>, vector<1x61xf32>,
    %447 = vector.extract_strided_slice %354 {offsets = [46, 0], sizes = [1, 61], strides = [1, 1]} : vector<64x61xf32> to vector<1x61xf32>
    %c1_299 = arith.constant 1 : index
    %c2806_300 = arith.constant 2806 : index
    %448 = vector.load %arg19[%c1_299, %c2806_300] : memref<2x3904xf32, #tpu.memory_space<vmem>>, vector<1x61xf32>
    tpu.vector_store %arg19[%c1_299, %c2806_300], %447 {strides = array<i32>} : memref<2x3904xf32, #tpu.memory_space<vmem>>, vector<1x61xf32>,
    %449 = vector.extract_strided_slice %354 {offsets = [47, 0], sizes = [1, 61], strides = [1, 1]} : vector<64x61xf32> to vector<1x61xf32>
    %c1_301 = arith.constant 1 : index
    %c2867_302 = arith.constant 2867 : index
    %450 = vector.load %arg19[%c1_301, %c2867_302] : memref<2x3904xf32, #tpu.memory_space<vmem>>, vector<1x61xf32>
    tpu.vector_store %arg19[%c1_301, %c2867_302], %449 {strides = array<i32>} : memref<2x3904xf32, #tpu.memory_space<vmem>>, vector<1x61xf32>,
    %451 = vector.extract_strided_slice %354 {offsets = [48, 0], sizes = [1, 61], strides = [1, 1]} : vector<64x61xf32> to vector<1x61xf32>
    %c1_303 = arith.constant 1 : index
    %c2928_304 = arith.constant 2928 : index
    %452 = vector.load %arg19[%c1_303, %c2928_304] : memref<2x3904xf32, #tpu.memory_space<vmem>>, vector<1x61xf32>
    tpu.vector_store %arg19[%c1_303, %c2928_304], %451 {strides = array<i32>} : memref<2x3904xf32, #tpu.memory_space<vmem>>, vector<1x61xf32>,
    %453 = vector.extract_strided_slice %354 {offsets = [49, 0], sizes = [1, 61], strides = [1, 1]} : vector<64x61xf32> to vector<1x61xf32>
    %c1_305 = arith.constant 1 : index
    %c2989_306 = arith.constant 2989 : index
    %454 = vector.load %arg19[%c1_305, %c2989_306] : memref<2x3904xf32, #tpu.memory_space<vmem>>, vector<1x61xf32>
    tpu.vector_store %arg19[%c1_305, %c2989_306], %453 {strides = array<i32>} : memref<2x3904xf32, #tpu.memory_space<vmem>>, vector<1x61xf32>,
    %455 = vector.extract_strided_slice %354 {offsets = [50, 0], sizes = [1, 61], strides = [1, 1]} : vector<64x61xf32> to vector<1x61xf32>
    %c1_307 = arith.constant 1 : index
    %c3050_308 = arith.constant 3050 : index
    %456 = vector.load %arg19[%c1_307, %c3050_308] : memref<2x3904xf32, #tpu.memory_space<vmem>>, vector<1x61xf32>
    tpu.vector_store %arg19[%c1_307, %c3050_308], %455 {strides = array<i32>} : memref<2x3904xf32, #tpu.memory_space<vmem>>, vector<1x61xf32>,
    %457 = vector.extract_strided_slice %354 {offsets = [51, 0], sizes = [1, 61], strides = [1, 1]} : vector<64x61xf32> to vector<1x61xf32>
    %c1_309 = arith.constant 1 : index
    %c3111_310 = arith.constant 3111 : index
    %458 = vector.load %arg19[%c1_309, %c3111_310] : memref<2x3904xf32, #tpu.memory_space<vmem>>, vector<1x61xf32>
    tpu.vector_store %arg19[%c1_309, %c3111_310], %457 {strides = array<i32>} : memref<2x3904xf32, #tpu.memory_space<vmem>>, vector<1x61xf32>,
    %459 = vector.extract_strided_slice %354 {offsets = [52, 0], sizes = [1, 61], strides = [1, 1]} : vector<64x61xf32> to vector<1x61xf32>
    %c1_311 = arith.constant 1 : index
    %c3172_312 = arith.constant 3172 : index
    %460 = vector.load %arg19[%c1_311, %c3172_312] : memref<2x3904xf32, #tpu.memory_space<vmem>>, vector<1x61xf32>
    tpu.vector_store %arg19[%c1_311, %c3172_312], %459 {strides = array<i32>} : memref<2x3904xf32, #tpu.memory_space<vmem>>, vector<1x61xf32>,
    %461 = vector.extract_strided_slice %354 {offsets = [53, 0], sizes = [1, 61], strides = [1, 1]} : vector<64x61xf32> to vector<1x61xf32>
    %c1_313 = arith.constant 1 : index
    %c3233_314 = arith.constant 3233 : index
    %462 = vector.load %arg19[%c1_313, %c3233_314] : memref<2x3904xf32, #tpu.memory_space<vmem>>, vector<1x61xf32>
    tpu.vector_store %arg19[%c1_313, %c3233_314], %461 {strides = array<i32>} : memref<2x3904xf32, #tpu.memory_space<vmem>>, vector<1x61xf32>,
    %463 = vector.extract_strided_slice %354 {offsets = [54, 0], sizes = [1, 61], strides = [1, 1]} : vector<64x61xf32> to vector<1x61xf32>
    %c1_315 = arith.constant 1 : index
    %c3294_316 = arith.constant 3294 : index
    %464 = vector.load %arg19[%c1_315, %c3294_316] : memref<2x3904xf32, #tpu.memory_space<vmem>>, vector<1x61xf32>
    tpu.vector_store %arg19[%c1_315, %c3294_316], %463 {strides = array<i32>} : memref<2x3904xf32, #tpu.memory_space<vmem>>, vector<1x61xf32>,
    %465 = vector.extract_strided_slice %354 {offsets = [55, 0], sizes = [1, 61], strides = [1, 1]} : vector<64x61xf32> to vector<1x61xf32>
    %c1_317 = arith.constant 1 : index
    %c3355_318 = arith.constant 3355 : index
    %466 = vector.load %arg19[%c1_317, %c3355_318] : memref<2x3904xf32, #tpu.memory_space<vmem>>, vector<1x61xf32>
    tpu.vector_store %arg19[%c1_317, %c3355_318], %465 {strides = array<i32>} : memref<2x3904xf32, #tpu.memory_space<vmem>>, vector<1x61xf32>,
    %467 = vector.extract_strided_slice %354 {offsets = [56, 0], sizes = [1, 61], strides = [1, 1]} : vector<64x61xf32> to vector<1x61xf32>
    %c1_319 = arith.constant 1 : index
    %c3416_320 = arith.constant 3416 : index
    %468 = vector.load %arg19[%c1_319, %c3416_320] : memref<2x3904xf32, #tpu.memory_space<vmem>>, vector<1x61xf32>
    tpu.vector_store %arg19[%c1_319, %c3416_320], %467 {strides = array<i32>} : memref<2x3904xf32, #tpu.memory_space<vmem>>, vector<1x61xf32>,
    %469 = vector.extract_strided_slice %354 {offsets = [57, 0], sizes = [1, 61], strides = [1, 1]} : vector<64x61xf32> to vector<1x61xf32>
    %c1_321 = arith.constant 1 : index
    %c3477_322 = arith.constant 3477 : index
    %470 = vector.load %arg19[%c1_321, %c3477_322] : memref<2x3904xf32, #tpu.memory_space<vmem>>, vector<1x61xf32>
    tpu.vector_store %arg19[%c1_321, %c3477_322], %469 {strides = array<i32>} : memref<2x3904xf32, #tpu.memory_space<vmem>>, vector<1x61xf32>,
    %471 = vector.extract_strided_slice %354 {offsets = [58, 0], sizes = [1, 61], strides = [1, 1]} : vector<64x61xf32> to vector<1x61xf32>
    %c1_323 = arith.constant 1 : index
    %c3538_324 = arith.constant 3538 : index
    %472 = vector.load %arg19[%c1_323, %c3538_324] : memref<2x3904xf32, #tpu.memory_space<vmem>>, vector<1x61xf32>
    tpu.vector_store %arg19[%c1_323, %c3538_324], %471 {strides = array<i32>} : memref<2x3904xf32, #tpu.memory_space<vmem>>, vector<1x61xf32>,
    %473 = vector.extract_strided_slice %354 {offsets = [59, 0], sizes = [1, 61], strides = [1, 1]} : vector<64x61xf32> to vector<1x61xf32>
    %c1_325 = arith.constant 1 : index
    %c3599_326 = arith.constant 3599 : index
    %474 = vector.load %arg19[%c1_325, %c3599_326] : memref<2x3904xf32, #tpu.memory_space<vmem>>, vector<1x61xf32>
    tpu.vector_store %arg19[%c1_325, %c3599_326], %473 {strides = array<i32>} : memref<2x3904xf32, #tpu.memory_space<vmem>>, vector<1x61xf32>,
    %475 = vector.extract_strided_slice %354 {offsets = [60, 0], sizes = [1, 61], strides = [1, 1]} : vector<64x61xf32> to vector<1x61xf32>
    %c1_327 = arith.constant 1 : index
    %c3660_328 = arith.constant 3660 : index
    %476 = vector.load %arg19[%c1_327, %c3660_328] : memref<2x3904xf32, #tpu.memory_space<vmem>>, vector<1x61xf32>
    tpu.vector_store %arg19[%c1_327, %c3660_328], %475 {strides = array<i32>} : memref<2x3904xf32, #tpu.memory_space<vmem>>, vector<1x61xf32>,
    %477 = vector.extract_strided_slice %354 {offsets = [61, 0], sizes = [1, 61], strides = [1, 1]} : vector<64x61xf32> to vector<1x61xf32>
    %c1_329 = arith.constant 1 : index
    %c3721_330 = arith.constant 3721 : index
    %478 = vector.load %arg19[%c1_329, %c3721_330] : memref<2x3904xf32, #tpu.memory_space<vmem>>, vector<1x61xf32>
    tpu.vector_store %arg19[%c1_329, %c3721_330], %477 {strides = array<i32>} : memref<2x3904xf32, #tpu.memory_space<vmem>>, vector<1x61xf32>,
    %479 = vector.extract_strided_slice %354 {offsets = [62, 0], sizes = [1, 61], strides = [1, 1]} : vector<64x61xf32> to vector<1x61xf32>
    %c1_331 = arith.constant 1 : index
    %c3782_332 = arith.constant 3782 : index
    %480 = vector.load %arg19[%c1_331, %c3782_332] : memref<2x3904xf32, #tpu.memory_space<vmem>>, vector<1x61xf32>
    tpu.vector_store %arg19[%c1_331, %c3782_332], %479 {strides = array<i32>} : memref<2x3904xf32, #tpu.memory_space<vmem>>, vector<1x61xf32>,
    %481 = vector.extract_strided_slice %354 {offsets = [63, 0], sizes = [1, 61], strides = [1, 1]} : vector<64x61xf32> to vector<1x61xf32>
    %c1_333 = arith.constant 1 : index
    %c3843_334 = arith.constant 3843 : index
    %482 = vector.load %arg19[%c1_333, %c3843_334] : memref<2x3904xf32, #tpu.memory_space<vmem>>, vector<1x61xf32>
    tpu.vector_store %arg19[%c1_333, %c3843_334], %481 {strides = array<i32>} : memref<2x3904xf32, #tpu.memory_space<vmem>>, vector<1x61xf32>,
    %c0_335 = arith.constant 0 : index
    %c0_336 = arith.constant 0 : index
    %483 = vector.load %arg19[%c0_335, %c0_336] : memref<2x3904xf32, #tpu.memory_space<vmem>>, vector<2x3904xf32>
    %484 = arith.truncf %483 : vector<2x3904xf32> to vector<2x3904xbf16>
    %c0_337 = arith.constant 0 : index
    %c0_338 = arith.constant 0 : index
    %485 = vector.load %arg11[%c0_337, %c0_338] : memref<3904x256xbf16, #tpu.memory_space<vmem>>, vector<3904x256xbf16>
    %cst_339 = arith.constant dense<0.000000e+00> : vector<2x256xf32>
    %486 = tpu.matmul %484, %485, %cst_339 {dimension_numbers = #tpu.dot_dimension_numbers<[1], [0], [0], [1], [0, 0, 1, 1], [], []>} : vector<2x3904xbf16>, vector<3904x256xbf16>, vector<2x256xf32> -> vector<2x256xf32>
    %c0_340 = arith.constant 0 : index
    %c0_341 = arith.constant 0 : index
    %487 = vector.load %arg12[%c0_340, %c0_341] : memref<1x256xf32, #tpu.memory_space<vmem>>, vector<1x256xf32>
    %488 = vector.broadcast %487 : vector<1x256xf32> to vector<2x256xf32>
    %489 = arith.addf %486, %488 : vector<2x256xf32>
    %cst_342 = arith.constant 0.000000e+00 : f32
    %490 = vector.broadcast %cst_342 : f32 to vector<2x256xf32>
    %491 = arith.maximumf %489, %490 : vector<2x256xf32>
    %492 = arith.truncf %491 : vector<2x256xf32> to vector<2x256xbf16>
    %c0_343 = arith.constant 0 : index
    %c0_344 = arith.constant 0 : index
    %493 = vector.load %arg13[%c0_343, %c0_344] : memref<256x256xbf16, #tpu.memory_space<vmem>>, vector<256x256xbf16>
    %cst_345 = arith.constant dense<0.000000e+00> : vector<2x256xf32>
    %494 = tpu.matmul %492, %493, %cst_345 {dimension_numbers = #tpu.dot_dimension_numbers<[1], [0], [0], [1], [0, 0, 1, 1], [], []>} : vector<2x256xbf16>, vector<256x256xbf16>, vector<2x256xf32> -> vector<2x256xf32>
    %c0_346 = arith.constant 0 : index
    %c0_347 = arith.constant 0 : index
    %495 = vector.load %arg14[%c0_346, %c0_347] : memref<1x256xf32, #tpu.memory_space<vmem>>, vector<1x256xf32>
    %496 = vector.broadcast %495 : vector<1x256xf32> to vector<2x256xf32>
    %497 = arith.addf %494, %496 : vector<2x256xf32>
    %cst_348 = arith.constant 0.000000e+00 : f32
    %498 = vector.broadcast %cst_348 : f32 to vector<2x256xf32>
    %499 = arith.maximumf %497, %498 : vector<2x256xf32>
    %500 = arith.truncf %499 : vector<2x256xf32> to vector<2x256xbf16>
    %c0_349 = arith.constant 0 : index
    %c0_350 = arith.constant 0 : index
    %501 = vector.load %arg15[%c0_349, %c0_350] : memref<256x4xbf16, #tpu.memory_space<vmem>>, vector<256x4xbf16>
    %cst_351 = arith.constant dense<0.000000e+00> : vector<2x4xf32>
    %502 = tpu.matmul %500, %501, %cst_351 {dimension_numbers = #tpu.dot_dimension_numbers<[1], [0], [0], [1], [0, 0, 1, 1], [], []>} : vector<2x256xbf16>, vector<256x4xbf16>, vector<2x4xf32> -> vector<2x4xf32>
    %c0_352 = arith.constant 0 : index
    %c0_353 = arith.constant 0 : index
    %503 = vector.load %arg16[%c0_352, %c0_353] : memref<1x4xf32, #tpu.memory_space<vmem>>, vector<1x4xf32>
    %504 = vector.broadcast %503 : vector<1x4xf32> to vector<2x4xf32>
    %505 = arith.addf %502, %504 : vector<2x4xf32>
    %506 = math.tanh %505 : vector<2x4xf32>
    %cst_354 = arith.constant 8.000000e-01 : f32
    %507 = vector.broadcast %cst_354 : f32 to vector<2x4xf32>
    %508 = arith.mulf %506, %507 : vector<2x4xf32>
    %c0_355 = arith.constant 0 : index
    %c0_356 = arith.constant 0 : index
    %c0_357 = arith.constant 0 : index
    %509 = vector.load %arg17[%c0_355, %c0_356, %c0_357] : memref<2x1x4xf32, #tpu.memory_space<vmem>>, vector<2x1x4xf32>
    %510 = vector.shape_cast %509 : vector<2x1x4xf32> to vector<2x4xf32>
    %511 = vector.shape_cast %508 : vector<2x4xf32> to vector<2x1x4xf32>
    tpu.vector_store %arg17[%c0_355, %c0_356, %c0_357], %511 {strides = array<i32>} : memref<2x1x4xf32, #tpu.memory_space<vmem>>, vector<2x1x4xf32>,
    return
  }
  func.func @transform_0(%arg0: i32) -> (i32, i32, i32) {
    %c0_i32 = arith.constant 0 : i32
    %c0_i32_0 = arith.constant 0 : i32
    %c0_i32_1 = arith.constant 0 : i32
    return %arg0, %c0_i32, %c0_i32_0 : i32, i32, i32
  }
  func.func @transform_1(%arg0: i32) -> (i32, i32) {
    %c0_i32 = arith.constant 0 : i32
    %c0_i32_0 = arith.constant 0 : i32
    %c0_i32_1 = arith.constant 0 : i32
    return %c0_i32, %c0_i32_0 : i32, i32
  }
  func.func @transform_2(%arg0: i32) -> (i32, i32) {
    %c0_i32 = arith.constant 0 : i32
    %c0_i32_0 = arith.constant 0 : i32
    %c0_i32_1 = arith.constant 0 : i32
    return %c0_i32, %c0_i32_0 : i32, i32
  }
  func.func @transform_3(%arg0: i32) -> (i32, i32) {
    %c0_i32 = arith.constant 0 : i32
    %c0_i32_0 = arith.constant 0 : i32
    %c0_i32_1 = arith.constant 0 : i32
    return %c0_i32, %c0_i32_0 : i32, i32
  }
  func.func @transform_4(%arg0: i32) -> (i32, i32) {
    %c0_i32 = arith.constant 0 : i32
    %c0_i32_0 = arith.constant 0 : i32
    %c0_i32_1 = arith.constant 0 : i32
    return %c0_i32, %c0_i32_0 : i32, i32
  }
  func.func @transform_5(%arg0: i32) -> (i32, i32, i32) {
    %c0_i32 = arith.constant 0 : i32
    %c0_i32_0 = arith.constant 0 : i32
    %c0_i32_1 = arith.constant 0 : i32
    %c0_i32_2 = arith.constant 0 : i32
    return %c0_i32, %c0_i32_0, %c0_i32_1 : i32, i32, i32
  }
  func.func @transform_6(%arg0: i32) -> (i32, i32) {
    %c0_i32 = arith.constant 0 : i32
    %c0_i32_0 = arith.constant 0 : i32
    %c0_i32_1 = arith.constant 0 : i32
    return %c0_i32, %c0_i32_0 : i32, i32
  }
  func.func @transform_7(%arg0: i32) -> (i32, i32) {
    %c0_i32 = arith.constant 0 : i32
    %c0_i32_0 = arith.constant 0 : i32
    %c0_i32_1 = arith.constant 0 : i32
    return %c0_i32, %c0_i32_0 : i32, i32
  }
  func.func @transform_8(%arg0: i32) -> (i32, i32) {
    %c0_i32 = arith.constant 0 : i32
    %c0_i32_0 = arith.constant 0 : i32
    %c0_i32_1 = arith.constant 0 : i32
    return %c0_i32, %c0_i32_0 : i32, i32
  }
  func.func @transform_9(%arg0: i32) -> (i32, i32) {
    %c0_i32 = arith.constant 0 : i32
    %c0_i32_0 = arith.constant 0 : i32
    %c0_i32_1 = arith.constant 0 : i32
    return %c0_i32, %c0_i32_0 : i32, i32
  }
  func.func @transform_10(%arg0: i32) -> (i32, i32) {
    %c0_i32 = arith.constant 0 : i32
    %c0_i32_0 = arith.constant 0 : i32
    %c0_i32_1 = arith.constant 0 : i32
    return %c0_i32, %c0_i32_0 : i32, i32
  }
  func.func @transform_11(%arg0: i32) -> (i32, i32) {
    %c0_i32 = arith.constant 0 : i32
    %c0_i32_0 = arith.constant 0 : i32
    %c0_i32_1 = arith.constant 0 : i32
    return %c0_i32, %c0_i32_0 : i32, i32
  }
  func.func @transform_12(%arg0: i32) -> (i32, i32) {
    %c0_i32 = arith.constant 0 : i32
    %c0_i32_0 = arith.constant 0 : i32
    %c0_i32_1 = arith.constant 0 : i32
    return %c0_i32, %c0_i32_0 : i32, i32
  }
  func.func @transform_13(%arg0: i32) -> (i32, i32) {
    %c0_i32 = arith.constant 0 : i32
    %c0_i32_0 = arith.constant 0 : i32
    %c0_i32_1 = arith.constant 0 : i32
    return %c0_i32, %c0_i32_0 : i32, i32
  }
  func.func @transform_14(%arg0: i32) -> (i32, i32) {
    %c0_i32 = arith.constant 0 : i32
    %c0_i32_0 = arith.constant 0 : i32
    %c0_i32_1 = arith.constant 0 : i32
    return %c0_i32, %c0_i32_0 : i32, i32
  }
  func.func @transform_15(%arg0: i32) -> (i32, i32) {
    %c0_i32 = arith.constant 0 : i32
    %c0_i32_0 = arith.constant 0 : i32
    %c0_i32_1 = arith.constant 0 : i32
    return %c0_i32, %c0_i32_0 : i32, i32
  }
  func.func @transform_16(%arg0: i32) -> (i32, i32, i32) {
    %c0_i32 = arith.constant 0 : i32
    %c0_i32_0 = arith.constant 0 : i32
    %c0_i32_1 = arith.constant 0 : i32
    return %arg0, %c0_i32, %c0_i32_0 : i32, i32, i32
  }
}

</mosaic_0001>

<bundles_post_ra>
// kernel: actor_forward.2
= control target key start
LH: loop header
LB: loop body
LE: loop exit
PB: predicated region body
PF: predicated region fallthrough
CT: control target
= control target key end

     0   :  { %v1975_v18 = vmov 0   ;;  %vm592_vm0 = vcmask 130048   ;;  %vm800_vm1 = vcmask 1043456   ;;  %vm801_vm2 = vcmask 130052   ;;  %s3014_s0 = inlined_call_operand.vmem [shape: bf16[2,256,400], index: 0, kind: input, shape index: {}]   ;;  %s3015_s1 = inlined_call_operand.vmem [shape: bf16[32,256], index: 1, kind: input, shape index: {}]   ;;  %s3016_s2 = inlined_call_operand.vmem [shape: f32[32,1], index: 2, kind: input, shape index: {}]   ;;  %s3017_s3 = inlined_call_operand.vmem [shape: f32[32,400], index: 3, kind: input, shape index: {}]   ;;  %s3018_s4 = inlined_call_operand.vmem [shape: f32[32,400], index: 4, kind: input, shape index: {}]   ;;  %s3019_s5 = inlined_call_operand.vmem [shape: bf16[2,32,400], index: 5, kind: output, shape index: {}]  }
   0x1   :  { %v1773_v0 = vld [vmem:[%s3014_s0 + $0x4] ss:$16 sps:$4 sm:$0xff]   ;;  %v1775_v1 = vld [vmem:[%s3014_s0 + $0xc] ss:$16 sps:$4 sm:$0xff]   ;;  %v1777_v2 = vld [vmem:[%s3014_s0] ss:$16 sps:$4 sm:$0xff]   ;;  %1771 = vset.pattern.permute.xlu0 %v1975_v18  ;;  %1772 = vset.pattern.permute.xlu1 %v1975_v18 }
   0x2   :  { %484 = vmatprep.subr.bf16.mxu0 %v1773_v0  ;;  %v1778_v3 = vld [vmem:[%s3014_s0 + $0x8] ss:$16 sps:$4 sm:$0xff]   ;;  %537 = vmatprep.subr.bf16.mxu1 %v1775_v1  ;;  %v1779_v4 = vld [vmem:[%s3014_s0 + $0x24] ss:$16 sps:$4 sm:$0xff]   ;;  %v1781_v5 = vld [vmem:[%s3014_s0 + $0x2c] ss:$16 sps:$4 sm:$0xff]  }
   0x3   :  { %485 = vmatpush1.bf16.msra.mxu0 %v1777_v2  ;;  %538 = vmatpush1.bf16.msra.mxu1 %v1778_v3  ;;  %v1783_v6 = vld [vmem:[%s3014_s0 + $0x20] ss:$16 sps:$4 sm:$0xff]   ;;  %v1784_v7 = vld [vmem:[%s3014_s0 + $0x28] ss:$16 sps:$4 sm:$0xff]   ;;  %v1785_v8 = vld [vmem:[%s3014_s0 + $0x44] ss:$16 sps:$4 sm:$0xff]  }
   0x4   :  { %486 = vmatprep.subr.bf16.mxu0 %v1779_v4  ;;  %539 = vmatprep.subr.bf16.mxu1 %v1781_v5  ;;  %v1787_v9 = vld [vmem:[%s3014_s0 + $0x4c] ss:$16 sps:$4 sm:$0xff]   ;;  %v1789_v10 = vld [vmem:[%s3014_s0 + $0x40] ss:$16 sps:$4 sm:$0xff]   ;;  %v1790_v11 = vld [vmem:[%s3014_s0 + $0x48] ss:$16 sps:$4 sm:$0xff]  }
   0x5   :  { %v1791_v12 = vld [vmem:[%s3014_s0 + $0x64] ss:$16 sps:$4 sm:$0xff]   ;;  %v1793_v13 = vld [vmem:[%s3014_s0 + $0x6c] ss:$16 sps:$4 sm:$0xff]   ;;  %v1795_v14 = vld [vmem:[%s3014_s0 + $0x60] ss:$16 sps:$4 sm:$0xff]  }
   0x6   :  { %v1796_v15 = vld [vmem:[%s3014_s0 + $0x68] ss:$16 sps:$4 sm:$0xff]   ;;  %v1797_v16 = vld [vmem:[%s3014_s0 + $0x84] ss:$16 sps:$4 sm:$0xff]   ;;  %v1799_v17 = vld [vmem:[%s3014_s0 + $0x8c] ss:$16 sps:$4 sm:$0xff]  }
   0x7   :  { %487 = vmatpush1.bf16.msra.mxu0 %v1783_v6  ;;  %540 = vmatpush1.bf16.msra.mxu1 %v1784_v7  ;;  %v1801_v19 = vld [vmem:[%s3014_s0 + $0x80] ss:$16 sps:$4 sm:$0xff]   ;;  %v1802_v20 = vld [vmem:[%s3014_s0 + $0x88] ss:$16 sps:$4 sm:$0xff]   ;;  %v1803_v21 = vld [vmem:[%s3014_s0 + $0xa4] ss:$16 sps:$4 sm:$0xff]  }
   0x8   :  { %488 = vmatprep.subr.bf16.mxu0 %v1785_v8  ;;  %541 = vmatprep.subr.bf16.mxu1 %v1787_v9  ;;  %v1805_v22 = vld [vmem:[%s3014_s0 + $0xac] ss:$16 sps:$4 sm:$0xff]   ;;  %v1807_v23 = vld [vmem:[%s3014_s0 + $0xa0] ss:$16 sps:$4 sm:$0xff]   ;;  %v1808_v24 = vld [vmem:[%s3014_s0 + $0xa8] ss:$16 sps:$4 sm:$0xff]  }
   0x9   :  { %v1809_v25 = vld [vmem:[%s3014_s0 + $0xc4] ss:$16 sps:$4 sm:$0xff]   ;;  %v1811_v26 = vld [vmem:[%s3014_s0 + $0xcc] ss:$16 sps:$4 sm:$0xff]   ;;  %v1813_v27 = vld [vmem:[%s3014_s0 + $0xc0] ss:$16 sps:$4 sm:$0xff]  }
   0xa   :  { %v1814_v28 = vld [vmem:[%s3014_s0 + $0xc8] ss:$16 sps:$4 sm:$0xff]   ;;  %v1815_v29 = vld [vmem:[%s3014_s0 + $0xe4] ss:$16 sps:$4 sm:$0xff]   ;;  %v1817_v30 = vld [vmem:[%s3014_s0 + $0xec] ss:$16 sps:$4 sm:$0xff]  }
   0xb   :  { %489 = vmatpush1.bf16.msra.mxu0 %v1789_v10  ;;  %542 = vmatpush1.bf16.msra.mxu1 %v1790_v11  ;;  %v1819_v31 = vld [vmem:[%s3014_s0 + $0xe0] ss:$16 sps:$4 sm:$0xff]   ;;  %v1820_v32 = vld [vmem:[%s3014_s0 + $0xe8] ss:$16 sps:$4 sm:$0xff]   ;;  %v1821_v33 = vld [vmem:[%s3014_s0 + $0x104] ss:$16 sps:$4 sm:$0xff]  }
   0xc   :  { %490 = vmatprep.subr.bf16.mxu0 %v1791_v12  ;;  %543 = vmatprep.subr.bf16.mxu1 %v1793_v13  ;;  %v1823_v34 = vld [vmem:[%s3014_s0 + $0x10c] ss:$16 sps:$4 sm:$0xff]   ;;  %v1825_v35 = vld [vmem:[%s3014_s0 + $0x100] ss:$16 sps:$4 sm:$0xff]   ;;  %v1826_v36 = vld [vmem:[%s3014_s0 + $0x108] ss:$16 sps:$4 sm:$0xff]  }
   0xd   :  { %v1827_v37 = vld [vmem:[%s3014_s0 + $0x124] ss:$16 sps:$4 sm:$0xff]   ;;  %v1829_v38 = vld [vmem:[%s3014_s0 + $0x12c] ss:$16 sps:$4 sm:$0xff]   ;;  %v1831_v39 = vld [vmem:[%s3014_s0 + $0x120] ss:$16 sps:$4 sm:$0xff]  }
   0xe   :  { %v1832_v40 = vld [vmem:[%s3014_s0 + $0x128] ss:$16 sps:$4 sm:$0xff]   ;;  %v1833_v41 = vld [vmem:[%s3014_s0 + $0x144] ss:$16 sps:$4 sm:$0xff]   ;;  %v1835_v42 = vld [vmem:[%s3014_s0 + $0x14c] ss:$16 sps:$4 sm:$0xff]  }
   0xf   :  { %491 = vmatpush1.bf16.msra.mxu0 %v1795_v14  ;;  %544 = vmatpush1.bf16.msra.mxu1 %v1796_v15  ;;  %v1837_v43 = vld [vmem:[%s3014_s0 + $0x140] ss:$16 sps:$4 sm:$0xff]   ;;  %v1838_v44 = vld [vmem:[%s3014_s0 + $0x148] ss:$16 sps:$4 sm:$0xff]   ;;  %v1839_v45 = vld [vmem:[%s3014_s0 + $0x164] ss:$16 sps:$4 sm:$0xff]  }
  0x10   :  { %492 = vmatprep.subr.bf16.mxu0 %v1797_v16  ;;  %545 = vmatprep.subr.bf16.mxu1 %v1799_v17  ;;  %v1841_v46 = vld [vmem:[%s3014_s0 + $0x16c] ss:$16 sps:$4 sm:$0xff]   ;;  %v1843_v47 = vld [vmem:[%s3014_s0 + $0x160] ss:$16 sps:$4 sm:$0xff]   ;;  %v1844_v48 = vld [vmem:[%s3014_s0 + $0x168] ss:$16 sps:$4 sm:$0xff]  }
  0x11   :  { %v2153_v49 = vld [vmem:[%s3015_s1 + $0x4] ss:$8 sps:$4 sm:$0xff]   ;;  %v1849_v52 = vld [vmem:[%s3014_s0 + $0x180] ss:$16 sps:$4 sm:$0xff]   ;;  %v1850_v53 = vld [vmem:[%s3014_s0 + $0x188] ss:$16 sps:$4 sm:$0xff]  }
  0x12   :  { %v1845_v50 = vld [vmem:[%s3014_s0 + $0x184] ss:$16 sps:$4 sm:$0xff]   ;;  %v1847_v51 = vld [vmem:[%s3014_s0 + $0x18c] ss:$16 sps:$4 sm:$0xff]   ;;  %516 = vmatprep.mubr.bf16.mxu0 %v2153_v49  ;;  %569 = vmatprep.mubr.bf16.mxu1 %v2153_v49  ;;  %v1855_v56 = vld [vmem:[%s3014_s0 + $0x1a0] ss:$16 sps:$4 sm:$0xff]  }
  0x13   :  { %493 = vmatpush1.bf16.msra.mxu0 %v1801_v19  ;;  %546 = vmatpush1.bf16.msra.mxu1 %v1802_v20  ;;  %v1851_v54 = vld [vmem:[%s3014_s0 + $0x1a4] ss:$16 sps:$4 sm:$0xff]   ;;  %v1853_v55 = vld [vmem:[%s3014_s0 + $0x1ac] ss:$16 sps:$4 sm:$0xff]   ;;  %v1856_v57 = vld [vmem:[%s3014_s0 + $0x1a8] ss:$16 sps:$4 sm:$0xff]  }
  0x14   :  { %494 = vmatprep.subr.bf16.mxu0 %v1803_v21  ;;  %547 = vmatprep.subr.bf16.mxu1 %v1805_v22  ;;  %v1857_v58 = vld [vmem:[%s3014_s0 + $0x1c4] ss:$16 sps:$4 sm:$0xff]   ;;  %v1859_v59 = vld [vmem:[%s3014_s0 + $0x1cc] ss:$16 sps:$4 sm:$0xff]   ;;  %v1861_v60 = vld [vmem:[%s3014_s0 + $0x1c0] ss:$16 sps:$4 sm:$0xff]  }
  0x15   :  { %v1862_v61 = vld [vmem:[%s3014_s0 + $0x1c8] ss:$16 sps:$4 sm:$0xff]   ;;  %v1863_v62 = vld [vmem:[%s3014_s0 + $0x1e4] ss:$16 sps:$4 sm:$0xff]   ;;  %v1865_v63 = vld [vmem:[%s3014_s0 + $0x1ec] ss:$16 sps:$4 sm:$0xff]  }
  0x16   :  { %v1867_v0 = vld [vmem:[%s3014_s0 + $0x1e0] ss:$16 sps:$4 sm:$0xff]   ;;  %v1868_v1 = vld [vmem:[%s3014_s0 + $0x1e8] ss:$16 sps:$4 sm:$0xff]   ;;  %v1874_v2 = vld [vmem:[%s3014_s0 + $0x204] ss:$16 sps:$4 sm:$0xff]  }
  0x17   :  { %495 = vmatpush1.bf16.msra.mxu0 %v1807_v23  ;;  %548 = vmatpush1.bf16.msra.mxu1 %v1808_v24  ;;  %v1877_v3 = vld [vmem:[%s3014_s0 + $0x20c] ss:$16 sps:$4 sm:$0xff]   ;;  %v2214_v4 = vld [vmem:[%s3015_s1] ss:$8 sps:$4 sm:$0xff]   ;;  %v1880_v7 = vld [vmem:[%s3014_s0 + $0x224] ss:$16 sps:$4 sm:$0xff]  }
  0x18   :  { %496 = vmatprep.subr.bf16.mxu0 %v1809_v25  ;;  %549 = vmatprep.subr.bf16.mxu1 %v1811_v26  ;;  %v1872_v5 = vld [vmem:[%s3014_s0 + $0x200] ss:$16 sps:$4 sm:$0xff]   ;;  %v1875_v6 = vld [vmem:[%s3014_s0 + $0x208] ss:$16 sps:$4 sm:$0xff]   ;;  %v1883_v8 = vld [vmem:[%s3014_s0 + $0x22c] ss:$16 sps:$4 sm:$0xff]  }
  0x19   :  { %v2231_v9 = vld [vmem:[%s3015_s1 + $0x14] ss:$8 sps:$4 sm:$0xff]   ;;  %v1878_v10 = vld [vmem:[%s3014_s0 + $0x220] ss:$16 sps:$4 sm:$0xff]   ;;  %v1881_v11 = vld [vmem:[%s3014_s0 + $0x228] ss:$16 sps:$4 sm:$0xff]  }
  0x1a   :  { %v1886_v12 = vld [vmem:[%s3014_s0 + $0x244] ss:$16 sps:$4 sm:$0xff]   ;;  %v1889_v13 = vld [vmem:[%s3014_s0 + $0x24c] ss:$16 sps:$4 sm:$0xff]   ;;  %v1884_v14 = vld [vmem:[%s3014_s0 + $0x240] ss:$16 sps:$4 sm:$0xff]  }
  0x1b   :  { %497 = vmatpush1.bf16.msra.mxu0 %v1813_v27  ;;  %550 = vmatpush1.bf16.msra.mxu1 %v1814_v28  ;;  %v1887_v15 = vld [vmem:[%s3014_s0 + $0x248] ss:$16 sps:$4 sm:$0xff]   ;;  %v1895_v17 = vld [vmem:[%s3014_s0 + $0x264] ss:$16 sps:$4 sm:$0xff]   ;;  %v1898_v18 = vld [vmem:[%s3014_s0 + $0x26c] ss:$16 sps:$4 sm:$0xff]  }
  0x1c   :  { %498 = vmatprep.subr.bf16.mxu0 %v1815_v29  ;;  %551 = vmatprep.subr.bf16.mxu1 %v1817_v30  ;;  %v2258_v16 = vld [vmem:[%s3015_s1 + $0x10] ss:$8 sps:$4 sm:$0xff]   ;;  %v1901_v21 = vld [vmem:[%s3014_s0 + $0x284] ss:$16 sps:$4 sm:$0xff]   ;;  %v1904_v22 = vld [vmem:[%s3014_s0 + $0x28c] ss:$16 sps:$4 sm:$0xff]  }
  0x1d   :  { %v1893_v19 = vld [vmem:[%s3014_s0 + $0x260] ss:$16 sps:$4 sm:$0xff]   ;;  %v1896_v20 = vld [vmem:[%s3014_s0 + $0x268] ss:$16 sps:$4 sm:$0xff]   ;;  %v1907_v25 = vld [vmem:[%s3014_s0 + $0x2a4] ss:$16 sps:$4 sm:$0xff]  }
  0x1e   :  { %v1899_v23 = vld [vmem:[%s3014_s0 + $0x280] ss:$16 sps:$4 sm:$0xff]   ;;  %v1902_v24 = vld [vmem:[%s3014_s0 + $0x288] ss:$16 sps:$4 sm:$0xff]   ;;  %v1910_v26 = vld [vmem:[%s3014_s0 + $0x2ac] ss:$16 sps:$4 sm:$0xff]  }
  0x1f   :  { %499 = vmatpush1.bf16.msra.mxu0 %v1819_v31  ;;  %552 = vmatpush1.bf16.msra.mxu1 %v1820_v32  ;;  %v1905_v27 = vld [vmem:[%s3014_s0 + $0x2a0] ss:$16 sps:$4 sm:$0xff]   ;;  %v1908_v28 = vld [vmem:[%s3014_s0 + $0x2a8] ss:$16 sps:$4 sm:$0xff]   ;;  %v1913_v29 = vld [vmem:[%s3014_s0 + $0x2c4] ss:$16 sps:$4 sm:$0xff]  }
  0x20   :  { %500 = vmatprep.subr.bf16.mxu0 %v1821_v33  ;;  %553 = vmatprep.subr.bf16.mxu1 %v1823_v34  ;;  %v1916_v30 = vld [vmem:[%s3014_s0 + $0x2cc] ss:$16 sps:$4 sm:$0xff]   ;;  %v1911_v31 = vld [vmem:[%s3014_s0 + $0x2c0] ss:$16 sps:$4 sm:$0xff]   ;;  %v1914_v32 = vld [vmem:[%s3014_s0 + $0x2c8] ss:$16 sps:$4 sm:$0xff]  }
  0x21   :  { %v56_v33 = vld [vmem:[%s3016_s2] sm:$0xff]  ;;  %v58_v34 = vld [vmem:[%s3016_s2 + $0x10] sm:$0xff]  ;;  %vm2859_vm3 = vmor %vm801_vm2, %vm800_vm1 }
  0x22   :  { %62 = vperm.xlu0 %1771, %v56_v33   ;;  %72 = vperm.xlu1 %1772, %v58_v34  }
  0x23   :  { %501 = vmatpush1.bf16.msra.mxu0 %v1825_v35  ;;  %554 = vmatpush1.bf16.msra.mxu1 %v1826_v36  ;;  %v1919_v35 = vld [vmem:[%s3014_s0 + $0x2e4] ss:$16 sps:$4 sm:$0xff]   ;;  %v1922_v36 = vld [vmem:[%s3014_s0 + $0x2ec] ss:$16 sps:$4 sm:$0xff]  }
  0x24   :  { %502 = vmatprep.subr.bf16.mxu0 %v1827_v37  ;;  %555 = vmatprep.subr.bf16.mxu1 %v1829_v38  ;;  %v57_v37 = vld [vmem:[%s3016_s2 + $0x8] sm:$0xff]  ;;  %v59_v38 = vld [vmem:[%s3016_s2 + $0x18] sm:$0xff] }
  0x26   :  { %67 = vperm.xlu0 %1771, %v57_v37   ;;  %77 = vperm.xlu1 %1772, %v59_v38  }
  0x27   :  { %503 = vmatpush1.bf16.msra.mxu0 %v1831_v39  ;;  %556 = vmatpush1.bf16.msra.mxu1 %v1832_v40  ;;  %v1917_v39 = vld [vmem:[%s3014_s0 + $0x2e0] ss:$16 sps:$4 sm:$0xff]   ;;  %v1920_v40 = vld [vmem:[%s3014_s0 + $0x2e8] ss:$16 sps:$4 sm:$0xff]  }
  0x28   :  { %504 = vmatprep.subr.bf16.mxu0 %v1833_v41  ;;  %557 = vmatprep.subr.bf16.mxu1 %v1835_v42  ;;  %v1925_v41 = vld [vmem:[%s3014_s0 + $0x304] ss:$16 sps:$4 sm:$0xff]   ;;  %v1928_v42 = vld [vmem:[%s3014_s0 + $0x30c] ss:$16 sps:$4 sm:$0xff]  }
  0x2b   :  { %505 = vmatpush1.bf16.msra.mxu0 %v1837_v43  ;;  %558 = vmatpush1.bf16.msra.mxu1 %v1838_v44  ;;  %v1923_v43 = vld [vmem:[%s3014_s0 + $0x300] ss:$16 sps:$4 sm:$0xff]   ;;  %v1926_v44 = vld [vmem:[%s3014_s0 + $0x308] ss:$16 sps:$4 sm:$0xff]  }
  0x2c   :  { %506 = vmatprep.subr.bf16.mxu0 %v1839_v45  ;;  %559 = vmatprep.subr.bf16.mxu1 %v1841_v46  ;;  %v1931_v45 = vld [vmem:[%s3014_s0 + $0x324] ss:$16 sps:$4 sm:$0xff]   ;;  %v1934_v46 = vld [vmem:[%s3014_s0 + $0x32c] ss:$16 sps:$4 sm:$0xff]  }
  0x2f   :  { %507 = vmatpush1.bf16.msra.mxu0 %v1843_v47  ;;  %560 = vmatpush1.bf16.msra.mxu1 %v1844_v48  ;;  %v1929_v47 = vld [vmem:[%s3014_s0 + $0x320] ss:$16 sps:$4 sm:$0xff]   ;;  %v1932_v48 = vld [vmem:[%s3014_s0 + $0x328] ss:$16 sps:$4 sm:$0xff]  }
  0x30   :  { %508 = vmatprep.subr.bf16.mxu0 %v1845_v50  ;;  %561 = vmatprep.subr.bf16.mxu1 %v1847_v51  ;;  %v1940_v50 = vld [vmem:[%s3014_s0 + $0x34c] ss:$16 sps:$4 sm:$0xff]   ;;  %v1935_v51 = vld [vmem:[%s3014_s0 + $0x340] ss:$16 sps:$4 sm:$0xff]  }
  0x33   :  { %509 = vmatpush1.bf16.msra.mxu0 %v1849_v52  ;;  %562 = vmatpush1.bf16.msra.mxu1 %v1850_v53  ;;  %v1938_v52 = vld [vmem:[%s3014_s0 + $0x348] ss:$16 sps:$4 sm:$0xff]   ;;  %v1943_v53 = vld [vmem:[%s3014_s0 + $0x364] ss:$16 sps:$4 sm:$0xff]  }
  0x34   :  { %510 = vmatprep.subr.bf16.mxu0 %v1851_v54  ;;  %563 = vmatprep.subr.bf16.mxu1 %v1853_v55  ;;  %v1946_v54 = vld [vmem:[%s3014_s0 + $0x36c] ss:$16 sps:$4 sm:$0xff]   ;;  %v1941_v55 = vld [vmem:[%s3014_s0 + $0x360] ss:$16 sps:$4 sm:$0xff]  }
  0x37   :  { %511 = vmatpush1.bf16.msra.mxu0 %v1855_v56  ;;  %564 = vmatpush1.bf16.msra.mxu1 %v1856_v57  ;;  %v1944_v56 = vld [vmem:[%s3014_s0 + $0x368] ss:$16 sps:$4 sm:$0xff]   ;;  %v1949_v57 = vld [vmem:[%s3014_s0 + $0x384] ss:$16 sps:$4 sm:$0xff]  }
  0x38   :  { %512 = vmatprep.subr.bf16.mxu0 %v1857_v58  ;;  %565 = vmatprep.subr.bf16.mxu1 %v1859_v59  ;;  %v1952_v58 = vld [vmem:[%s3014_s0 + $0x38c] ss:$16 sps:$4 sm:$0xff]   ;;  %v1947_v59 = vld [vmem:[%s3014_s0 + $0x380] ss:$16 sps:$4 sm:$0xff]  }
  0x3b   :  { %513 = vmatpush1.bf16.msra.mxu0 %v1861_v60  ;;  %566 = vmatpush1.bf16.msra.mxu1 %v1862_v61  ;;  %v1950_v60 = vld [vmem:[%s3014_s0 + $0x388] ss:$16 sps:$4 sm:$0xff]   ;;  %v1955_v61 = vld [vmem:[%s3014_s0 + $0x3a4] ss:$16 sps:$4 sm:$0xff]  }
  0x3c   :  { %514 = vmatprep.subr.bf16.mxu0 %v1863_v62  ;;  %567 = vmatprep.subr.bf16.mxu1 %v1865_v63  ;;  %v1958_v62 = vld [vmem:[%s3014_s0 + $0x3ac] ss:$16 sps:$4 sm:$0xff]   ;;  %v1953_v63 = vld [vmem:[%s3014_s0 + $0x3a0] ss:$16 sps:$4 sm:$0xff]  }
  0x3f   :  { %515 = vmatpush1.bf16.msra.mxu0 %v1867_v0  ;;  %568 = vmatpush1.bf16.msra.mxu1 %v1868_v1  ;;  %v1956_v0 = vld [vmem:[%s3014_s0 + $0x3a8] ss:$16 sps:$4 sm:$0xff]   ;;  %v1961_v1 = vld [vmem:[%s3014_s0 + $0x3c4] ss:$16 sps:$4 sm:$0xff]  }
  0x40   :  { %1195 = vmatprep.subr.bf16.mxu0 %v1874_v2  ;;  %1248 = vmatprep.subr.bf16.mxu1 %v1877_v3  ;;  %v1964_v2 = vld [vmem:[%s3014_s0 + $0x3cc] ss:$16 sps:$4 sm:$0xff]   ;;  %v1959_v3 = vld [vmem:[%s3014_s0 + $0x3c0] ss:$16 sps:$4 sm:$0xff]  }
  0x42   :  { %517 = vmatmul.mubr.bf16.vlgmr.msra.gmra.mrb[0].mxu0 %v2214_v4  ;;  %570 = vmatmul.mubr.bf16.vlgmr.msra.gmra.mrb[0].mxu1 %v2214_v4 }
  0x43   :  { %1196 = vmatpush1.bf16.msra.mxu0 %v1872_v5  ;;  %1249 = vmatpush1.bf16.msra.mxu1 %v1875_v6  ;;  %v1962_v5 = vld [vmem:[%s3014_s0 + $0x3c8] ss:$16 sps:$4 sm:$0xff]   ;;  %v1967_v6 = vld [vmem:[%s3014_s0 + $0x3e4] ss:$16 sps:$4 sm:$0xff]  }
  0x44   :  { %1197 = vmatprep.subr.bf16.mxu0 %v1880_v7  ;;  %1250 = vmatprep.subr.bf16.mxu1 %v1883_v8  ;;  %v1970_v7 = vld [vmem:[%s3014_s0 + $0x3ec] ss:$16 sps:$4 sm:$0xff]   ;;  %v1965_v8 = vld [vmem:[%s3014_s0 + $0x3e0] ss:$16 sps:$4 sm:$0xff]  }
  0x45   :  { %526 = vmatprep.mubr.bf16.mxu0 %v2231_v9  ;;  %579 = vmatprep.mubr.bf16.mxu1 %v2231_v9 }
  0x47   :  { %1198 = vmatpush1.bf16.msra.mxu0 %v1878_v10  ;;  %1251 = vmatpush1.bf16.msra.mxu1 %v1881_v11  ;;  %v1968_v10 = vld [vmem:[%s3014_s0 + $0x3e8] ss:$16 sps:$4 sm:$0xff]  }
  0x48   :  { %1199 = vmatprep.subr.bf16.mxu0 %v1886_v12  ;;  %1252 = vmatprep.subr.bf16.mxu1 %v1889_v13 }
  0x4a   :  { %527 = vmatmul.mubr.bf16.gmra.mrb[4].mxu0 %v2258_v16  ;;  %580 = vmatmul.mubr.bf16.gmra.mrb[4].mxu1 %v2258_v16 }
  0x4b   :  { %1200 = vmatpush1.bf16.msra.mxu0 %v1884_v14  ;;  %1253 = vmatpush1.bf16.msra.mxu1 %v1887_v15 }
  0x4c   :  { %1201 = vmatprep.subr.bf16.mxu0 %v1895_v17  ;;  %1254 = vmatprep.subr.bf16.mxu1 %v1898_v18 }
  0x4d   :  { %1227 = vmatprep.mubr.bf16.mxu0 %v2153_v49  ;;  %1280 = vmatprep.mubr.bf16.mxu1 %v2153_v49  ;;  %v1937_v49 = vld [vmem:[%s3014_s0 + $0x344] ss:$16 sps:$4 sm:$0xff]  }
  0x4f   :  { %1202 = vmatpush1.bf16.msra.mxu0 %v1893_v19  ;;  %1255 = vmatpush1.bf16.msra.mxu1 %v1896_v20 }
  0x50   :  { %1203 = vmatprep.subr.bf16.mxu0 %v1901_v21  ;;  %1256 = vmatprep.subr.bf16.mxu1 %v1904_v22 }
  0x53   :  { %1204 = vmatpush1.bf16.msra.mxu0 %v1899_v23  ;;  %1257 = vmatpush1.bf16.msra.mxu1 %v1902_v24 }
  0x54   :  { %1205 = vmatprep.subr.bf16.mxu0 %v1907_v25  ;;  %1258 = vmatprep.subr.bf16.mxu1 %v1910_v26 }
  0x57   :  { %1206 = vmatpush1.bf16.msra.mxu0 %v1905_v27  ;;  %1259 = vmatpush1.bf16.msra.mxu1 %v1908_v28 }
  0x58   :  { %1207 = vmatprep.subr.bf16.mxu0 %v1913_v29  ;;  %1260 = vmatprep.subr.bf16.mxu1 %v1916_v30 }
  0x5b   :  { %1208 = vmatpush1.bf16.msra.mxu0 %v1911_v31  ;;  %1261 = vmatpush1.bf16.msra.mxu1 %v1914_v32 }
  0x5c   :  { %1209 = vmatprep.subr.bf16.mxu0 %v1919_v35  ;;  %1262 = vmatprep.subr.bf16.mxu1 %v1922_v36 }
  0x5f   :  { %1210 = vmatpush1.bf16.msra.mxu0 %v1917_v39  ;;  %1263 = vmatpush1.bf16.msra.mxu1 %v1920_v40 }
  0x60   :  { %1211 = vmatprep.subr.bf16.mxu0 %v1925_v41  ;;  %1264 = vmatprep.subr.bf16.mxu1 %v1928_v42 }
  0x63   :  { %1212 = vmatpush1.bf16.msra.mxu0 %v1923_v43  ;;  %1265 = vmatpush1.bf16.msra.mxu1 %v1926_v44 }
  0x64   :  { %1213 = vmatprep.subr.bf16.mxu0 %v1931_v45  ;;  %1266 = vmatprep.subr.bf16.mxu1 %v1934_v46 }
  0x67   :  { %1214 = vmatpush1.bf16.msra.mxu0 %v1929_v47  ;;  %1267 = vmatpush1.bf16.msra.mxu1 %v1932_v48 }
  0x68   :  { %1215 = vmatprep.subr.bf16.mxu0 %v1937_v49  ;;  %1268 = vmatprep.subr.bf16.mxu1 %v1940_v50 }
  0x6b   :  { %1216 = vmatpush1.bf16.msra.mxu0 %v1935_v51  ;;  %1269 = vmatpush1.bf16.msra.mxu1 %v1938_v52 }
  0x6c   :  { %1217 = vmatprep.subr.bf16.mxu0 %v1943_v53  ;;  %1270 = vmatprep.subr.bf16.mxu1 %v1946_v54 }
  0x6f   :  { %1218 = vmatpush1.bf16.msra.mxu0 %v1941_v55  ;;  %1271 = vmatpush1.bf16.msra.mxu1 %v1944_v56 }
  0x70   :  { %1219 = vmatprep.subr.bf16.mxu0 %v1949_v57  ;;  %1272 = vmatprep.subr.bf16.mxu1 %v1952_v58 }
  0x73   :  { %1220 = vmatpush1.bf16.msra.mxu0 %v1947_v59  ;;  %1273 = vmatpush1.bf16.msra.mxu1 %v1950_v60 }
  0x74   :  { %1221 = vmatprep.subr.bf16.mxu0 %v1955_v61  ;;  %1274 = vmatprep.subr.bf16.mxu1 %v1958_v62 }
  0x77   :  { %1222 = vmatpush1.bf16.msra.mxu0 %v1953_v63  ;;  %1275 = vmatpush1.bf16.msra.mxu1 %v1956_v0 }
  0x78   :  { %1223 = vmatprep.subr.bf16.mxu0 %v1961_v1  ;;  %1276 = vmatprep.subr.bf16.mxu1 %v1964_v2 }
  0x7b   :  { %1224 = vmatpush1.bf16.msra.mxu0 %v1959_v3  ;;  %1277 = vmatpush1.bf16.msra.mxu1 %v1962_v5 }
  0x7c   :  { %1225 = vmatprep.subr.bf16.mxu0 %v1967_v6  ;;  %1278 = vmatprep.subr.bf16.mxu1 %v1970_v7 }
  0x7f   :  { %1226 = vmatpush1.bf16.msra.mxu0 %v1965_v8  ;;  %1279 = vmatpush1.bf16.msra.mxu1 %v1968_v10 }
  0x82   :  { %1228 = vmatmul.mubr.bf16.vlgmr.msra.gmra.mrb[8].mxu0 %v2214_v4  ;;  %1281 = vmatmul.mubr.bf16.vlgmr.msra.gmra.mrb[8].mxu1 %v2214_v4 }
  0x83   :  { %1237 = vmatprep.mubr.bf16.mxu0 %v2231_v9  ;;  %1290 = vmatprep.mubr.bf16.mxu1 %v2231_v9 }
  0x8a   :  { %1238 = vmatmul.mubr.bf16.gmra.mrb[12].mxu0 %v2258_v16  ;;  %1291 = vmatmul.mubr.bf16.gmra.mrb[12].mxu1 %v2258_v16 }
  0xa1   :  { %v2438_v11 = vpop.permute.xlu0 %62  ;;  %v73_v41 = vpop.permute.xlu1 %72 }
  0xa5   :  { %v2454_v23 = vpop.permute.xlu0 %67  ;;  %v78_v51 = vpop.permute.xlu1 %77 }
 0x115   :  { %v518_v12 = vpop.f32.mrb[0].mxu0  ;;  %v571_v13 = vpop.f32.mrb[0].mxu1 }
 0x116   :  { %v2441_v14 = vadd.f32 %v518_v12, %v2438_v11  ;;  %v520_v15 = vpop.f32.mrb[1].mxu0  ;;  %v573_v17 = vpop.f32.mrb[1].mxu1  ;;  %v2450_v16 = vadd.f32 %v571_v13, %v2438_v11 }
 0x117   :  { %v2444_v18 = vadd.f32 %v520_v15, %v2438_v11  ;;  %v522_v4 = vpop.f32.mrb[2].mxu0  ;;  %v575_v19 = vpop.f32.mrb[2].mxu1  ;;  %v2447_v9 = vadd.f32 %v573_v17, %v2438_v11 }
 0x118   :  { %v524_v20 = vpop.f32.mrb[3].mxu0  ;;  %v577_v21 = vpop.f32.mrb[3].mxu1  ;;  %v2460_v27 = vadd.f32 %v522_v4, %v2454_v23  ;;  %v2470_v39 = vadd.f32 %v575_v19, %v2454_v23 }
 0x119   :  { %v590_v22 = vadd.f32 %v2444_v18, %v2441_v14  ;;  %v593_v25 = vsel %vm592_vm0, %v2447_v9, 0.0  ;;  %v2464_v33 = vadd.f32 %v524_v20, %v2454_v23  ;;  %v2467_v36 = vadd.f32 %v577_v21, %v2454_v23 }
 0x11b   :  { %v591_v24 = vadd.f32 %v590_v22, %v2450_v16  ;;  %v598_v44 = vsel %vm592_vm0, %v2467_v36, 0.0 }
 0x11d   :  { %v594_v26 = vadd.f32 %v593_v25, %v591_v24  ;;  %v528_v28 = vpop.f32.mrb[4].mxu0  ;;  %v581_v29 = vpop.f32.mrb[4].mxu1 }
 0x11e   :  { %v530_v30 = vpop.f32.mrb[5].mxu0  ;;  %v583_v31 = vpop.f32.mrb[5].mxu1  ;;  %v2474_v43 = vadd.f32 %v528_v28, %v73_v41  ;;  %v2483_v49 = vadd.f32 %v581_v29, %v73_v41 }
 0x11f   :  { %v595_v32 = vadd.f32 %v594_v26, %v2460_v27  ;;  %v532_v34 = vpop.f32.mrb[6].mxu0  ;;  %v585_v35 = vpop.f32.mrb[6].mxu1  ;;  %v2479_v47 = vadd.f32 %v530_v30, %v73_v41  ;;  %v2481_v48 = vadd.f32 %v583_v31, %v73_v41 }
 0x120   :  { %v534_v37 = vpop.f32.mrb[7].mxu0  ;;  %v587_v38 = vpop.f32.mrb[7].mxu1  ;;  %v2489_v55 = vadd.f32 %v532_v34, %v78_v51  ;;  %v2497_v60 = vadd.f32 %v585_v35, %v78_v51 }
 0x121   :  { %v596_v40 = vadd.f32 %v595_v32, %v2464_v33  ;;  %v603_v53 = vsel %vm592_vm0, %v2481_v48, 0.0  ;;  %v2491_v56 = vadd.f32 %v534_v37, %v78_v51  ;;  %v2494_v58 = vadd.f32 %v587_v38, %v78_v51 }
 0x123   :  { %v597_v42 = vadd.f32 %v596_v40, %v2470_v39  ;;  %v608_v62 = vsel %vm592_vm0, %v2494_v58, 0.0 }
 0x125   :  { %v599_v45 = vadd.f32 %v598_v44, %v597_v42 }
 0x127   :  { %v600_v46 = vadd.f32 %v599_v45, %v2474_v43 }
 0x129   :  { %v601_v50 = vadd.f32 %v600_v46, %v2479_v47 }
 0x12b   :  { %v602_v52 = vadd.f32 %v601_v50, %v2483_v49 }
 0x12d   :  { %v604_v54 = vadd.f32 %v603_v53, %v602_v52 }
 0x12f   :  { %v605_v57 = vadd.f32 %v604_v54, %v2489_v55 }
 0x131   :  { %v606_v59 = vadd.f32 %v605_v57, %v2491_v56 }
 0x133   :  { %v607_v61 = vadd.f32 %v606_v59, %v2497_v60 }
 0x135   :  { %v609_v63 = vadd.f32 %v608_v62, %v607_v61 }
 0x137   :  { %610 = vadd.xlane.f32.xlu0 %v609_v63 }
 0x155   :  { %v1229_v0 = vpop.f32.mrb[8].mxu0  ;;  %v1282_v1 = vpop.f32.mrb[8].mxu1 }
 0x156   :  { %v2503_v2 = vadd.f32 %v1229_v0, %v2438_v11  ;;  %v1231_v3 = vpop.f32.mrb[9].mxu0  ;;  %v1284_v5 = vpop.f32.mrb[9].mxu1  ;;  %v2512_v15 = vadd.f32 %v1282_v1, %v2438_v11 }
 0x157   :  { %v2506_v6 = vadd.f32 %v1231_v3, %v2438_v11  ;;  %v1233_v7 = vpop.f32.mrb[10].mxu0  ;;  %v1286_v8 = vpop.f32.mrb[10].mxu1  ;;  %v2509_v10 = vadd.f32 %v1284_v5, %v2438_v11 }
 0x158   :  { %v1235_v12 = vpop.f32.mrb[11].mxu0  ;;  %v1288_v13 = vpop.f32.mrb[11].mxu1  ;;  %v2520_v21 = vadd.f32 %v1233_v7, %v2454_v23  ;;  %v2530_v35 = vadd.f32 %v1286_v8, %v2454_v23 }
 0x159   :  { %v1301_v17 = vadd.f32 %v2506_v6, %v2503_v2  ;;  %v1303_v19 = vsel %vm592_vm0, %v2509_v10, 0.0  ;;  %v2524_v11 = vadd.f32 %v1235_v12, %v2454_v23  ;;  %v2527_v31 = vadd.f32 %v1288_v13, %v2454_v23 }
 0x15b   :  { %v1302_v4 = vadd.f32 %v1301_v17, %v2512_v15  ;;  %v1308_v40 = vsel %vm592_vm0, %v2527_v31, 0.0 }
 0x15d   :  { %v1304_v20 = vadd.f32 %v1303_v19, %v1302_v4  ;;  %v1239_v22 = vpop.f32.mrb[12].mxu0  ;;  %v1292_v24 = vpop.f32.mrb[12].mxu1 }
 0x15e   :  { %v1241_v25 = vpop.f32.mrb[13].mxu0  ;;  %v1294_v26 = vpop.f32.mrb[13].mxu1  ;;  %v2536_v44 = vadd.f32 %v1239_v22, %v73_v41  ;;  %v2543_v52 = vadd.f32 %v1292_v24, %v73_v41 }
 0x15f   :  { %v1305_v28 = vadd.f32 %v1304_v20, %v2520_v21  ;;  %v1243_v29 = vpop.f32.mrb[14].mxu0  ;;  %v1296_v30 = vpop.f32.mrb[14].mxu1  ;;  %v2539_v46 = vadd.f32 %v1241_v25, %v73_v41  ;;  %v2541_v50 = vadd.f32 %v1294_v26, %v73_v41 }
 0x160   :  { %v1245_v32 = vpop.f32.mrb[15].mxu0  ;;  %v1298_v34 = vpop.f32.mrb[15].mxu1  ;;  %v2549_v59 = vadd.f32 %v1243_v29, %v78_v51  ;;  %v2556_v0 = vadd.f32 %v1296_v30, %v78_v51 }
 0x161   :  { %v1306_v37 = vadd.f32 %v1305_v28, %v2524_v11  ;;  %v1313_v54 = vsel %vm592_vm0, %v2541_v50, 0.0  ;;  %v2552_v62 = vadd.f32 %v1245_v32, %v78_v51  ;;  %v2554_v63 = vadd.f32 %v1298_v34, %v78_v51 }
 0x163   :  { %v1307_v38 = vadd.f32 %v1306_v37, %v2530_v35  ;;  %v1318_v3 = vsel %vm592_vm0, %v2554_v63, 0.0 }
 0x165   :  { %v1309_v42 = vadd.f32 %v1308_v40, %v1307_v38 }
 0x167   :  { %v1310_v45 = vadd.f32 %v1309_v42, %v2536_v44 }
 0x169   :  { %v1311_v23 = vadd.f32 %v1310_v45, %v2539_v46 }
 0x16b   :  { %v1312_v53 = vadd.f32 %v1311_v23, %v2543_v52 }
 0x16d   :  { %v1314_v57 = vadd.f32 %v1313_v54, %v1312_v53 }
 0x16f   :  { %v1315_v61 = vadd.f32 %v1314_v57, %v2549_v59 }
 0x171   :  { %v1316_v41 = vadd.f32 %v1315_v61, %v2552_v62 }
 0x173   :  { %v1317_v1 = vadd.f32 %v1316_v41, %v2556_v0 }
 0x175   :  { %v1319_v5 = vadd.f32 %v1318_v3, %v1317_v1 }
 0x177   :  { %1320 = vadd.xlane.f32.xlu0 %v1319_v5 }
 0x1c4   :  { %v611_v7 = vpop.xlane.xlu0 %610 }
 0x1c5   :  { %v612_v8 = vrot.slane %v611_v7, 4 }
 0x1c7   :  { %v613_v12 = vadd.f32 %v612_v8, %v611_v7 }
 0x1c9   :  { %v614_v13 = vrot.slane %v613_v12, 2 }
 0x1cb   :  { %v615_v17 = vadd.f32 %v614_v13, %v613_v12 }
 0x1cd   :  { %v616_v4 = vrot.slane %v615_v17, 1 }
 0x1cf   :  { %v617_v19 = vadd.f32 %v616_v4, %v615_v17 }
 0x1d1   :  { %1758 = vpush %v617_v19 }
 0x202   :  { %s1759_s0 = spop %1758 }
 0x203   :  { %s619_s8 = smul.f32 7.8125e-05, %s1759_s0 }
 0x205   :  { %v620_v51 = vstv %s619_s8 }
 0x206   :  { %v2563_v20 = vsub.f32 %v2441_v14, %v620_v51  ;;  %v2566_v22 = vsub.f32 %v2444_v18, %v620_v51  ;;  %v2569_v24 = vsub.f32 %v2447_v9, %v620_v51  ;;  %v2572_v25 = vsub.f32 %v2450_v16, %v620_v51 }
 0x207   :  { %v2581_v14 = vsub.f32 %v2460_v27, %v620_v51  ;;  %v2586_v30 = vsub.f32 %v2464_v33, %v620_v51  ;;  %v2589_v32 = vsub.f32 %v2467_v36, %v620_v51  ;;  %v2593_v37 = vsub.f32 %v2470_v39, %v620_v51 }
 0x208   :  { %v637_v26 = vmul.f32 %v2563_v20, %v2563_v20  ;;  %v638_v28 = vmul.f32 %v2566_v22, %v2566_v22  ;;  %v640_v29 = vmul.f32 %v2569_v24, %v2569_v24  ;;  %v639_v18 = vmul.f32 %v2572_v25, %v2572_v25 }
 0x209   :  { %v641_v27 = vmul.f32 %v2581_v14, %v2581_v14  ;;  %v642_v40 = vmul.f32 %v2586_v30, %v2586_v30  ;;  %v644_v33 = vmul.f32 %v2589_v32, %v2589_v32  ;;  %v2602_v45 = vsub.f32 %v2474_v43, %v620_v51 }
 0x20a   :  { %v653_v9 = vadd.f32 %v638_v28, %v637_v26  ;;  %v655_v34 = vsel %vm592_vm0, %v640_v29, 0.0  ;;  %v643_v36 = vmul.f32 %v2593_v37, %v2593_v37  ;;  %v2607_v39 = vsub.f32 %v2479_v47, %v620_v51 }
 0x20b   :  { %v2610_v54 = vsub.f32 %v2481_v48, %v620_v51  ;;  %v660_v57 = vsel %vm592_vm0, %v644_v33, 0.0  ;;  %v2614_v61 = vsub.f32 %v2483_v49, %v620_v51  ;;  %v645_v43 = vmul.f32 %v2602_v45, %v2602_v45 }
 0x20c   :  { %v654_v16 = vadd.f32 %v653_v9, %v639_v18  ;;  %v646_v1 = vmul.f32 %v2607_v39, %v2607_v39  ;;  %v2623_v5 = vsub.f32 %v2489_v55, %v620_v51  ;;  %v2628_v49 = vsub.f32 %v2491_v56, %v620_v51 }
 0x20d   :  { %v648_v47 = vmul.f32 %v2610_v54, %v2610_v54  ;;  %v647_v48 = vmul.f32 %v2614_v61, %v2614_v61  ;;  %v2631_v12 = vsub.f32 %v2494_v58, %v620_v51  ;;  %v2635_v17 = vsub.f32 %v2497_v60, %v620_v51 }
 0x20e   :  { %v656_v38 = vadd.f32 %v655_v34, %v654_v16  ;;  %v649_v55 = vmul.f32 %v2623_v5, %v2623_v5  ;;  %v650_v19 = vmul.f32 %v2628_v49, %v2628_v49 }
 0x20f   :  { %v665_v13 = vsel %vm592_vm0, %v648_v47, 0.0  ;;  %v652_v56 = vmul.f32 %v2631_v12, %v2631_v12  ;;  %v651_v58 = vmul.f32 %v2635_v17, %v2635_v17  ;;  %v2654_v47 = vld [vmem:[%s3017_s3 + $0x8] sm:$0xff] }
 0x210   :  { %v657_v42 = vadd.f32 %v656_v38, %v641_v27 }
 0x211   :  { %v670_v18 = vsel %vm592_vm0, %v652_v56, 0.0 }
 0x212   :  { %v658_v23 = vadd.f32 %v657_v42, %v642_v40  ;;  %v1321_v42 = vpop.xlane.xlu0 %1320 }
 0x213   :  { %v1322_v33 = vrot.slane %v1321_v42, 4 }
 0x214   :  { %v659_v53 = vadd.f32 %v658_v23, %v643_v36 }
 0x215   :  { %v1323_v36 = vadd.f32 %v1322_v33, %v1321_v42  ;;  %v2755_v42 = vld [vmem:[%s3018_s4 + $0x10] sm:$0xff] }
 0x216   :  { %v661_v41 = vadd.f32 %v660_v57, %v659_v53 }
 0x217   :  { %v1324_v23 = vrot.slane %v1323_v36, 2 }
 0x218   :  { %v662_v3 = vadd.f32 %v661_v41, %v645_v43 }
 0x219   :  { %v1325_v57 = vadd.f32 %v1324_v23, %v1323_v36  ;;  %v2769_v36 = vld [vmem:[%s3018_s4 + $0x20] sm:$0xff]  ;;  %v2774_v23 = vld [vmem:[%s3018_s4 + $0x28] sm:$0xff] }
 0x21a   :  { %v663_v7 = vadd.f32 %v662_v3, %v646_v1  ;;  %v2649_v3 = vld [vmem:[%s3017_s3] sm:$0xff] }
 0x21b   :  { %v1326_v43 = vrot.slane %v1325_v57, 1 }
 0x21c   :  { %v664_v8 = vadd.f32 %v663_v7, %v647_v48  ;;  %v2659_v48 = vld [vmem:[%s3017_s3 + $0x10] sm:$0xff]  ;;  %v2664_v7 = vld [vmem:[%s3017_s3 + $0x18] sm:$0xff] }
 0x21d   :  { %v1327_v1 = vadd.f32 %v1326_v43, %v1325_v57 }
 0x21e   :  { %v666_v4 = vadd.f32 %v665_v13, %v664_v8  ;;  %v2669_v13 = vld [vmem:[%s3017_s3 + $0x20] sm:$0xff] }
 0x220   :  { %v667_v26 = vadd.f32 %v666_v4, %v649_v55  ;;  %v2674_v55 = vld [vmem:[%s3017_s3 + $0x28] sm:$0xff]  ;;  %v2679_v4 = vld [vmem:[%s3017_s3 + $0x30] sm:$0xff] }
 0x221   :  { %3036 = vst [vmem:[#allocation2_spill] sm:$0xff] %v2679_v4 }
 0x222   :  { %v668_v28 = vadd.f32 %v667_v26, %v650_v19  ;;  %v2684_v19 = vld [vmem:[%s3017_s3 + $0x38] sm:$0xff] }
 0x223   :  { %3037 = vst [vmem:[#allocation3_spill] sm:$0xff] %v2684_v19 }
 0x224   :  { %v669_v29 = vadd.f32 %v668_v28, %v651_v58 }
 0x226   :  { %v671_v60 = vadd.f32 %v670_v18, %v669_v29  ;;  %v2693_v29 = vld [vmem:[%s3017_s3 + $0x40] sm:$0xff]  ;;  %v2698_v18 = vld [vmem:[%s3017_s3 + $0x48] sm:$0xff] }
 0x227   :  { %3038 = vst [vmem:[#allocation4_spill] sm:$0xff] %v2693_v29  ;;  %3039 = vst [vmem:[#allocation5_spill] sm:$0xff] %v2698_v18 }
 0x228   :  { %672 = vadd.xlane.f32.xlu1 %v671_v60 }
 0x2b5   :  { %v673_v51 = vpop.xlane.xlu1 %672 }
 0x2b6   :  { %v674_v9 = vrot.slane %v673_v51, 4 }
 0x2b8   :  { %v675_v16 = vadd.f32 %v674_v9, %v673_v51  ;;  %v2712_v51 = vld [vmem:[%s3017_s3 + $0x58] sm:$0xff]  ;;  %v2717_v9 = vld [vmem:[%s3017_s3 + $0x60] sm:$0xff] }
 0x2b9   :  { %3041 = vst [vmem:[#allocation7_spill] sm:$0xff] %v2712_v51  ;;  %3042 = vst [vmem:[#allocation8_spill] sm:$0xff] %v2717_v9 }
 0x2ba   :  { %v676_v34 = vrot.slane %v675_v16, 2 }
 0x2bc   :  { %v677_v27 = vadd.f32 %v676_v34, %v675_v16  ;;  %v2731_v34 = vld [vmem:[%s3017_s3 + $0x70] sm:$0xff] }
 0x2bd   :  { %3044 = vst [vmem:[#allocation10_spill] sm:$0xff] %v2731_v34 }
 0x2be   :  { %v678_v38 = vrot.slane %v677_v27, 1 }
 0x2c0   :  { %v679_v40 = vadd.f32 %v678_v38, %v677_v27  ;;  %v2736_v27 = vld [vmem:[%s3017_s3 + $0x78] sm:$0xff] }
 0x2c1   :  { %3045 = vst [vmem:[#allocation11_spill] sm:$0xff] %v2736_v27 }
 0x2c2   :  { %1760 = vpush %v679_v40  ;;  %v2750_v40 = vld [vmem:[%s3018_s4 + $0x8] sm:$0xff] }
 0x2f3   :  { %s1761_s1 = spop %1760 }
 0x2f4   :  { %s681_s9 = smul.f32 7.8125e-05, %s1761_s1 }
 0x2f6   :  { %s682_s10 = sadd.f32 1e-05, %s681_s9 }
 0x2f8   :  { %v683_v53 = vstv %s682_s10 }
 0x2f9   :  { %1971 = vrsqrt.f32 %v683_v53  ;;  %v2779_v53 = vld [vmem:[%s3018_s4 + $0x30] sm:$0xff] }
 0x303   :  { %v1972_v41 = vpop.eup %1971 }
 0x304   :  { %1762 = vpush %v1972_v41 }
 0x305   :  { %1764 = vpush %v1327_v1 }
 0x335   :  { %s1763_s11 = spop %1762 }
 0x336   :  { %v686_v8 = vstv %s1763_s11 }
 0x337   :  { %v687_v26 = vmul.f32 %v686_v8, %v2563_v20  ;;  %v688_v56 = vmul.f32 %v686_v8, %v2566_v22  ;;  %v689_v58 = vmul.f32 %v686_v8, %v2572_v25  ;;  %v690_v28 = vmul.f32 %v686_v8, %v2569_v24  ;;  %v2703_v20 = vld [vmem:[%s3017_s3 + $0x50] sm:$0xff] }
 0x338   :  { %3040 = vst [vmem:[#allocation6_spill] sm:$0xff] %v2703_v20  ;;  %v691_v22 = vmul.f32 %v686_v8, %v2581_v14  ;;  %v692_v25 = vmul.f32 %v686_v8, %v2586_v30  ;;  %v693_v24 = vmul.f32 %v686_v8, %v2593_v37  ;;  %v694_v60 = vmul.f32 %v686_v8, %v2589_v32  ;;  %v2722_v14 = vld [vmem:[%s3017_s3 + $0x68] sm:$0xff] }
 0x339   :  { %3043 = vst [vmem:[#allocation9_spill] sm:$0xff] %v2722_v14  ;;  %v695_v30 = vmul.f32 %v686_v8, %v2602_v45  ;;  %v696_v37 = vmul.f32 %v686_v8, %v2607_v39  ;;  %v697_v32 = vmul.f32 %v686_v8, %v2614_v61  ;;  %v698_v16 = vmul.f32 %v686_v8, %v2610_v54  ;;  %v2741_v45 = vld [vmem:[%s3018_s4] sm:$0xff] }
 0x33a   :  { %v699_v39 = vmul.f32 %v686_v8, %v2623_v5  ;;  %v700_v61 = vmul.f32 %v686_v8, %v2628_v49  ;;  %v701_v54 = vmul.f32 %v686_v8, %v2635_v17  ;;  %v702_v38 = vmul.f32 %v686_v8, %v2631_v12  ;;  %v2760_v5 = vld [vmem:[%s3018_s4 + $0x18] sm:$0xff] }
 0x33b   :  { %v703_v49 = vmul.f32 %v687_v26, %v2649_v3  ;;  %v704_v17 = vmul.f32 %v688_v56, %v2654_v47  ;;  %v705_v12 = vmul.f32 %v689_v58, %v2659_v48  ;;  %v706_v33 = vmul.f32 %v690_v28, %v2664_v7  ;;  %v2788_v8 = vld [vmem:[%s3018_s4 + $0x38] sm:$0xff]  ;;  %v2793_v26 = vld [vmem:[%s3018_s4 + $0x40] sm:$0xff]  ;;  %v2798_v56 = vld [vmem:[%s3018_s4 + $0x48] sm:$0xff] }
 0x33c   :  { %v707_v57 = vmul.f32 %v691_v22, %v2669_v13  ;;  %v708_v43 = vmul.f32 %v692_v25, %v2674_v55  ;;  %v709_v41 = vmul.f32 %v693_v24, %v2679_v4  ;;  %v710_v1 = vmul.f32 %v694_v60, %v2684_v19  ;;  %3046 = vst [vmem:[#allocation12_spill] sm:$0xff] %v2793_v26  ;;  %v2807_v24 = vld [vmem:[%s3018_s4 + $0x50] sm:$0xff]  ;;  %v2812_v60 = vld [vmem:[%s3018_s4 + $0x58] sm:$0xff] }
 0x33d   :  { %3047 = vst [vmem:[#allocation13_spill] sm:$0xff] %v2798_v56  ;;  %v711_v58 = vmul.f32 %v695_v30, %v2693_v29  ;;  %v712_v28 = vmul.f32 %v696_v37, %v2698_v18  ;;  %v713_v22 = vmul.f32 %v697_v32, %v2703_v20  ;;  %v714_v25 = vmul.f32 %v698_v16, %v2712_v51  ;;  %v2817_v30 = vld [vmem:[%s3018_s4 + $0x60] sm:$0xff]  ;;  %v2826_v20 = vld [vmem:[%s3018_s4 + $0x68] sm:$0xff]  ;;  %v2831_v18 = vld [vmem:[%s3018_s4 + $0x70] sm:$0xff] }
 0x33e   :  { %3048 = vst [vmem:[#allocation14_spill] sm:$0xff] %v2807_v24  ;;  %3049 = vst [vmem:[#allocation15_spill] sm:$0xff] %v2812_v60  ;;  %v715_v37 = vmul.f32 %v699_v39, %v2717_v9  ;;  %v716_v32 = vmul.f32 %v700_v61, %v2722_v14  ;;  %v717_v16 = vmul.f32 %v701_v54, %v2731_v34  ;;  %v2836_v39 = vld [vmem:[%s3018_s4 + $0x78] sm:$0xff]  ;;  %s2854_s4 = spop %1764 }
 0x33f   :  { %3050 = vst [vmem:[#allocation16_spill] sm:$0xff] %v2817_v30  ;;  %v718_v51 = vmul.f32 %v702_v38, %v2736_v27  ;;  %3051 = vst [vmem:[#allocation17_spill] sm:$0xff] %v2831_v18  ;;  %v719_v61 = vadd.f32 %v703_v49, %v2741_v45  ;;  %v720_v54 = vadd.f32 %v704_v17, %v2750_v40  ;;  %s1329_s19 = smul.f32 7.8125e-05, %s2854_s4 }
 0x340   :  { %v721_v38 = vadd.f32 %v705_v12, %v2755_v42  ;;  %v722_v27 = vadd.f32 %v706_v33, %v2760_v5  ;;  %v723_v34 = vadd.f32 %v707_v57, %v2769_v36  ;;  %v724_v14 = vadd.f32 %v708_v43, %v2774_v23 }
 0x341   :  { %v725_v9 = vadd.f32 %v709_v41, %v2779_v53  ;;  %v726_v29 = vadd.f32 %v710_v1, %v2788_v8  ;;  %v727_v19 = vadd.f32 %v711_v58, %v2793_v26  ;;  %v728_v4 = vadd.f32 %v712_v28, %v2798_v56 }
 0x342   :  { %v729_v49 = vadd.f32 %v713_v22, %v2807_v24  ;;  %v730_v17 = vadd.f32 %v714_v25, %v2812_v60  ;;  %v731_v12 = vadd.f32 %v715_v37, %v2817_v30  ;;  %v732_v33 = vadd.f32 %v716_v32, %v2826_v20 }
 0x343   :  { %v733_v57 = vadd.f32 %v717_v16, %v2831_v18  ;;  %v734_v43 = vadd.f32 %v718_v51, %v2836_v39  ;;  %v735_v41 = vmax.f32 %v719_v61, 0.0  ;;  %v736_v1 = vmax.f32 %v720_v54, 0.0 }
 0x344   :  { %v737_v58 = vmax.f32 %v721_v38, 0.0  ;;  %v738_v26 = vmax.f32 %v722_v27, 0.0  ;;  %v739_v28 = vmax.f32 %v723_v34, 0.0  ;;  %v740_v56 = vmax.f32 %v724_v14, 0.0 }
 0x345   :  { %v741_v22 = vmax.f32 %v725_v9, 0.0  ;;  %v742_v24 = vmax.f32 %v726_v29, 0.0  ;;  %v743_v25 = vmax.f32 %v727_v19, 0.0  ;;  %v744_v60 = vmax.f32 %v728_v4, 0.0 }
 0x346   :  { %v745_v37 = vmax.f32 %v729_v49, 0.0  ;;  %v746_v30 = vmax.f32 %v730_v17, 0.0  ;;  %v747_v32 = vmax.f32 %v731_v12, 0.0  ;;  %v748_v16 = vmax.f32 %v732_v33, 0.0 }
 0x347   :  { %v749_v18 = vmax.f32 %v733_v57, 0.0  ;;  %v750_v51 = vmax.f32 %v734_v43, 0.0  ;;  %v1742_v27 = vpack.c.bf16 %v736_v1, %v735_v41  ;;  %v1743_v34 = vpack.c.bf16 %v738_v26, %v737_v58 }
 0x348   :  { %v1744_v14 = vpack.c.bf16 %v740_v56, %v739_v28  ;;  %v1745_v9 = vpack.c.bf16 %v742_v24, %v741_v22  ;;  %v1746_v29 = vpack.c.bf16 %v744_v60, %v743_v25  ;;  %v1747_v19 = vpack.c.bf16 %v746_v30, %v745_v37 }
 0x349   :  { %v1748_v4 = vpack.c.bf16 %v748_v16, %v747_v32  ;;  %v1749_v54 = vpack.c.bf16 %v750_v51, %v749_v18  ;;  %799 = vst [vmem:[%s3019_s5] sm:$0xff] %v1742_v27  ;;  %803 = vst.msk [vmem:[%s3019_s5 + $0x8] sm:$0xff] %vm2859_vm3, %v1743_v34  ;;  %v1330_v18 = vstv %s1329_s19 }
 0x34a   :  { %804 = vst [vmem:[%s3019_s5 + $0x10] sm:$0xff] %v1744_v14  ;;  %805 = vst.msk [vmem:[%s3019_s5 + $0x18] sm:$0xff] %vm2859_vm3, %v1745_v9  ;;  %v2896_v26 = vsub.f32 %v2503_v2, %v1330_v18  ;;  %v2899_v56 = vsub.f32 %v2506_v6, %v1330_v18  ;;  %v2902_v24 = vsub.f32 %v2509_v10, %v1330_v18 }
 0x34b   :  { %806 = vst [vmem:[%s3019_s5 + $0x20] sm:$0xff] %v1746_v29  ;;  %807 = vst.msk [vmem:[%s3019_s5 + $0x28] sm:$0xff] %vm2859_vm3, %v1747_v19  ;;  %v2905_v60 = vsub.f32 %v2512_v15, %v1330_v18  ;;  %v2914_v2 = vsub.f32 %v2520_v21, %v1330_v18  ;;  %v2919_v17 = vsub.f32 %v2524_v11, %v1330_v18 }
 0x34c   :  { %808 = vst [vmem:[%s3019_s5 + $0x30] sm:$0xff] %v1748_v4  ;;  %809 = vst.msk [vmem:[%s3019_s5 + $0x38] sm:$0xff] %vm2859_vm3, %v1749_v54  ;;  %v1347_v30 = vmul.f32 %v2896_v26, %v2896_v26  ;;  %v1348_v38 = vmul.f32 %v2899_v56, %v2899_v56  ;;  %v1350_v49 = vmul.f32 %v2902_v24, %v2902_v24 }
 0x34d   :  { %v1349_v6 = vmul.f32 %v2905_v60, %v2905_v60  ;;  %v2922_v12 = vsub.f32 %v2527_v31, %v1330_v18  ;;  %v1337_v57 = vsub.f32 %v2530_v35, %v1330_v18  ;;  %v1351_v43 = vmul.f32 %v2914_v2, %v2914_v2 }
 0x34e   :  { %v1363_v10 = vadd.f32 %v1348_v38, %v1347_v30  ;;  %v1365_v33 = vsel %vm592_vm0, %v1350_v49, 0.0  ;;  %v1352_v41 = vmul.f32 %v2919_v17, %v2919_v17  ;;  %v1339_v58 = vsub.f32 %v2536_v44, %v1330_v18 }
 0x34f   :  { %v1354_v11 = vmul.f32 %v2922_v12, %v2922_v12  ;;  %v1353_v28 = vmul.f32 %v1337_v57, %v1337_v57  ;;  %v1340_v22 = vsub.f32 %v2539_v46, %v1330_v18  ;;  %v1342_v35 = vsub.f32 %v2541_v50, %v1330_v18 }
 0x350   :  { %v1364_v15 = vadd.f32 %v1363_v10, %v1349_v6  ;;  %v1341_v32 = vsub.f32 %v2543_v52, %v1330_v18  ;;  %v1355_v16 = vmul.f32 %v1339_v58, %v1339_v58  ;;  %v1343_v9 = vsub.f32 %v2549_v59, %v1330_v18 }
 0x351   :  { %v1370_v37 = vsel %vm592_vm0, %v1354_v11, 0.0  ;;  %v1356_v27 = vmul.f32 %v1340_v22, %v1340_v22  ;;  %v1358_v14 = vmul.f32 %v1342_v35, %v1342_v35  ;;  %v1344_v19 = vsub.f32 %v2552_v62, %v1330_v18 }
 0x352   :  { %v1366_v21 = vadd.f32 %v1365_v33, %v1364_v15  ;;  %v1357_v29 = vmul.f32 %v1341_v32, %v1341_v32  ;;  %v1346_v46 = vsub.f32 %v2554_v63, %v1330_v18  ;;  %v1345_v54 = vsub.f32 %v2556_v0, %v1330_v18 }
 0x353   :  { %v1375_v50 = vsel %vm592_vm0, %v1358_v14, 0.0  ;;  %v1359_v30 = vmul.f32 %v1343_v9, %v1343_v9  ;;  %v1360_v38 = vmul.f32 %v1344_v19, %v1344_v19 }
 0x354   :  { %v1367_v1 = vadd.f32 %v1366_v21, %v1351_v43  ;;  %v1362_v6 = vmul.f32 %v1346_v46, %v1346_v46  ;;  %v1361_v10 = vmul.f32 %v1345_v54, %v1345_v54 }
 0x356   :  { %v1368_v31 = vadd.f32 %v1367_v1, %v1352_v41  ;;  %v1380_v59 = vsel %vm592_vm0, %v1362_v6, 0.0  ;;  %v3059_v6 = vld [vmem:[#allocation7_spill] sm:$0xff] }
 0x358   :  { %v1369_v25 = vadd.f32 %v1368_v31, %v1353_v28 }
 0x35a   :  { %v1371_v51 = vadd.f32 %v1370_v37, %v1369_v25 }
 0x35c   :  { %v1372_v34 = vadd.f32 %v1371_v51, %v1355_v16 }
 0x35e   :  { %v1373_v44 = vadd.f32 %v1372_v34, %v1356_v27 }
 0x360   :  { %v1374_v4 = vadd.f32 %v1373_v44, %v1357_v29 }
 0x362   :  { %v1376_v52 = vadd.f32 %v1375_v50, %v1374_v4 }
 0x364   :  { %v1377_v49 = vadd.f32 %v1376_v52, %v1359_v30 }
 0x366   :  { %v1378_v15 = vadd.f32 %v1377_v49, %v1360_v38 }
 0x368   :  { %v1379_v33 = vadd.f32 %v1378_v15, %v1361_v10  ;;  %v3060_v10 = vld [vmem:[#allocation8_spill] sm:$0xff]  ;;  %v3061_v15 = vld [vmem:[#allocation9_spill] sm:$0xff] }
 0x36a   :  { %v1381_v43 = vadd.f32 %v1380_v59, %v1379_v33  ;;  %v3062_v33 = vld [vmem:[#allocation10_spill] sm:$0xff]  ;;  %v3063_v59 = vld [vmem:[#allocation11_spill] sm:$0xff] }
 0x36c   :  { %1382 = vadd.xlane.f32.xlu0 %v1381_v43 }
 0x3f9   :  { %v1383_v62 = vpop.xlane.xlu0 %1382 }
 0x3fa   :  { %v1384_v21 = vrot.slane %v1383_v62, 4 }
 0x3fc   :  { %v1385_v41 = vadd.f32 %v1384_v21, %v1383_v62 }
 0x3fe   :  { %v1386_v63 = vrot.slane %v1385_v41, 2 }
 0x400   :  { %v1387_v1 = vadd.f32 %v1386_v63, %v1385_v41 }
 0x402   :  { %v1388_v11 = vrot.slane %v1387_v1, 1 }
 0x404   :  { %v1389_v28 = vadd.f32 %v1388_v11, %v1387_v1 }
 0x406   :  { %1766 = vpush %v1389_v28 }
 0x437   :  { %s1767_s8 = spop %1766 }
 0x438   :  { %s1391_s1 = smul.f32 7.8125e-05, %s1767_s8 }
 0x43a   :  { %s1392_s9 = sadd.f32 1e-05, %s1391_s1 }
 0x43c   :  { %v1393_v0 = vstv %s1392_s9 }
 0x43d   :  { %1973 = vrsqrt.f32 %v1393_v0  ;;  %v3064_v0 = vld [vmem:[#allocation12_spill] sm:$0xff] }
 0x447   :  { %v1974_v18 = vpop.eup %1973 }
 0x448   :  { %1768 = vpush %v1974_v18 }
 0x479   :  { %s1769_s10 = spop %1768 }
 0x47a   :  { %v1396_v31 = vstv %s1769_s10 }
 0x47b   :  { %v1397_v25 = vmul.f32 %v1396_v31, %v2896_v26  ;;  %v1398_v37 = vmul.f32 %v1396_v31, %v2899_v56  ;;  %v1399_v16 = vmul.f32 %v1396_v31, %v2905_v60  ;;  %v1400_v51 = vmul.f32 %v1396_v31, %v2902_v24 }
 0x47c   :  { %v1401_v27 = vmul.f32 %v1396_v31, %v2914_v2  ;;  %v1402_v34 = vmul.f32 %v1396_v31, %v2919_v17  ;;  %v1403_v14 = vmul.f32 %v1396_v31, %v1337_v57  ;;  %v1404_v29 = vmul.f32 %v1396_v31, %v2922_v12  ;;  %v3054_v57 = vld [vmem:[#allocation2_spill] sm:$0xff] }
 0x47d   :  { %v1405_v44 = vmul.f32 %v1396_v31, %v1339_v58  ;;  %v1406_v4 = vmul.f32 %v1396_v31, %v1340_v22  ;;  %v1407_v50 = vmul.f32 %v1396_v31, %v1341_v32  ;;  %v1408_v30 = vmul.f32 %v1396_v31, %v1342_v35  ;;  %v3055_v22 = vld [vmem:[#allocation3_spill] sm:$0xff]  ;;  %v3056_v32 = vld [vmem:[#allocation4_spill] sm:$0xff] }
 0x47e   :  { %v1409_v52 = vmul.f32 %v1396_v31, %v1343_v9  ;;  %v1410_v38 = vmul.f32 %v1396_v31, %v1344_v19  ;;  %v1411_v26 = vmul.f32 %v1396_v31, %v1345_v54  ;;  %v1412_v49 = vmul.f32 %v1396_v31, %v1346_v46  ;;  %v3057_v19 = vld [vmem:[#allocation5_spill] sm:$0xff]  ;;  %v3058_v54 = vld [vmem:[#allocation6_spill] sm:$0xff] }
 0x47f   :  { %v1413_v56 = vmul.f32 %v1397_v25, %v2649_v3  ;;  %v1414_v60 = vmul.f32 %v1398_v37, %v2654_v47  ;;  %v1415_v24 = vmul.f32 %v1399_v16, %v2659_v48  ;;  %v1416_v2 = vmul.f32 %v1400_v51, %v2664_v7  ;;  %v3065_v31 = vld [vmem:[#allocation13_spill] sm:$0xff]  ;;  %v3066_v37 = vld [vmem:[#allocation14_spill] sm:$0xff]  ;;  %v3067_v16 = vld [vmem:[#allocation15_spill] sm:$0xff] }
 0x480   :  { %v1417_v17 = vmul.f32 %v1401_v27, %v2669_v13  ;;  %v1418_v12 = vmul.f32 %v1402_v34, %v2674_v55  ;;  %v1419_v58 = vmul.f32 %v1403_v14, %v3054_v57  ;;  %v1420_v35 = vmul.f32 %v1404_v29, %v3055_v22  ;;  %v3068_v51 = vld [vmem:[#allocation16_spill] sm:$0xff]  ;;  %v3069_v27 = vld [vmem:[#allocation17_spill] sm:$0xff] }
 0x481   :  { %v1421_v9 = vmul.f32 %v1405_v44, %v3056_v32  ;;  %v1422_v46 = vmul.f32 %v1406_v4, %v3057_v19  ;;  %v1423_v3 = vmul.f32 %v1407_v50, %v3058_v54  ;;  %v1424_v47 = vmul.f32 %v1408_v30, %v3059_v6 }
 0x482   :  { %v1425_v48 = vmul.f32 %v1409_v52, %v3060_v10  ;;  %v1426_v7 = vmul.f32 %v1410_v38, %v3061_v15  ;;  %v1427_v13 = vmul.f32 %v1411_v26, %v3062_v33  ;;  %v1428_v55 = vmul.f32 %v1412_v49, %v3063_v59 }
 0x483   :  { %v1429_v43 = vadd.f32 %v1413_v56, %v2741_v45  ;;  %v1430_v62 = vadd.f32 %v1414_v60, %v2750_v40  ;;  %v1431_v21 = vadd.f32 %v1415_v24, %v2755_v42  ;;  %v1432_v41 = vadd.f32 %v1416_v2, %v2760_v5 }
 0x484   :  { %v1433_v63 = vadd.f32 %v1417_v17, %v2769_v36  ;;  %v1434_v1 = vadd.f32 %v1418_v12, %v2774_v23  ;;  %v1435_v11 = vadd.f32 %v1419_v58, %v2779_v53  ;;  %v1436_v28 = vadd.f32 %v1420_v35, %v2788_v8 }
 0x485   :  { %v1437_v18 = vadd.f32 %v1421_v9, %v3064_v0  ;;  %v1438_v25 = vadd.f32 %v1422_v46, %v3065_v31  ;;  %v1439_v45 = vadd.f32 %v1423_v3, %v3066_v37  ;;  %v1440_v40 = vadd.f32 %v1424_v47, %v3067_v16 }
 0x486   :  { %v1441_v42 = vadd.f32 %v1425_v48, %v3068_v51  ;;  %v1442_v5 = vadd.f32 %v1426_v7, %v2826_v20  ;;  %v1443_v36 = vadd.f32 %v1427_v13, %v3069_v27  ;;  %v1444_v23 = vadd.f32 %v1428_v55, %v2836_v39 }
 0x487   :  { %v1445_v34 = vmax.f32 %v1429_v43, 0.0  ;;  %v1446_v53 = vmax.f32 %v1430_v62, 0.0  ;;  %v1447_v14 = vmax.f32 %v1431_v21, 0.0  ;;  %v1448_v8 = vmax.f32 %v1432_v41, 0.0 }
 0x488   :  { %v1449_v29 = vmax.f32 %v1433_v63, 0.0  ;;  %v1450_v44 = vmax.f32 %v1434_v1, 0.0  ;;  %v1451_v4 = vmax.f32 %v1435_v11, 0.0  ;;  %v1452_v50 = vmax.f32 %v1436_v28, 0.0 }
 0x489   :  { %v1453_v30 = vmax.f32 %v1437_v18, 0.0  ;;  %v1454_v52 = vmax.f32 %v1438_v25, 0.0  ;;  %v1455_v38 = vmax.f32 %v1439_v45, 0.0  ;;  %v1456_v26 = vmax.f32 %v1440_v40, 0.0 }
 0x48a   :  { %v1457_v49 = vmax.f32 %v1441_v42, 0.0  ;;  %v1458_v56 = vmax.f32 %v1442_v5, 0.0  ;;  %v1459_v60 = vmax.f32 %v1443_v36, 0.0  ;;  %v1460_v20 = vmax.f32 %v1444_v23, 0.0 }
 0x48b   :  { %v1750_v24 = vpack.c.bf16 %v1446_v53, %v1445_v34  ;;  %v1751_v2 = vpack.c.bf16 %v1448_v8, %v1447_v14  ;;  %v1752_v17 = vpack.c.bf16 %v1450_v44, %v1449_v29  ;;  %v1753_v39 = vpack.c.bf16 %v1452_v50, %v1451_v4 }
 0x48c   :  { %v1754_v12 = vpack.c.bf16 %v1454_v52, %v1453_v30  ;;  %v1755_v57 = vpack.c.bf16 %v1456_v26, %v1455_v38  ;;  %v1756_v58 = vpack.c.bf16 %v1458_v56, %v1457_v49  ;;  %v1757_v22 = vpack.c.bf16 %v1460_v20, %v1459_v60 }
 0x48d   :  { %1734 = vst [vmem:[%s3019_s5 + $0x40] sm:$0xff] %v1750_v24  ;;  %1735 = vst.msk [vmem:[%s3019_s5 + $0x48] sm:$0xff] %vm2859_vm3, %v1751_v2 }
 0x48e   :  { %1736 = vst [vmem:[%s3019_s5 + $0x50] sm:$0xff] %v1752_v17  ;;  %1737 = vst.msk [vmem:[%s3019_s5 + $0x58] sm:$0xff] %vm2859_vm3, %v1753_v39 }
 0x48f   :  { %1738 = vst [vmem:[%s3019_s5 + $0x60] sm:$0xff] %v1754_v12  ;;  %1739 = vst.msk [vmem:[%s3019_s5 + $0x68] sm:$0xff] %vm2859_vm3, %v1755_v57 }
 0x490   :  { %1740 = vst [vmem:[%s3019_s5 + $0x70] sm:$0xff] %v1756_v58  ;;  %1741 = vst.msk [vmem:[%s3019_s5 + $0x78] sm:$0xff] %vm2859_vm3, %v1757_v22 }

// kernel: actor_forward.3
= control target key start
LH: loop header
LB: loop body
LE: loop exit
PB: predicated region body
PF: predicated region fallthrough
CT: control target
= control target key end

     0   :  { %s16171_s0 = inlined_call_operand.vmem [shape: bf16[2,512,81], index: 0, kind: input, shape index: {}]   ;;  %s16172_s1 = inlined_call_operand.vmem [shape: bf16[64,512], index: 1, kind: input, shape index: {}]   ;;  %s16173_s2 = inlined_call_operand.vmem [shape: f32[64,1], index: 2, kind: input, shape index: {}]   ;;  %s16174_s3 = inlined_call_operand.vmem [shape: f32[64,81], index: 3, kind: input, shape index: {}]   ;;  %s16175_s4 = inlined_call_operand.vmem [shape: f32[64,81], index: 4, kind: input, shape index: {}]   ;;  %s16176_s5 = inlined_call_operand.vmem [shape: bf16[9,64,64], index: 5, kind: input, shape index: {}]   ;;  %s16177_s6 = inlined_call_operand.vmem [shape: f32[64,1], index: 6, kind: input, shape index: {}]   ;;  %s16178_s7 = inlined_call_operand.vmem [shape: f32[64,61], index: 7, kind: input, shape index: {}]   ;;  %s16179_s8 = inlined_call_operand.vmem [shape: f32[64,61], index: 8, kind: input, shape index: {}]   ;;  %s16180_s9 = inlined_call_operand.vmem [shape: f32[1,61], index: 9, kind: input, shape index: {}]   ;;  %s16181_s10 = inlined_call_operand.vmem [shape: bf16[3904,256], index: 10, kind: input, shape index: {}]   ;;  %s16182_s11 = inlined_call_operand.vmem [shape: f32[1,256], index: 11, kind: input, shape index: {}]   ;;  %s16183_s12 = inlined_call_operand.vmem [shape: bf16[256,256], index: 12, kind: input, shape index: {}]   ;;  %s16184_s13 = inlined_call_operand.vmem [shape: f32[1,256], index: 13, kind: input, shape index: {}]   ;;  %s16185_s14 = inlined_call_operand.vmem [shape: bf16[256,4], index: 14, kind: input, shape index: {}]   ;;  %s16186_s15 = inlined_call_operand.vmem [shape: f32[1,4], index: 15, kind: input, shape index: {}]   ;;  %s16187_s16 = inlined_call_operand.hbm [shape: f32[2,1,4], index: 16, kind: output, shape index: {}]  }
   0x1   :  { %16244 = sst [smem:[#allocation7_spill]] %s16171_s0 }
   0x2   :  { %s16245_s23 = sld [smem:[#allocation7_spill]]  ;;  %v12257_v2 = vmov 0   ;;  %v12453_v12 = vld [vmem:[%s16172_s1 + $0x4] ss:$16 sps:$4 sm:$0xff]   ;;  %v12477_v19 = vld [vmem:[%s16172_s1] ss:$16 sps:$4 sm:$0xff]  }
   0x3   :  { %11241 = vset.pattern.permute.xlu0 %v12257_v2  ;;  %11242 = vset.pattern.permute.xlu1 %v12257_v2  ;;  %v12485_v21 = vld [vmem:[%s16172_s1 + $0x24] ss:$16 sps:$4 sm:$0xff]   ;;  %v12501_v25 = vld [vmem:[%s16172_s1 + $0x20] ss:$16 sps:$4 sm:$0xff]   ;;  %v12557_v39 = vld [vmem:[%s16172_s1 + $0xc] ss:$16 sps:$4 sm:$0xff]  }
   0x4   :  { %580 = vmatprep.mubr.bf16.mxu1 %v12453_v12  ;;  %v12509_v27 = vld [vmem:[%s16172_s1 + $0x44] ss:$16 sps:$4 sm:$0xff]   ;;  %v12525_v31 = vld [vmem:[%s16172_s1 + $0x40] ss:$16 sps:$4 sm:$0xff]   ;;  %v12573_v43 = vld [vmem:[%s16172_s1 + $0x8] ss:$16 sps:$4 sm:$0xff]  }
   0x5   :  { %v12533_v33 = vld [vmem:[%s16172_s1 + $0x64] ss:$16 sps:$4 sm:$0xff]   ;;  %v12549_v37 = vld [vmem:[%s16172_s1 + $0x60] ss:$16 sps:$4 sm:$0xff]   ;;  %v12581_v45 = vld [vmem:[%s16172_s1 + $0x2c] ss:$16 sps:$4 sm:$0xff]  }
   0x6   :  { %v12594_v48 = vld [vmem:[%s16172_s1 + $0x28] ss:$16 sps:$4 sm:$0xff]   ;;  %v87_v51 = vld [vmem:[%s16173_s2] sm:$0xff]  ;;  %v12611_v53 = vld [vmem:[%s16172_s1 + $0x4c] ss:$16 sps:$4 sm:$0xff]   ;;  %vm16218_vm0 = vcmask 491520  }
   0x7   :  { %97 = vperm.xlu0 %11241, %v87_v51   ;;  %v88_v54 = vld [vmem:[%s16173_s2 + $0x8] sm:$0xff]  ;;  %v89_v55 = vld [vmem:[%s16173_s2 + $0x10] sm:$0xff]  ;;  %v90_v59 = vld [vmem:[%s16173_s2 + $0x18] sm:$0xff]  ;;  %vm16204_vm1 = vcmask 662528  }
   0x8   :  { %v11243_v0 = vld [vmem:[%s16245_s23 + $0x40] sm:$0xff]   ;;  %v11245_v3 = vld [vmem:[%s16245_s23 + $0x48] sm:$0xff]   ;;  %v11247_v5 = vld [vmem:[%s16245_s23 + $0x50] sm:$0xff]   ;;  %107 = vperm.xlu1 %11242, %v89_v55  }
   0x9   :  { %v11244_v1 = vld [vmem:[%s16245_s23] sm:$0xff]   ;;  %10322 = vmatprep.subr.bf16.mxu1 %v11243_v0  ;;  %v11246_v4 = vld [vmem:[%s16245_s23 + $0x8] sm:$0xff]   ;;  %v11248_v6 = vld [vmem:[%s16245_s23 + $0x10] sm:$0xff]  }
   0xa   :  { %10323 = vmatpush3.bf16.msra.mxu1 %v11244_v1  ;;  %v11249_v7 = vld [vmem:[%s16245_s23 + $0x58] sm:$0xff]   ;;  %v11251_v9 = vld [vmem:[%s16245_s23 + $0x60] sm:$0xff]   ;;  %v11253_v11 = vld [vmem:[%s16245_s23 + $0x68] sm:$0xff]  }
   0xb   :  { %10324 = vmatprep.subr.bf16.mxu1 %v11245_v3  ;;  %v11250_v8 = vld [vmem:[%s16245_s23 + $0x18] sm:$0xff]   ;;  %v11252_v10 = vld [vmem:[%s16245_s23 + $0x20] sm:$0xff]   ;;  %v11254_v13 = vld [vmem:[%s16245_s23 + $0x28] sm:$0xff]   ;;  %102 = vperm.xlu0 %11241, %v88_v54  }
   0xc   :  { %v11255_v14 = vld [vmem:[%s16245_s23 + $0x70] sm:$0xff]   ;;  %v11257_v16 = vld [vmem:[%s16245_s23 + $0x78] sm:$0xff]   ;;  %v11262_v18 = vld [vmem:[%s16245_s23 + $0xc0] sm:$0xff]   ;;  %112 = vperm.xlu1 %11242, %v90_v59  }
   0xd   :  { %v11256_v15 = vld [vmem:[%s16245_s23 + $0x30] sm:$0xff]   ;;  %v11258_v17 = vld [vmem:[%s16245_s23 + $0x38] sm:$0xff]   ;;  %v11263_v20 = vld [vmem:[%s16245_s23 + $0x80] sm:$0xff]  }
   0xe   :  { %10325 = vmatpush3.bf16.msra.mxu1 %v11246_v4  ;;  %v11264_v22 = vld [vmem:[%s16245_s23 + $0xc8] sm:$0xff]   ;;  %v11269_v24 = vld [vmem:[%s16245_s23 + $0xd0] sm:$0xff]   ;;  %v11271_v28 = vld [vmem:[%s16245_s23 + $0xd8] sm:$0xff]  }
   0xf   :  { %10326 = vmatprep.subr.bf16.mxu1 %v11247_v5  ;;  %v11265_v23 = vld [vmem:[%s16245_s23 + $0x88] sm:$0xff]   ;;  %v11270_v26 = vld [vmem:[%s16245_s23 + $0x90] sm:$0xff]   ;;  %v11272_v29 = vld [vmem:[%s16245_s23 + $0x98] sm:$0xff]  }
  0x10   :  { %v11276_v30 = vld [vmem:[%s16245_s23 + $0xe0] sm:$0xff]   ;;  %v11278_v34 = vld [vmem:[%s16245_s23 + $0xe8] sm:$0xff]   ;;  %v11283_v36 = vld [vmem:[%s16245_s23 + $0xf0] sm:$0xff]  }
  0x11   :  { %v11277_v32 = vld [vmem:[%s16245_s23 + $0xa0] sm:$0xff]   ;;  %v11279_v35 = vld [vmem:[%s16245_s23 + $0xa8] sm:$0xff]   ;;  %v11284_v38 = vld [vmem:[%s16245_s23 + $0xb0] sm:$0xff]  }
  0x12   :  { %10327 = vmatpush3.bf16.msra.mxu1 %v11248_v6  ;;  %v11285_v40 = vld [vmem:[%s16245_s23 + $0xf8] sm:$0xff]   ;;  %v11290_v42 = vld [vmem:[%s16245_s23 + $0x140] sm:$0xff]   ;;  %v11292_v46 = vld [vmem:[%s16245_s23 + $0x148] sm:$0xff]  }
  0x13   :  { %10328 = vmatprep.subr.bf16.mxu1 %v11249_v7  ;;  %v11286_v41 = vld [vmem:[%s16245_s23 + $0xb8] sm:$0xff]   ;;  %v11291_v44 = vld [vmem:[%s16245_s23 + $0x100] sm:$0xff]   ;;  %v11293_v47 = vld [vmem:[%s16245_s23 + $0x108] sm:$0xff]  }
  0x14   :  { %v11297_v49 = vld [vmem:[%s16245_s23 + $0x150] sm:$0xff]   ;;  %v11299_v52 = vld [vmem:[%s16245_s23 + $0x158] sm:$0xff]   ;;  %v11304_v58 = vld [vmem:[%s16245_s23 + $0x160] sm:$0xff]  }
  0x15   :  { %v11298_v50 = vld [vmem:[%s16245_s23 + $0x110] sm:$0xff]   ;;  %v11300_v56 = vld [vmem:[%s16245_s23 + $0x118] sm:$0xff]   ;;  %v91_v60 = vld [vmem:[%s16173_s2 + $0x20] sm:$0xff] }
  0x16   :  { %10329 = vmatpush3.bf16.msra.mxu1 %v11250_v8  ;;  %v12627_v57 = vld [vmem:[%s16172_s1 + $0x48] ss:$16 sps:$4 sm:$0xff]   ;;  %v11305_v61 = vld [vmem:[%s16245_s23 + $0x120] sm:$0xff]   ;;  %v12644_v62 = vld [vmem:[%s16172_s1 + $0x6c] ss:$16 sps:$4 sm:$0xff]   ;;  %117 = vperm.xlu0 %11241, %v91_v60  }
  0x17   :  { %10330 = vmatprep.subr.bf16.mxu1 %v11251_v9  ;;  %v93_v63 = vld [vmem:[%s16173_s2 + $0x30] sm:$0xff]  ;;  %v11306_v0 = vld [vmem:[%s16245_s23 + $0x168] sm:$0xff]   ;;  %v94_v5 = vld [vmem:[%s16173_s2 + $0x38] sm:$0xff] }
  0x18   :  { %v92_v1 = vld [vmem:[%s16173_s2 + $0x28] sm:$0xff]  ;;  %v11311_v4 = vld [vmem:[%s16245_s23 + $0x170] sm:$0xff]   ;;  %v11313_v8 = vld [vmem:[%s16245_s23 + $0x178] sm:$0xff]  }
  0x19   :  { %v11307_v3 = vld [vmem:[%s16245_s23 + $0x128] sm:$0xff]   ;;  %122 = vperm.xlu1 %11242, %v92_v1   ;;  %v11312_v7 = vld [vmem:[%s16245_s23 + $0x130] sm:$0xff]   ;;  %v11314_v9 = vld [vmem:[%s16245_s23 + $0x138] sm:$0xff]  }
  0x1a   :  { %10331 = vmatpush3.bf16.msra.mxu1 %v11252_v10  ;;  %127 = vperm.xlu0 %11241, %v93_v63   ;;  %v11310_v6 = vld [vmem:[%s16172_s1 + $0x68] ss:$16 sps:$4 sm:$0xff]   ;;  %v11315_v10 = vld [vmem:[%s16245_s23 + $0x1c0] sm:$0xff]  }
  0x1b   :  { %10332 = vmatprep.subr.bf16.mxu1 %v11253_v11  ;;  %v11316_v11 = vld [vmem:[%s16245_s23 + $0x180] sm:$0xff]  }
  0x1d   :  { %132 = vperm.xlu1 %11242, %v94_v5  }
  0x1e   :  { %10333 = vmatpush3.bf16.msra.mxu1 %v11254_v13  ;;  %v11317_v13 = vld [vmem:[%s16245_s23 + $0x1c8] sm:$0xff]  }
  0x1f   :  { %10334 = vmatprep.subr.bf16.mxu1 %v11255_v14  ;;  %v11318_v14 = vld [vmem:[%s16245_s23 + $0x188] sm:$0xff]  }
  0x22   :  { %10335 = vmatpush3.bf16.msra.mxu1 %v11256_v15  ;;  %v11320_v15 = vld [vmem:[%s16245_s23 + $0x190] sm:$0xff]  }
  0x23   :  { %10336 = vmatprep.subr.bf16.mxu1 %v11257_v16  ;;  %v11321_v16 = vld [vmem:[%s16245_s23 + $0x1d8] sm:$0xff]  }
  0x26   :  { %10337 = vmatpush3.bf16.msra.mxu1 %v11258_v17  ;;  %v11322_v17 = vld [vmem:[%s16245_s23 + $0x198] sm:$0xff]  }
  0x27   :  { %10362 = vmatprep.subr.bf16.mxu1 %v11262_v18  ;;  %v11323_v18 = vld [vmem:[%s16245_s23 + $0x1e0] sm:$0xff]  }
  0x29   :  { %581 = vmatmul.mubr.bf16.vlgmr.msra.gmra.mrb[0].mxu1 %v12477_v19 }
  0x2a   :  { %10363 = vmatpush3.bf16.msra.mxu1 %v11263_v20  ;;  %588 = vmatprep.mubr.bf16.mxu1 %v12485_v21  ;;  %v11325_v20 = vld [vmem:[%s16245_s23 + $0x1e8] sm:$0xff]  }
  0x2b   :  { %10364 = vmatprep.subr.bf16.mxu1 %v11264_v22  ;;  %v11327_v22 = vld [vmem:[%s16245_s23 + $0x1f0] sm:$0xff]  }
  0x2e   :  { %10365 = vmatpush3.bf16.msra.mxu1 %v11265_v23  ;;  %v11328_v23 = vld [vmem:[%s16245_s23 + $0x1b0] sm:$0xff]  }
  0x2f   :  { %10366 = vmatprep.subr.bf16.mxu1 %v11269_v24  ;;  %v11329_v24 = vld [vmem:[%s16245_s23 + $0x1f8] sm:$0xff]  }
  0x31   :  { %589 = vmatmul.mubr.bf16.gmra.mrb[4].mxu1 %v12501_v25 }
  0x32   :  { %10367 = vmatpush3.bf16.msra.mxu1 %v11270_v26  ;;  %596 = vmatprep.mubr.bf16.mxu1 %v12509_v27  ;;  %v199_v26 = vld [vmem:[%s16180_s9] sm:$0x1] }
  0x33   :  { %10368 = vmatprep.subr.bf16.mxu1 %v11271_v28 }
  0x36   :  { %10369 = vmatpush3.bf16.msra.mxu1 %v11272_v29 }
  0x37   :  { %10370 = vmatprep.subr.bf16.mxu1 %v11276_v30 }
  0x39   :  { %597 = vmatmul.mubr.bf16.gmra.mrb[8].mxu1 %v12525_v31 }
  0x3a   :  { %10371 = vmatpush3.bf16.msra.mxu1 %v11277_v32  ;;  %604 = vmatprep.mubr.bf16.mxu1 %v12533_v33 }
  0x3b   :  { %10372 = vmatprep.subr.bf16.mxu1 %v11278_v34 }
  0x3e   :  { %10373 = vmatpush3.bf16.msra.mxu1 %v11279_v35 }
  0x3f   :  { %10374 = vmatprep.subr.bf16.mxu1 %v11283_v36 }
  0x41   :  { %605 = vmatmul.mubr.bf16.gmra.mrb[12].mxu1 %v12549_v37 }
  0x42   :  { %10375 = vmatpush3.bf16.msra.mxu1 %v11284_v38  ;;  %645 = vmatprep.mubr.bf16.mxu1 %v12557_v39 }
  0x43   :  { %10376 = vmatprep.subr.bf16.mxu1 %v11285_v40 }
  0x46   :  { %10377 = vmatpush3.bf16.msra.mxu1 %v11286_v41 }
  0x47   :  { %10474 = vmatprep.subr.bf16.mxu1 %v11290_v42 }
  0x49   :  { %646 = vmatmul.mubr.bf16.vlgmr.msra.gmra.mrb[16].mxu1 %v12573_v43 }
  0x4a   :  { %10475 = vmatpush3.bf16.msra.mxu1 %v11291_v44  ;;  %653 = vmatprep.mubr.bf16.mxu1 %v12581_v45 }
  0x4b   :  { %10476 = vmatprep.subr.bf16.mxu1 %v11292_v46 }
  0x4e   :  { %10477 = vmatpush3.bf16.msra.mxu1 %v11293_v47 }
  0x4f   :  { %10478 = vmatprep.subr.bf16.mxu1 %v11297_v49 }
  0x51   :  { %654 = vmatmul.mubr.bf16.gmra.mrb[20].mxu1 %v12594_v48 }
  0x52   :  { %10479 = vmatpush3.bf16.msra.mxu1 %v11298_v50  ;;  %661 = vmatprep.mubr.bf16.mxu1 %v12611_v53 }
  0x53   :  { %10480 = vmatprep.subr.bf16.mxu1 %v11299_v52 }
  0x56   :  { %10481 = vmatpush3.bf16.msra.mxu1 %v11300_v56 }
  0x57   :  { %10482 = vmatprep.subr.bf16.mxu1 %v11304_v58 }
  0x59   :  { %662 = vmatmul.mubr.bf16.gmra.mrb[24].mxu1 %v12627_v57 }
  0x5a   :  { %10483 = vmatpush3.bf16.msra.mxu1 %v11305_v61  ;;  %669 = vmatprep.mubr.bf16.mxu1 %v12644_v62 }
  0x5b   :  { %10484 = vmatprep.subr.bf16.mxu1 %v11306_v0 }
  0x5e   :  { %10485 = vmatpush3.bf16.msra.mxu1 %v11307_v3 }
  0x5f   :  { %10486 = vmatprep.subr.bf16.mxu1 %v11311_v4 }
  0x61   :  { %670 = vmatmul.mubr.bf16.gmra.mrb[28].mxu1 %v11310_v6 }
  0x62   :  { %10487 = vmatpush3.bf16.msra.mxu1 %v11312_v7  ;;  %3028 = vmatprep.mubr.bf16.mxu1 %v12453_v12  ;;  %v11319_v12 = vld [vmem:[%s16245_s23 + $0x1d0] sm:$0xff]  }
  0x63   :  { %10488 = vmatprep.subr.bf16.mxu1 %v11313_v8 }
  0x66   :  { %10489 = vmatpush3.bf16.msra.mxu1 %v11314_v9 }
  0x67   :  { %10514 = vmatprep.subr.bf16.mxu1 %v11315_v10 }
  0x69   :  { %3029 = vmatmul.mubr.bf16.vlgmr.msra.gmra.mrb[32].mxu1 %v12477_v19  ;;  %v11324_v19 = vld [vmem:[%s16245_s23 + $0x1a0] sm:$0xff]  }
  0x6a   :  { %10515 = vmatpush3.bf16.msra.mxu1 %v11316_v11  ;;  %3036 = vmatprep.mubr.bf16.mxu1 %v12485_v21  ;;  %v11326_v21 = vld [vmem:[%s16245_s23 + $0x1a8] sm:$0xff]  }
  0x6b   :  { %10516 = vmatprep.subr.bf16.mxu1 %v11317_v13 }
  0x6e   :  { %10517 = vmatpush3.bf16.msra.mxu1 %v11318_v14 }
  0x6f   :  { %10518 = vmatprep.subr.bf16.mxu1 %v11319_v12 }
  0x71   :  { %3037 = vmatmul.mubr.bf16.gmra.mrb[36].mxu1 %v12501_v25  ;;  %v11330_v25 = vld [vmem:[%s16245_s23 + $0x1b8] sm:$0xff]  }
  0x72   :  { %10519 = vmatpush3.bf16.msra.mxu1 %v11320_v15  ;;  %3044 = vmatprep.mubr.bf16.mxu1 %v12509_v27  ;;  %v201_v27 = vsel %vm16218_vm0, %v199_v26, 0.0 }
  0x73   :  { %10520 = vmatprep.subr.bf16.mxu1 %v11321_v16  ;;  %202 = vadd.xlane.f32.xlu0 %v201_v27 }
  0x76   :  { %10521 = vmatpush3.bf16.msra.mxu1 %v11322_v17 }
  0x77   :  { %10522 = vmatprep.subr.bf16.mxu1 %v11323_v18 }
  0x79   :  { %3045 = vmatmul.mubr.bf16.gmra.mrb[40].mxu1 %v12525_v31 }
  0x7a   :  { %10523 = vmatpush3.bf16.msra.mxu1 %v11324_v19  ;;  %3052 = vmatprep.mubr.bf16.mxu1 %v12533_v33 }
  0x7b   :  { %10524 = vmatprep.subr.bf16.mxu1 %v11325_v20 }
  0x7e   :  { %10525 = vmatpush3.bf16.msra.mxu1 %v11326_v21 }
  0x7f   :  { %10526 = vmatprep.subr.bf16.mxu1 %v11327_v22 }
  0x81   :  { %3053 = vmatmul.mubr.bf16.gmra.mrb[44].mxu1 %v12549_v37 }
  0x82   :  { %10527 = vmatpush3.bf16.msra.mxu1 %v11328_v23  ;;  %3093 = vmatprep.mubr.bf16.mxu1 %v12557_v39 }
  0x83   :  { %10528 = vmatprep.subr.bf16.mxu1 %v11329_v24 }
  0x86   :  { %10529 = vmatpush3.bf16.msra.mxu1 %v11330_v25  ;;  %v12745_v50 = vpop.permute.xlu0 %97 }
  0x87   :  { %v12750_v59 = vpop.permute.xlu1 %107 }
  0x89   :  { %3094 = vmatmul.mubr.bf16.vlgmr.msra.gmra.mrb[48].mxu1 %v12573_v43 }
  0x8a   :  { %3101 = vmatprep.mubr.bf16.mxu1 %v12581_v45  ;;  %v12747_v54 = vpop.permute.xlu0 %102 }
  0x8b   :  { %v12757_v3 = vpop.permute.xlu1 %112 }
  0x91   :  { %3102 = vmatmul.mubr.bf16.gmra.mrb[52].mxu1 %v12594_v48 }
  0x92   :  { %3109 = vmatprep.mubr.bf16.mxu1 %v12611_v53 }
  0x95   :  { %v12767_v12 = vpop.permute.xlu0 %117 }
  0x98   :  { %v12773_v18 = vpop.permute.xlu1 %122 }
  0x99   :  { %3110 = vmatmul.mubr.bf16.gmra.mrb[56].mxu1 %v12627_v57 }
  0x9a   :  { %3117 = vmatprep.mubr.bf16.mxu1 %v12644_v62 }
  0xa1   :  { %3118 = vmatmul.mubr.bf16.gmra.mrb[60].mxu1 %v11310_v6 }
  0xfc   :  { %v10338_v28 = vpop.f32.mrb[0].mxu1 }
  0xfd   :  { %v10339_v29 = vpop.f32.mrb[1].mxu1 }
  0xfe   :  { %v10340_v30 = vadd.f32 %v10339_v29, %v10338_v28  ;;  %v10341_v31 = vpop.f32.mrb[2].mxu1 }
  0xff   :  { %v10342_v32 = vpop.f32.mrb[3].mxu1 }
 0x100   :  { %v10343_v33 = vadd.f32 %v10342_v32, %v10341_v31  ;;  %v583_v56 = vadd.f32 %v10340_v30, %v12745_v50  ;;  %v12785_v32 = vpop.permute.xlu0 %127 }
 0x102   :  { %v586_v61 = vadd.f32 %v10343_v33, %v12747_v54 }
 0x104   :  { %v10344_v34 = vpop.f32.mrb[4].mxu1 }
 0x105   :  { %v10345_v35 = vpop.f32.mrb[5].mxu1 }
 0x106   :  { %v10346_v36 = vadd.f32 %v10345_v35, %v10344_v34  ;;  %v10347_v37 = vpop.f32.mrb[6].mxu1  ;;  %v12787_v35 = vpop.permute.xlu1 %132 }
 0x107   :  { %v10348_v38 = vpop.f32.mrb[7].mxu1 }
 0x108   :  { %v10349_v39 = vadd.f32 %v10348_v38, %v10347_v37  ;;  %v591_v5 = vadd.f32 %v10346_v36, %v12750_v59 }
 0x10a   :  { %v594_v9 = vadd.f32 %v10349_v39, %v12757_v3 }
 0x10c   :  { %v10350_v40 = vpop.f32.mrb[8].mxu1 }
 0x10d   :  { %v10351_v41 = vpop.f32.mrb[9].mxu1 }
 0x10e   :  { %v10352_v42 = vadd.f32 %v10351_v41, %v10350_v40  ;;  %v10353_v43 = vpop.f32.mrb[10].mxu1 }
 0x10f   :  { %v10354_v44 = vpop.f32.mrb[11].mxu1 }
 0x110   :  { %v10355_v45 = vadd.f32 %v10354_v44, %v10353_v43  ;;  %v599_v21 = vadd.f32 %v10352_v42, %v12767_v12 }
 0x112   :  { %v602_v26 = vadd.f32 %v10355_v45, %v12773_v18 }
 0x114   :  { %v10356_v46 = vpop.f32.mrb[12].mxu1 }
 0x115   :  { %v10357_v47 = vpop.f32.mrb[13].mxu1 }
 0x116   :  { %v10358_v48 = vadd.f32 %v10357_v47, %v10356_v46  ;;  %v10359_v49 = vpop.f32.mrb[14].mxu1 }
 0x117   :  { %v10360_v51 = vpop.f32.mrb[15].mxu1 }
 0x118   :  { %v10361_v52 = vadd.f32 %v10360_v51, %v10359_v49  ;;  %v607_v38 = vadd.f32 %v10358_v48, %v12785_v32 }
 0x11a   :  { %v610_v43 = vadd.f32 %v10361_v52, %v12787_v35 }
 0x11c   :  { %v10378_v53 = vpop.f32.mrb[16].mxu1 }
 0x11d   :  { %v10379_v55 = vpop.f32.mrb[17].mxu1 }
 0x11e   :  { %v10380_v57 = vadd.f32 %v10379_v55, %v10378_v53  ;;  %v10381_v58 = vpop.f32.mrb[18].mxu1 }
 0x11f   :  { %v10382_v60 = vpop.f32.mrb[19].mxu1 }
 0x120   :  { %v12753_v62 = vadd.f32 %v10380_v57, %v583_v56  ;;  %v10383_v63 = vadd.f32 %v10382_v60, %v10381_v58 }
 0x122   :  { %v12755_v0 = vadd.f32 %v10383_v63, %v586_v61  ;;  %v679_v15 = vsel %vm16204_vm1, %v12753_v62, 0.0 }
 0x124   :  { %v10384_v1 = vpop.f32.mrb[20].mxu1  ;;  %v680_v13 = vsel %vm16204_vm1, %v12755_v0, 0.0 }
 0x125   :  { %v10385_v4 = vpop.f32.mrb[21].mxu1  ;;  %v681_v19 = vadd.f32 %v680_v13, %v679_v15 }
 0x126   :  { %v10386_v6 = vadd.f32 %v10385_v4, %v10384_v1  ;;  %v10387_v7 = vpop.f32.mrb[22].mxu1 }
 0x127   :  { %v10388_v8 = vpop.f32.mrb[23].mxu1 }
 0x128   :  { %v12761_v10 = vadd.f32 %v10386_v6, %v591_v5  ;;  %v10389_v11 = vadd.f32 %v10388_v8, %v10387_v7 }
 0x12a   :  { %v12765_v14 = vadd.f32 %v10389_v11, %v594_v9  ;;  %v682_v16 = vsel %vm16204_vm1, %v12761_v10, 0.0 }
 0x12b   :  { %v683_v24 = vadd.f32 %v682_v16, %v681_v19 }
 0x12c   :  { %v10390_v17 = vpop.f32.mrb[24].mxu1  ;;  %v684_v27 = vsel %vm16204_vm1, %v12765_v14, 0.0 }
 0x12d   :  { %v10391_v20 = vpop.f32.mrb[25].mxu1  ;;  %v685_v33 = vadd.f32 %v684_v27, %v683_v24 }
 0x12e   :  { %v10392_v22 = vadd.f32 %v10391_v20, %v10390_v17  ;;  %v10393_v23 = vpop.f32.mrb[26].mxu1 }
 0x12f   :  { %v10394_v25 = vpop.f32.mrb[27].mxu1 }
 0x130   :  { %v12779_v28 = vadd.f32 %v10392_v22, %v599_v21  ;;  %v10395_v29 = vadd.f32 %v10394_v25, %v10393_v23 }
 0x132   :  { %v686_v30 = vsel %vm16204_vm1, %v12779_v28, 0.0  ;;  %v12783_v31 = vadd.f32 %v10395_v29, %v602_v26 }
 0x133   :  { %v687_v36 = vadd.f32 %v686_v30, %v685_v33 }
 0x134   :  { %v10396_v34 = vpop.f32.mrb[28].mxu1  ;;  %v688_v39 = vsel %vm16204_vm1, %v12783_v31, 0.0 }
 0x135   :  { %v10397_v37 = vpop.f32.mrb[29].mxu1  ;;  %v689_v46 = vadd.f32 %v688_v39, %v687_v36 }
 0x136   :  { %v10398_v40 = vadd.f32 %v10397_v37, %v10396_v34  ;;  %v10399_v41 = vpop.f32.mrb[30].mxu1 }
 0x137   :  { %v10400_v42 = vpop.f32.mrb[31].mxu1 }
 0x138   :  { %v12793_v44 = vadd.f32 %v10398_v40, %v607_v38  ;;  %v10401_v45 = vadd.f32 %v10400_v42, %v10399_v41 }
 0x13a   :  { %v12795_v47 = vadd.f32 %v10401_v45, %v610_v43  ;;  %v690_v49 = vsel %vm16204_vm1, %v12793_v44, 0.0 }
 0x13b   :  { %v691_v51 = vadd.f32 %v690_v49, %v689_v46 }
 0x13c   :  { %v10490_v53 = vpop.f32.mrb[32].mxu1  ;;  %v692_v48 = vsel %vm16204_vm1, %v12795_v47, 0.0 }
 0x13d   :  { %v10491_v55 = vpop.f32.mrb[33].mxu1  ;;  %v693_v56 = vadd.f32 %v692_v48, %v691_v51 }
 0x13e   :  { %v10492_v57 = vadd.f32 %v10491_v55, %v10490_v53  ;;  %v10493_v58 = vpop.f32.mrb[34].mxu1 }
 0x13f   :  { %v10494_v60 = vpop.f32.mrb[35].mxu1  ;;  %694 = vadd.xlane.f32.xlu1 %v693_v56 }
 0x140   :  { %v10495_v52 = vadd.f32 %v10494_v60, %v10493_v58 }
 0x141   :  { %21 = vsyncpa [#allocation5], 0  ;;  %v203_v5 = vpop.xlane.xlu0 %202  ;;  %v3031_v36 = vadd.f32 %v10492_v57, %v12745_v50  ;;  %vm16203_vm2 = vcmask 523264   ;;  %s12258_s19 = smov 127   ;;  %s12259_s20 = smov 126   ;;  %vm1947_vm3 = vcmask 498688  }
 0x142   :  { %v204_v7 = vrot.slane %v203_v5, 4  ;;  %v3034_v40 = vadd.f32 %v10495_v52, %v12747_v54  ;;  %s12260_s23 = smov 119   ;;  %s16236_s0 = smov 110   ;;  %vm16210_vm4 = vcmask 991720   ;;  %vm2089_vm5 = vcmask 1041360  }
 0x143   :  { %s16191_s17 = smov 109   ;;  %s16189_s18 = smov 108   ;;  %vm2090_vm6 = vcmask 444418   ;;  %vm16214_vm7 = vcmask 998400   ;;  %vm16205_vm9 = vcmask 942520   ;;  %vm2114_vm10 = vcmask 1041312  }
 0x144   :  { %v10496_v61 = vpop.f32.mrb[36].mxu1  ;;  %v205_v9 = vadd.f32 %v204_v7, %v203_v5  ;;  %s12275_s22 = smov 13   ;;  %s16200_s25 = smov 7   ;;  %vm13768_vm8 = vmor %vm2090_vm6, %vm2089_vm5  ;;  %vm2115_vm11 = vcmask 395266   ;;  %vm16207_vm12 = vcmask 949248   ;;  %vm16206_vm14 = vcmask 893320  }
 0x145   :  { %v10497_v63 = vpop.f32.mrb[37].mxu1  ;;  %s16199_s24 = smov 50   ;;  %vm13778_vm13 = vmor %vm2115_vm11, %vm2114_vm10  ;;  %vm2132_vm15 = vcmask 1041264   ;;  %vm16208_vm5 = vcmask 900096   ;;  %vm16209_vm10 = vcmask 844120   ;;  %vm2157_vm11 = vcmask 1041216  }
 0x146   :  { %v10498_v1 = vadd.f32 %v10497_v63, %v10496_v61  ;;  %v10499_v4 = vpop.f32.mrb[38].mxu1  ;;  %v206_v11 = vrot.slane %v205_v9, 2 }
 0x147   :  { %v10500_v6 = vpop.f32.mrb[39].mxu1 }
 0x148   :  { %v10501_v8 = vadd.f32 %v10500_v6, %v10499_v4  ;;  %v207_v16 = vadd.f32 %v206_v11, %v205_v9  ;;  %v3039_v49 = vadd.f32 %v10498_v1, %v12750_v59 }
 0x14a   :  { %v208_v21 = vrot.slane %v207_v16, 1  ;;  %v3042_v55 = vadd.f32 %v10501_v8, %v12757_v3 }
 0x14c   :  { %v10502_v13 = vpop.f32.mrb[40].mxu1  ;;  %v209_v23 = vadd.f32 %v208_v21, %v207_v16 }
 0x14d   :  { %v10503_v15 = vpop.f32.mrb[41].mxu1 }
 0x14e   :  { %v10504_v17 = vadd.f32 %v10503_v15, %v10502_v13  ;;  %v10505_v19 = vpop.f32.mrb[42].mxu1  ;;  %11140 = vpush %v209_v23 }
 0x14f   :  { %v10506_v20 = vpop.f32.mrb[43].mxu1 }
 0x150   :  { %v10507_v22 = vadd.f32 %v10506_v20, %v10505_v19  ;;  %v3047_v60 = vadd.f32 %v10504_v17, %v12767_v12 }
 0x152   :  { %v3050_v4 = vadd.f32 %v10507_v22, %v12773_v18 }
 0x154   :  { %v10508_v24 = vpop.f32.mrb[44].mxu1 }
 0x155   :  { %v10509_v25 = vpop.f32.mrb[45].mxu1 }
 0x156   :  { %v10510_v26 = vadd.f32 %v10509_v25, %v10508_v24  ;;  %v10511_v27 = vpop.f32.mrb[46].mxu1 }
 0x157   :  { %v10512_v29 = vpop.f32.mrb[47].mxu1 }
 0x158   :  { %v10513_v30 = vadd.f32 %v10512_v29, %v10511_v27  ;;  %v3055_v7 = vadd.f32 %v10510_v26, %v12785_v32 }
 0x15a   :  { %v3058_v13 = vadd.f32 %v10513_v30, %v12787_v35 }
 0x15c   :  { %v10530_v33 = vpop.f32.mrb[48].mxu1 }
 0x15d   :  { %v10531_v34 = vpop.f32.mrb[49].mxu1 }
 0x15e   :  { %v10532_v37 = vadd.f32 %v10531_v34, %v10530_v33  ;;  %v10533_v38 = vpop.f32.mrb[50].mxu1 }
 0x15f   :  { %v10534_v39 = vpop.f32.mrb[51].mxu1 }
 0x160   :  { %v12803_v41 = vadd.f32 %v10532_v37, %v3031_v36  ;;  %v10535_v42 = vadd.f32 %v10534_v39, %v10533_v38 }
 0x162   :  { %v12805_v43 = vadd.f32 %v10535_v42, %v3034_v40 }
 0x164   :  { %v10536_v45 = vpop.f32.mrb[52].mxu1 }
 0x165   :  { %v10537_v46 = vpop.f32.mrb[53].mxu1 }
 0x166   :  { %v10538_v51 = vadd.f32 %v10537_v46, %v10536_v45  ;;  %v10539_v53 = vpop.f32.mrb[54].mxu1 }
 0x167   :  { %v10540_v48 = vpop.f32.mrb[55].mxu1 }
 0x168   :  { %v12809_v50 = vadd.f32 %v10538_v51, %v3039_v49  ;;  %v10541_v56 = vadd.f32 %v10540_v48, %v10539_v53 }
 0x16a   :  { %v12811_v57 = vadd.f32 %v10541_v56, %v3042_v55 }
 0x16c   :  { %v10542_v54 = vpop.f32.mrb[56].mxu1 }
 0x16d   :  { %v10543_v58 = vpop.f32.mrb[57].mxu1 }
 0x16e   :  { %v10544_v52 = vadd.f32 %v10543_v58, %v10542_v54  ;;  %v10545_v61 = vpop.f32.mrb[58].mxu1 }
 0x16f   :  { %v10546_v63 = vpop.f32.mrb[59].mxu1 }
 0x170   :  { %v12815_v59 = vadd.f32 %v10544_v52, %v3047_v60  ;;  %v10547_v1 = vadd.f32 %v10546_v63, %v10545_v61 }
 0x172   :  { %v12817_v5 = vadd.f32 %v10547_v1, %v3050_v4 }
 0x174   :  { %v10548_v3 = vpop.f32.mrb[60].mxu1 }
 0x175   :  { %v10549_v6 = vpop.f32.mrb[61].mxu1 }
 0x176   :  { %v10550_v8 = vadd.f32 %v10549_v6, %v10548_v3  ;;  %v10551_v9 = vpop.f32.mrb[62].mxu1  ;;  %v11331_v6 = vld [vmem:[%s16176_s5] sm:$0xff]  }
 0x177   :  { %v10552_v11 = vpop.f32.mrb[63].mxu1  ;;  %10656 = vmatprep.mubr.msk.bf16.mxu0 %vm16203_vm2, %v11331_v6 }
 0x178   :  { %v12821_v12 = vadd.f32 %v10550_v8, %v3055_v7  ;;  %v10553_v15 = vadd.f32 %v10552_v11, %v10551_v9  ;;  %v71_v7 = vld [vmem:[%s16174_s3] sm:$0xff]  ;;  %v72_v8 = vld [vmem:[%s16174_s3 + $0x8] sm:$0xff]  ;;  %v73_v9 = vld [vmem:[%s16174_s3 + $0x10] sm:$0xff] }
 0x179   :  { %v74_v11 = vld [vmem:[%s16174_s3 + $0x18] sm:$0xff] }
 0x17a   :  { %v12823_v16 = vadd.f32 %v10553_v15, %v3058_v13  ;;  %v75_v13 = vld [vmem:[%s16174_s3 + $0x20] sm:$0xff]  ;;  %v76_v15 = vld [vmem:[%s16174_s3 + $0x28] sm:$0xff] }
 0x17f   :  { %s12825_s26 = spop %11140 }
 0x1cc   :  { %v695_v18 = vpop.xlane.xlu1 %694 }
 0x1cd   :  { %v696_v17 = vrot.slane %v695_v18, 4 }
 0x1cf   :  { %v697_v19 = vadd.f32 %v696_v17, %v695_v18  ;;  %v77_v18 = vld [vmem:[%s16174_s3 + $0x30] sm:$0xff] }
 0x1d1   :  { %v698_v20 = vrot.slane %v697_v19, 2 }
 0x1d3   :  { %v699_v21 = vadd.f32 %v698_v20, %v697_v19  ;;  %v78_v19 = vld [vmem:[%s16174_s3 + $0x38] sm:$0xff]  ;;  %v79_v20 = vld [vmem:[%s16175_s4] sm:$0xff] }
 0x1d5   :  { %v700_v22 = vrot.slane %v699_v21, 1 }
 0x1d7   :  { %v701_v23 = vadd.f32 %v700_v22, %v699_v21  ;;  %v80_v21 = vld [vmem:[%s16175_s4 + $0x8] sm:$0xff] }
 0x1d9   :  { %11142 = vpush %v701_v23 }
 0x20a   :  { %s11143_s1 = spop %11142 }
 0x20b   :  { %s705_s27 = smul.f32 0.00019290124, %s11143_s1 }
 0x20d   :  { %v706_v32 = vstv %s705_s27 }
 0x20e   :  { %v707_v35 = vsub.f32 %v12753_v62, %v706_v32  ;;  %v708_v24 = vsub.f32 %v12755_v0, %v706_v32  ;;  %v709_v25 = vsub.f32 %v12761_v10, %v706_v32  ;;  %v710_v26 = vsub.f32 %v12765_v14, %v706_v32 }
 0x20f   :  { %v12832_v27 = vsub.f32 %v12779_v28, %v706_v32  ;;  %v712_v34 = vsub.f32 %v12783_v31, %v706_v32  ;;  %v713_v0 = vsub.f32 %v12793_v44, %v706_v32  ;;  %v714_v39 = vsub.f32 %v12795_v47, %v706_v32 }
 0x210   :  { %v715_v29 = vmul.f32 %v707_v35, %v707_v35  ;;  %v716_v30 = vmul.f32 %v708_v24, %v708_v24  ;;  %v717_v33 = vmul.f32 %v709_v25, %v709_v25  ;;  %v718_v36 = vmul.f32 %v710_v26, %v710_v26 }
 0x211   :  { %v719_v10 = vmul.f32 %v12832_v27, %v12832_v27  ;;  %v720_v40 = vmul.f32 %v712_v34, %v712_v34  ;;  %v721_v45 = vmul.f32 %v713_v0, %v713_v0  ;;  %v722_v51 = vmul.f32 %v714_v39, %v714_v39 }
 0x212   :  { %v723_v37 = vsel %vm16204_vm1, %v715_v29, 0.0  ;;  %v724_v38 = vsel %vm16204_vm1, %v716_v30, 0.0  ;;  %v726_v14 = vsel %vm16204_vm1, %v717_v33, 0.0  ;;  %v728_v42 = vsel %vm16204_vm1, %v718_v36, 0.0  ;;  %v81_v30 = vld [vmem:[%s16175_s4 + $0x10] sm:$0xff]  ;;  %v82_v33 = vld [vmem:[%s16175_s4 + $0x18] sm:$0xff] }
 0x213   :  { %v725_v62 = vadd.f32 %v724_v38, %v723_v37  ;;  %v730_v46 = vsel %vm16204_vm1, %v719_v10, 0.0  ;;  %v732_v53 = vsel %vm16204_vm1, %v720_v40, 0.0  ;;  %v734_v48 = vsel %vm16204_vm1, %v721_v45, 0.0  ;;  %v83_v36 = vld [vmem:[%s16175_s4 + $0x20] sm:$0xff] }
 0x214   :  { %v736_v56 = vsel %vm16204_vm1, %v722_v51, 0.0 }
 0x215   :  { %v727_v28 = vadd.f32 %v726_v14, %v725_v62 }
 0x217   :  { %v729_v31 = vadd.f32 %v728_v42, %v727_v28 }
 0x219   :  { %v731_v49 = vadd.f32 %v730_v46, %v729_v31 }
 0x21b   :  { %v733_v44 = vadd.f32 %v732_v53, %v731_v49 }
 0x21d   :  { %v735_v55 = vadd.f32 %v734_v48, %v733_v44 }
 0x21f   :  { %v737_v54 = vadd.f32 %v736_v56, %v735_v55 }
 0x221   :  { %738 = vadd.xlane.f32.xlu0 %v737_v54 }
 0x2ae   :  { %v739_v47 = vpop.xlane.xlu0 %738 }
 0x2af   :  { %v740_v58 = vrot.slane %v739_v47, 4 }
 0x2b1   :  { %v741_v60 = vadd.f32 %v740_v58, %v739_v47 }
 0x2b3   :  { %v742_v52 = vrot.slane %v741_v60, 2 }
 0x2b5   :  { %v743_v61 = vadd.f32 %v742_v52, %v741_v60 }
 0x2b7   :  { %v744_v63 = vrot.slane %v743_v61, 1 }
 0x2b9   :  { %v745_v4 = vadd.f32 %v744_v63, %v743_v61 }
 0x2bb   :  { %11144 = vpush %v745_v4 }
 0x2ec   :  { %s11145_s28 = spop %11144 }
 0x2ed   :  { %s749_s29 = smul.f32 0.00019290124, %s11145_s28 }
 0x2ef   :  { %s750_s30 = sadd.f32 1e-05, %s749_s29  ;;  %s16193_s29 = smov 118  }
 0x2f1   :  { %v751_v1 = vstv %s750_s30  ;;  %s16238_s30 = smov 117  }
 0x2f2   :  { %12204 = vrsqrt.f32 %v751_v1 }
 0x2fc   :  { %v12205_v3 = vpop.eup %12204 }
 0x2fd   :  { %11146 = vpush %v12205_v3 }
 0x32e   :  { %s11147_s2 = spop %11146 }
 0x32f   :  { %v754_v17 = vstv %s11147_s2 }
 0x330   :  { %v755_v22 = vmul.f32 %v754_v17, %v707_v35  ;;  %v756_v23 = vmul.f32 %v754_v17, %v708_v24  ;;  %v757_v32 = vmul.f32 %v754_v17, %v709_v25  ;;  %v758_v29 = vmul.f32 %v754_v17, %v710_v26  ;;  %v12894_v24 = vld [vmem:[%s16175_s4 + $0x28] sm:$0xff]  ;;  %v12899_v25 = vld [vmem:[%s16175_s4 + $0x30] sm:$0xff]  ;;  %v12904_v26 = vld [vmem:[%s16175_s4 + $0x38] sm:$0xff] }
 0x331   :  { %v759_v37 = vmul.f32 %v754_v17, %v12832_v27  ;;  %v760_v38 = vmul.f32 %v754_v17, %v712_v34  ;;  %v761_v62 = vmul.f32 %v754_v17, %v713_v0  ;;  %v762_v35 = vmul.f32 %v754_v17, %v714_v39  ;;  %v11333_v17 = vld [vmem:[%s16176_s5 + $0x10] sm:$0xff]  }
 0x332   :  { %v763_v10 = vmul.f32 %v755_v22, %v71_v7  ;;  %v764_v27 = vmul.f32 %v756_v23, %v72_v8  ;;  %v765_v34 = vmul.f32 %v757_v32, %v73_v9  ;;  %v766_v0 = vmul.f32 %v758_v29, %v74_v11  ;;  %v152_v22 = vld [vmem:[%s16177_s6 + $0x8] sm:$0xff]  ;;  %v153_v23 = vld [vmem:[%s16177_s6 + $0x10] sm:$0xff]  ;;  %v154_v32 = vld [vmem:[%s16177_s6 + $0x18] sm:$0xff] }
 0x333   :  { %v767_v14 = vmul.f32 %v759_v37, %v75_v13  ;;  %v768_v28 = vmul.f32 %v760_v38, %v76_v15  ;;  %v769_v39 = vmul.f32 %v761_v62, %v77_v18  ;;  %v770_v40 = vmul.f32 %v762_v35, %v78_v19  ;;  %v11332_v18 = vld [vmem:[%s16176_s5 + $0x8] sm:$0xff]   ;;  %v11334_v19 = vld [vmem:[%s16176_s5 + $0x18] sm:$0xff]   ;;  %v155_v29 = vld [vmem:[%s16177_s6 + $0x20] sm:$0xff] }
 0x334   :  { %v771_v42 = vadd.f32 %v763_v10, %v79_v20  ;;  %v772_v31 = vadd.f32 %v764_v27, %v80_v21  ;;  %v773_v45 = vadd.f32 %v765_v34, %v81_v30  ;;  %v774_v46 = vadd.f32 %v766_v0, %v82_v33  ;;  %v11335_v20 = vld [vmem:[%s16176_s5 + $0x20] sm:$0xff]   ;;  %v156_v30 = vld [vmem:[%s16177_s6 + $0x28] sm:$0xff]  ;;  %v157_v33 = vld [vmem:[%s16177_s6 + $0x30] sm:$0xff] }
 0x335   :  { %v775_v49 = vadd.f32 %v767_v14, %v83_v36  ;;  %v776_v51 = vadd.f32 %v768_v28, %v12894_v24  ;;  %v777_v53 = vadd.f32 %v769_v39, %v12899_v25  ;;  %v778_v44 = vadd.f32 %v770_v40, %v12904_v26  ;;  %v151_v21 = vld [vmem:[%s16177_s6] sm:$0xff]  ;;  %v158_v36 = vld [vmem:[%s16177_s6 + $0x38] sm:$0xff]  ;;  %v11336_v10 = vld [vmem:[%s16176_s5 + $0x28] sm:$0xff]  }
 0x336   :  { %v779_v48 = vmax.f32 %v771_v42, 0.0  ;;  %v780_v55 = vmax.f32 %v772_v31, 0.0  ;;  %v781_v56 = vmax.f32 %v773_v45, 0.0  ;;  %v782_v54 = vmax.f32 %v774_v46, 0.0  ;;  %v11337_v34 = vld [vmem:[%s16176_s5 + $0x30] sm:$0xff]   ;;  %v11338_v14 = vld [vmem:[%s16176_s5 + $0x38] sm:$0xff]  }
 0x337   :  { %v783_v47 = vmax.f32 %v775_v49, 0.0  ;;  %v784_v58 = vmax.f32 %v776_v51, 0.0  ;;  %v785_v60 = vmax.f32 %v777_v53, 0.0  ;;  %v786_v52 = vmax.f32 %v778_v44, 0.0  ;;  %v11339_v39 = vld [vmem:[%s16176_s5 + $0x40] sm:$0xff]   ;;  %v11340_v42 = vld [vmem:[%s16176_s5 + $0x48] sm:$0xff]  }
 0x338   :  { %787 = vst.msk [vmem:[#allocation2] sm:$0xff] %vm16204_vm1, %v779_v48  ;;  %788 = vst.msk [vmem:[#allocation2 + $0x8] sm:$0xff] %vm16204_vm1, %v780_v55  ;;  %v11341_v45 = vld [vmem:[%s16176_s5 + $0x50] sm:$0xff]   ;;  %v11342_v49 = vld [vmem:[%s16176_s5 + $0x58] sm:$0xff]  }
 0x339   :  { %789 = vst.msk [vmem:[#allocation2 + $0x10] sm:$0xff] %vm16204_vm1, %v781_v56  ;;  %790 = vst.msk [vmem:[#allocation2 + $0x18] sm:$0xff] %vm16204_vm1, %v782_v54  ;;  %v11343_v53 = vld [vmem:[%s16176_s5 + $0x60] sm:$0xff]   ;;  %v11344_v48 = vld [vmem:[%s16176_s5 + $0x68] sm:$0xff]  }
 0x33a   :  { %791 = vst.msk [vmem:[#allocation2 + $0x20] sm:$0xff] %vm16204_vm1, %v783_v47  ;;  %792 = vst.msk [vmem:[#allocation2 + $0x28] sm:$0xff] %vm16204_vm1, %v784_v58  ;;  %v11345_v56 = vld [vmem:[%s16176_s5 + $0x70] sm:$0xff]   ;;  %v11346_v47 = vld [vmem:[%s16176_s5 + $0x78] sm:$0xff]  }
 0x33b   :  { %793 = vst.msk [vmem:[#allocation2 + $0x30] sm:$0xff] %vm16204_vm1, %v785_v60  ;;  %794 = vst.msk [vmem:[#allocation2 + $0x38] sm:$0xff] %vm16204_vm1, %v786_v52  ;;  %v11347_v60 = vld [vmem:[%s16176_s5 + $0x80] sm:$0xff]  }
 0x33f   :  { %v803_v4 = vld [vmem:[#allocation2] sm:$0xff]  ;;  %v804_v3 = vld [vmem:[#allocation2 + $0x8] sm:$0xff] }
 0x340   :  { %v805_v61 = vld [vmem:[#allocation2 + $0x10] sm:$0xff]  ;;  %v806_v63 = vld [vmem:[#allocation2 + $0x18] sm:$0xff]  ;;  %v811_v6 = vpack.c.bf16 %v804_v3, %v803_v4  ;;  %v11349_v4 = vld [vmem:[%s16176_s5 + $0x90] sm:$0xff]  }
 0x341   :  { %v812_v1 = vpack.c.bf16 %v806_v63, %v805_v61  ;;  %v807_v7 = vld [vmem:[#allocation2 + $0x20] sm:$0xff]  ;;  %v808_v8 = vld [vmem:[#allocation2 + $0x28] sm:$0xff]  ;;  %v11348_v61 = vld [vmem:[%s16176_s5 + $0x88] sm:$0xff]  }
 0x342   :  { %v809_v9 = vld [vmem:[#allocation2 + $0x30] sm:$0xff]  ;;  %v810_v11 = vld [vmem:[#allocation2 + $0x38] sm:$0xff]  ;;  %954 = vrot.lane.b32.xlu0 %v811_v6, %s12258_s19  ;;  %10648 = vmatprep.subr.bf16.mxu0 %v811_v6  ;;  %v813_v13 = vpack.c.bf16 %v808_v8, %v807_v7  ;;  %v11350_v3 = vld [vmem:[%s16176_s5 + $0x98] sm:$0xff]  }
 0x343   :  { %956 = vrot.lane.b32.xlu1 %v812_v1, %s12258_s19  ;;  %10649 = vmatpush3.bf16.msra.mxu0 %v811_v6  ;;  %v814_v15 = vpack.c.bf16 %v810_v11, %v809_v9  ;;  %v11351_v7 = vld [vmem:[%s16176_s5 + $0xa0] sm:$0xff]   ;;  %v11352_v9 = vld [vmem:[%s16176_s5 + $0xa8] sm:$0xff]  }
 0x344   :  { %10650 = vmatprep.subr.bf16.mxu0 %v812_v1 }
 0x346   :  { %960 = vrot.lane.b32.xlu0 %v814_v15, %s12258_s19 }
 0x347   :  { %958 = vrot.lane.b32.xlu1 %v813_v13, %s12258_s19  ;;  %10651 = vmatpush3.bf16.msra.mxu0 %v812_v1 }
 0x348   :  { %10652 = vmatprep.subr.bf16.mxu0 %v813_v13 }
 0x34a   :  { %1082 = vrot.lane.b32.xlu0 %v812_v1, %s12259_s20 }
 0x34b   :  { %1080 = vrot.lane.b32.xlu1 %v811_v6, %s12259_s20  ;;  %10653 = vmatpush3.bf16.msra.mxu0 %v813_v13 }
 0x34c   :  { %10654 = vmatprep.subr.bf16.mxu0 %v814_v15 }
 0x34e   :  { %1086 = vrot.lane.b32.xlu0 %v814_v15, %s12259_s20 }
 0x34f   :  { %1084 = vrot.lane.b32.xlu1 %v813_v13, %s12259_s20  ;;  %10655 = vmatpush3.bf16.msra.mxu0 %v814_v15 }
 0x352   :  { %1208 = vrot.lane.b32.xlu0 %v812_v1, %s12260_s23  ;;  %10657 = vmatmul.mubr.msk.bf16.vlgmr.msra.gmra.mrb[0].mxu0 %vm16203_vm2, %v11332_v18  ;;  %v11354_v18 = vld [vmem:[%s16176_s5 + $0xb8] sm:$0xff]  }
 0x353   :  { %1206 = vrot.lane.b32.xlu1 %v811_v6, %s12260_s23  ;;  %10660 = vmatprep.mubr.msk.bf16.mxu0 %vm16203_vm2, %v11333_v17 }
 0x356   :  { %1212 = vrot.lane.b32.xlu0 %v814_v15, %s12260_s23 }
 0x357   :  { %1210 = vrot.lane.b32.xlu1 %v813_v13, %s12260_s23 }
 0x35a   :  { %1334 = vrot.lane.b32.xlu0 %v812_v1, %s16193_s29  ;;  %10661 = vmatmul.mubr.msk.bf16.gmra.mrb[4].mxu0 %vm16203_vm2, %v11334_v19  ;;  %v11355_v19 = vld [vmem:[%s16176_s5 + $0xc0] sm:$0xff]  }
 0x35b   :  { %1332 = vrot.lane.b32.xlu1 %v811_v6, %s16193_s29  ;;  %10672 = vmatprep.mubr.msk.bf16.mxu0 %vm16203_vm2, %v11335_v20 }
 0x35e   :  { %1338 = vrot.lane.b32.xlu0 %v814_v15, %s16193_s29 }
 0x35f   :  { %1336 = vrot.lane.b32.xlu1 %v813_v13, %s16193_s29 }
 0x362   :  { %1460 = vrot.lane.b32.xlu0 %v812_v1, %s16238_s30 }
 0x363   :  { %1458 = vrot.lane.b32.xlu1 %v811_v6, %s16238_s30 }
 0x366   :  { %1464 = vrot.lane.b32.xlu0 %v814_v15, %s16238_s30 }
 0x367   :  { %1462 = vrot.lane.b32.xlu1 %v813_v13, %s16238_s30 }
 0x36a   :  { %1586 = vrot.lane.b32.xlu0 %v812_v1, %s16236_s0 }
 0x36b   :  { %1584 = vrot.lane.b32.xlu1 %v811_v6, %s16236_s0 }
 0x36e   :  { %1590 = vrot.lane.b32.xlu0 %v814_v15, %s16236_s0 }
 0x36f   :  { %1588 = vrot.lane.b32.xlu1 %v813_v13, %s16236_s0 }
 0x372   :  { %1712 = vrot.lane.b32.xlu0 %v812_v1, %s16191_s17 }
 0x373   :  { %1710 = vrot.lane.b32.xlu1 %v811_v6, %s16191_s17 }
 0x376   :  { %1716 = vrot.lane.b32.xlu0 %v814_v15, %s16191_s17 }
 0x377   :  { %1714 = vrot.lane.b32.xlu1 %v813_v13, %s16191_s17 }
 0x37a   :  { %1838 = vrot.lane.b32.xlu0 %v812_v1, %s16189_s18 }
 0x37b   :  { %1836 = vrot.lane.b32.xlu1 %v811_v6, %s16189_s18 }
 0x37e   :  { %1842 = vrot.lane.b32.xlu0 %v814_v15, %s16189_s18 }
 0x37f   :  { %1840 = vrot.lane.b32.xlu1 %v813_v13, %s16189_s18  ;;  %v11353_v13 = vld [vmem:[%s16176_s5 + $0xb0] sm:$0xff]  }
 0x382   :  { %166 = vperm.xlu0 %11241, %v152_v22  }
 0x383   :  { %161 = vperm.xlu1 %11242, %v151_v21   ;;  %v11356_v21 = vld [vmem:[%s16176_s5 + $0xc8] sm:$0xff]  }
 0x386   :  { %176 = vperm.xlu0 %11241, %v154_v32  }
 0x387   :  { %171 = vperm.xlu1 %11242, %v153_v23   ;;  %v11357_v23 = vld [vmem:[%s16176_s5 + $0xd0] sm:$0xff]  }
 0x38a   :  { %186 = vperm.xlu0 %11241, %v156_v30  }
 0x38b   :  { %181 = vperm.xlu1 %11242, %v155_v29   ;;  %v11358_v29 = vld [vmem:[%s16176_s5 + $0xd8] sm:$0xff]  }
 0x38e   :  { %196 = vperm.xlu0 %11241, %v158_v36  }
 0x38f   :  { %191 = vperm.xlu1 %11242, %v157_v33   ;;  %v11359_v33 = vld [vmem:[%s16176_s5 + $0xe0] sm:$0xff]  }
 0x3b4   :  { %v955_v38 = vpop.permute.xlu0 %954 }
 0x3b5   :  { %v957_v37 = vpop.permute.xlu1 %956  ;;  %10664 = vmatprep.subr.bf16.mxu0 %v955_v38 }
 0x3b6   :  { %10665 = vmatpush3.bf16.msra.mxu0 %v955_v38 }
 0x3b7   :  { %10666 = vmatprep.subr.bf16.mxu0 %v957_v37 }
 0x3b8   :  { %v961_v35 = vpop.permute.xlu0 %960 }
 0x3b9   :  { %v959_v62 = vpop.permute.xlu1 %958 }
 0x3ba   :  { %10667 = vmatpush3.bf16.msra.mxu0 %v957_v37  ;;  %v11360_v37 = vld [vmem:[%s16176_s5 + $0xe8] sm:$0xff]  }
 0x3bb   :  { %10668 = vmatprep.subr.bf16.mxu0 %v959_v62 }
 0x3bc   :  { %v1083_v0 = vpop.permute.xlu0 %1082 }
 0x3bd   :  { %v1081_v27 = vpop.permute.xlu1 %1080 }
 0x3be   :  { %10669 = vmatpush3.bf16.msra.mxu0 %v959_v62  ;;  %v11361_v62 = vld [vmem:[%s16176_s5 + $0xf0] sm:$0xff]  }
 0x3bf   :  { %10670 = vmatprep.subr.bf16.mxu0 %v961_v35 }
 0x3c0   :  { %v1087_v40 = vpop.permute.xlu0 %1086 }
 0x3c1   :  { %v1085_v28 = vpop.permute.xlu1 %1084 }
 0x3c2   :  { %10671 = vmatpush3.bf16.msra.mxu0 %v961_v35 }
 0x3c3   :  { %10680 = vmatprep.subr.bf16.mxu0 %v1081_v27 }
 0x3c4   :  { %v1209_v46 = vpop.permute.xlu0 %1208 }
 0x3c5   :  { %10673 = vmatmul.mubr.msk.bf16.vlgmr.msra.gmra.mrb[0].mxu0 %vm16203_vm2, %v11336_v10  ;;  %v1207_v31 = vpop.permute.xlu1 %1206  ;;  %v11362_v10 = vld [vmem:[%s16176_s5 + $0xf8] sm:$0xff]  }
 0x3c6   :  { %10681 = vmatpush3.bf16.msra.mxu0 %v1081_v27  ;;  %10676 = vmatprep.mubr.msk.bf16.mxu0 %vm16203_vm2, %v11337_v34  ;;  %v11363_v34 = vld [vmem:[%s16176_s5 + $0x100] sm:$0xff]  }
 0x3c7   :  { %10682 = vmatprep.subr.bf16.mxu0 %v1083_v0 }
 0x3c8   :  { %v1213_v44 = vpop.permute.xlu0 %1212 }
 0x3c9   :  { %v1211_v51 = vpop.permute.xlu1 %1210 }
 0x3ca   :  { %10683 = vmatpush3.bf16.msra.mxu0 %v1083_v0 }
 0x3cb   :  { %10684 = vmatprep.subr.bf16.mxu0 %v1085_v28 }
 0x3cc   :  { %v1335_v54 = vpop.permute.xlu0 %1334 }
 0x3cd   :  { %10677 = vmatmul.mubr.msk.bf16.gmra.mrb[4].mxu0 %vm16203_vm2, %v11338_v14  ;;  %v1333_v55 = vpop.permute.xlu1 %1332  ;;  %v11364_v14 = vld [vmem:[%s16176_s5 + $0x108] sm:$0xff]  }
 0x3ce   :  { %10685 = vmatpush3.bf16.msra.mxu0 %v1085_v28  ;;  %10688 = vmatprep.mubr.msk.bf16.mxu0 %vm16203_vm2, %v11339_v39  ;;  %v11365_v28 = vld [vmem:[%s16176_s5 + $0x110] sm:$0xff]   ;;  %v11366_v39 = vld [vmem:[%s16176_s5 + $0x118] sm:$0xff]  }
 0x3cf   :  { %10686 = vmatprep.subr.bf16.mxu0 %v1087_v40 }
 0x3d0   :  { %v1339_v52 = vpop.permute.xlu0 %1338 }
 0x3d1   :  { %v1337_v58 = vpop.permute.xlu1 %1336 }
 0x3d2   :  { %10687 = vmatpush3.bf16.msra.mxu0 %v1087_v40  ;;  %v1934_v40 = vlaneseq }
 0x3d3   :  { %10696 = vmatprep.subr.bf16.mxu0 %v1207_v31 }
 0x3d4   :  { %v1461_v1 = vpop.permute.xlu0 %1460 }
 0x3d5   :  { %10689 = vmatmul.mubr.msk.bf16.vlgmr.msra.gmra.mrb[0].mxu0 %vm16203_vm2, %v11340_v42  ;;  %v1459_v63 = vpop.permute.xlu1 %1458 }
 0x3d6   :  { %10697 = vmatpush3.bf16.msra.mxu0 %v1207_v31  ;;  %10692 = vmatprep.mubr.msk.bf16.mxu0 %vm16203_vm2, %v11341_v45  ;;  %v13115_v31 = vshrl.u32 %v1934_v40, 7 }
 0x3d7   :  { %10698 = vmatprep.subr.bf16.mxu0 %v1209_v46 }
 0x3d8   :  { %v1465_v8 = vpop.permute.xlu0 %1464 }
 0x3d9   :  { %v1463_v6 = vpop.permute.xlu1 %1462 }
 0x3da   :  { %10699 = vmatpush3.bf16.msra.mxu0 %v1209_v46  ;;  %v1936_v46 = vsub.s32 0, %v13115_v31 }
 0x3db   :  { %10700 = vmatprep.subr.bf16.mxu0 %v1211_v51 }
 0x3dc   :  { %v1587_v15 = vpop.permute.xlu0 %1586 }
 0x3dd   :  { %10693 = vmatmul.mubr.msk.bf16.gmra.mrb[4].mxu0 %vm16203_vm2, %v11342_v49  ;;  %v1585_v11 = vpop.permute.xlu1 %1584 }
 0x3de   :  { %10701 = vmatpush3.bf16.msra.mxu0 %v1211_v51  ;;  %10704 = vmatprep.mubr.msk.bf16.mxu0 %vm16203_vm2, %v11343_v53  ;;  %v13127_v53 = vld [vmem:[%s16180_s9] ss:$0 sm:$0xff]  ;;  %s211_s9 = smul.f32 64.0, %s12825_s26 }
 0x3df   :  { %10702 = vmatprep.subr.bf16.mxu0 %v1213_v44 }
 0x3e0   :  { %v1591_v20 = vpop.permute.xlu0 %1590 }
 0x3e1   :  { %v1589_v17 = vpop.permute.xlu1 %1588 }
 0x3e2   :  { %10703 = vmatpush3.bf16.msra.mxu0 %v1213_v44 }
 0x3e3   :  { %10712 = vmatprep.subr.bf16.mxu0 %v1333_v55 }
 0x3e4   :  { %v1713_v32 = vpop.permute.xlu0 %1712 }
 0x3e5   :  { %10705 = vmatmul.mubr.msk.bf16.vlgmr.msra.gmra.mrb[0].mxu0 %vm16203_vm2, %v11344_v48  ;;  %v1711_v22 = vpop.permute.xlu1 %1710 }
 0x3e6   :  { %10713 = vmatpush3.bf16.msra.mxu0 %v1333_v55  ;;  %10708 = vmatprep.mubr.msk.bf16.mxu0 %vm16203_vm2, %v11345_v56 }
 0x3e7   :  { %10714 = vmatprep.subr.bf16.mxu0 %v1335_v54 }
 0x3e8   :  { %v1717_v36 = vpop.permute.xlu0 %1716 }
 0x3e9   :  { %v1715_v30 = vpop.permute.xlu1 %1714 }
 0x3ea   :  { %10715 = vmatpush3.bf16.msra.mxu0 %v1335_v54 }
 0x3eb   :  { %10716 = vmatprep.subr.bf16.mxu0 %v1337_v58 }
 0x3ec   :  { %v1839_v35 = vpop.permute.xlu0 %1838 }
 0x3ed   :  { %10709 = vmatmul.mubr.msk.bf16.gmra.mrb[4].mxu0 %vm16203_vm2, %v11346_v47  ;;  %v1837_v38 = vpop.permute.xlu1 %1836 }
 0x3ee   :  { %10717 = vmatpush3.bf16.msra.mxu0 %v1337_v58  ;;  %10720 = vmatprep.mubr.msk.bf16.mxu0 %vm16203_vm2, %v11347_v60 }
 0x3ef   :  { %10718 = vmatprep.subr.bf16.mxu0 %v1339_v52 }
 0x3f0   :  { %v1843_v0 = vpop.permute.xlu0 %1842 }
 0x3f1   :  { %v1841_v27 = vpop.permute.xlu1 %1840 }
 0x3f2   :  { %10719 = vmatpush3.bf16.msra.mxu0 %v1339_v52 }
 0x3f3   :  { %10728 = vmatprep.subr.bf16.mxu0 %v1459_v63 }
 0x3f5   :  { %10721 = vmatmul.mubr.msk.bf16.vlgmr.msra.gmra.mrb[0].mxu0 %vm16203_vm2, %v11348_v61 }
 0x3f6   :  { %10729 = vmatpush3.bf16.msra.mxu0 %v1459_v63  ;;  %10724 = vmatprep.mubr.msk.bf16.mxu0 %vm16203_vm2, %v11349_v4 }
 0x3f7   :  { %10730 = vmatprep.subr.bf16.mxu0 %v1461_v1 }
 0x3fa   :  { %10731 = vmatpush3.bf16.msra.mxu0 %v1461_v1 }
 0x3fb   :  { %10732 = vmatprep.subr.bf16.mxu0 %v1463_v6 }
 0x3fd   :  { %10725 = vmatmul.mubr.msk.bf16.gmra.mrb[4].mxu0 %vm16203_vm2, %v11350_v3 }
 0x3fe   :  { %10733 = vmatpush3.bf16.msra.mxu0 %v1463_v6  ;;  %10736 = vmatprep.mubr.msk.bf16.mxu0 %vm16203_vm2, %v11351_v7 }
 0x3ff   :  { %10734 = vmatprep.subr.bf16.mxu0 %v1465_v8 }
 0x401   :  { %v13117_v45 = vpop.permute.xlu0 %166 }
 0x402   :  { %10735 = vmatpush3.bf16.msra.mxu0 %v1465_v8  ;;  %v13113_v42 = vpop.permute.xlu1 %161 }
 0x403   :  { %10744 = vmatprep.subr.bf16.mxu0 %v1585_v11 }
 0x405   :  { %10737 = vmatmul.mubr.msk.bf16.vlgmr.msra.gmra.mrb[0].mxu0 %vm16203_vm2, %v11352_v9  ;;  %v13122_v51 = vpop.permute.xlu0 %176 }
 0x406   :  { %10745 = vmatpush3.bf16.msra.mxu0 %v1585_v11  ;;  %10740 = vmatprep.mubr.msk.bf16.mxu0 %vm16203_vm2, %v11353_v13  ;;  %v13120_v49 = vpop.permute.xlu1 %171 }
 0x407   :  { %10746 = vmatprep.subr.bf16.mxu0 %v1587_v15 }
 0x409   :  { %v13143_v63 = vpop.permute.xlu0 %186 }
 0x40a   :  { %10747 = vmatpush3.bf16.msra.mxu0 %v1587_v15  ;;  %v13135_v47 = vpop.permute.xlu1 %181 }
 0x40b   :  { %10748 = vmatprep.subr.bf16.mxu0 %v1589_v17 }
 0x40d   :  { %10741 = vmatmul.mubr.msk.bf16.gmra.mrb[4].mxu0 %vm16203_vm2, %v11354_v18 }
 0x40e   :  { %10749 = vmatpush3.bf16.msra.mxu0 %v1589_v17  ;;  %10752 = vmatprep.mubr.msk.bf16.mxu0 %vm16203_vm2, %v11355_v19  ;;  %v13152_v9 = vpop.permute.xlu1 %191 }
 0x40f   :  { %10750 = vmatprep.subr.bf16.mxu0 %v1591_v20 }
 0x412   :  { %10751 = vmatpush3.bf16.msra.mxu0 %v1591_v20  ;;  %v13159_v20 = vpop.permute.xlu0 %196 }
 0x413   :  { %10760 = vmatprep.subr.bf16.mxu0 %v1711_v22 }
 0x415   :  { %10753 = vmatmul.mubr.msk.bf16.vlgmr.msra.gmra.mrb[0].mxu0 %vm16203_vm2, %v11356_v21 }
 0x416   :  { %10761 = vmatpush3.bf16.msra.mxu0 %v1711_v22  ;;  %10756 = vmatprep.mubr.msk.bf16.mxu0 %vm16203_vm2, %v11357_v23 }
 0x417   :  { %10762 = vmatprep.subr.bf16.mxu0 %v1713_v32 }
 0x41a   :  { %10763 = vmatpush3.bf16.msra.mxu0 %v1713_v32 }
 0x41b   :  { %10764 = vmatprep.subr.bf16.mxu0 %v1715_v30 }
 0x41d   :  { %10757 = vmatmul.mubr.msk.bf16.gmra.mrb[4].mxu0 %vm16203_vm2, %v11358_v29 }
 0x41e   :  { %10765 = vmatpush3.bf16.msra.mxu0 %v1715_v30  ;;  %10768 = vmatprep.mubr.msk.bf16.mxu0 %vm16203_vm2, %v11359_v33 }
 0x41f   :  { %10766 = vmatprep.subr.bf16.mxu0 %v1717_v36 }
 0x422   :  { %10767 = vmatpush3.bf16.msra.mxu0 %v1717_v36 }
 0x423   :  { %10776 = vmatprep.subr.bf16.mxu0 %v1837_v38 }
 0x425   :  { %10769 = vmatmul.mubr.msk.bf16.vlgmr.msra.gmra.mrb[0].mxu0 %vm16203_vm2, %v11360_v37 }
 0x426   :  { %10777 = vmatpush3.bf16.msra.mxu0 %v1837_v38  ;;  %10772 = vmatprep.mubr.msk.bf16.mxu0 %vm16203_vm2, %v11361_v62 }
 0x427   :  { %10778 = vmatprep.subr.bf16.mxu0 %v1839_v35 }
 0x42a   :  { %10779 = vmatpush3.bf16.msra.mxu0 %v1839_v35 }
 0x42b   :  { %10780 = vmatprep.subr.bf16.mxu0 %v1841_v27 }
 0x42d   :  { %10773 = vmatmul.mubr.msk.bf16.gmra.mrb[4].mxu0 %vm16203_vm2, %v11362_v10 }
 0x42e   :  { %10781 = vmatpush3.bf16.msra.mxu0 %v1841_v27  ;;  %10784 = vmatprep.mubr.msk.bf16.mxu0 %vm16203_vm2, %v11363_v34 }
 0x42f   :  { %10782 = vmatprep.subr.bf16.mxu0 %v1843_v0 }
 0x432   :  { %10783 = vmatpush3.bf16.msra.mxu0 %v1843_v0 }
 0x435   :  { %10785 = vmatmul.mubr.msk.bf16.vlgmr.msra.gmra.mrb[0].mxu0 %vm16203_vm2, %v11364_v14 }
 0x436   :  { %10788 = vmatprep.mubr.msk.bf16.mxu0 %vm16203_vm2, %v11365_v28 }
 0x43d   :  { %10789 = vmatmul.mubr.msk.bf16.gmra.mrb[4].mxu0 %vm16203_vm2, %v11366_v39  ;;  %v1972_v39 = vstv %s211_s9 }
 0x43e   :  { %12206 = vrcp.f32 %v1972_v39  ;;  %v3133_v39 = vsel %vm16204_vm1, %v12815_v59, 0.0 }
 0x508   :  { %v10786_v44 = vpop.f32.mrb[0].mxu0 }
 0x509   :  { %v1894_v48 = vpop.f32.mrb[1].mxu0  ;;  %v13130_v55 = vadd.f32 %v10786_v44, %v13120_v49 }
 0x50a   :  { %v13133_v56 = vadd.f32 %v1894_v48, %v13113_v42  ;;  %v10787_v54 = vpop.f32.mrb[2].mxu0 }
 0x50b   :  { %v1897_v58 = vpop.f32.mrb[3].mxu0  ;;  %v13140_v52 = vadd.f32 %v10787_v54, %v13122_v51  ;;  %v1941_v4 = vmul.f32 %v13127_v53, %v13130_v55 }
 0x50c   :  { %v1939_v60 = vmul.f32 %v13127_v53, %v13133_v56  ;;  %v10939_v61 = vadd.f32 %v1897_v58, %v13117_v45 }
 0x50d   :  { %v1942_v6 = vmul.f32 %v13127_v53, %v13140_v52  ;;  %v1951_v15 = vsel %vm1947_vm3, %v1941_v4, 0.0 }
 0x50e   :  { %v1940_v1 = vmul.f32 %v13127_v53, %v10939_v61  ;;  %v1948_v3 = vsel %vm1947_vm3, %v1939_v60, 0.0 }
 0x50f   :  { %v1953_v23 = vsel %vm1947_vm3, %v1942_v6, 0.0 }
 0x510   :  { %v1949_v7 = vsel %vm1947_vm3, %v1940_v1, 0.0  ;;  %v10790_v8 = vpop.f32.mrb[4].mxu0  ;;  %v12207_v1 = vpop.eup %12206 }
 0x511   :  { %v1950_v11 = vadd.f32 %v1949_v7, %v1948_v3  ;;  %v1910_v13 = vpop.f32.mrb[5].mxu0  ;;  %v13156_v18 = vadd.f32 %v10790_v8, %v13152_v9 }
 0x512   :  { %v10941_v17 = vadd.f32 %v1910_v13, %v13135_v47  ;;  %v10791_v19 = vpop.f32.mrb[6].mxu0  ;;  %v3127_v13 = vsel %vm16204_vm1, %v12805_v43, 0.0 }
 0x513   :  { %v1952_v21 = vadd.f32 %v1951_v15, %v1950_v11  ;;  %v1913_v22 = vpop.f32.mrb[7].mxu0  ;;  %v13164_v29 = vadd.f32 %v10791_v19, %v13159_v20  ;;  %v1945_v36 = vmul.f32 %v13127_v53, %v13156_v18 }
 0x514   :  { %v1943_v32 = vmul.f32 %v13127_v53, %v10941_v17  ;;  %v10943_v30 = vadd.f32 %v1913_v22, %v13143_v63 }
 0x515   :  { %v1954_v33 = vadd.f32 %v1953_v23, %v1952_v21  ;;  %v1946_v35 = vmul.f32 %v13127_v53, %v13164_v29  ;;  %v1959_v34 = vsel %vm1947_vm3, %v1945_v36, 0.0 }
 0x516   :  { %v1955_v37 = vsel %vm1947_vm3, %v1943_v32, 0.0  ;;  %v1944_v38 = vmul.f32 %v13127_v53, %v10943_v30 }
 0x517   :  { %v1956_v62 = vadd.f32 %v1955_v37, %v1954_v33  ;;  %v1961_v14 = vsel %vm1947_vm3, %v1946_v35, 0.0 }
 0x518   :  { %v1957_v10 = vsel %vm1947_vm3, %v1944_v38, 0.0 }
 0x519   :  { %v1958_v27 = vadd.f32 %v1957_v10, %v1956_v62 }
 0x51b   :  { %v1960_v0 = vadd.f32 %v1959_v34, %v1958_v27  ;;  %v3131_v34 = vsel %vm16204_vm1, %v12811_v57, 0.0 }
 0x51d   :  { %v1962_v28 = vadd.f32 %v1961_v14, %v1960_v0 }
 0x51f   :  { %1963 = vadd.xlane.f32.xlu1 %v1962_v28 }
 0x5ac   :  { %v1964_v40 = vpop.xlane.xlu1 %1963 }
 0x5ad   :  { %v1965_v44 = vrot.slane %v1964_v40, 4 }
 0x5af   :  { %v1966_v48 = vadd.f32 %v1965_v44, %v1964_v40 }
 0x5b1   :  { %v1967_v54 = vrot.slane %v1966_v48, 2 }
 0x5b3   :  { %v1968_v58 = vadd.f32 %v1967_v54, %v1966_v48 }
 0x5b5   :  { %v1969_v60 = vrot.slane %v1968_v58, 1 }
 0x5b7   :  { %v1970_v4 = vadd.f32 %v1969_v60, %v1968_v58 }
 0x5b9   :  { %11148 = vpush %v1970_v4 }
 0x5ba   :  { %11150 = vpush %v12207_v1 }
 0x5ea   :  { %s11149_s2 = spop %11148 }
 0x5eb   :  { %s13177_s1 = spop %11150 }
 0x5ec   :  { %s1975_s17 = smul.f32 %s13177_s1, %s11149_s2  ;;  %s16247_s2 = smov 108  }
 0x5ee   :  { %v1976_v3 = vstv %s1975_s17  ;;  %s16195_s17 = smov 123  }
 0x5ef   :  { %v1977_v6 = vsub.f32 %v13133_v56, %v1976_v3  ;;  %v1978_v7 = vsub.f32 %v10939_v61, %v1976_v3  ;;  %v1979_v8 = vsub.f32 %v13130_v55, %v1976_v3  ;;  %v1980_v11 = vsub.f32 %v13140_v52, %v1976_v3 }
 0x5f0   :  { %v1981_v15 = vsub.f32 %v10941_v17, %v1976_v3  ;;  %v1982_v19 = vsub.f32 %v10943_v30, %v1976_v3  ;;  %v3126_v55 = vsel %vm16204_vm1, %v12803_v41, 0.0  ;;  %v3129_v52 = vsel %vm16204_vm1, %v12809_v50, 0.0 }
 0x5f1   :  { %v13186_v21 = vmul.f32 %v13127_v53, %v1977_v6  ;;  %v13189_v22 = vmul.f32 %v13127_v53, %v1978_v7  ;;  %v13192_v23 = vmul.f32 %v13127_v53, %v1979_v8  ;;  %v13195_v56 = vmul.f32 %v13127_v53, %v1980_v11 }
 0x5f2   :  { %v1983_v61 = vsub.f32 %v13156_v18, %v1976_v3  ;;  %v13203_v17 = vmul.f32 %v13127_v53, %v1981_v15  ;;  %v3128_v36 = vadd.f32 %v3127_v13, %v3126_v55  ;;  %v1984_v37 = vsub.f32 %v13164_v29, %v1976_v3 }
 0x5f3   :  { %v1993_v32 = vmul.f32 %v13186_v21, %v13186_v21  ;;  %v1994_v30 = vmul.f32 %v13189_v22, %v13189_v22  ;;  %v1995_v33 = vmul.f32 %v13192_v23, %v13192_v23  ;;  %v13213_v38 = vmul.f32 %v13127_v53, %v1982_v19 }
 0x5f4   :  { %v1996_v18 = vmul.f32 %v13195_v56, %v13195_v56  ;;  %v3130_v10 = vadd.f32 %v3129_v52, %v3128_v36  ;;  %v13222_v0 = vmul.f32 %v13127_v53, %v1983_v61  ;;  %v1997_v29 = vmul.f32 %v13203_v17, %v13203_v17 }
 0x5f5   :  { %v2001_v62 = vsel %vm1947_vm3, %v1993_v32, 0.0  ;;  %v2002_v35 = vsel %vm1947_vm3, %v1994_v30, 0.0  ;;  %v2004_v14 = vsel %vm1947_vm3, %v1995_v33, 0.0  ;;  %v13230_v40 = vmul.f32 %v13127_v53, %v1984_v37 }
 0x5f6   :  { %v2003_v27 = vadd.f32 %v2002_v35, %v2001_v62  ;;  %v1998_v44 = vmul.f32 %v13213_v38, %v13213_v38  ;;  %v2006_v48 = vsel %vm1947_vm3, %v1996_v18, 0.0  ;;  %v3132_v54 = vadd.f32 %v3131_v34, %v3130_v10 }
 0x5f7   :  { %v1999_v60 = vmul.f32 %v13222_v0, %v13222_v0  ;;  %v2008_v4 = vsel %vm1947_vm3, %v1997_v29, 0.0  ;;  %v3135_v6 = vsel %vm16204_vm1, %v12817_v5, 0.0  ;;  %v2000_v7 = vmul.f32 %v13230_v40, %v13230_v40 }
 0x5f8   :  { %v2005_v28 = vadd.f32 %v2004_v14, %v2003_v27  ;;  %v3134_v1 = vadd.f32 %v3133_v39, %v3132_v54  ;;  %v2010_v8 = vsel %vm1947_vm3, %v1998_v44, 0.0  ;;  %v3137_v15 = vsel %vm16204_vm1, %v12821_v12, 0.0 }
 0x5f9   :  { %v2012_v13 = vsel %vm1947_vm3, %v1999_v60, 0.0  ;;  %v2014_v52 = vsel %vm1947_vm3, %v2000_v7, 0.0  ;;  %v3139_v30 = vsel %vm16204_vm1, %v12823_v16, 0.0 }
 0x5fa   :  { %v2007_v58 = vadd.f32 %v2006_v48, %v2005_v28  ;;  %v3136_v55 = vadd.f32 %v3135_v6, %v3134_v1  ;;  %v135_v1 = vld [vmem:[%s16178_s7] sm:$0xff] }
 0x5fc   :  { %v2009_v3 = vadd.f32 %v2008_v4, %v2007_v58  ;;  %v3138_v32 = vadd.f32 %v3137_v15, %v3136_v55 }
 0x5fe   :  { %v2011_v11 = vadd.f32 %v2010_v8, %v2009_v3  ;;  %v3140_v33 = vadd.f32 %v3139_v30, %v3138_v32 }
 0x600   :  { %v2013_v19 = vadd.f32 %v2012_v13, %v2011_v11 }
 0x602   :  { %v2015_v61 = vadd.f32 %v2014_v52, %v2013_v19 }
 0x604   :  { %2016 = vadd.xlane.f32.xlu0 %v2015_v61 }
 0x608   :  { %3141 = vadd.xlane.f32.xlu0 %v3140_v33 }
 0x691   :  { %v2017_v36 = vpop.xlane.xlu0 %2016 }
 0x692   :  { %v2018_v37 = vrot.slane %v2017_v36, 4 }
 0x694   :  { %v2019_v18 = vadd.f32 %v2018_v37, %v2017_v36 }
 0x695   :  { %v3142_v34 = vpop.xlane.xlu0 %3141 }
 0x696   :  { %v2020_v62 = vrot.slane %v2019_v18, 2  ;;  %v3143_v29 = vrot.slane %v3142_v34, 4 }
 0x698   :  { %v2021_v35 = vadd.f32 %v2020_v62, %v2019_v18  ;;  %v3144_v14 = vadd.f32 %v3143_v29, %v3142_v34 }
 0x69a   :  { %v2022_v10 = vrot.slane %v2021_v35, 1  ;;  %v3145_v28 = vrot.slane %v3144_v14, 2 }
 0x69c   :  { %v2023_v27 = vadd.f32 %v2022_v10, %v2021_v35  ;;  %v3146_v44 = vadd.f32 %v3145_v28, %v3144_v14 }
 0x69e   :  { %11152 = vpush %v2023_v27  ;;  %v3147_v48 = vrot.slane %v3146_v44, 1 }
 0x6a0   :  { %v3148_v58 = vadd.f32 %v3147_v48, %v3146_v44 }
 0x6cf   :  { %s11153_s26 = spop %11152 }
 0x6d0   :  { %s2028_s18 = smul.f32 %s11153_s26, %s13177_s1 }
 0x6d2   :  { %s2029_s6 = sadd.f32 1e-05, %s2028_s18 }
 0x6d4   :  { %v2030_v39 = vstv %s2029_s6 }
 0x6d5   :  { %12208 = vrsqrt.f32 %v2030_v39 }
 0x6df   :  { %v12209_v54 = vpop.eup %12208 }
 0x6e0   :  { %11154 = vpush %v12209_v54 }
 0x6e1   :  { %11156 = vpush %v3148_v58 }
 0x711   :  { %s11155_s27 = spop %11154 }
 0x712   :  { %v13250_v60 = vstv %s11155_s27  ;;  %s11157_s28 = spop %11156 }
 0x713   :  { %s3152_s21 = smul.f32 0.00019290124, %s11157_s28  ;;  %v2034_v4 = vmul.f32 %v13250_v60, %v13186_v21  ;;  %v143_v21 = vld [vmem:[%s16179_s8] sm:$0xff]  ;;  %s16239_s28 = smov 31  }
 0x715   :  { %v3153_v3 = vstv %s3152_s21  ;;  %v2042_v13 = vmul.f32 %v2034_v4, %v135_v1  ;;  %s16196_s21 = smov 19  }
 0x716   :  { %v3154_v6 = vsub.f32 %v12803_v41, %v3153_v3  ;;  %v3155_v7 = vsub.f32 %v12805_v43, %v3153_v3  ;;  %v3156_v8 = vsub.f32 %v12809_v50, %v3153_v3  ;;  %v3157_v11 = vsub.f32 %v12811_v57, %v3153_v3 }
 0x717   :  { %v3158_v15 = vsub.f32 %v12815_v59, %v3153_v3  ;;  %v3159_v61 = vsub.f32 %v12817_v5, %v3153_v3  ;;  %v3160_v57 = vsub.f32 %v12821_v12, %v3153_v3  ;;  %v2050_v33 = vadd.f32 %v2042_v13, %v143_v21 }
 0x718   :  { %v3162_v19 = vmul.f32 %v3154_v6, %v3154_v6  ;;  %v3163_v55 = vmul.f32 %v3155_v7, %v3155_v7  ;;  %v3164_v52 = vmul.f32 %v3156_v8, %v3156_v8  ;;  %v3165_v32 = vmul.f32 %v3157_v11, %v3157_v11 }
 0x719   :  { %v3166_v30 = vmul.f32 %v3158_v15, %v3158_v15  ;;  %v3161_v37 = vsub.f32 %v12823_v16, %v3153_v3  ;;  %v3167_v18 = vmul.f32 %v3159_v61, %v3159_v61  ;;  %v13272_v35 = vmax.f32 %v2050_v33, 0.0 }
 0x71a   :  { %v3170_v41 = vsel %vm16204_vm1, %v3162_v19, 0.0  ;;  %v3171_v43 = vsel %vm16204_vm1, %v3163_v55, 0.0  ;;  %v3173_v59 = vsel %vm16204_vm1, %v3164_v52, 0.0  ;;  %v3175_v62 = vsel %vm16204_vm1, %v3165_v32, 0.0  ;;  %v11367_v19 = vld [vmem:[%s16176_s5] sm:$0xff]  }
 0x71b   :  { %v3172_v50 = vadd.f32 %v3171_v43, %v3170_v41  ;;  %v3168_v10 = vmul.f32 %v3160_v57, %v3160_v57  ;;  %v3177_v27 = vsel %vm16204_vm1, %v3166_v30, 0.0  ;;  %2066 = vst.msk [vmem:[#allocation3] sm:$0x1] %vm16218_vm0, %v13272_v35  ;;  %v3169_v34 = vmul.f32 %v3161_v37, %v3161_v37  ;;  %10800 = vmatprep.mubr.msk.bf16.mxu0 %vm16203_vm2, %v11367_v19 }
 0x71c   :  { %v3179_v29 = vsel %vm16204_vm1, %v3167_v18, 0.0  ;;  %v12217_v18 = vld [vmem:[%s16174_s3] sm:$0xff]  ;;  %vm2262_vm0 = vcmask 51202  }
 0x71d   :  { %v3174_v36 = vadd.f32 %v3173_v59, %v3172_v50  ;;  %v3181_v28 = vsel %vm16204_vm1, %v3168_v10, 0.0  ;;  %v3183_v39 = vsel %vm16204_vm1, %v3169_v34, 0.0  ;;  %v12224_v34 = vld [vmem:[%s16174_s3 + $0x38] sm:$0xff] }
 0x71f   :  { %v3176_v5 = vadd.f32 %v3175_v62, %v3174_v36 }
 0x721   :  { %v3178_v12 = vadd.f32 %v3177_v27, %v3176_v5  ;;  %v12218_v5 = vld [vmem:[%s16174_s3 + $0x8] sm:$0xff]  ;;  %v12223_v27 = vld [vmem:[%s16174_s3 + $0x30] sm:$0xff] }
 0x723   :  { %v3180_v14 = vadd.f32 %v3179_v29, %v3178_v12 }
 0x725   :  { %v3182_v16 = vadd.f32 %v3181_v28, %v3180_v14  ;;  %v12225_v14 = vld [vmem:[%s16175_s4] sm:$0xff] }
 0x727   :  { %v3184_v44 = vadd.f32 %v3183_v39, %v3182_v16  ;;  %v12226_v16 = vld [vmem:[%s16175_s4 + $0x8] sm:$0xff] }
 0x729   :  { %3185 = vadd.xlane.f32.xlu1 %v3184_v44  ;;  %v12227_v44 = vld [vmem:[%s16175_s4 + $0x10] sm:$0xff] }
 0x7b6   :  { %v3186_v48 = vpop.xlane.xlu1 %3185 }
 0x7b7   :  { %v3187_v54 = vrot.slane %v3186_v48, 4 }
 0x7b9   :  { %v3188_v58 = vadd.f32 %v3187_v54, %v3186_v48  ;;  %v12228_v54 = vld [vmem:[%s16175_s4 + $0x18] sm:$0xff] }
 0x7bb   :  { %v3189_v4 = vrot.slane %v3188_v58, 2 }
 0x7bd   :  { %v3190_v1 = vadd.f32 %v3189_v4, %v3188_v58  ;;  %v12229_v4 = vld [vmem:[%s16175_s4 + $0x20] sm:$0xff]  ;;  %s16237_s4 = smov 25  }
 0x7bf   :  { %v3191_v3 = vrot.slane %v3190_v1, 1 }
 0x7c1   :  { %v3192_v13 = vadd.f32 %v3191_v3, %v3190_v1 }
 0x7c3   :  { %11158 = vpush %v3192_v13 }
 0x7f4   :  { %s11159_s26 = spop %11158 }
 0x7f5   :  { %s3196_s18 = smul.f32 0.00019290124, %s11159_s26  ;;  %s16197_s26 = smov 1  }
 0x7f7   :  { %s3197_s6 = sadd.f32 1e-05, %s3196_s18  ;;  %s16201_s18 = smov 43  }
 0x7f9   :  { %v3198_v55 = vstv %s3197_s6  ;;  %s16235_s6 = smov 62  }
 0x7fa   :  { %12210 = vrsqrt.f32 %v3198_v55 }
 0x804   :  { %v12211_v52 = vpop.eup %12210 }
 0x805   :  { %11160 = vpush %v12211_v52 }
 0x836   :  { %s11161_s27 = spop %11160 }
 0x837   :  { %v3201_v21 = vstv %s11161_s27  ;;  %s12280_s27 = smov 56  }
 0x838   :  { %v3202_v32 = vmul.f32 %v3201_v21, %v3154_v6  ;;  %v3203_v41 = vmul.f32 %v3201_v21, %v3155_v7  ;;  %v3204_v43 = vmul.f32 %v3201_v21, %v3156_v8  ;;  %v3205_v50 = vmul.f32 %v3201_v21, %v3157_v11  ;;  %v12219_v6 = vld [vmem:[%s16174_s3 + $0x10] sm:$0xff]  ;;  %v12220_v8 = vld [vmem:[%s16174_s3 + $0x18] sm:$0xff] }
 0x839   :  { %v3206_v30 = vmul.f32 %v3201_v21, %v3158_v15  ;;  %v3207_v59 = vmul.f32 %v3201_v21, %v3159_v61  ;;  %v3208_v33 = vmul.f32 %v3201_v21, %v3160_v57  ;;  %v3209_v36 = vmul.f32 %v3201_v21, %v3161_v37  ;;  %v12221_v15 = vld [vmem:[%s16174_s3 + $0x20] sm:$0xff]  ;;  %v12222_v57 = vld [vmem:[%s16174_s3 + $0x28] sm:$0xff]  ;;  %s12271_s3 = smov 37  }
 0x83a   :  { %v3210_v62 = vmul.f32 %v12217_v18, %v3202_v32  ;;  %v3211_v10 = vmul.f32 %v12218_v5, %v3203_v41  ;;  %v3212_v7 = vmul.f32 %v12219_v6, %v3204_v43  ;;  %v3213_v11 = vmul.f32 %v12220_v8, %v3205_v50 }
 0x83b   :  { %v3214_v61 = vmul.f32 %v12221_v15, %v3206_v30  ;;  %v3215_v37 = vmul.f32 %v12222_v57, %v3207_v59  ;;  %v3216_v12 = vmul.f32 %v12223_v27, %v3208_v33  ;;  %v3217_v29 = vmul.f32 %v12224_v34, %v3209_v36  ;;  %v11369_v15 = vld [vmem:[%s16176_s5 + $0x10] sm:$0xff]   ;;  %v11372_v34 = vld [vmem:[%s16176_s5 + $0x28] sm:$0xff]  }
 0x83c   :  { %v3218_v28 = vadd.f32 %v12225_v14, %v3210_v62  ;;  %v3219_v39 = vadd.f32 %v12226_v16, %v3211_v10  ;;  %v3220_v48 = vadd.f32 %v12227_v44, %v3212_v7  ;;  %v3221_v58 = vadd.f32 %v12228_v54, %v3213_v11  ;;  %v11371_v7 = vld [vmem:[%s16176_s5 + $0x20] sm:$0xff]   ;;  %v11368_v11 = vld [vmem:[%s16176_s5 + $0x8] sm:$0xff]   ;;  %v11373_v14 = vld [vmem:[%s16176_s5 + $0x30] sm:$0xff]  }
 0x83d   :  { %v3222_v1 = vadd.f32 %v12229_v4, %v3214_v61  ;;  %v3223_v3 = vadd.f32 %v3215_v37, %v12894_v24  ;;  %v3224_v13 = vadd.f32 %v3216_v12, %v12899_v25  ;;  %v3225_v19 = vadd.f32 %v3217_v29, %v12904_v26  ;;  %10816 = vmatprep.mubr.msk.bf16.mxu1 %vm16203_vm2, %v11371_v7  ;;  %v11370_v61 = vld [vmem:[%s16176_s5 + $0x18] sm:$0xff]   ;;  %v11375_v44 = vld [vmem:[%s16176_s5 + $0x40] sm:$0xff]   ;;  %v11376_v54 = vld [vmem:[%s16176_s5 + $0x48] sm:$0xff]  }
 0x83e   :  { %v3226_v55 = vmax.f32 %v3218_v28, 0.0  ;;  %v3227_v52 = vmax.f32 %v3219_v39, 0.0  ;;  %v3228_v21 = vmax.f32 %v3220_v48, 0.0  ;;  %v3229_v32 = vmax.f32 %v3221_v58, 0.0  ;;  %v11374_v16 = vld [vmem:[%s16176_s5 + $0x38] sm:$0xff]   ;;  %v11377_v4 = vld [vmem:[%s16176_s5 + $0x50] sm:$0xff]  }
 0x83f   :  { %v3230_v41 = vmax.f32 %v3222_v1, 0.0  ;;  %v3231_v43 = vmax.f32 %v3223_v3, 0.0  ;;  %v3232_v50 = vmax.f32 %v3224_v13, 0.0  ;;  %v3233_v30 = vmax.f32 %v3225_v19, 0.0  ;;  %v11378_v3 = vld [vmem:[%s16176_s5 + $0x58] sm:$0xff]   ;;  %v11379_v19 = vld [vmem:[%s16176_s5 + $0x60] sm:$0xff]  }
 0x840   :  { %3234 = vst.msk [vmem:[#allocation2] sm:$0xff] %vm16204_vm1, %v3226_v55  ;;  %3235 = vst.msk [vmem:[#allocation2 + $0x8] sm:$0xff] %vm16204_vm1, %v3227_v52  ;;  %v11380_v52 = vld [vmem:[%s16176_s5 + $0x68] sm:$0xff]   ;;  %v11389_v7 = vld [vmem:[%s16176_s5 + $0xb0] sm:$0xff]  }
 0x841   :  { %3236 = vst.msk [vmem:[#allocation2 + $0x10] sm:$0xff] %vm16204_vm1, %v3228_v21  ;;  %3237 = vst.msk [vmem:[#allocation2 + $0x18] sm:$0xff] %vm16204_vm1, %v3229_v32  ;;  %v11381_v32 = vld [vmem:[%s16176_s5 + $0x70] sm:$0xff]  }
 0x842   :  { %3238 = vst.msk [vmem:[#allocation2 + $0x20] sm:$0xff] %vm16204_vm1, %v3230_v41  ;;  %3239 = vst.msk [vmem:[#allocation2 + $0x28] sm:$0xff] %vm16204_vm1, %v3231_v43  ;;  %v11382_v43 = vld [vmem:[%s16176_s5 + $0x78] sm:$0xff]  }
 0x843   :  { %3240 = vst.msk [vmem:[#allocation2 + $0x30] sm:$0xff] %vm16204_vm1, %v3232_v50  ;;  %3241 = vst.msk [vmem:[#allocation2 + $0x38] sm:$0xff] %vm16204_vm1, %v3233_v30  ;;  %v11383_v30 = vld [vmem:[%s16176_s5 + $0x80] sm:$0xff]   ;;  %vm16212_vm1 = vcmask 850944  }
 0x847   :  { %v3250_v26 = vld [vmem:[#allocation2] sm:$0xff]  ;;  %v3251_v33 = vld [vmem:[#allocation2 + $0x8] sm:$0xff] }
 0x848   :  { %v3252_v24 = vld [vmem:[#allocation2 + $0x10] sm:$0xff]  ;;  %v3253_v25 = vld [vmem:[#allocation2 + $0x18] sm:$0xff]  ;;  %v3258_v36 = vpack.c.bf16 %v3251_v33, %v3250_v26 }
 0x849   :  { %v3259_v59 = vpack.c.bf16 %v3253_v25, %v3252_v24  ;;  %v3254_v18 = vld [vmem:[#allocation2 + $0x20] sm:$0xff]  ;;  %v3255_v62 = vld [vmem:[#allocation2 + $0x28] sm:$0xff]  ;;  %v11384_v25 = vld [vmem:[%s16176_s5 + $0x88] sm:$0xff]  }
 0x84a   :  { %v3256_v5 = vld [vmem:[#allocation2 + $0x30] sm:$0xff]  ;;  %v3257_v10 = vld [vmem:[#allocation2 + $0x38] sm:$0xff]  ;;  %3399 = vrot.lane.b32.xlu0 %v3258_v36, %s12258_s19  ;;  %10792 = vmatprep.subr.bf16.mxu0 %v3258_v36  ;;  %v3260_v6 = vpack.c.bf16 %v3255_v62, %v3254_v18 }
 0x84b   :  { %3401 = vrot.lane.b32.xlu1 %v3259_v59, %s12258_s19  ;;  %10793 = vmatpush3.bf16.msra.mxu0 %v3258_v36  ;;  %v3261_v8 = vpack.c.bf16 %v3257_v10, %v3256_v5  ;;  %v11387_v62 = vld [vmem:[%s16176_s5 + $0xa0] sm:$0xff]   ;;  %v11388_v10 = vld [vmem:[%s16176_s5 + $0xa8] sm:$0xff]  }
 0x84c   :  { %10794 = vmatprep.subr.bf16.mxu0 %v3259_v59 }
 0x84e   :  { %3405 = vrot.lane.b32.xlu0 %v3261_v8, %s12258_s19 }
 0x84f   :  { %3403 = vrot.lane.b32.xlu1 %v3260_v6, %s12258_s19  ;;  %10795 = vmatpush3.bf16.msra.mxu0 %v3259_v59  ;;  %s12282_s19 = smov 122  }
 0x850   :  { %10796 = vmatprep.subr.bf16.mxu0 %v3260_v6 }
 0x852   :  { %3526 = vrot.lane.b32.xlu0 %v3259_v59, %s12259_s20 }
 0x853   :  { %3524 = vrot.lane.b32.xlu1 %v3258_v36, %s12259_s20  ;;  %10797 = vmatpush3.bf16.msra.mxu0 %v3260_v6 }
 0x854   :  { %10798 = vmatprep.subr.bf16.mxu0 %v3261_v8 }
 0x856   :  { %3530 = vrot.lane.b32.xlu0 %v3261_v8, %s12259_s20 }
 0x857   :  { %3528 = vrot.lane.b32.xlu1 %v3260_v6, %s12259_s20  ;;  %10799 = vmatpush3.bf16.msra.mxu0 %v3261_v8  ;;  %s12267_s20 = smov 61  }
 0x85a   :  { %3651 = vrot.lane.b32.xlu0 %v3259_v59, %s12260_s23  ;;  %10801 = vmatmul.mubr.msk.bf16.vlgmr.msra.gmra.mrb[8].mxu0 %vm16203_vm2, %v11368_v11  ;;  %v11390_v11 = vld [vmem:[%s16176_s5 + $0xb8] sm:$0xff]  }
 0x85b   :  { %3649 = vrot.lane.b32.xlu1 %v3258_v36, %s12260_s23  ;;  %10804 = vmatprep.mubr.msk.bf16.mxu0 %vm16203_vm2, %v11369_v15 }
 0x85e   :  { %3655 = vrot.lane.b32.xlu0 %v3261_v8, %s12260_s23 }
 0x85f   :  { %3653 = vrot.lane.b32.xlu1 %v3260_v6, %s12260_s23  ;;  %s16246_s23 = smov 109  }
 0x862   :  { %3776 = vrot.lane.b32.xlu0 %v3259_v59, %s16193_s29  ;;  %10805 = vmatmul.mubr.msk.bf16.gmra.mrb[12].mxu0 %vm16203_vm2, %v11370_v61  ;;  %v11391_v61 = vld [vmem:[%s16176_s5 + $0xc0] sm:$0xff]  }
 0x863   :  { %3774 = vrot.lane.b32.xlu1 %v3258_v36, %s16193_s29 }
 0x866   :  { %3780 = vrot.lane.b32.xlu0 %v3261_v8, %s16193_s29 }
 0x867   :  { %3778 = vrot.lane.b32.xlu1 %v3260_v6, %s16193_s29  ;;  %s12285_s29 = smov 98  }
 0x86a   :  { %3901 = vrot.lane.b32.xlu0 %v3259_v59, %s16238_s30 }
 0x86b   :  { %3899 = vrot.lane.b32.xlu1 %v3258_v36, %s16238_s30 }
 0x86e   :  { %3905 = vrot.lane.b32.xlu0 %v3261_v8, %s16238_s30 }
 0x86f   :  { %3903 = vrot.lane.b32.xlu1 %v3260_v6, %s16238_s30 }
 0x872   :  { %4026 = vrot.lane.b32.xlu0 %v3259_v59, %s16236_s0 }
 0x873   :  { %4024 = vrot.lane.b32.xlu1 %v3258_v36, %s16236_s0 }
 0x876   :  { %4030 = vrot.lane.b32.xlu0 %v3261_v8, %s16236_s0 }
 0x877   :  { %4028 = vrot.lane.b32.xlu1 %v3260_v6, %s16236_s0 }
 0x87a   :  { %4151 = vrot.lane.b32.xlu0 %v3259_v59, %s16246_s23 }
 0x87b   :  { %4149 = vrot.lane.b32.xlu1 %v3258_v36, %s16246_s23 }
 0x87e   :  { %4155 = vrot.lane.b32.xlu0 %v3261_v8, %s16246_s23 }
 0x87f   :  { %4153 = vrot.lane.b32.xlu1 %v3260_v6, %s16246_s23  ;;  %s12268_s23 = smov 55  }
 0x882   :  { %4276 = vrot.lane.b32.xlu0 %v3259_v59, %s16247_s2  ;;  %v11385_v59 = vld [vmem:[%s16176_s5 + $0x90] sm:$0xff]  }
 0x883   :  { %4274 = vrot.lane.b32.xlu1 %v3258_v36, %s16247_s2  ;;  %v11386_v36 = vld [vmem:[%s16176_s5 + $0x98] sm:$0xff]  }
 0x886   :  { %4280 = vrot.lane.b32.xlu0 %v3261_v8, %s16247_s2 }
 0x887   :  { %4278 = vrot.lane.b32.xlu1 %v3260_v6, %s16247_s2  ;;  %s16241_s2 = smov 49  }
 0x8bc   :  { %v3400_v37 = vpop.permute.xlu0 %3399 }
 0x8bd   :  { %v3402_v57 = vpop.permute.xlu1 %3401  ;;  %10808 = vmatprep.subr.bf16.mxu1 %v3400_v37 }
 0x8be   :  { %10809 = vmatpush3.bf16.msra.mxu1 %v3400_v37  ;;  %v11392_v37 = vld [vmem:[%s16176_s5 + $0xc8] sm:$0xff]  }
 0x8bf   :  { %10810 = vmatprep.subr.bf16.mxu1 %v3402_v57 }
 0x8c0   :  { %v3406_v12 = vpop.permute.xlu0 %3405 }
 0x8c1   :  { %v3404_v27 = vpop.permute.xlu1 %3403 }
 0x8c2   :  { %10811 = vmatpush3.bf16.msra.mxu1 %v3402_v57 }
 0x8c3   :  { %10812 = vmatprep.subr.bf16.mxu1 %v3404_v27 }
 0x8c4   :  { %v3527_v28 = vpop.permute.xlu0 %3526 }
 0x8c5   :  { %v3525_v29 = vpop.permute.xlu1 %3524 }
 0x8c6   :  { %10813 = vmatpush3.bf16.msra.mxu1 %v3404_v27 }
 0x8c7   :  { %10814 = vmatprep.subr.bf16.mxu1 %v3406_v12 }
 0x8c8   :  { %v3531_v48 = vpop.permute.xlu0 %3530 }
 0x8c9   :  { %v3529_v39 = vpop.permute.xlu1 %3528 }
 0x8ca   :  { %10815 = vmatpush3.bf16.msra.mxu1 %v3406_v12  ;;  %v11393_v12 = vld [vmem:[%s16176_s5 + $0xd0] sm:$0xff]  }
 0x8cb   :  { %10824 = vmatprep.subr.bf16.mxu1 %v3525_v29 }
 0x8cc   :  { %v3652_v1 = vpop.permute.xlu0 %3651 }
 0x8cd   :  { %10817 = vmatmul.mubr.msk.bf16.vlgmr.msra.gmra.mrb[64].mxu1 %vm16203_vm2, %v11372_v34  ;;  %v3650_v58 = vpop.permute.xlu1 %3649 }
 0x8ce   :  { %10825 = vmatpush3.bf16.msra.mxu1 %v3525_v29  ;;  %10820 = vmatprep.mubr.msk.bf16.mxu1 %vm16203_vm2, %v11373_v14  ;;  %v11394_v29 = vld [vmem:[%s16176_s5 + $0xd8] sm:$0xff]  }
 0x8cf   :  { %10826 = vmatprep.subr.bf16.mxu1 %v3527_v28 }
 0x8d0   :  { %v3656_v55 = vpop.permute.xlu0 %3655 }
 0x8d1   :  { %v3654_v13 = vpop.permute.xlu1 %3653 }
 0x8d2   :  { %10827 = vmatpush3.bf16.msra.mxu1 %v3527_v28  ;;  %v11395_v28 = vld [vmem:[%s16176_s5 + $0xe0] sm:$0xff]  }
 0x8d3   :  { %10828 = vmatprep.subr.bf16.mxu1 %v3529_v39 }
 0x8d4   :  { %v3777_v41 = vpop.permute.xlu0 %3776 }
 0x8d5   :  { %10821 = vmatmul.mubr.msk.bf16.gmra.mrb[68].mxu1 %vm16203_vm2, %v11374_v16  ;;  %v3775_v21 = vpop.permute.xlu1 %3774 }
 0x8d6   :  { %10829 = vmatpush3.bf16.msra.mxu1 %v3529_v39  ;;  %10832 = vmatprep.mubr.msk.bf16.mxu1 %vm16203_vm2, %v11375_v44  ;;  %v11396_v39 = vld [vmem:[%s16176_s5 + $0xe8] sm:$0xff]  }
 0x8d7   :  { %10830 = vmatprep.subr.bf16.mxu1 %v3531_v48 }
 0x8d8   :  { %v3781_v24 = vpop.permute.xlu0 %3780 }
 0x8d9   :  { %v3779_v50 = vpop.permute.xlu1 %3778 }
 0x8da   :  { %10831 = vmatpush3.bf16.msra.mxu1 %v3531_v48  ;;  %v11397_v48 = vld [vmem:[%s16176_s5 + $0xf0] sm:$0xff]  }
 0x8db   :  { %10840 = vmatprep.subr.bf16.mxu1 %v3650_v58 }
 0x8dc   :  { %v3902_v33 = vpop.permute.xlu0 %3901 }
 0x8dd   :  { %10833 = vmatmul.mubr.msk.bf16.vlgmr.msra.gmra.mrb[64].mxu1 %vm16203_vm2, %v11376_v54  ;;  %v3900_v26 = vpop.permute.xlu1 %3899 }
 0x8de   :  { %10841 = vmatpush3.bf16.msra.mxu1 %v3650_v58  ;;  %10836 = vmatprep.mubr.msk.bf16.mxu1 %vm16203_vm2, %v11377_v4 }
 0x8df   :  { %10842 = vmatprep.subr.bf16.mxu1 %v3652_v1 }
 0x8e0   :  { %v3906_v5 = vpop.permute.xlu0 %3905 }
 0x8e1   :  { %v3904_v18 = vpop.permute.xlu1 %3903 }
 0x8e2   :  { %10843 = vmatpush3.bf16.msra.mxu1 %v3652_v1 }
 0x8e3   :  { %10844 = vmatprep.subr.bf16.mxu1 %v3654_v13 }
 0x8e4   :  { %v4027_v8 = vpop.permute.xlu0 %4026 }
 0x8e5   :  { %10837 = vmatmul.mubr.msk.bf16.gmra.mrb[68].mxu1 %vm16203_vm2, %v11378_v3  ;;  %v4025_v6 = vpop.permute.xlu1 %4024 }
 0x8e6   :  { %10845 = vmatpush3.bf16.msra.mxu1 %v3654_v13  ;;  %10848 = vmatprep.mubr.msk.bf16.mxu1 %vm16203_vm2, %v11379_v19  ;;  %v11398_v13 = vld [vmem:[%s16176_s5 + $0xf8] sm:$0xff]  }
 0x8e7   :  { %10846 = vmatprep.subr.bf16.mxu1 %v3656_v55 }
 0x8e8   :  { %v4031_v57 = vpop.permute.xlu0 %4030 }
 0x8e9   :  { %v4029_v15 = vpop.permute.xlu1 %4028 }
 0x8ea   :  { %10847 = vmatpush3.bf16.msra.mxu1 %v3656_v55  ;;  %v11399_v55 = vld [vmem:[%s16176_s5 + $0x100] sm:$0xff]  }
 0x8eb   :  { %10856 = vmatprep.subr.bf16.mxu1 %v3775_v21 }
 0x8ec   :  { %v4152_v34 = vpop.permute.xlu0 %4151 }
 0x8ed   :  { %10849 = vmatmul.mubr.msk.bf16.vlgmr.msra.gmra.mrb[64].mxu1 %vm16203_vm2, %v11380_v52  ;;  %v4150_v27 = vpop.permute.xlu1 %4149 }
 0x8ee   :  { %10857 = vmatpush3.bf16.msra.mxu1 %v3775_v21  ;;  %10852 = vmatprep.mubr.msk.bf16.mxu1 %vm16203_vm2, %v11381_v32 }
 0x8ef   :  { %10858 = vmatprep.subr.bf16.mxu1 %v3777_v41 }
 0x8f0   :  { %v4156_v16 = vpop.permute.xlu0 %4155 }
 0x8f1   :  { %v4154_v14 = vpop.permute.xlu1 %4153 }
 0x8f2   :  { %10859 = vmatpush3.bf16.msra.mxu1 %v3777_v41 }
 0x8f3   :  { %10860 = vmatprep.subr.bf16.mxu1 %v3779_v50 }
 0x8f4   :  { %v4277_v58 = vpop.permute.xlu0 %4276 }
 0x8f5   :  { %10853 = vmatmul.mubr.msk.bf16.gmra.mrb[68].mxu1 %vm16203_vm2, %v11382_v43  ;;  %v4275_v44 = vpop.permute.xlu1 %4274 }
 0x8f6   :  { %10861 = vmatpush3.bf16.msra.mxu1 %v3779_v50  ;;  %10864 = vmatprep.mubr.msk.bf16.mxu1 %vm16203_vm2, %v11383_v30  ;;  %v11400_v50 = vld [vmem:[%s16176_s5 + $0x108] sm:$0xff]   ;;  %v11401_v30 = vld [vmem:[%s16176_s5 + $0x110] sm:$0xff]  }
 0x8f7   :  { %10862 = vmatprep.subr.bf16.mxu1 %v3781_v24 }
 0x8f8   :  { %v4281_v21 = vpop.permute.xlu0 %4280 }
 0x8f9   :  { %v4279_v19 = vpop.permute.xlu1 %4278 }
 0x8fa   :  { %10863 = vmatpush3.bf16.msra.mxu1 %v3781_v24  ;;  %v11402_v24 = vld [vmem:[%s16176_s5 + $0x118] sm:$0xff]  }
 0x8fb   :  { %10872 = vmatprep.subr.bf16.mxu1 %v3900_v26 }
 0x8fd   :  { %10865 = vmatmul.mubr.msk.bf16.vlgmr.msra.gmra.mrb[64].mxu1 %vm16203_vm2, %v11384_v25 }
 0x8fe   :  { %10873 = vmatpush3.bf16.msra.mxu1 %v3900_v26  ;;  %10868 = vmatprep.mubr.msk.bf16.mxu1 %vm16203_vm2, %v11385_v59 }
 0x8ff   :  { %10874 = vmatprep.subr.bf16.mxu1 %v3902_v33 }
 0x902   :  { %10875 = vmatpush3.bf16.msra.mxu1 %v3902_v33 }
 0x903   :  { %10876 = vmatprep.subr.bf16.mxu1 %v3904_v18 }
 0x905   :  { %10869 = vmatmul.mubr.msk.bf16.gmra.mrb[68].mxu1 %vm16203_vm2, %v11386_v36 }
 0x906   :  { %10877 = vmatpush3.bf16.msra.mxu1 %v3904_v18  ;;  %10880 = vmatprep.mubr.msk.bf16.mxu1 %vm16203_vm2, %v11387_v62 }
 0x907   :  { %10878 = vmatprep.subr.bf16.mxu1 %v3906_v5 }
 0x90a   :  { %10879 = vmatpush3.bf16.msra.mxu1 %v3906_v5 }
 0x90b   :  { %10888 = vmatprep.subr.bf16.mxu1 %v4025_v6 }
 0x90d   :  { %10881 = vmatmul.mubr.msk.bf16.vlgmr.msra.gmra.mrb[64].mxu1 %vm16203_vm2, %v11388_v10 }
 0x90e   :  { %10889 = vmatpush3.bf16.msra.mxu1 %v4025_v6  ;;  %10884 = vmatprep.mubr.msk.bf16.mxu1 %vm16203_vm2, %v11389_v7 }
 0x90f   :  { %10890 = vmatprep.subr.bf16.mxu1 %v4027_v8 }
 0x912   :  { %10891 = vmatpush3.bf16.msra.mxu1 %v4027_v8 }
 0x913   :  { %10892 = vmatprep.subr.bf16.mxu1 %v4029_v15 }
 0x915   :  { %10885 = vmatmul.mubr.msk.bf16.gmra.mrb[68].mxu1 %vm16203_vm2, %v11390_v11 }
 0x916   :  { %10893 = vmatpush3.bf16.msra.mxu1 %v4029_v15  ;;  %10896 = vmatprep.mubr.msk.bf16.mxu1 %vm16203_vm2, %v11391_v61 }
 0x917   :  { %10894 = vmatprep.subr.bf16.mxu1 %v4031_v57 }
 0x91a   :  { %10895 = vmatpush3.bf16.msra.mxu1 %v4031_v57 }
 0x91b   :  { %10904 = vmatprep.subr.bf16.mxu1 %v4150_v27 }
 0x91d   :  { %10897 = vmatmul.mubr.msk.bf16.vlgmr.msra.gmra.mrb[64].mxu1 %vm16203_vm2, %v11392_v37 }
 0x91e   :  { %10905 = vmatpush3.bf16.msra.mxu1 %v4150_v27  ;;  %10900 = vmatprep.mubr.msk.bf16.mxu1 %vm16203_vm2, %v11393_v12 }
 0x91f   :  { %10906 = vmatprep.subr.bf16.mxu1 %v4152_v34 }
 0x922   :  { %10907 = vmatpush3.bf16.msra.mxu1 %v4152_v34 }
 0x923   :  { %10908 = vmatprep.subr.bf16.mxu1 %v4154_v14 }
 0x925   :  { %10901 = vmatmul.mubr.msk.bf16.gmra.mrb[68].mxu1 %vm16203_vm2, %v11394_v29 }
 0x926   :  { %10909 = vmatpush3.bf16.msra.mxu1 %v4154_v14  ;;  %10912 = vmatprep.mubr.msk.bf16.mxu1 %vm16203_vm2, %v11395_v28 }
 0x927   :  { %10910 = vmatprep.subr.bf16.mxu1 %v4156_v16 }
 0x92a   :  { %10911 = vmatpush3.bf16.msra.mxu1 %v4156_v16 }
 0x92b   :  { %10920 = vmatprep.subr.bf16.mxu1 %v4275_v44 }
 0x92d   :  { %v10802_v54 = vpop.f32.mrb[8].mxu0  ;;  %10913 = vmatmul.mubr.msk.bf16.vlgmr.msra.gmra.mrb[64].mxu1 %vm16203_vm2, %v11396_v39 }
 0x92e   :  { %v3328_v4 = vpop.f32.mrb[9].mxu0  ;;  %10921 = vmatpush3.bf16.msra.mxu1 %v4275_v44  ;;  %10916 = vmatprep.mubr.msk.bf16.mxu1 %vm16203_vm2, %v11397_v48  ;;  %v3361_v25 = vadd.f32 %v10802_v54, %v13120_v49 }
 0x92f   :  { %v10803_v1 = vpop.f32.mrb[10].mxu0  ;;  %10922 = vmatprep.subr.bf16.mxu1 %v4277_v58  ;;  %v3359_v26 = vadd.f32 %v3328_v4, %v13113_v42 }
 0x930   :  { %v3331_v3 = vpop.f32.mrb[11].mxu0  ;;  %v3362_v33 = vadd.f32 %v10803_v1, %v13122_v51 }
 0x931   :  { %v3360_v62 = vadd.f32 %v3331_v3, %v13117_v45 }
 0x932   :  { %10923 = vmatpush3.bf16.msra.mxu1 %v4277_v58 }
 0x933   :  { %10924 = vmatprep.subr.bf16.mxu1 %v4279_v19 }
 0x935   :  { %v10806_v52 = vpop.f32.mrb[12].mxu0  ;;  %10917 = vmatmul.mubr.msk.bf16.gmra.mrb[68].mxu1 %vm16203_vm2, %v11398_v13 }
 0x936   :  { %v3344_v32 = vpop.f32.mrb[13].mxu0  ;;  %10925 = vmatpush3.bf16.msra.mxu1 %v4279_v19  ;;  %10928 = vmatprep.mubr.msk.bf16.mxu1 %vm16203_vm2, %v11399_v55  ;;  %v3365_v11 = vadd.f32 %v10806_v52, %v13152_v9 }
 0x937   :  { %v10807_v41 = vpop.f32.mrb[14].mxu0  ;;  %10926 = vmatprep.subr.bf16.mxu1 %v4281_v21  ;;  %v3363_v45 = vadd.f32 %v3344_v32, %v13135_v47 }
 0x938   :  { %v3347_v43 = vpop.f32.mrb[15].mxu0  ;;  %v3366_v27 = vadd.f32 %v10807_v41, %v13159_v20 }
 0x939   :  { %v3364_v14 = vadd.f32 %v3347_v43, %v13143_v63  ;;  %v12266_v43 = vmov 1983009808  }
 0x93a   :  { %10927 = vmatpush3.bf16.msra.mxu1 %v4281_v21 }
 0x93d   :  { %10929 = vmatmul.mubr.msk.bf16.vlgmr.msra.gmra.mrb[64].mxu1 %vm16203_vm2, %v11400_v50  ;;  %v2069_v50 = vunpack.c.l.s4 %v12266_v43 }
 0x93e   :  { %10932 = vmatprep.mubr.msk.bf16.mxu1 %vm16203_vm2, %v11401_v30 }
 0x93f   :  { %v2070_v30 = vunpack.c.0.s8 %v2069_v50 }
 0x945   :  { %10933 = vmatmul.mubr.msk.bf16.gmra.mrb[68].mxu1 %vm16203_vm2, %v11402_v24  ;;  %v13555_v24 = vsub.s32 %v2070_v30, %v13115_v31  ;;  %vm2158_vm2 = vcmask 296962  }
 0xa10   :  { %v10930_v59 = vpop.f32.mrb[64].mxu1 }
 0xa11   :  { %v13509_v36 = vadd.f32 %v10930_v59, %v3361_v25  ;;  %v4332_v18 = vpop.f32.mrb[65].mxu1  ;;  %v2074_v25 = vrot.slane %v13272_v35, %v13555_v24  ;;  %v13564_v59 = vld [vmem:[%s16178_s7 + $0x8] sm:$0xff] }
 0xa12   :  { %v13512_v5 = vadd.f32 %v4332_v18, %v3359_v26  ;;  %v10931_v10 = vpop.f32.mrb[66].mxu1  ;;  %v2035_v26 = vmul.f32 %v13250_v60, %v13189_v22 }
 0xa13   :  { %v13514_v6 = vadd.f32 %v10931_v10, %v3362_v33  ;;  %v4335_v7 = vpop.f32.mrb[67].mxu1  ;;  %v4373_v42 = vmul.f32 %v13127_v53, %v13509_v36  ;;  %v9488_v33 = vrot.slane %v2074_v25, 9  ;;  %v13566_v18 = vcombine.high %v2074_v25, %v2074_v25 }
 0xa14   :  { %v4371_v8 = vmul.f32 %v13127_v53, %v13512_v5  ;;  %v13518_v49 = vadd.f32 %v4335_v7, %v3360_v62  ;;  %v2100_v62 = vcombine.high %v13272_v35, %v13272_v35  ;;  %v2043_v10 = vmul.f32 %v2035_v26, %v13564_v59  ;;  %v13574_v7 = vld [vmem:[%s16179_s8 + $0x8] sm:$0xff] }
 0xa15   :  { %v4374_v61 = vmul.f32 %v13127_v53, %v13514_v6  ;;  %v4382_v9 = vsel %vm1947_vm3, %v4373_v42, 0.0  ;;  %v9489_v22 = vrot.slane %v13566_v18, 9 }
 0xa16   :  { %v4372_v51 = vmul.f32 %v13127_v53, %v13518_v49  ;;  %v4379_v15 = vsel %vm1947_vm3, %v4371_v8, 0.0  ;;  %v13579_v8 = vrot.slane %v2100_v62, %v13555_v24  ;;  %v2051_v42 = vadd.f32 %v2043_v10, %v13574_v7 }
 0xa17   :  { %v4384_v48 = vsel %vm1947_vm3, %v4374_v61, 0.0 }
 0xa18   :  { %v4380_v57 = vsel %vm1947_vm3, %v4372_v51, 0.0  ;;  %v10934_v37 = vpop.f32.mrb[68].mxu1  ;;  %v9490_v35 = vrot.slane %v13579_v8, 9  ;;  %v13586_v51 = vcombine.high %v13579_v8, %v13579_v8 }
 0xa19   :  { %v4381_v12 = vadd.f32 %v4380_v57, %v4379_v15  ;;  %v13531_v34 = vadd.f32 %v10934_v37, %v3365_v11  ;;  %v4348_v29 = vpop.f32.mrb[69].mxu1  ;;  %v2059_v11 = vmax.f32 %v2051_v42, 0.0  ;;  %v13598_v57 = vld [vmem:[%s16178_s7 + $0x10] sm:$0xff] }
 0xa1a   :  { %v13535_v28 = vadd.f32 %v4348_v29, %v3363_v45  ;;  %v10935_v47 = vpop.f32.mrb[70].mxu1  ;;  %v2036_v45 = vmul.f32 %v13250_v60, %v13192_v23  ;;  %v9491_v15 = vrot.slane %v13586_v51, 9  ;;  %v13610_v29 = vld [vmem:[%s16179_s8 + $0x10] sm:$0xff] }
 0xa1b   :  { %v4383_v16 = vadd.f32 %v4382_v9, %v4381_v12  ;;  %v13537_v39 = vadd.f32 %v10935_v47, %v3366_v27  ;;  %v4351_v44 = vpop.f32.mrb[71].mxu1  ;;  %v4377_v63 = vmul.f32 %v13127_v53, %v13531_v34  ;;  %v13593_v61 = vrot.slane %v2059_v11, %v13555_v24 }
 0xa1c   :  { %v4375_v20 = vmul.f32 %v13127_v53, %v13535_v28  ;;  %v13542_v54 = vadd.f32 %v4351_v44, %v3364_v14  ;;  %v2186_v27 = vcombine.high %v2059_v11, %v2059_v11  ;;  %v2044_v23 = vmul.f32 %v2036_v45, %v13598_v57 }
 0xa1d   :  { %v4385_v58 = vadd.f32 %v4384_v48, %v4383_v16  ;;  %v4378_v13 = vmul.f32 %v13127_v53, %v13537_v39  ;;  %v4390_v52 = vsel %vm1947_vm3, %v4377_v63, 0.0  ;;  %v9492_v37 = vrot.slane %v13593_v61, 9 }
 0xa1e   :  { %v4386_v4 = vsel %vm1947_vm3, %v4375_v20, 0.0  ;;  %v4376_v1 = vmul.f32 %v13127_v53, %v13542_v54  ;;  %v13604_v12 = vcombine.high %v13593_v61, %v13593_v61  ;;  %v13615_v9 = vrot.slane %v2186_v27, %v13555_v24 }
 0xa1f   :  { %v4387_v3 = vadd.f32 %v4386_v4, %v4385_v58  ;;  %v4392_v32 = vsel %vm1947_vm3, %v4378_v13, 0.0  ;;  %v2052_v47 = vadd.f32 %v2044_v23, %v13610_v29 }
 0xa20   :  { %v4388_v19 = vsel %vm1947_vm3, %v4376_v1, 0.0  ;;  %v9493_v14 = vrot.slane %v13604_v12, 9  ;;  %v9494_v16 = vrot.slane %v13615_v9, 9  ;;  %v13622_v44 = vcombine.high %v13615_v9, %v13615_v9 }
 0xa21   :  { %v4389_v55 = vadd.f32 %v4388_v19, %v4387_v3  ;;  %v2060_v48 = vmax.f32 %v2052_v47, 0.0 }
 0xa22   :  { %v9495_v20 = vrot.slane %v13622_v44, 9 }
 0xa23   :  { %v4391_v21 = vadd.f32 %v4390_v52, %v4389_v55  ;;  %v13627_v58 = vrot.slane %v2060_v48, %v13555_v24  ;;  %v2272_v63 = vcombine.high %v2060_v48, %v2060_v48  ;;  %v2037_v55 = vmul.f32 %v13250_v60, %v13195_v56  ;;  %v13647_v52 = vld [vmem:[%s16178_s7 + $0x18] sm:$0xff] }
 0xa25   :  { %v4393_v41 = vadd.f32 %v4392_v32, %v4391_v21  ;;  %v9496_v4 = vrot.slane %v13627_v58, 9  ;;  %v13633_v1 = vcombine.high %v13627_v58, %v13627_v58  ;;  %v13636_v3 = vrot.slane %v2272_v63, %v13555_v24 }
 0xa26   :  { %v2045_v32 = vmul.f32 %v2037_v55, %v13647_v52 }
 0xa27   :  { %4394 = vadd.xlane.f32.xlu1 %v4393_v41  ;;  %v9497_v13 = vrot.slane %v13633_v1, 9  ;;  %v2297_v19 = vcombine.high %v13636_v3, %v13636_v3  ;;  %v13654_v41 = vld [vmem:[%s16179_s8 + $0x18] sm:$0xff]  ;;  %v9498_v56 = vrot.slane %v13636_v3, 9 }
 0xa28   :  { %v2053_v43 = vadd.f32 %v2045_v32, %v13654_v41 }
 0xa29   :  { %v9499_v21 = vrot.slane %v2297_v19, 9 }
 0xa2a   :  { %v13660_v50 = vmax.f32 %v2053_v43, 0.0 }
 0xa2c   :  { %v13665_v30 = vrot.slane %v13660_v50, %v13555_v24 }
 0xa2e   :  { %v13671_v25 = vcombine.high %v13665_v30, %v13665_v30 }
 0xa38   :  { %2077 = vrot.lane.b32.xlu1 %v9488_v33, %s12267_s20 }
 0xa3c   :  { %2095 = vrot.lane.b32.xlu1 %v9489_v22, %s12268_s23 }
 0xa40   :  { %2120 = vrot.lane.b32.xlu1 %v9490_v35, %s16241_s2  ;;  %s16278_s2 = smov 31  }
 0xa44   :  { %2138 = vrot.lane.b32.xlu1 %v9491_v15, %s16201_s18  ;;  %s16234_s18 = smov 111  }
 0xa48   :  { %2163 = vrot.lane.b32.xlu1 %v9492_v37, %s12271_s3 }
 0xa4c   :  { %2181 = vrot.lane.b32.xlu1 %v9493_v14, %s16239_s28  ;;  %s12312_s28 = smov 45  }
 0xa50   :  { %2206 = vrot.lane.b32.xlu1 %v9494_v16, %s16237_s4  ;;  %s12321_s4 = smov 82  }
 0xa54   :  { %2224 = vrot.lane.b32.xlu1 %v9495_v20, %s16196_s21  ;;  %s16202_s21 = smov 86  }
 0xa58   :  { %2249 = vrot.lane.b32.xlu1 %v9496_v4, %s12275_s22 }
 0xa5c   :  { %2267 = vrot.lane.b32.xlu1 %v9497_v13, %s16200_s25  ;;  %s16240_s25 = smov 68  }
 0xa60   :  { %2305 = vrot.lane.b32.xlu1 %v9499_v21, %s16195_s17  ;;  %s12286_s17 = smov 92  }
 0xa64   :  { %2292 = vrot.lane.b32.xlu1 %v9498_v56, %s16197_s26  ;;  %s12288_s26 = smov 80  }
 0xa68   :  { %2298 = vrot.lane.b32.xlu1 %v2297_v19, %s16235_s6 }
 0xa6c   :  { %2323 = vrot.lane.b32.xlu1 %v13665_v30, %s12280_s27 }
 0xa70   :  { %2341 = vrot.lane.b32.xlu1 %v13671_v25, %s16199_s24  ;;  %s12289_s24 = smov 74  }
 0xab4   :  { %v4395_v26 = vpop.xlane.xlu1 %4394 }
 0xab5   :  { %v4396_v33 = vrot.slane %v4395_v26, 4 }
 0xab7   :  { %v4397_v62 = vadd.f32 %v4396_v33, %v4395_v26 }
 0xab8   :  { %v2078_v10 = vpop.permute.xlu1 %2077 }
 0xab9   :  { %2081 = vst.msk [vmem:[#allocation3] sm:$0x1] %vm16210_vm4, %v2078_v10  ;;  %v4398_v22 = vrot.slane %v4397_v62, 2  ;;  %vm16216_vm4 = vcmask 752640  }
 0xabb   :  { %v4399_v42 = vadd.f32 %v4398_v22, %v4397_v62 }
 0xabd   :  { %v4400_v35 = vrot.slane %v4399_v42, 1 }
 0xabf   :  { %v4401_v11 = vadd.f32 %v4400_v35, %v4399_v42 }
 0xac1   :  { %11162 = vpush %v4401_v11 }
 0xaf2   :  { %s11163_s5 = spop %11162 }
 0xaf3   :  { %s4406_s9 = smul.f32 %s11163_s5, %s13177_s1  ;;  %s12283_s5 = smov 116  }
 0xaf5   :  { %v4407_v45 = vstv %s4406_s9  ;;  %s12284_s9 = smov 104  }
 0xaf6   :  { %v4408_v15 = vsub.f32 %v13512_v5, %v4407_v45  ;;  %v4409_v37 = vsub.f32 %v13518_v49, %v4407_v45  ;;  %v4410_v27 = vsub.f32 %v13509_v36, %v4407_v45  ;;  %v4411_v23 = vsub.f32 %v13514_v6, %v4407_v45 }
 0xaf7   :  { %v4412_v14 = vsub.f32 %v13535_v28, %v4407_v45  ;;  %v4413_v47 = vsub.f32 %v13542_v54, %v4407_v45  ;;  %v4414_v36 = vsub.f32 %v13531_v34, %v4407_v45  ;;  %v4415_v63 = vsub.f32 %v13537_v39, %v4407_v45 }
 0xaf8   :  { %v13684_v16 = vmul.f32 %v13127_v53, %v4408_v15  ;;  %v13687_v48 = vmul.f32 %v13127_v53, %v4409_v37  ;;  %v13690_v20 = vmul.f32 %v13127_v53, %v4410_v27  ;;  %v13693_v5 = vmul.f32 %v13127_v53, %v4411_v23 }
 0xaf9   :  { %v13697_v6 = vmul.f32 %v13127_v53, %v4412_v14  ;;  %v13707_v4 = vmul.f32 %v13127_v53, %v4413_v47  ;;  %v13714_v21 = vmul.f32 %v13127_v53, %v4414_v36  ;;  %v13720_v43 = vmul.f32 %v13127_v53, %v4415_v63 }
 0xafa   :  { %v4424_v49 = vmul.f32 %v13684_v16, %v13684_v16  ;;  %v4425_v28 = vmul.f32 %v13687_v48, %v13687_v48  ;;  %v4426_v54 = vmul.f32 %v13690_v20, %v13690_v20  ;;  %v4427_v34 = vmul.f32 %v13693_v5, %v13693_v5 }
 0xafb   :  { %v4428_v32 = vmul.f32 %v13697_v6, %v13697_v6  ;;  %v4429_v26 = vmul.f32 %v13707_v4, %v13707_v4  ;;  %v4430_v10 = vmul.f32 %v13714_v21, %v13714_v21  ;;  %v4431_v35 = vmul.f32 %v13720_v43, %v13720_v43 }
 0xafc   :  { %v4432_v13 = vsel %vm1947_vm3, %v4424_v49, 0.0  ;;  %v4433_v19 = vsel %vm1947_vm3, %v4425_v28, 0.0  ;;  %v4435_v56 = vsel %vm1947_vm3, %v4426_v54, 0.0  ;;  %v4437_v33 = vsel %vm1947_vm3, %v4427_v34, 0.0 }
 0xafd   :  { %v4434_v55 = vadd.f32 %v4433_v19, %v4432_v13  ;;  %v4439_v22 = vsel %vm1947_vm3, %v4428_v32, 0.0  ;;  %v4441_v11 = vsel %vm1947_vm3, %v4429_v26, 0.0  ;;  %v4443_v53 = vsel %vm1947_vm3, %v4430_v10, 0.0 }
 0xafe   :  { %v4445_v37 = vsel %vm1947_vm3, %v4431_v35, 0.0  ;;  %vm2133_vm3 = vcmask 346114   ;;  %v16254_v35 = vmov 0 }
 0xaff   :  { %v4436_v39 = vadd.f32 %v4435_v56, %v4434_v55  ;;  %vm13788_vm6 = vmor %vm2133_vm3, %vm2132_vm15  ;;  %vm16211_vm15 = vcmask 794920   ;;  %vm2175_vm3 = vcmask 1041168   ;;  %v2041_v55 = vmul.f32 %v13250_v60, %v13230_v40  ;;  %v150_v40 = vld [vmem:[%s16179_s8 + $0x38] sm:$0xff] }
 0xb01   :  { %v4438_v62 = vadd.f32 %v4437_v33, %v4436_v39 }
 0xb03   :  { %v4440_v42 = vadd.f32 %v4439_v22, %v4438_v62 }
 0xb05   :  { %v4442_v45 = vadd.f32 %v4441_v11, %v4440_v42 }
 0xb07   :  { %v4444_v15 = vadd.f32 %v4443_v53, %v4442_v45 }
 0xb09   :  { %v4446_v27 = vadd.f32 %v4445_v37, %v4444_v15  ;;  %v16256_v37 = vmov 0 }
 0xb0b   :  { %4447 = vadd.xlane.f32.xlu0 %v4446_v27 }
 0xb21   :  { %2083 = vrot.lane.b32.xlu0 %v13566_v18, %s12282_s19  ;;  %v2358_v18 = vcombine.high %v13660_v50, %v13660_v50 }
 0xb25   :  { %2108 = vrot.lane.b32.xlu0 %v13579_v8, %s12283_s5  ;;  %v9500_v8 = vrot.slane %v13665_v30, 9 }
 0xb29   :  { %2126 = vrot.lane.b32.xlu0 %v13586_v51, %s16236_s0  ;;  %v9501_v51 = vrot.slane %v13671_v25, 9  ;;  %s12307_s0 = smov 2  }
 0xb2d   :  { %2151 = vrot.lane.b32.xlu0 %v13593_v61, %s12284_s9  ;;  %v13759_v61 = vrot.slane %v2358_v18, %v13555_v24 }
 0xb31   :  { %2169 = vrot.lane.b32.xlu0 %v13604_v12, %s12285_s29  ;;  %v9502_v12 = vrot.slane %v13759_v61, 9 }
 0xb35   :  { %2194 = vrot.lane.b32.xlu0 %v13615_v9, %s12286_s17  ;;  %v2096_v9 = vpop.permute.xlu1 %2095 }
 0xb39   :  { %2212 = vrot.lane.b32.xlu0 %v13622_v44, %s16202_s21  ;;  %s16233_s21 = smov 105   ;;  %v2121_v44 = vpop.permute.xlu1 %2120 }
 0xb3d   :  { %2237 = vrot.lane.b32.xlu0 %v13627_v58, %s12288_s26  ;;  %v2139_v58 = vpop.permute.xlu1 %2138 }
 0xb41   :  { %2255 = vrot.lane.b32.xlu0 %v13633_v1, %s12289_s24  ;;  %v2164_v1 = vpop.permute.xlu1 %2163 }
 0xb45   :  { %2280 = vrot.lane.b32.xlu0 %v13636_v3, %s16240_s25  ;;  %v13764_v3 = vpop.permute.xlu1 %2181 }
 0xb49   :  { %2330 = vrot.lane.b32.xlu0 %v9500_v8, %s16238_s30  ;;  %v13766_v30 = vpop.permute.xlu1 %2206 }
 0xb4d   :  { %2348 = vrot.lane.b32.xlu0 %v9501_v51, %s16234_s18  ;;  %v13772_v28 = vpop.permute.xlu1 %2224 }
 0xb51   :  { %2373 = vrot.lane.b32.xlu0 %v9502_v12, %s16233_s21  ;;  %v13785_v26 = vpop.permute.xlu1 %2249  ;;  %v16258_v12 = vmov 0 }
 0xb55   :  { %v2268_v11 = vpop.permute.xlu1 %2267 }
 0xb59   :  { %v13811_v8 = vpop.permute.xlu1 %2305 }
 0xb98   :  { %v4448_v50 = vpop.xlane.xlu0 %4447 }
 0xb99   :  { %v4449_v25 = vrot.slane %v4448_v50, 4 }
 0xb9b   :  { %v4450_v23 = vadd.f32 %v4449_v25, %v4448_v50 }
 0xb9c   :  { %v2084_v14 = vpop.permute.xlu0 %2083 }
 0xb9d   :  { %v2085_v36 = vrot.slane %v2084_v14, 6  ;;  %v4451_v49 = vrot.slane %v4450_v23, 2 }
 0xb9f   :  { %v2087_v54 = vsel %vm16214_vm7, %v2085_v36, %v2084_v14  ;;  %v4452_v63 = vadd.f32 %v4451_v49, %v4450_v23 }
 0xba0   :  { %2092 = vst.msk [vmem:[#allocation3] sm:$0x5] %vm13768_vm8, %v2087_v54  ;;  %v2109_v34 = vpop.permute.xlu0 %2108 }
 0xba1   :  { %v2110_v13 = vrot.slane %v2109_v34, 6  ;;  %v4453_v19 = vrot.slane %v4452_v63, 1  ;;  %2099 = vst.msk [vmem:[#allocation3 + $0x2] sm:$0x1] %vm16205_vm9, %v2096_v9  ;;  %vm13796_vm9 = vmor %vm2158_vm2, %vm2157_vm11  ;;  %vm16215_vm2 = vcmask 745720   ;;  %vm2200_vm11 = vcmask 1041120  }
 0xba2   :  { %v16255_v35 = vsel %vm13796_vm9, 4294967295, %v16254_v35 }
 0xba3   :  { %v2112_v32 = vsel %vm16207_vm12, %v2110_v13, %v2109_v34  ;;  %v4454_v56 = vadd.f32 %v4453_v19, %v4452_v63  ;;  %vm16213_vm12 = vcmask 801792  }
 0xba4   :  { %v2127_v39 = vpop.permute.xlu0 %2126  ;;  %2117 = vst.msk [vmem:[#allocation3 + $0x2] sm:$0x5] %vm13778_vm13, %v2112_v32  ;;  %v2307_v32 = vrot.slane %v13811_v8, 6 }
 0xba5   :  { %v2128_v33 = vrot.slane %v2127_v39, 6  ;;  %11164 = vpush %v4454_v56 }
 0xba6   :  { %2124 = vst.msk [vmem:[#allocation3 + $0x4] sm:$0x1] %vm16206_vm14, %v2121_v44  ;;  %vm2176_vm14 = vcmask 247810  }
 0xba7   :  { %v2130_v10 = vsel %vm16208_vm5, %v2128_v33, %v2127_v39  ;;  %vm13804_vm5 = vmor %vm2176_vm14, %vm2175_vm3  ;;  %vm16217_vm3 = vcmask 696520   ;;  %v11500_v33 = vld [vmem:[%s16181_s10 + $0x140] ss:$8 sps:$4 sm:$0xff]  }
 0xba8   :  { %v2152_v22 = vpop.permute.xlu0 %2151  ;;  %2135 = vst.msk [vmem:[#allocation3 + $0x4] sm:$0x5] %vm13788_vm6, %v2130_v10  ;;  %v16257_v37 = vsel %vm13804_vm5, 4294967295, %v16256_v37 }
 0xba9   :  { %v2153_v42 = vrot.slane %v2152_v22, 6  ;;  %2142 = vst.msk [vmem:[#allocation3 + $0x6] sm:$0x1] %vm16209_vm10, %v2139_v58  ;;  %vm2201_vm10 = vcmask 198658  }
 0xbaa   :  { %vm13815_vm14 = vmor %vm2201_vm10, %vm2200_vm11  ;;  %vm16220_vm10 = vcmask 647320   ;;  %vm2243_vm11 = vcmask 1041024  }
 0xbab   :  { %v2155_v45 = vsel %vm16212_vm1, %v2153_v42, %v2152_v22  ;;  %v16259_v12 = vsel %vm13815_vm14, 4294967295, %v16258_v12  ;;  %vm2219_vm1 = vcmask 149506  }
 0xbac   :  { %v2170_v53 = vpop.permute.xlu0 %2169  ;;  %2160 = vst.msk [vmem:[#allocation3 + $0x6] sm:$0x5] %vm13796_vm9, %v2155_v45  ;;  %vm2337_vm9 = vcmask 403458  }
 0xbad   :  { %v2171_v15 = vrot.slane %v2170_v53, 6  ;;  %2167 = vst.msk [vmem:[#allocation3 + $0x8] sm:$0x1] %vm16211_vm15, %v2164_v1  ;;  %vm2218_vm15 = vcmask 1041072   ;;  %v16260_v1 = vmov 0 }
 0xbae   :  { %vm13824_vm7 = vmor %vm2219_vm1, %vm2218_vm15  ;;  %vm16224_vm1 = vcmask 598120   ;;  %vm2261_vm15 = vcmask 1040976  }
 0xbaf   :  { %v2173_v27 = vsel %vm16213_vm12, %v2171_v15, %v2170_v53  ;;  %vm16221_vm12 = vcmask 703488   ;;  %v16261_v1 = vsel %vm13824_vm7, 4294967295, %v16260_v1 }
 0xbb0   :  { %v2195_v18 = vpop.permute.xlu0 %2194  ;;  %2178 = vst.msk [vmem:[#allocation3 + $0x8] sm:$0x5] %vm13804_vm5, %v2173_v27  ;;  %vm2336_vm5 = vcmask 1041320   ;;  %v11506_v27 = vld [vmem:[%s16181_s10 + $0x150] ss:$8 sps:$4 sm:$0xff]  }
 0xbb1   :  { %v2196_v51 = vrot.slane %v2195_v18, 6  ;;  %2185 = vst.msk [vmem:[#allocation3 + $0xa] sm:$0x1] %vm16215_vm2, %v13764_v3  ;;  %vm2244_vm2 = vcmask 100354   ;;  %v2293_v3 = vpop.permute.xlu1 %2292 }
 0xbb3   :  { %v2198_v9 = vsel %vm16216_vm4, %v2196_v51, %v2195_v18  ;;  %vm16222_vm4 = vcmask 654336  }
 0xbb4   :  { %v2213_v44 = vpop.permute.xlu0 %2212  ;;  %2203 = vst.msk [vmem:[#allocation3 + $0xa] sm:$0x5] %vm13815_vm14, %v2198_v9  ;;  %vm16226_vm14 = vcmask 605184   ;;  %v11403_v9 = vld [vmem:[%s16181_s10] ss:$8 sps:$4 sm:$0xff]  }
 0xbb5   :  { %v2214_v58 = vrot.slane %v2213_v44, 6  ;;  %2210 = vst.msk [vmem:[#allocation3 + $0xc] sm:$0x1] %vm16217_vm3, %v13766_v30  ;;  %vm13833_vm3 = vmor %vm2244_vm2, %vm2243_vm11  ;;  %v16262_v30 = vmov 0  ;;  %v2299_v49 = vpop.permute.xlu1 %2298  ;;  %vm16230_vm2 = vcmask 548920   ;;  %vm2286_vm11 = vcmask 1040928  }
 0xbb6   :  { %v16263_v30 = vsel %vm13833_vm3, 4294967295, %v16262_v30 }
 0xbb7   :  { %v2216_v50 = vsel %vm16221_vm12, %v2214_v58, %v2213_v44  ;;  %vm2287_vm12 = vcmask 2050   ;;  %v11405_v44 = vld [vmem:[%s16181_s10 + $0x4] ss:$8 sps:$4 sm:$0xff]   ;;  %v11406_v58 = vld [vmem:[%s16181_s10 + $0x10] ss:$8 sps:$4 sm:$0xff]  }
 0xbb8   :  { %v2238_v25 = vpop.permute.xlu0 %2237  ;;  %2221 = vst.msk [vmem:[#allocation3 + $0xc] sm:$0x5] %vm13824_vm7, %v2216_v50  ;;  %vm16232_vm7 = vcmask 499720   ;;  %8174 = vmatprep.subr.bf16.mxu1 %v11405_v44  ;;  %v11409_v50 = vld [vmem:[%s16181_s10 + $0x20] ss:$8 sps:$4 sm:$0xff]  }
 0xbb9   :  { %v2239_v23 = vrot.slane %v2238_v25, 6  ;;  %2228 = vst.msk [vmem:[#allocation3 + $0xe] sm:$0x1] %vm16220_vm10, %v13772_v28  ;;  %vm13842_vm10 = vmor %vm2262_vm0, %vm2261_vm15  ;;  %v16264_v28 = vmov 0  ;;  %vm2311_vm0 = vcmask 1041368   ;;  %vm2312_vm15 = vcmask 452610   ;;  %v2324_v56 = vpop.permute.xlu1 %2323  ;;  %8175 = vmatpush1.bf16.msra.mxu1 %v11403_v9 }
 0xbba   :  { %v16265_v28 = vsel %vm13842_vm10, 4294967295, %v16264_v28  ;;  %v11423_v44 = vld [vmem:[%s16181_s10 + $0x64] ss:$8 sps:$4 sm:$0xff]  }
 0xbbb   :  { %v2241_v14 = vsel %vm16222_vm4, %v2239_v23, %v2238_v25  ;;  %vm16231_vm4 = vcmask 556032   ;;  %v11411_v25 = vld [vmem:[%s16181_s10 + $0x24] ss:$8 sps:$4 sm:$0xff]  }
 0xbbc   :  { %v2256_v36 = vpop.permute.xlu0 %2255  ;;  %2246 = vst.msk [vmem:[#allocation3 + $0xe] sm:$0x5] %vm13833_vm3, %v2241_v14  ;;  %vm13850_vm3 = vmor %vm2287_vm12, %vm2286_vm11  ;;  %vm2326_vm11 = vcmask 950720  }
 0xbbd   :  { %v2257_v54 = vrot.slane %v2256_v36, 6  ;;  %2253 = vst.msk [vmem:[#allocation3 + $0x10] sm:$0x1] %vm16224_vm1, %v13785_v26  ;;  %vm2308_vm1 = vcmask 1006592   ;;  %vm13858_vm12 = vmor %vm2312_vm15, %vm2311_vm0  ;;  %vm16272_vm0 = vcmask 957440   ;;  %vm16242_vm15 = vcmask 901520   ;;  %v2342_v53 = vpop.permute.xlu1 %2341 }
 0xbbe   :  { %v2309_v22 = vsel %vm2308_vm1, %v2307_v32, %v13811_v8 }
 0xbbf   :  { %v2259_v63 = vsel %vm16226_vm14, %v2257_v54, %v2256_v36  ;;  %vm2301_vm14 = vcmask 999920   ;;  %v11414_v54 = vld [vmem:[%s16181_s10 + $0x34] ss:$8 sps:$4 sm:$0xff]  }
 0xbc0   :  { %v2281_v34 = vpop.permute.xlu0 %2280  ;;  %2264 = vst.msk [vmem:[#allocation3 + $0x10] sm:$0x5] %vm13842_vm10, %v2259_v63  ;;  %vm2355_vm10 = vcmask 354306  }
 0xbc1   :  { %v2282_v13 = vrot.slane %v2281_v34, 6  ;;  %2271 = vst.msk [vmem:[#allocation3 + $0x12] sm:$0x1] %vm16230_vm2, %v2268_v11  ;;  %vm13866_vm2 = vmor %vm2337_vm9, %vm2336_vm5  ;;  %vm16293_vm5 = vcmask 998400  }
 0xbc3   :  { %v2284_v39 = vsel %vm16231_vm4, %v2282_v13, %v2281_v34  ;;  %vm2354_vm4 = vcmask 1041272  }
 0xbc4   :  { %v2331_v26 = vpop.permute.xlu0 %2330  ;;  %2289 = vst.msk [vmem:[#allocation3 + $0x12] sm:$0x5] %vm13850_vm3, %v2284_v39  ;;  %vm13876_vm9 = vmor %vm2355_vm10, %vm2354_vm4  ;;  %vm16275_vm4 = vcmask 491520   ;;  %vm16294_vm10 = vcmask 991720  }
 0xbc5   :  { %v2332_v10 = vrot.slane %v2331_v26, 6  ;;  %2296 = vst.msk [vmem:[#allocation3 + $0x14] sm:$0x1] %vm16232_vm7, %v2293_v3  ;;  %vm2351_vm7 = vcmask 908288   ;;  %v11408_v3 = vld [vmem:[%s16181_s10 + $0x14] ss:$8 sps:$4 sm:$0xff]  }
 0xbc6   :  { %2302 = vst.msk [vmem:[#allocation3 + $0x14] sm:$0x1] %vm2301_vm14, %v2299_v49  ;;  %8176 = vmatprep.subr.bf16.mxu1 %v11408_v3  ;;  %v11412_v49 = vld [vmem:[%s16181_s10 + $0x30] ss:$8 sps:$4 sm:$0xff]  }
 0xbc7   :  { %v2334_v11 = vsel %vm16272_vm0, %v2332_v10, %v2331_v26  ;;  %2314 = vst.msk [vmem:[#allocation3 + $0x14] sm:$0x5] %vm13858_vm12, %v2309_v22  ;;  %8177 = vmatpush1.bf16.msra.mxu1 %v11406_v58  ;;  %v11417_v26 = vld [vmem:[%s16181_s10 + $0x44] ss:$8 sps:$4 sm:$0xff]   ;;  %v11424_v3 = vld [vmem:[%s16181_s10 + $0x70] ss:$8 sps:$4 sm:$0xff]  }
 0xbc8   :  { %v2349_v45 = vpop.permute.xlu0 %2348  ;;  %2327 = vst.msk [vmem:[#allocation3 + $0x16] sm:$0x1] %vm2326_vm11, %v2324_v56  ;;  %8178 = vmatprep.subr.bf16.mxu1 %v11411_v25  ;;  %vm16296_vm0 = vcmask 942520  }
 0xbc9   :  { %v2350_v15 = vrot.slane %v2349_v45, 6  ;;  %2339 = vst.msk [vmem:[#allocation3 + $0x16] sm:$0x5] %vm13866_vm2, %v2334_v11 }
 0xbca   :  { %2345 = vst.msk [vmem:[#allocation3 + $0x18] sm:$0x1] %vm16242_vm15, %v2342_v53  ;;  %vm16315_vm15 = vcmask 598120  }
 0xbcb   :  { %v2352_v18 = vsel %vm2351_vm7, %v2350_v15, %v2349_v45  ;;  %8179 = vmatpush1.bf16.msra.mxu1 %v11409_v50  ;;  %v11426_v50 = vld [vmem:[%s16181_s10 + $0x74] ss:$8 sps:$4 sm:$0xff]  }
 0xbcc   :  { %2357 = vst.msk [vmem:[#allocation3 + $0x18] sm:$0x5] %vm13876_vm9, %v2352_v18  ;;  %8180 = vmatprep.subr.bf16.mxu1 %v11414_v54 }
 0xbcf   :  { %8181 = vmatpush1.bf16.msra.mxu1 %v11412_v49 }
 0xbd0   :  { %8182 = vmatprep.subr.bf16.mxu1 %v11417_v26 }
 0xbd6   :  { %s11165_s21 = spop %11164 }
 0xbd7   :  { %s4459_s18 = smul.f32 %s11165_s21, %s13177_s1  ;;  %s16277_s21 = smov 68  }
 0xbd8   :  { %s12300_s1 = smov 20  }
 0xbd9   :  { %s4460_s6 = sadd.f32 1e-05, %s4459_s18  ;;  %s12294_s18 = smov 99  }
 0xbdb   :  { %v4461_v8 = vstv %s4460_s6  ;;  %s12296_s6 = smov 93  }
 0xbdc   :  { %12212 = vrsqrt.f32 %v4461_v8  ;;  %v11421_v8 = vld [vmem:[%s16181_s10 + $0x60] ss:$8 sps:$4 sm:$0xff]  }
 0xbe6   :  { %v12213_v51 = vpop.eup %12212 }
 0xbe7   :  { %11166 = vpush %v12213_v51 }
 0xc18   :  { %s11167_s30 = spop %11166 }
 0xc19   :  { %v13903_v23 = vstv %s11167_s30  ;;  %s12322_s30 = smov 76  }
 0xc1a   :  { %v4465_v14 = vmul.f32 %v13903_v23, %v13684_v16  ;;  %v4468_v36 = vmul.f32 %v13903_v23, %v13693_v5  ;;  %v4466_v63 = vmul.f32 %v13903_v23, %v13687_v48  ;;  %v4467_v34 = vmul.f32 %v13903_v23, %v13690_v20  ;;  %v12230_v16 = vld [vmem:[%s16178_s7] sm:$0xff] }
 0xc1b   :  { %v12231_v48 = vld [vmem:[%s16179_s8] sm:$0xff] }
 0xc1c   :  { %v4476_v13 = vmul.f32 %v4468_v36, %v13647_v52  ;;  %v4473_v5 = vmul.f32 %v12230_v16, %v4465_v14  ;;  %v4474_v32 = vmul.f32 %v4466_v63, %v13564_v59  ;;  %v4475_v56 = vmul.f32 %v4467_v34, %v13598_v57  ;;  %v11415_v52 = vld [vmem:[%s16181_s10 + $0x40] ss:$8 sps:$4 sm:$0xff]   ;;  %v11429_v63 = vld [vmem:[%s16181_s10 + $0x84] ss:$8 sps:$4 sm:$0xff]   ;;  %v11432_v16 = vld [vmem:[%s16181_s10 + $0x94] ss:$8 sps:$4 sm:$0xff]  }
 0xc1d   :  { %8183 = vmatpush1.bf16.msra.mxu1 %v11415_v52  ;;  %v11427_v36 = vld [vmem:[%s16181_s10 + $0x80] ss:$8 sps:$4 sm:$0xff]  }
 0xc1e   :  { %v4484_v39 = vadd.f32 %v4476_v13, %v13654_v41  ;;  %v4481_v20 = vadd.f32 %v12231_v48, %v4473_v5  ;;  %v4482_v59 = vadd.f32 %v4474_v32, %v13574_v7  ;;  %v4483_v57 = vadd.f32 %v4475_v56, %v13610_v29  ;;  %v11418_v7 = vld [vmem:[%s16181_s10 + $0x50] ss:$8 sps:$4 sm:$0xff]   ;;  %v11420_v29 = vld [vmem:[%s16181_s10 + $0x54] ss:$8 sps:$4 sm:$0xff]   ;;  %v11433_v32 = vld [vmem:[%s16181_s10 + $0x600] ss:$8 sps:$4 sm:$0xff]  }
 0xc1f   :  { %8184 = vmatprep.subr.bf16.mxu1 %v11420_v29  ;;  %v11430_v13 = vld [vmem:[%s16181_s10 + $0x90] ss:$8 sps:$4 sm:$0xff]   ;;  %v11435_v56 = vld [vmem:[%s16181_s10 + $0x604] ss:$8 sps:$4 sm:$0xff]   ;;  %v11436_v48 = vld [vmem:[%s16181_s10 + $0xa0] ss:$8 sps:$4 sm:$0xff]  }
 0xc20   :  { %v13937_v10 = vmax.f32 %v4484_v39, 0.0  ;;  %v4489_v41 = vmax.f32 %v4481_v20, 0.0  ;;  %v4490_v22 = vmax.f32 %v4482_v59, 0.0  ;;  %v4491_v15 = vmax.f32 %v4483_v57, 0.0  ;;  %8420 = vmatprep.subr.bf16.mxu0 %v11435_v56  ;;  %v11438_v20 = vld [vmem:[%s16181_s10 + $0xa4] ss:$8 sps:$4 sm:$0xff]  }
 0xc21   :  { %8185 = vmatpush1.bf16.msra.mxu1 %v11418_v7  ;;  %8421 = vmatpush1.bf16.msra.mxu0 %v11433_v32  ;;  %v11439_v59 = vld [vmem:[%s16181_s10 + $0x610] ss:$8 sps:$4 sm:$0xff]   ;;  %v11441_v57 = vld [vmem:[%s16181_s10 + $0x614] ss:$8 sps:$4 sm:$0xff]   ;;  %v11445_v29 = vld [vmem:[%s16181_s10 + $0x620] ss:$8 sps:$4 sm:$0xff]   ;;  %v2038_v56 = vmul.f32 %v13250_v60, %v13203_v17 }
 0xc22   :  { %v13941_v11 = vrot.slane %v13937_v10, %v13555_v24  ;;  %v4505_v45 = vrot.slane %v4489_v41, %v13555_v24  ;;  %4497 = vst.msk [vmem:[#allocation3 + $0x1] sm:$0x1] %vm16275_vm4, %v4489_v41  ;;  %v4565_v53 = vrot.slane %v4490_v22, %v13555_v24  ;;  %v4631_v51 = vrot.slane %v4491_v15, %v13555_v24  ;;  %v11444_v7 = vld [vmem:[%s16181_s10 + $0xb4] ss:$8 sps:$4 sm:$0xff]   ;;  %v11469_v17 = vld [vmem:[%s16181_s10 + $0x660] ss:$8 sps:$4 sm:$0xff]  }
 0xc23   :  { %v4525_v9 = vcombine.high %v4489_v41, %v4489_v41  ;;  %8186 = vmatprep.subr.bf16.mxu1 %v11423_v44  ;;  %v4591_v54 = vcombine.high %v4490_v22, %v4490_v22  ;;  %v4657_v26 = vcombine.high %v4491_v15, %v4491_v15  ;;  %8422 = vmatprep.subr.bf16.mxu0 %v11441_v57  ;;  %v11453_v44 = vld [vmem:[%s16181_s10 + $0x634] ss:$8 sps:$4 sm:$0xff]   ;;  %vm16297_vm4 = vcmask 893320  }
 0xc24   :  { %4698 = vrot.lane.b32.xlu1 %v13941_v11, %s12280_s27  ;;  %4566 = vrot.lane.b32.xlu0 %v4565_v53, %s12284_s9  ;;  %v4512_v18 = vcombine.high %v4505_v45, %v4505_v45  ;;  %v9752_v58 = vrot.slane %v4505_v45, 9  ;;  %v9756_v14 = vrot.slane %v4565_v53, 9  ;;  %v4578_v49 = vcombine.high %v4565_v53, %v4565_v53  ;;  %v11442_v45 = vld [vmem:[%s16181_s10 + $0xb0] ss:$8 sps:$4 sm:$0xff]   ;;  %v11447_v53 = vld [vmem:[%s16181_s10 + $0x624] ss:$8 sps:$4 sm:$0xff]  }
 0xc25   :  { %8187 = vmatpush1.bf16.msra.mxu1 %v11421_v8  ;;  %v4532_v25 = vrot.slane %v4525_v9, %v13555_v24  ;;  %v9760_v34 = vrot.slane %v4631_v51, 9  ;;  %v4598_v5 = vrot.slane %v4591_v54, %v13555_v24  ;;  %v14002_v52 = vcombine.high %v4631_v51, %v4631_v51  ;;  %8423 = vmatpush1.bf16.msra.mxu0 %v11439_v59  ;;  %v11450_v8 = vld [vmem:[%s16181_s10 + $0xc4] ss:$8 sps:$4 sm:$0xff]   ;;  %v11451_v9 = vld [vmem:[%s16181_s10 + $0x630] ss:$8 sps:$4 sm:$0xff]   ;;  %s16282_s27 = smov 62  }
 0xc26   :  { %8188 = vmatprep.subr.bf16.mxu1 %v11426_v50  ;;  %v9753_v39 = vrot.slane %v4512_v18, 9  ;;  %v14014_v22 = vrot.slane %v4657_v26, %v13555_v24  ;;  %v9757_v15 = vrot.slane %v4578_v49, 9  ;;  %8424 = vmatprep.subr.bf16.mxu0 %v11447_v53  ;;  %v11454_v50 = vld [vmem:[%s16181_s10 + $0xd0] ss:$8 sps:$4 sm:$0xff]   ;;  %s16283_s9 = smov 86   ;;  %v4710_v26 = vcombine.high %v13941_v11, %v13941_v11 }
 0xc27   :  { %v9754_v41 = vrot.slane %v4532_v25, 9  ;;  %v4723_v59 = vcombine.high %v13937_v10, %v13937_v10  ;;  %v11475_v10 = vld [vmem:[%s16181_s10 + $0x670] ss:$8 sps:$4 sm:$0xff]   ;;  %v4469_v53 = vmul.f32 %v13903_v23, %v13697_v6 }
 0xc28   :  { %4513 = vrot.lane.b32.xlu1 %v4512_v18, %s12282_s19  ;;  %4632 = vrot.lane.b32.xlu0 %v4631_v51, %s12288_s26  ;;  %v11448_v18 = vld [vmem:[%s16181_s10 + $0xc0] ss:$8 sps:$4 sm:$0xff]   ;;  %v9764_v51 = vrot.slane %v13941_v11, 9  ;;  %v14065_v54 = vcombine.high %v14014_v22, %v14014_v22  ;;  %v9762_v57 = vrot.slane %v14014_v22, 9  ;;  %s16289_s19 = smov 111   ;;  %s12313_s26 = smov 106  }
 0xc29   :  { %8189 = vmatpush1.bf16.msra.mxu1 %v11424_v3  ;;  %8425 = vmatpush1.bf16.msra.mxu0 %v11445_v29  ;;  %v4545_v3 = vcombine.high %v4532_v25, %v4532_v25  ;;  %v147_v11 = vld [vmem:[%s16179_s8 + $0x20] sm:$0xff] }
 0xc2a   :  { %8190 = vmatprep.subr.bf16.mxu1 %v11429_v63  ;;  %8426 = vmatprep.subr.bf16.mxu0 %v11453_v44  ;;  %v11460_v63 = vld [vmem:[%s16181_s10 + $0xe0] ss:$8 sps:$4 sm:$0xff]   ;;  %v11481_v29 = vld [vmem:[%s16181_s10 + $0x684] ss:$8 sps:$4 sm:$0xff]   ;;  %v2383_v44 = vcombine.high %v13759_v61, %v13759_v61 }
 0xc2b   :  { %v9755_v32 = vrot.slane %v4545_v3, 9 }
 0xc2c   :  { %4508 = vrot.lane.b32.xlu1 %v9752_v58, %s12267_s20  ;;  %4533 = vrot.lane.b32.xlu0 %v4532_v25, %s12283_s5  ;;  %v9758_v58 = vrot.slane %v4598_v5, 9  ;;  %s16281_s5 = smov 110   ;;  %v11462_v25 = vld [vmem:[%s16181_s10 + $0xe4] ss:$8 sps:$4 sm:$0xff]   ;;  %s16285_s20 = smov 7  }
 0xc2d   :  { %8191 = vmatpush1.bf16.msra.mxu1 %v11427_v36  ;;  %8427 = vmatpush1.bf16.msra.mxu0 %v11451_v9  ;;  %v11457_v36 = vld [vmem:[%s16181_s10 + $0x640] ss:$8 sps:$4 sm:$0xff]  }
 0xc2e   :  { %8192 = vmatprep.subr.bf16.mxu1 %v11432_v16  ;;  %v11463_v16 = vld [vmem:[%s16181_s10 + $0x650] ss:$8 sps:$4 sm:$0xff]  }
 0xc30   :  { %4574 = vrot.lane.b32.xlu1 %v9756_v14, %s12271_s3  ;;  %4579 = vrot.lane.b32.xlu0 %v4578_v49, %s12285_s29  ;;  %v11456_v14 = vld [vmem:[%s16181_s10 + $0xd4] ss:$8 sps:$4 sm:$0xff]   ;;  %v11459_v49 = vld [vmem:[%s16181_s10 + $0x644] ss:$8 sps:$4 sm:$0xff]   ;;  %s16286_s3 = smov 50  }
 0xc31   :  { %8193 = vmatpush1.bf16.msra.mxu1 %v11430_v13  ;;  %8428 = vmatprep.subr.bf16.mxu0 %v11459_v49  ;;  %v4611_v13 = vcombine.high %v4598_v5, %v4598_v5 }
 0xc32   :  { %8194 = vmatprep.subr.bf16.mxu1 %v11438_v20  ;;  %8429 = vmatpush1.bf16.msra.mxu0 %v11457_v36  ;;  %v11468_v20 = vld [vmem:[%s16181_s10 + $0xf4] ss:$8 sps:$4 sm:$0xff]  }
 0xc34   :  { %4640 = vrot.lane.b32.xlu1 %v9760_v34, %s12275_s22  ;;  %4599 = vrot.lane.b32.xlu0 %v4598_v5, %s12286_s17  ;;  %s16279_s22 = smov 117   ;;  %v11465_v34 = vld [vmem:[%s16181_s10 + $0x654] ss:$8 sps:$4 sm:$0xff]   ;;  %v139_v5 = vld [vmem:[%s16178_s7 + $0x20] sm:$0xff]  ;;  %s16284_s17 = smov 43  }
 0xc35   :  { %8195 = vmatpush1.bf16.msra.mxu1 %v11436_v48  ;;  %8430 = vmatprep.subr.bf16.mxu0 %v11465_v34  ;;  %v11466_v48 = vld [vmem:[%s16181_s10 + $0xf0] ss:$8 sps:$4 sm:$0xff]   ;;  %v4477_v6 = vmul.f32 %v4469_v53, %v139_v5  ;;  %v11491_v34 = vld [vmem:[%s16181_s10 + $0x6a0] ss:$8 sps:$4 sm:$0xff]  }
 0xc36   :  { %8196 = vmatprep.subr.bf16.mxu1 %v11444_v7  ;;  %8431 = vmatpush1.bf16.msra.mxu0 %v11463_v16  ;;  %v11477_v7 = vld [vmem:[%s16181_s10 + $0x674] ss:$8 sps:$4 sm:$0xff]   ;;  %v9763_v16 = vrot.slane %v14065_v54, 9 }
 0xc37   :  { %v4485_v49 = vadd.f32 %v4477_v6, %v147_v11 }
 0xc38   :  { %4521 = vrot.lane.b32.xlu1 %v9753_v39, %s12268_s23  ;;  %4645 = vrot.lane.b32.xlu0 %v14002_v52, %s12289_s24  ;;  %s16276_s24 = smov 49   ;;  %s16280_s23 = smov 25   ;;  %v9761_v39 = vrot.slane %v14002_v52, 9  ;;  %v11471_v52 = vld [vmem:[%s16181_s10 + $0x664] ss:$8 sps:$4 sm:$0xff]  }
 0xc39   :  { %8197 = vmatpush1.bf16.msra.mxu1 %v11442_v45  ;;  %8432 = vmatprep.subr.bf16.mxu0 %v11471_v52  ;;  %v11474_v45 = vld [vmem:[%s16181_s10 + $0x104] ss:$8 sps:$4 sm:$0xff]   ;;  %v11511_v52 = vld [vmem:[%s16181_s10 + $0x6d4] ss:$8 sps:$4 sm:$0xff]  }
 0xc3a   :  { %8198 = vmatprep.subr.bf16.mxu1 %v11450_v8  ;;  %8433 = vmatpush1.bf16.msra.mxu0 %v11469_v17 }
 0xc3b   :  { %8434 = vmatprep.subr.bf16.mxu0 %v11477_v7 }
 0xc3c   :  { %4541 = vrot.lane.b32.xlu1 %v9754_v41, %s16276_s24  ;;  %4665 = vrot.lane.b32.xlu0 %v14014_v22, %s16277_s21  ;;  %v2046_v41 = vmul.f32 %v2038_v56, %v139_v5  ;;  %v9759_v22 = vrot.slane %v4611_v13, 9  ;;  %s12295_s21 = smov 38   ;;  %v11499_v56 = vld [vmem:[%s16181_s10 + $0x6b4] ss:$8 sps:$4 sm:$0xff]   ;;  %s12298_s24 = smov 87  }
 0xc3d   :  { %8199 = vmatpush1.bf16.msra.mxu1 %v11448_v18  ;;  %v4730_v18 = vrot.slane %v4723_v59, %v13555_v24  ;;  %v11509_v59 = vld [vmem:[%s16181_s10 + $0x6d0] ss:$8 sps:$4 sm:$0xff]  }
 0xc3e   :  { %8200 = vmatprep.subr.bf16.mxu1 %v11456_v14  ;;  %v2054_v8 = vadd.f32 %v2046_v41, %v147_v11  ;;  %8435 = vmatpush1.bf16.msra.mxu0 %v11475_v10  ;;  %v9503_v14 = vrot.slane %v2383_v44, 9  ;;  %v11517_v41 = vld [vmem:[%s16181_s10 + $0x6e4] ss:$8 sps:$4 sm:$0xff]  }
 0xc3f   :  { %8436 = vmatprep.subr.bf16.mxu0 %v11481_v29  ;;  %v9766_v9 = vrot.slane %v4730_v18, 9  ;;  %v140_v11 = vld [vmem:[%s16178_s7 + $0x28] sm:$0xff]  ;;  %v4470_v29 = vmul.f32 %v13903_v23, %v13707_v4 }
 0xc40   :  { %4587 = vrot.lane.b32.xlu1 %v9757_v15, %s16278_s2  ;;  %4704 = vrot.lane.b32.xlu0 %v9764_v51, %s16279_s22  ;;  %v9765_v15 = vrot.slane %v4710_v26, 9  ;;  %v11479_v51 = vld [vmem:[%s16181_s10 + $0x680] ss:$8 sps:$4 sm:$0xff]   ;;  %s16291_s2 = smov 123   ;;  %v11529_v4 = vld [vmem:[%s16181_s10 + $0x704] ss:$8 sps:$4 sm:$0xff]  }
 0xc41   :  { %8201 = vmatpush1.bf16.msra.mxu1 %v11454_v50  ;;  %v11485_v50 = vld [vmem:[%s16181_s10 + $0x690] ss:$8 sps:$4 sm:$0xff]   ;;  %v4478_v6 = vmul.f32 %v4470_v29, %v140_v11  ;;  %s12310_s22 = smov 51  }
 0xc42   :  { %8202 = vmatprep.subr.bf16.mxu1 %v11462_v25  ;;  %8437 = vmatpush1.bf16.msra.mxu0 %v11479_v51  ;;  %v11521_v51 = vld [vmem:[%s16181_s10 + $0x6f0] ss:$8 sps:$4 sm:$0xff]  }
 0xc44   :  { %4607 = vrot.lane.b32.xlu1 %v9758_v58, %s16280_s23  ;;  %4546 = vrot.lane.b32.xlu0 %v4545_v3, %s16281_s5  ;;  %v14131_v58 = vmax.f32 %v2054_v8, 0.0  ;;  %v11487_v3 = vld [vmem:[%s16181_s10 + $0x694] ss:$8 sps:$4 sm:$0xff]   ;;  %s12293_s23 = smov 44   ;;  %s16290_s5 = smov 105   ;;  %v148_v8 = vld [vmem:[%s16179_s8 + $0x28] sm:$0xff] }
 0xc45   :  { %8203 = vmatpush1.bf16.msra.mxu1 %v11460_v63  ;;  %8438 = vmatprep.subr.bf16.mxu0 %v11487_v3  ;;  %v4743_v63 = vcombine.high %v4730_v18, %v4730_v18 }
 0xc46   :  { %8204 = vmatprep.subr.bf16.mxu1 %v11468_v20  ;;  %v2408_v36 = vrot.slane %v14131_v58, %v13555_v24  ;;  %8439 = vmatpush1.bf16.msra.mxu0 %v11485_v50  ;;  %v11503_v20 = vld [vmem:[%s16181_s10 + $0x6c0] ss:$8 sps:$4 sm:$0xff]   ;;  %v2444_v7 = vcombine.high %v14131_v58, %v14131_v58 }
 0xc48   :  { %4678 = vrot.lane.b32.xlu1 %v14065_v54, %s16282_s27  ;;  %4612 = vrot.lane.b32.xlu0 %v4611_v13, %s16283_s9  ;;  %s16287_s9 = smov 1   ;;  %v9504_v25 = vrot.slane %v2408_v36, 9  ;;  %v11493_v13 = vld [vmem:[%s16181_s10 + $0x6a4] ss:$8 sps:$4 sm:$0xff]   ;;  %v2426_v5 = vcombine.high %v2408_v36, %v2408_v36  ;;  %s12309_s27 = smov 57  }
 0xc49   :  { %8205 = vmatpush1.bf16.msra.mxu1 %v11466_v48  ;;  %8440 = vmatprep.subr.bf16.mxu0 %v11493_v13  ;;  %v11505_v54 = vld [vmem:[%s16181_s10 + $0x6c4] ss:$8 sps:$4 sm:$0xff]  }
 0xc4a   :  { %8215 = vmatprep.subr.bf16.mxu1 %v11474_v45  ;;  %8441 = vmatpush1.bf16.msra.mxu0 %v11491_v34  ;;  %v9505_v17 = vrot.slane %v2426_v5, 9 }
 0xc4b   :  { %8442 = vmatprep.subr.bf16.mxu0 %v11499_v56 }
 0xc4c   :  { %4554 = vrot.lane.b32.xlu1 %v9755_v32, %s16284_s17  ;;  %4653 = vrot.lane.b32.xlu0 %v9761_v39, %s16285_s20  ;;  %s16288_s17 = smov 19   ;;  %v11497_v39 = vld [vmem:[%s16181_s10 + $0x6b0] ss:$8 sps:$4 sm:$0xff]   ;;  %s12302_s20 = smov 14  }
 0xc4e   :  { %8443 = vmatpush1.bf16.msra.mxu0 %v11497_v39 }
 0xc4f   :  { %8444 = vmatprep.subr.bf16.mxu0 %v11505_v54 }
 0xc50   :  { %4711 = vrot.lane.b32.xlu1 %v4710_v26, %s16286_s3  ;;  %4673 = vrot.lane.b32.xlu0 %v9762_v57, %s16287_s9  ;;  %v9767_v26 = vrot.slane %v4743_v63, 9  ;;  %v2039_v57 = vmul.f32 %v13250_v60, %v13213_v38  ;;  %v11515_v38 = vld [vmem:[%s16181_s10 + $0x6e0] ss:$8 sps:$4 sm:$0xff]   ;;  %s12308_s3 = smov 63  }
 0xc52   :  { %8445 = vmatpush1.bf16.msra.mxu0 %v11503_v20  ;;  %v2047_v10 = vmul.f32 %v2039_v57, %v140_v11  ;;  %v4471_v11 = vmul.f32 %v13903_v23, %v13714_v21 }
 0xc53   :  { %8446 = vmatprep.subr.bf16.mxu0 %v11511_v52 }
 0xc54   :  { %4620 = vrot.lane.b32.xlu1 %v9759_v22, %s16288_s17  ;;  %4717 = vrot.lane.b32.xlu0 %v9765_v15, %s16289_s19  ;;  %s12297_s19 = smov 32   ;;  %v11523_v22 = vld [vmem:[%s16181_s10 + $0x6f4] ss:$8 sps:$4 sm:$0xff]   ;;  %v2451_v15 = vrot.slane %v2444_v7, %v13555_v24  ;;  %v2055_v58 = vadd.f32 %v2047_v10, %v148_v8  ;;  %s12311_s17 = smov 112  }
 0xc56   :  { %8447 = vmatpush1.bf16.msra.mxu0 %v11509_v59  ;;  %v2468_v50 = vcombine.high %v2451_v15, %v2451_v15  ;;  %v141_v59 = vld [vmem:[%s16178_s7 + $0x30] sm:$0xff] }
 0xc57   :  { %8448 = vmatprep.subr.bf16.mxu0 %v11517_v41 }
 0xc58   :  { %2366 = vrot.lane.b32.xlu1 %v13759_v61, %s12293_s23  ;;  %4737 = vrot.lane.b32.xlu0 %v9766_v9, %s16290_s5  ;;  %v4493_v61 = vmax.f32 %v4485_v49, 0.0  ;;  %v9506_v9 = vrot.slane %v2451_v15, 9  ;;  %v9507_v49 = vrot.slane %v2468_v50, 9  ;;  %s12304_s5 = smov 69  }
 0xc5a   :  { %v4763_v32 = vrot.slane %v4493_v61, %v13555_v24  ;;  %8449 = vmatpush1.bf16.msra.mxu0 %v11515_v38 }
 0xc5b   :  { %8450 = vmatprep.subr.bf16.mxu0 %v11523_v22 }
 0xc5c   :  { %4731 = vrot.lane.b32.xlu1 %v4730_v18, %s12293_s23  ;;  %2391 = vrot.lane.b32.xlu0 %v9503_v14, %s12294_s18  ;;  %v9768_v48 = vrot.slane %v4763_v32, 9  ;;  %v4776_v45 = vcombine.high %v4763_v32, %v4763_v32  ;;  %v4789_v18 = vcombine.high %v4493_v61, %v4493_v61  ;;  %s12301_s23 = smov 81   ;;  %v2063_v14 = vmax.f32 %v2055_v58, 0.0 }
 0xc5e   :  { %v9769_v53 = vrot.slane %v4776_v45, 9  ;;  %8451 = vmatpush1.bf16.msra.mxu0 %v11521_v51 }
 0xc5f   :  { %8461 = vmatprep.subr.bf16.mxu0 %v11529_v4 }
 0xc60   :  { %2384 = vrot.lane.b32.xlu1 %v2383_v44, %s12295_s21  ;;  %2416 = vrot.lane.b32.xlu0 %v9504_v25, %s12296_s6  ;;  %v4796_v44 = vrot.slane %v4789_v18, %v13555_v24  ;;  %v2493_v25 = vrot.slane %v2063_v14, %v13555_v24  ;;  %v4479_v18 = vmul.f32 %v4471_v11, %v141_v59  ;;  %v142_v11 = vld [vmem:[%s16178_s7 + $0x38] sm:$0xff]  ;;  %s12316_s7 = smov 33  }
 0xc62   :  { %v9770_v3 = vrot.slane %v4796_v44, 9  ;;  %v9508_v34 = vrot.slane %v2493_v25, 9 }
 0xc64   :  { %4744 = vrot.lane.b32.xlu1 %v4743_v63, %s12295_s21  ;;  %4684 = vrot.lane.b32.xlu0 %v9763_v16, %s16291_s2  ;;  %v4809_v63 = vcombine.high %v4796_v44, %v4796_v44  ;;  %v2524_v16 = vcombine.high %v2063_v14, %v2063_v14  ;;  %s12305_s21 = smov 8   ;;  %s16292_s2 = smov 118  }
 0xc66   :  { %v2531_v56 = vrot.slane %v2524_v16, %v13555_v24  ;;  %v9771_v39 = vrot.slane %v4809_v63, 9 }
 0xc68   :  { %2409 = vrot.lane.b32.xlu1 %v2408_v36, %s12297_s19  ;;  %4770 = vrot.lane.b32.xlu0 %v9768_v48, %s12296_s6  ;;  %v4486_v36 = vadd.f32 %v4478_v6, %v148_v8  ;;  %s12306_s6 = smov 124   ;;  %v9510_v10 = vrot.slane %v2531_v56, 9 }
 0xc6a   :  { %v4494_v61 = vmax.f32 %v4486_v36, 0.0 }
 0xc6c   :  { %2434 = vrot.lane.b32.xlu1 %v9505_v17, %s12298_s24  ;;  %4750 = vrot.lane.b32.xlu0 %v9767_v26, %s12294_s18  ;;  %s12299_s18 = smov 26   ;;  %v4829_v13 = vrot.slane %v4494_v61, %v13555_v24  ;;  %v4853_v54 = vcombine.high %v4494_v61, %v4494_v61  ;;  %v14204_v17 = vpop.permute.xlu0 %2373  ;;  %v2040_v26 = vmul.f32 %v13250_v60, %v13222_v0  ;;  %v149_v0 = vld [vmem:[%s16179_s8 + $0x30] sm:$0xff]  ;;  %s12317_s8 = smov 94  }
 0xc6d   :  { %v4487_v58 = vadd.f32 %v4479_v18, %v149_v0  ;;  %v4472_v60 = vmul.f32 %v13903_v23, %v13720_v43 }
 0xc6e   :  { %v4842_v20 = vcombine.high %v4829_v13, %v4829_v13  ;;  %v4860_v52 = vrot.slane %v4853_v54, %v13555_v24  ;;  %v2048_v7 = vmul.f32 %v2040_v26, %v141_v59 }
 0xc6f   :  { %v4495_v36 = vmax.f32 %v4487_v58, 0.0  ;;  %v4480_v58 = vmul.f32 %v4472_v60, %v142_v11 }
 0xc70   :  { %2427 = vrot.lane.b32.xlu1 %v2426_v5, %s12299_s18  ;;  %4764 = vrot.lane.b32.xlu0 %v4763_v32, %s12297_s19  ;;  %v9772_v32 = vrot.slane %v4829_v13, 9  ;;  %v2511_v5 = vcombine.high %v2493_v25, %v2493_v25  ;;  %v9773_v41 = vrot.slane %v4842_v20, 9  ;;  %v9774_v21 = vrot.slane %v4860_v52, 9  ;;  %s12314_s19 = smov 100  }
 0xc72   :  { %v9509_v48 = vrot.slane %v2511_v5, 9 }
 0xc74   :  { %4777 = vrot.lane.b32.xlu1 %v4776_v45, %s12299_s18  ;;  %4783 = vrot.lane.b32.xlu0 %v9769_v53, %s12298_s24  ;;  %s12303_s24 = smov 75   ;;  %v2549_v53 = vcombine.high %v2531_v56, %v2531_v56 }
 0xc78   :  { %2452 = vrot.lane.b32.xlu1 %v2451_v15, %s12300_s1  ;;  %2459 = vrot.lane.b32.xlu0 %v9506_v9, %s12301_s23  ;;  %v2056_v15 = vadd.f32 %v2048_v7, %v149_v0  ;;  %v4873_v9 = vcombine.high %v4860_v52, %v4860_v52  ;;  %v4919_v7 = vcombine.high %v4495_v36, %v4495_v36 }
 0xc7c   :  { %4797 = vrot.lane.b32.xlu1 %v4796_v44, %s12300_s1  ;;  %4803 = vrot.lane.b32.xlu0 %v9770_v3, %s12301_s23  ;;  %v2064_v44 = vmax.f32 %v2056_v15, 0.0  ;;  %v9511_v3 = vrot.slane %v2549_v53, 9  ;;  %s12315_s23 = smov 39  }
 0xc7e   :  { %v2574_v14 = vrot.slane %v2064_v44, %v13555_v24  ;;  %v2610_v16 = vcombine.high %v2064_v44, %v2064_v44 }
 0xc80   :  { %2469 = vrot.lane.b32.xlu1 %v2468_v50, %s12302_s20  ;;  %2476 = vrot.lane.b32.xlu0 %v9507_v49, %s12303_s24  ;;  %v2617_v54 = vrot.slane %v2610_v16, %v13555_v24 }
 0xc82   :  { %v2635_v44 = vcombine.high %v2617_v54, %v2617_v54 }
 0xc84   :  { %4810 = vrot.lane.b32.xlu1 %v4809_v63, %s12302_s20  ;;  %2501 = vrot.lane.b32.xlu0 %v9508_v34, %s12304_s5  ;;  %v4893_v63 = vrot.slane %v4495_v36, %v13555_v24  ;;  %v9515_v16 = vrot.slane %v2635_v44, 9 }
 0xc88   :  { %2494 = vrot.lane.b32.xlu1 %v2493_v25, %s12305_s21  ;;  %4836 = vrot.lane.b32.xlu0 %v9772_v32, %s12304_s5  ;;  %v9775_v25 = vrot.slane %v4873_v9, 9  ;;  %s12318_s5 = smov 27  }
 0xc8c   :  { %2532 = vrot.lane.b32.xlu1 %v2531_v56, %s12306_s6  ;;  %4816 = vrot.lane.b32.xlu0 %v9771_v39, %s12303_s24  ;;  %v2592_v39 = vcombine.high %v2574_v14, %v2574_v14 }
 0xc8e   :  { %v9513_v26 = vrot.slane %v2592_v39, 9 }
 0xc90   :  { %2512 = vrot.lane.b32.xlu1 %v2511_v5, %s12307_s0  ;;  %4830 = vrot.lane.b32.xlu0 %v4829_v13, %s12305_s21  ;;  %v9512_v13 = vrot.slane %v2574_v14, 9  ;;  %s12319_s21 = smov 88  }
 0xc94   :  { %2519 = vrot.lane.b32.xlu1 %v9509_v48, %s12308_s3  ;;  %4861 = vrot.lane.b32.xlu0 %v4860_v52, %s12306_s6  ;;  %s12320_s6 = smov 21  }
 0xc96   :  { %v14212_v57 = vpop.permute.xlu1 %4698  ;;  %v14214_v45 = vpop.permute.xlu0 %4566 }
 0xc98   :  { %4849 = vrot.lane.b32.xlu1 %v9773_v41, %s12308_s3  ;;  %4843 = vrot.lane.b32.xlu0 %v4842_v20, %s12307_s0  ;;  %v4906_v20 = vcombine.high %v4893_v63, %v4893_v63  ;;  %v9776_v41 = vrot.slane %v4893_v63, 9 }
 0xc9a   :  { %v4514_v38 = vpop.permute.xlu1 %4513  ;;  %v14221_v22 = vpop.permute.xlu0 %4632 }
 0xc9b   :  { %v4515_v29 = vrot.slane %v4514_v38, 6 }
 0xc9c   :  { %2544 = vrot.lane.b32.xlu1 %v9510_v10, %s12309_s27  ;;  %2550 = vrot.lane.b32.xlu0 %v2549_v53, %s16292_s2  ;;  %v2049_v10 = vmul.f32 %v2041_v55, %v142_v11  ;;  %v4926_v53 = vrot.slane %v4919_v7, %v13555_v24 }
 0xc9d   :  { %v4516_v51 = vsel %vm16293_vm5, %v4515_v29, %v4514_v38  ;;  %v9777_v38 = vrot.slane %v4906_v20, 9  ;;  %vm16299_vm5 = vcmask 850944  }
 0xc9e   :  { %v4509_v8 = vpop.permute.xlu1 %4508  ;;  %v4534_v4 = vpop.permute.xlu0 %4533 }
 0xc9f   :  { %4511 = vst.msk [vmem:[#allocation3 + $0x1] sm:$0x1] %vm16294_vm10, %v4509_v8  ;;  %v4535_v47 = vrot.slane %v4534_v4, 6  ;;  %vm16301_vm10 = vnez %v16255_v35 }
 0xca0   :  { %4518 = vst.msk [vmem:[#allocation3 + $0x1] sm:$0x5] %vm13768_vm8, %v4516_v51  ;;  %4869 = vrot.lane.b32.xlu1 %v9774_v21, %s12309_s27  ;;  %4874 = vrot.lane.b32.xlu0 %v4873_v9, %s16292_s2  ;;  %vm16295_vm8 = vcmask 949248   ;;  %v9514_v21 = vrot.slane %v2617_v54, 9  ;;  %v2057_v51 = vadd.f32 %v2049_v10, %v150_v40 }
 0xca1   :  { %v4536_v32 = vsel %vm16295_vm8, %v4535_v47, %v4534_v4  ;;  %v4568_v4 = vrot.slane %v14214_v45, 6  ;;  %v4939_v47 = vcombine.high %v4926_v53, %v4926_v53  ;;  %vm16302_vm8 = vcmask 801792  }
 0xca2   :  { %v14229_v6 = vpop.permute.xlu1 %4574  ;;  %v14231_v50 = vpop.permute.xlu0 %4579 }
 0xca3   :  { %v4581_v43 = vrot.slane %v14231_v50, 6  ;;  %v4569_v36 = vsel %vm16299_vm5, %v4568_v4, %v14214_v45  ;;  %vm16306_vm5 = vcmask 745720  }
 0xca4   :  { %2562 = vrot.lane.b32.xlu1 %v9511_v3, %s12310_s22  ;;  %2575 = vrot.lane.b32.xlu0 %v2574_v14, %s12311_s17  ;;  %v9778_v3 = vrot.slane %v4926_v53, 9  ;;  %v14269_v14 = vmax.f32 %v2057_v51, 0.0 }
 0xca6   :  { %v14234_v49 = vpop.permute.xlu1 %4640  ;;  %v14236_v61 = vpop.permute.xlu0 %4599 }
 0xca8   :  { %4882 = vrot.lane.b32.xlu1 %v9775_v25, %s12310_s22  ;;  %4894 = vrot.lane.b32.xlu0 %v4893_v63, %s12311_s17  ;;  %v4601_v25 = vrot.slane %v14236_v61, 6  ;;  %v4488_v63 = vadd.f32 %v4480_v58, %v150_v40 }
 0xcaa   :  { %v4522_v34 = vpop.permute.xlu1 %4521  ;;  %v14240_v56 = vpop.permute.xlu0 %4645 }
 0xcab   :  { %4524 = vst.msk [vmem:[#allocation3 + $0x3] sm:$0x1] %vm16296_vm0, %v4522_v34  ;;  %v4582_v34 = vsel %vm16302_vm8, %v4581_v43, %v14231_v50  ;;  %vm16303_vm0 = vcmask 794920   ;;  %v2660_v50 = vrot.slane %v14269_v14, %v13555_v24  ;;  %vm16309_vm8 = vcmask 696520  }
 0xcac   :  { %4538 = vst.msk [vmem:[#allocation3 + $0x3] sm:$0x5] %vm13778_vm13, %v4536_v32  ;;  %2587 = vrot.lane.b32.xlu1 %v9512_v13, %s12312_s28  ;;  %2593 = vrot.lane.b32.xlu0 %v2592_v39, %s12313_s26  ;;  %vm16298_vm13 = vcmask 900096   ;;  %v4634_v32 = vrot.slane %v14221_v22, 6 }
 0xcae   :  { %v4542_v5 = vpop.permute.xlu1 %4541  ;;  %v14246_v48 = vpop.permute.xlu0 %4665 }
 0xcaf   :  { %4544 = vst.msk [vmem:[#allocation3 + $0x5] sm:$0x1] %vm16297_vm4, %v4542_v5  ;;  %vm16304_vm4 = vnez %v16257_v37  ;;  %v14291_v5 = vmax.f32 %v4488_v63, 0.0  ;;  %v4647_v37 = vrot.slane %v14240_v56, 6 }
 0xcb0   :  { %2618 = vrot.lane.b32.xlu1 %v2617_v54, %s12314_s19  ;;  %4907 = vrot.lane.b32.xlu0 %v4906_v20, %s12313_s26  ;;  %v9779_v54 = vrot.slane %v4939_v47, 9  ;;  %v2375_v20 = vrot.slane %v14204_v17, 6 }
 0xcb1   :  { %v14309_v55 = vrot.slane %v14291_v5, %v13555_v24 }
 0xcb2   :  { %v4588_v52 = vpop.permute.xlu1 %4587  ;;  %v14251_v59 = vpop.permute.xlu0 %4704 }
 0xcb3   :  { %v4972_v4 = vcombine.high %v14309_v55, %v14309_v55 }
 0xcb4   :  { %2605 = vrot.lane.b32.xlu1 %v9513_v26, %s12315_s23  ;;  %4902 = vrot.lane.b32.xlu0 %v9776_v41, %s12312_s28  ;;  %s12323_s28 = smov 15  }
 0xcb6   :  { %v4608_v0 = vpop.permute.xlu1 %4607  ;;  %v4547_v29 = vpop.permute.xlu0 %4546 }
 0xcb7   :  { %v4548_v15 = vrot.slane %v4547_v29, 6 }
 0xcb8   :  { %4915 = vrot.lane.b32.xlu1 %v9777_v38, %s12315_s23  ;;  %4927 = vrot.lane.b32.xlu0 %v4926_v53, %s12314_s19 }
 0xcb9   :  { %v4549_v18 = vsel %vm16298_vm13, %v4548_v15, %v4547_v29  ;;  %vm16305_vm13 = vcmask 752640  }
 0xcba   :  { %v14263_v8 = vpop.permute.xlu1 %4678  ;;  %4551 = vst.msk [vmem:[#allocation3 + $0x5] sm:$0x5] %vm13788_vm6, %v4549_v18  ;;  %v4613_v9 = vpop.permute.xlu0 %4612  ;;  %vm16300_vm6 = vcmask 844120   ;;  %v4602_v35 = vsel %vm16305_vm13, %v4601_v25, %v14236_v61  ;;  %vm2380_vm13 = vcmask 305154   ;;  %v4985_v25 = vcombine.high %v14291_v5, %v14291_v5  ;;  %v11502_v5 = vld [vmem:[%s16181_s10 + $0x144] ss:$8 sps:$4 sm:$0xff]  }
 0xcbb   :  { %v4614_v13 = vrot.slane %v4613_v9, 6 }
 0xcbc   :  { %2630 = vrot.lane.b32.xlu1 %v9514_v21, %s12316_s7  ;;  %2636 = vrot.lane.b32.xlu0 %v2635_v44, %s12317_s8  ;;  %v11484_v21 = vld [vmem:[%s16181_s10 + $0x114] ss:$8 sps:$4 sm:$0xff]   ;;  %v11490_v44 = vld [vmem:[%s16181_s10 + $0x124] ss:$8 sps:$4 sm:$0xff]  }
 0xcbe   :  { %v4555_v23 = vpop.permute.xlu1 %4554  ;;  %v4654_v62 = vpop.permute.xlu0 %4653 }
 0xcbf   :  { %4557 = vst.msk [vmem:[#allocation3 + $0x7] sm:$0x1] %vm16300_vm6, %v4555_v23  ;;  %vm16307_vm6 = vnez %v16259_v12 }
 0xcc0   :  { %4571 = vst.msk [vmem:[#allocation3 + $0x7] sm:$0x5] %vm16301_vm10, %v4569_v36  ;;  %4935 = vrot.lane.b32.xlu1 %v9778_v3, %s12316_s7  ;;  %4940 = vrot.lane.b32.xlu0 %v4939_v47, %s12317_s8  ;;  %vm16308_vm10 = vcmask 703488   ;;  %v9780_v36 = vrot.slane %v14309_v55, 9  ;;  %v11496_v47 = vld [vmem:[%s16181_s10 + $0x134] ss:$8 sps:$4 sm:$0xff]  }
 0xcc1   :  { %4577 = vst.msk [vmem:[#allocation3 + $0x9] sm:$0x1] %vm16303_vm0, %v14229_v6  ;;  %v4615_v6 = vsel %vm16308_vm10, %v4614_v13, %v4613_v9  ;;  %vm16310_vm0 = vnez %v16261_v1  ;;  %vm2376_vm10 = vcmask 859136   ;;  %v11482_v9 = vld [vmem:[%s16181_s10 + $0x110] ss:$8 sps:$4 sm:$0xff]   ;;  %s12324_s8 = smov 9  }
 0xcc2   :  { %4584 = vst.msk [vmem:[#allocation3 + $0x9] sm:$0x5] %vm16304_vm4, %v4582_v34  ;;  %v14283_v45 = vpop.permute.xlu1 %4711  ;;  %v4674_v39 = vpop.permute.xlu0 %4673  ;;  %vm2379_vm4 = vcmask 1041224   ;;  %v9781_v34 = vrot.slane %v4972_v4, 9 }
 0xcc3   :  { %4590 = vst.msk [vmem:[#allocation3 + $0xb] sm:$0x1] %vm16306_vm5, %v4588_v52  ;;  %vm16311_vm5 = vcmask 654336   ;;  %v4667_v52 = vrot.slane %v14246_v48, 6 }
 0xcc4   :  { %2648 = vrot.lane.b32.xlu1 %v9515_v16, %s12318_s5  ;;  %4604 = vst.msk [vmem:[#allocation3 + $0xb] sm:$0x5] %vm16307_vm6, %v4602_v35  ;;  %2661 = vrot.lane.b32.xlu0 %v2660_v50, %s12319_s21  ;;  %v4635_v12 = vsel %vm16311_vm5, %v4634_v32, %v14221_v22  ;;  %vm16312_vm6 = vcmask 647320   ;;  %vm16314_vm5 = vcmask 605184   ;;  %v14393_v32 = vrot.slane %v4985_v25, %v13555_v24 }
 0xcc5   :  { %4610 = vst.msk [vmem:[#allocation3 + $0xd] sm:$0x1] %vm16309_vm8, %v4608_v0  ;;  %vm16313_vm8 = vnez %v16263_v30  ;;  %v4648_v7 = vsel %vm16314_vm5, %v4647_v37, %v14240_v56  ;;  %v9516_v0 = vrot.slane %v2660_v50, 9  ;;  %v2696_v56 = vcombine.high %v14269_v14, %v14269_v14 }
 0xcc6   :  { %4617 = vst.msk [vmem:[#allocation3 + $0xd] sm:$0x5] %vm16310_vm0, %v4615_v6  ;;  %v4621_v61 = vpop.permute.xlu1 %4620  ;;  %v14304_v26 = vpop.permute.xlu0 %4717  ;;  %vm2369_vm0 = vcmask 852320   ;;  %vm2398_vm5 = vcmask 256002   ;;  %v4706_v35 = vrot.slane %v14251_v59, 6 }
 0xcc7   :  { %4623 = vst.msk [vmem:[#allocation3 + $0xf] sm:$0x1] %vm16312_vm6, %v4621_v61  ;;  %v5018_v1 = vld [vmem:[#allocation3] sm:$0xff]  ;;  %vm14321_vm6 = vmor %vm2380_vm13, %vm2379_vm4  ;;  %vm16320_vm4 = vcmask 548920   ;;  %vm16321_vm13 = vcmask 499720   ;;  %v14356_v15 = vrot.slane %v2696_v56, %v13555_v24  ;;  %v4719_v6 = vrot.slane %v14304_v26, 6 }
 0xcc8   :  { %4637 = vst.msk [vmem:[#allocation3 + $0xf] sm:$0x5] %vm16313_vm8, %v4635_v12  ;;  %4948 = vrot.lane.b32.xlu1 %v9779_v54, %s12318_s5  ;;  %v5041_v41 = vrot.slane %v5018_v1, %v13555_v24  ;;  %v5034_v22 = vcombine.high %v5018_v1, %v5018_v1  ;;  %4960 = vrot.lane.b32.xlu0 %v14309_v55, %s12319_s21  ;;  %vm16318_vm8 = vnez %v16265_v28  ;;  %v11514_v56 = vld [vmem:[%s16181_s10 + $0x164] ss:$8 sps:$4 sm:$0xff]  }
 0xcc9   :  { %4643 = vst.msk [vmem:[#allocation3 + $0x11] sm:$0x1] %vm16315_vm15, %v14234_v49  ;;  %v2377_v49 = vsel %vm2376_vm10, %v2375_v20, %v14204_v17  ;;  %vm16319_vm15 = vcmask 556032   ;;  %v2678_v28 = vcombine.high %v2660_v50, %v2660_v50  ;;  %v11472_v17 = vld [vmem:[%s16181_s10 + $0x100] ss:$8 sps:$4 sm:$0xff]   ;;  %v2721_v20 = vcombine.high %v14356_v15, %v14356_v15 }
 0xcca   :  { %4650 = vst.msk [vmem:[#allocation3 + $0x11] sm:$0x5] %vm16318_vm8, %v4648_v7  ;;  %v2367_v30 = vpop.permute.xlu1 %2366  ;;  %v5049_v38 = vcombine.high %v5041_v41, %v5041_v41  ;;  %v14330_v10 = vrot.slane %v5034_v22, %v13555_v24  ;;  %v4668_v29 = vsel %vm16319_vm15, %v4667_v52, %v14246_v48  ;;  %v14337_v53 = vpop.permute.xlu0 %4737  ;;  %v5200_v19 = vpack.c.bf16 %v5041_v41, %v5041_v41  ;;  %v11494_v50 = vld [vmem:[%s16181_s10 + $0x130] ss:$8 sps:$4 sm:$0xff]  }
 0xccb   :  { %4656 = vst.msk [vmem:[#allocation3 + $0x13] sm:$0x1] %vm16320_vm4, %v4654_v62  ;;  %vm16243_vm8 = vcmask 809984   ;;  %v9517_v23 = vrot.slane %v2678_v28, 9  ;;  %v11488_v62 = vld [vmem:[%s16181_s10 + $0x120] ss:$8 sps:$4 sm:$0xff]  }
 0xccc   :  { %2370 = vst.msk [vmem:[#allocation3 + $0x1a] sm:$0x1] %vm2369_vm0, %v2367_v30  ;;  %2673 = vrot.lane.b32.xlu1 %v9516_v0, %s12320_s6  ;;  %v5201_v40 = vpack.c.bf16 %v5049_v38, %v5049_v38  ;;  %v5050_v48 = vcombine.high %v14330_v10, %v14330_v10  ;;  %2679 = vrot.lane.b32.xlu0 %v2678_v28, %s12321_s4  ;;  %vm2422_vm4 = vcmask 1041128   ;;  %v9518_v12 = vrot.slane %v14356_v15, 9 }
 0xccd   :  { %4670 = vst.msk [vmem:[#allocation3 + $0x13] sm:$0x5] %vm13850_vm3, %v4668_v29  ;;  %vm2397_vm3 = vcmask 1041176   ;;  %v4739_v41 = vrot.slane %v14337_v53, 6  ;;  %v9519_v7 = vrot.slane %v2721_v20, 9  ;;  %v5005_v0 = vcombine.high %v14393_v32, %v14393_v32 }
 0xcce   :  { %2382 = vst.msk [vmem:[#allocation3 + $0x1a] sm:$0x5] %vm14321_vm6, %v2377_v49  ;;  %8206 = vmatprep.mubr.bf16.mxu1 %v5201_v40  ;;  %v14353_v60 = vpop.permute.xlu1 %4731  ;;  %v5203_v18 = vpack.c.bf16 %v5050_v48, %v5050_v48  ;;  %v2392_v51 = vpop.permute.xlu0 %2391  ;;  %vm14372_vm15 = vmor %vm2398_vm5, %vm2397_vm3  ;;  %vm2419_vm3 = vcmask 760832   ;;  %vm2412_vm5 = vcmask 753920   ;;  %v11512_v48 = vld [vmem:[%s16181_s10 + $0x160] ss:$8 sps:$4 sm:$0xff]  }
 0xccf   :  { %4676 = vst.msk [vmem:[#allocation3 + $0x15] sm:$0x1] %vm16321_vm13, %v4674_v39  ;;  %8207 = vmatmul.mubr.bf16.vlgmr.msra.gmra.mrb[72].mxu1 %v5200_v19  ;;  %vm2423_vm13 = vcmask 206850   ;;  %v4740_v38 = vsel %vm2376_vm10, %v4739_v41, %v14337_v53  ;;  %vm16330_vm10 = vcmask 809984   ;;  %v11520_v19 = vld [vmem:[%s16181_s10 + $0x174] ss:$8 sps:$4 sm:$0xff]  }
 0xcd0   :  { %4681 = vst.msk [vmem:[#allocation3 + $0x15] sm:$0x1] %vm2301_vm14, %v14263_v8  ;;  %v2393_v8 = vrot.slane %v2392_v51, 6  ;;  %8216 = vmatpush1.bf16.msra.mxu1 %v11472_v17  ;;  %2704 = vrot.lane.b32.xlu1 %v14356_v15, %s12322_s30  ;;  %vm2387_vm14 = vcmask 803120   ;;  %v9782_v17 = vrot.slane %v14393_v32, 9 }
 0xcd1   :  { %4973 = vrot.lane.b32.xlu0 %v4972_v4, %s12321_s4  ;;  %8247 = vmatprep.mubr.bf16.mxu1 %v5203_v18  ;;  %s12326_s4 = smov 3   ;;  %v9783_v18 = vrot.slane %v5005_v0, 9  ;;  %v11526_v4 = vld [vmem:[%s16181_s10 + $0x184] ss:$8 sps:$4 sm:$0xff]   ;;  %v11536_v41 = vld [vmem:[%s16181_s10 + $0x710] ss:$8 sps:$4 sm:$0xff]  }
 0xcd2   :  { %8217 = vmatprep.subr.bf16.mxu1 %v11484_v21  ;;  %v2385_v43 = vpop.permute.xlu1 %2384  ;;  %v2395_v3 = vsel %vm16243_vm8, %v2393_v8, %v2392_v51  ;;  %v2417_v14 = vpop.permute.xlu0 %2416  ;;  %vm14405_vm8 = vmor %vm2423_vm13, %vm2422_vm4  ;;  %vm16326_vm4 = vcmask 957440   ;;  %v11518_v51 = vld [vmem:[%s16181_s10 + $0x170] ss:$8 sps:$4 sm:$0xff]   ;;  %vm2472_vm13 = vcmask 606320  }
 0xcd3   :  { %2388 = vst.msk [vmem:[#allocation3 + $0x1c] sm:$0x1] %vm2387_vm14, %v2385_v43  ;;  %v2418_v13 = vrot.slane %v2417_v14, 6  ;;  %v4707_v1 = vsel %vm16326_vm4, %v4706_v35, %v14251_v59  ;;  %v4720_v59 = vsel %vm2351_vm7, %v4719_v6, %v14304_v26  ;;  %vm2430_vm7 = vcmask 704720   ;;  %v11524_v43 = vld [vmem:[%s16181_s10 + $0x180] ss:$8 sps:$4 sm:$0xff]  }
 0xcd4   :  { %8218 = vmatpush1.bf16.msra.mxu1 %v11482_v9  ;;  %2691 = vrot.lane.b32.xlu1 %v9517_v23, %s12323_s28  ;;  %2400 = vst.msk [vmem:[#allocation3 + $0x1c] sm:$0x5] %vm14372_vm15, %v2395_v3  ;;  %v11527_v35 = vld [vmem:[%s16181_s10 + $0x700] ss:$8 sps:$4 sm:$0xff]   ;;  %v11565_v3 = vld [vmem:[%s16181_s10 + $0x1f4] ss:$8 sps:$4 sm:$0xff]  }
 0xcd5   :  { %4968 = vrot.lane.b32.xlu0 %v9780_v36, %s12320_s6  ;;  %8219 = vmatprep.subr.bf16.mxu1 %v11490_v44  ;;  %v2420_v52 = vsel %vm2419_vm3, %v2418_v13, %v2417_v14  ;;  %s12325_s6 = smov 70   ;;  %v11532_v14 = vld [vmem:[%s16181_s10 + $0x194] ss:$8 sps:$4 sm:$0xff]  }
 0xcd6   :  { %v14390_v63 = vpop.permute.xlu1 %4744  ;;  %v4685_v16 = vpop.permute.xlu0 %4684 }
 0xcd7   :  { %v4686_v39 = vrot.slane %v4685_v16, 6 }
 0xcd8   :  { %8220 = vmatpush1.bf16.msra.mxu1 %v11488_v62  ;;  %4981 = vrot.lane.b32.xlu1 %v9781_v34, %s12323_s28 }
 0xcd9   :  { %4993 = vrot.lane.b32.xlu0 %v14393_v32, %s12322_s30  ;;  %8221 = vmatprep.subr.bf16.mxu1 %v11496_v47  ;;  %v4687_v61 = vsel %vm2308_vm1, %v4686_v39, %v4685_v16  ;;  %vm16327_vm1 = vcmask 901520   ;;  %v11530_v32 = vld [vmem:[%s16181_s10 + $0x190] ss:$8 sps:$4 sm:$0xff]  }
 0xcda   :  { %v2410_v54 = vpop.permute.xlu1 %2409  ;;  %4689 = vst.msk [vmem:[#allocation3 + $0x15] sm:$0x5] %vm13858_vm12, %v4687_v61  ;;  %v4771_v55 = vpop.permute.xlu0 %4770  ;;  %vm2440_vm12 = vcmask 1041080   ;;  %v11535_v61 = vld [vmem:[%s16181_s10 + $0x1a4] ss:$8 sps:$4 sm:$0xff]  }
 0xcdb   :  { %2413 = vst.msk [vmem:[#allocation3 + $0x1e] sm:$0x1] %vm2412_vm5, %v2410_v54  ;;  %v11538_v54 = vld [vmem:[%s16181_s10 + $0x714] ss:$8 sps:$4 sm:$0xff]  }
 0xcdc   :  { %4701 = vst.msk [vmem:[#allocation3 + $0x17] sm:$0x1] %vm2326_vm11, %v14212_v57  ;;  %8222 = vmatpush1.bf16.msra.mxu1 %v11494_v50  ;;  %2716 = vrot.lane.b32.xlu1 %v9518_v12, %s12324_s8  ;;  %v11508_v57 = vld [vmem:[%s16181_s10 + $0x154] ss:$8 sps:$4 sm:$0xff]   ;;  %vm2441_vm11 = vcmask 157698  }
 0xcdd   :  { %2425 = vst.msk [vmem:[#allocation3 + $0x1e] sm:$0x5] %vm14405_vm8, %v2420_v52  ;;  %2722 = vrot.lane.b32.xlu0 %v2721_v20, %s12325_s6  ;;  %8223 = vmatprep.subr.bf16.mxu1 %v11502_v5 }
 0xcde   :  { %4709 = vst.msk [vmem:[#allocation3 + $0x17] sm:$0x5] %vm13866_vm2, %v4707_v1  ;;  %v2435_v22 = vpop.permute.xlu1 %2434  ;;  %v4751_v42 = vpop.permute.xlu0 %4750  ;;  %vm2437_vm2 = vcmask 711680  }
 0xcdf   :  { %4714 = vst.msk [vmem:[#allocation3 + $0x19] sm:$0x1] %vm16327_vm1, %v14283_v45  ;;  %v2436_v30 = vrot.slane %v2435_v22, 6  ;;  %v4772_v45 = vrot.slane %v4771_v55, 6  ;;  %v4752_v26 = vrot.slane %v4751_v42, 6  ;;  %vm2479_vm1 = vcmask 613376  }
 0xce0   :  { %4722 = vst.msk [vmem:[#allocation3 + $0x19] sm:$0x5] %vm13876_vm9, %v4720_v59  ;;  %8224 = vmatpush1.bf16.msra.mxu1 %v11500_v33  ;;  %2734 = vrot.lane.b32.xlu1 %v9519_v7, %s12326_s4  ;;  %vm14457_vm9 = vmor %vm2441_vm11, %vm2440_vm12  ;;  %v11541_v33 = vld [vmem:[%s16181_s10 + $0x1b4] ss:$8 sps:$4 sm:$0xff]   ;;  %vm2507_vm11 = vcmask 1040936  }
 0xce1   :  { %4734 = vst.msk [vmem:[#allocation3 + $0x1b] sm:$0x1] %vm2369_vm0, %v14353_v60  ;;  %5006 = vrot.lane.b32.xlu0 %v5005_v0, %s12325_s6  ;;  %8225 = vmatprep.subr.bf16.mxu1 %v11508_v57  ;;  %v4753_v29 = vsel %vm16330_vm10, %v4752_v26, %v4751_v42  ;;  %v2438_v11 = vsel %vm2437_vm2, %v2436_v30, %v2435_v22  ;;  %vm2455_vm0 = vcmask 655520   ;;  %v11544_v22 = vld [vmem:[%s16181_s10 + $0x724] ss:$8 sps:$4 sm:$0xff]  }
 0xce2   :  { %4742 = vst.msk [vmem:[#allocation3 + $0x1b] sm:$0x5] %vm14321_vm6, %v4740_v38  ;;  %v2428_v53 = vpop.permute.xlu1 %2427  ;;  %v4765_v28 = vpop.permute.xlu0 %4764  ;;  %v4773_v40 = vsel %vm2419_vm3, %v4772_v45, %v4771_v55  ;;  %vm2464_vm6 = vcmask 1041032   ;;  %vm2482_vm3 = vcmask 1040984   ;;  %v11533_v55 = vld [vmem:[%s16181_s10 + $0x1a0] ss:$8 sps:$4 sm:$0xff]  }
 0xce3   :  { %4747 = vst.msk [vmem:[#allocation3 + $0x1d] sm:$0x1] %vm2387_vm14, %v14390_v63  ;;  %v11539_v30 = vld [vmem:[%s16181_s10 + $0x1b0] ss:$8 sps:$4 sm:$0xff]   ;;  %v11542_v0 = vld [vmem:[%s16181_s10 + $0x720] ss:$8 sps:$4 sm:$0xff]  }
 0xce4   :  { %4755 = vst.msk [vmem:[#allocation3 + $0x1d] sm:$0x5] %vm14372_vm15, %v4753_v29  ;;  %8226 = vmatpush1.bf16.msra.mxu1 %v11506_v27  ;;  %vm16333_vm15 = vcmask 662528   ;;  %v11547_v38 = vld [vmem:[%s16181_s10 + $0x1c4] ss:$8 sps:$4 sm:$0xff]  }
 0xce5   :  { %2431 = vst.msk [vmem:[#allocation3 + $0x20] sm:$0x1] %vm2430_vm7, %v2428_v53  ;;  %5001 = vrot.lane.b32.xlu0 %v9782_v17, %s12324_s8  ;;  %8227 = vmatprep.subr.bf16.mxu1 %v11514_v56  ;;  %vm16334_vm4 = vmmov %vm16333_vm15  ;;  %v11550_v27 = vld [vmem:[%s16181_s10 + $0x734] ss:$8 sps:$4 sm:$0xff]   ;;  %v11545_v29 = vld [vmem:[%s16181_s10 + $0x1c0] ss:$8 sps:$4 sm:$0xff]  }
 0xce6   :  { %4767 = vst.msk [vmem:[#allocation3 + $0x1f] sm:$0x1] %vm2412_vm5, %v4765_v28  ;;  %v4778_v60 = vpop.permute.xlu1 %4777  ;;  %v4784_v15 = vpop.permute.xlu0 %4783  ;;  %vm2483_vm5 = vcmask 59394   ;;  %v11548_v53 = vld [vmem:[%s16181_s10 + $0x730] ss:$8 sps:$4 sm:$0xff]  }
 0xce7   :  { %2443 = vst.msk [vmem:[#allocation3 + $0x20] sm:$0x5] %vm14457_vm9, %v2438_v11  ;;  %v4785_v21 = vrot.slane %v4784_v15, 6  ;;  %vm14535_vm12 = vmor %vm2483_vm5, %vm2482_vm3  ;;  %v11553_v11 = vld [vmem:[%s16181_s10 + $0x1d4] ss:$8 sps:$4 sm:$0xff]   ;;  %vm2547_vm3 = vcmask 958920  }
 0xce8   :  { %4775 = vst.msk [vmem:[#allocation3 + $0x1f] sm:$0x5] %vm14405_vm8, %v4773_v40  ;;  %8228 = vmatpush1.bf16.msra.mxu1 %v11512_v48  ;;  %vm2465_vm8 = vcmask 108546   ;;  %v11556_v17 = vld [vmem:[%s16181_s10 + $0x744] ss:$8 sps:$4 sm:$0xff]   ;;  %vm2556_vm5 = vcmask 1041328  }
 0xce9   :  { %4780 = vst.msk [vmem:[#allocation3 + $0x21] sm:$0x1] %vm2430_vm7, %v4778_v60  ;;  %5014 = vrot.lane.b32.xlu0 %v9783_v18, %s12326_s4  ;;  %8229 = vmatprep.subr.bf16.mxu1 %v11520_v19  ;;  %v4786_v8 = vsel %vm2437_vm2, %v4785_v21, %v4784_v15  ;;  %vm14497_vm14 = vmor %vm2465_vm8, %vm2464_vm6  ;;  %vm2508_vm2 = vcmask 10242   ;;  %vm2504_vm7 = vcmask 564224   ;;  %v11551_v60 = vld [vmem:[%s16181_s10 + $0x1d0] ss:$8 sps:$4 sm:$0xff]  }
 0xcea   :  { %v2453_v9 = vpop.permute.xlu1 %2452  ;;  %v2460_v44 = vpop.permute.xlu0 %2459  ;;  %4788 = vst.msk [vmem:[#allocation3 + $0x21] sm:$0x5] %vm14457_vm9, %v4786_v8  ;;  %vm2497_vm9 = vcmask 557120   ;;  %vm14561_vm10 = vmor %vm2508_vm2, %vm2507_vm11  ;;  %v11554_v15 = vld [vmem:[%s16181_s10 + $0x740] ss:$8 sps:$4 sm:$0xff]   ;;  %vm2538_vm6 = vcmask 1041376  }
 0xceb   :  { %2456 = vst.msk [vmem:[#allocation3 + $0x22] sm:$0x1] %vm2455_vm0, %v2453_v9  ;;  %v2461_v58 = vrot.slane %v2460_v44, 6  ;;  %v11559_v18 = vld [vmem:[%s16181_s10 + $0x1e4] ss:$8 sps:$4 sm:$0xff]   ;;  %vm2539_vm8 = vcmask 460802  }
 0xcec   :  { %8230 = vmatpush1.bf16.msra.mxu1 %v11518_v51  ;;  %v11581_v45 = vld [vmem:[%s16181_s10 + $0x220] ss:$8 sps:$4 sm:$0xff]   ;;  %vm2565_vm11 = vcmask 909720   ;;  %vm2581_vm2 = vcmask 1041280  }
 0xced   :  { %8231 = vmatprep.subr.bf16.mxu1 %v11526_v4  ;;  %v2462_v62 = vsel %vm16333_vm15, %v2461_v58, %v2460_v44  ;;  %v11562_v4 = vld [vmem:[%s16181_s10 + $0x754] ss:$8 sps:$4 sm:$0xff]   ;;  %vm2522_vm15 = vcmask 1008120  }
 0xcee   :  { %v4798_v47 = vpop.permute.xlu1 %4797  ;;  %v4804_v63 = vpop.permute.xlu0 %4803  ;;  %2467 = vst.msk [vmem:[#allocation3 + $0x22] sm:$0x5] %vm14497_vm14, %v2462_v62  ;;  %v14600_v44 = vld [vmem:[#allocation3 + $0x8] sm:$0xff] }
 0xcef   :  { %v5021_v23 = vld [vmem:[#allocation3 + $0x18] sm:$0xff]  ;;  %4800 = vst.msk [vmem:[#allocation3 + $0x23] sm:$0x1] %vm2455_vm0, %v4798_v47  ;;  %v4805_v16 = vrot.slane %v4804_v63, 6  ;;  %vm2515_vm0 = vcmask 507920   ;;  %v14626_v62 = vrot.slane %v14600_v44, %v13555_v24 }
 0xcf0   :  { %v5092_v36 = vrot.slane %v5021_v23, %v13555_v24  ;;  %v5085_v25 = vcombine.high %v5021_v23, %v5021_v23  ;;  %8232 = vmatpush1.bf16.msra.mxu1 %v11524_v43  ;;  %v11557_v43 = vld [vmem:[%s16181_s10 + $0x1e0] ss:$8 sps:$4 sm:$0xff]   ;;  %v11560_v23 = vld [vmem:[%s16181_s10 + $0x750] ss:$8 sps:$4 sm:$0xff]  }
 0xcf1   :  { %8233 = vmatprep.subr.bf16.mxu1 %v11532_v14  ;;  %v4806_v5 = vsel %vm16334_vm4, %v4805_v16, %v4804_v63  ;;  %vm2557_vm4 = vcmask 411650   ;;  %v11599_v14 = vld [vmem:[%s16181_s10 + $0x250] ss:$8 sps:$4 sm:$0xff]  }
 0xcf2   :  { %v5100_v34 = vcombine.high %v5092_v36, %v5092_v36  ;;  %v14510_v13 = vrot.slane %v5085_v25, %v13555_v24  ;;  %v5212_v37 = vpack.c.bf16 %v5092_v36, %v5092_v36  ;;  %v2470_v6 = vpop.permute.xlu1 %2469  ;;  %v2477_v20 = vpop.permute.xlu0 %2476  ;;  %4808 = vst.msk [vmem:[#allocation3 + $0x23] sm:$0x5] %vm14497_vm14, %v4806_v5  ;;  %vm2535_vm14 = vcmask 1014784   ;;  %v11568_v25 = vld [vmem:[%s16181_s10 + $0x764] ss:$8 sps:$4 sm:$0xff]  }
 0xcf3   :  { %2473 = vst.msk [vmem:[#allocation3 + $0x24] sm:$0x1] %vm2472_vm13, %v2470_v6  ;;  %v2478_v52 = vrot.slane %v2477_v20, 6  ;;  %v5066_v5 = vcombine.high %v14626_v62, %v14626_v62  ;;  %v11569_v6 = vld [vmem:[%s16181_s10 + $0x200] ss:$8 sps:$4 sm:$0xff]  }
 0xcf4   :  { %v5213_v39 = vpack.c.bf16 %v5100_v34, %v5100_v34  ;;  %v5101_v50 = vcombine.high %v14510_v13, %v14510_v13  ;;  %8234 = vmatpush1.bf16.msra.mxu1 %v11530_v32  ;;  %v11563_v34 = vld [vmem:[%s16181_s10 + $0x1f0] ss:$8 sps:$4 sm:$0xff]   ;;  %v11566_v32 = vld [vmem:[%s16181_s10 + $0x760] ss:$8 sps:$4 sm:$0xff]  }
 0xcf5   :  { %v2480_v57 = vsel %vm2479_vm1, %v2478_v52, %v2477_v20  ;;  %8235 = vmatprep.subr.bf16.mxu1 %v11535_v61  ;;  %v11572_v20 = vld [vmem:[%s16181_s10 + $0x770] ss:$8 sps:$4 sm:$0xff]  }
 0xcf6   :  { %8452 = vmatprep.mubr.bf16.mxu0 %v5213_v39  ;;  %v5215_v12 = vpack.c.bf16 %v5101_v50, %v5101_v50  ;;  %v4811_v59 = vpop.permute.xlu1 %4810  ;;  %v2502_v7 = vpop.permute.xlu0 %2501  ;;  %2485 = vst.msk [vmem:[#allocation3 + $0x24] sm:$0x5] %vm14535_vm12, %v2480_v57  ;;  %v11574_v50 = vld [vmem:[%s16181_s10 + $0x774] ss:$8 sps:$4 sm:$0xff]  }
 0xcf7   :  { %8453 = vmatmul.mubr.bf16.vlgmr.msra.gmra.mrb[16].mxu0 %v5212_v37  ;;  %4813 = vst.msk [vmem:[#allocation3 + $0x25] sm:$0x1] %vm2472_vm13, %v4811_v59  ;;  %v2503_v42 = vrot.slane %v2502_v7, 6  ;;  %vm14617_vm13 = vmor %vm2539_vm8, %vm2538_vm6  ;;  %v11578_v59 = vld [vmem:[%s16181_s10 + $0x780] ss:$8 sps:$4 sm:$0xff]   ;;  %vm2599_vm6 = vcmask 1041232  }
 0xcf8   :  { %8462 = vmatpush1.bf16.msra.mxu0 %v11527_v35  ;;  %8493 = vmatprep.mubr.bf16.mxu0 %v5215_v12  ;;  %v11571_v35 = vld [vmem:[%s16181_s10 + $0x204] ss:$8 sps:$4 sm:$0xff]   ;;  %v11577_v12 = vld [vmem:[%s16181_s10 + $0x214] ss:$8 sps:$4 sm:$0xff]   ;;  %vm2600_vm8 = vcmask 313346  }
 0xcf9   :  { %8463 = vmatprep.subr.bf16.mxu0 %v11538_v54  ;;  %8236 = vmatpush1.bf16.msra.mxu1 %v11533_v55  ;;  %v2505_v56 = vsel %vm2504_vm7, %v2503_v42, %v2502_v7  ;;  %v5202_v54 = vpack.c.bf16 %v14330_v10, %v14330_v10  ;;  %v5205_v55 = vpack.c.bf16 %v5066_v5, %v5066_v5  ;;  %v11580_v10 = vld [vmem:[%s16181_s10 + $0x784] ss:$8 sps:$4 sm:$0xff]   ;;  %v11608_v5 = vld [vmem:[%s16181_s10 + $0x7d0] ss:$8 sps:$4 sm:$0xff]   ;;  %v11622_v57 = vld [vmem:[%s16181_s10 + $0x7f4] ss:$8 sps:$4 sm:$0xff]  }
 0xcfa   :  { %8237 = vmatprep.subr.bf16.mxu1 %v11541_v33  ;;  %v2495_v26 = vpop.permute.xlu1 %2494  ;;  %v4837_v49 = vpop.permute.xlu0 %4836  ;;  %v11575_v33 = vld [vmem:[%s16181_s10 + $0x210] ss:$8 sps:$4 sm:$0xff]  }
 0xcfb   :  { %2498 = vst.msk [vmem:[#allocation3 + $0x26] sm:$0x1] %vm2497_vm9, %v2495_v26  ;;  %v4838_v48 = vrot.slane %v4837_v49, 6  ;;  %v11584_v26 = vld [vmem:[%s16181_s10 + $0x790] ss:$8 sps:$4 sm:$0xff]  }
 0xcfc   :  { %8464 = vmatpush1.bf16.msra.mxu0 %v11536_v41  ;;  %2510 = vst.msk [vmem:[#allocation3 + $0x26] sm:$0x5] %vm14561_vm10, %v2505_v56 }
 0xcfd   :  { %8465 = vmatprep.subr.bf16.mxu0 %v11544_v22  ;;  %8238 = vmatpush1.bf16.msra.mxu1 %v11539_v30  ;;  %v4839_v58 = vsel %vm2504_vm7, %v4838_v48, %v4837_v49  ;;  %v11583_v22 = vld [vmem:[%s16181_s10 + $0x224] ss:$8 sps:$4 sm:$0xff]   ;;  %v11586_v30 = vld [vmem:[%s16181_s10 + $0x794] ss:$8 sps:$4 sm:$0xff]   ;;  %vm2582_vm7 = vcmask 362498  }
 0xcfe   :  { %8239 = vmatprep.subr.bf16.mxu1 %v11547_v38  ;;  %v2533_v28 = vpop.permute.xlu1 %2532  ;;  %v4817_v40 = vpop.permute.xlu0 %4816  ;;  %v11595_v48 = vld [vmem:[%s16181_s10 + $0x244] ss:$8 sps:$4 sm:$0xff]  }
 0xcff   :  { %v4818_v19 = vrot.slane %v4817_v40, 6  ;;  %v2534_v8 = vrot.slane %v2533_v28, 6 }
 0xd00   :  { %8466 = vmatpush1.bf16.msra.mxu0 %v11542_v0 }
 0xd01   :  { %8467 = vmatprep.subr.bf16.mxu0 %v11550_v27  ;;  %8240 = vmatpush1.bf16.msra.mxu1 %v11545_v29  ;;  %v4819_v21 = vsel %vm2479_vm1, %v4818_v19, %v4817_v40  ;;  %v2536_v47 = vsel %vm2535_vm14, %v2534_v8, %v2533_v28  ;;  %vm2553_vm1 = vcmask 965632   ;;  %v11589_v27 = vld [vmem:[%s16181_s10 + $0x234] ss:$8 sps:$4 sm:$0xff]   ;;  %v11592_v29 = vld [vmem:[%s16181_s10 + $0x7a4] ss:$8 sps:$4 sm:$0xff]  }
 0xd02   :  { %8241 = vmatprep.subr.bf16.mxu1 %v11553_v11  ;;  %v2513_v51 = vpop.permute.xlu1 %2512  ;;  %4821 = vst.msk [vmem:[#allocation3 + $0x25] sm:$0x5] %vm14535_vm12, %v4819_v21  ;;  %v4831_v9 = vpop.permute.xlu0 %4830  ;;  %vm14670_vm12 = vmor %vm2557_vm4, %vm2556_vm5  ;;  %v11587_v28 = vld [vmem:[%s16181_s10 + $0x230] ss:$8 sps:$4 sm:$0xff]   ;;  %v11590_v40 = vld [vmem:[%s16181_s10 + $0x7a0] ss:$8 sps:$4 sm:$0xff]  }
 0xd03   :  { %2516 = vst.msk [vmem:[#allocation3 + $0x28] sm:$0x1] %vm2515_vm0, %v2513_v51  ;;  %v11593_v51 = vld [vmem:[%s16181_s10 + $0x240] ss:$8 sps:$4 sm:$0xff]   ;;  %v11601_v8 = vld [vmem:[%s16181_s10 + $0x254] ss:$8 sps:$4 sm:$0xff]  }
 0xd04   :  { %8468 = vmatpush1.bf16.msra.mxu0 %v11548_v53  ;;  %4833 = vst.msk [vmem:[#allocation3 + $0x27] sm:$0x1] %vm2497_vm9, %v4831_v9  ;;  %vm2578_vm9 = vcmask 916480   ;;  %vm2621_vm5 = vcmask 818176   ;;  %vm2608_vm4 = vcmask 811320  }
 0xd05   :  { %8469 = vmatprep.subr.bf16.mxu0 %v11556_v17  ;;  %8242 = vmatpush1.bf16.msra.mxu1 %v11551_v60  ;;  %4841 = vst.msk [vmem:[#allocation3 + $0x27] sm:$0x5] %vm14561_vm10, %v4839_v58  ;;  %vm14706_vm10 = vmor %vm2582_vm7, %vm2581_vm2  ;;  %vm2643_vm2 = vcmask 215042   ;;  %vm2639_vm7 = vcmask 769024   ;;  %v5214_v17 = vpack.c.bf16 %v14510_v13, %v14510_v13  ;;  %v11629_v13 = vld [vmem:[%s16181_s10 + $0x2a0] ss:$8 sps:$4 sm:$0xff]  }
 0xd06   :  { %8243 = vmatprep.subr.bf16.mxu1 %v11559_v18  ;;  %v2520_v36 = vpop.permute.xlu1 %2519  ;;  %v4862_v63 = vpop.permute.xlu0 %4861 }
 0xd07   :  { %2523 = vst.msk [vmem:[#allocation3 + $0x28] sm:$0x1] %vm2522_vm15, %v2520_v36  ;;  %v4863_v16 = vrot.slane %v4862_v63, 6  ;;  %v11643_v36 = vld [vmem:[%s16181_s10 + $0x2c4] ss:$8 sps:$4 sm:$0xff]  }
 0xd08   :  { %8470 = vmatpush1.bf16.msra.mxu0 %v11554_v15  ;;  %2541 = vst.msk [vmem:[#allocation3 + $0x28] sm:$0x5] %vm14617_vm13, %v2536_v47  ;;  %v11598_v15 = vld [vmem:[%s16181_s10 + $0x7b4] ss:$8 sps:$4 sm:$0xff]   ;;  %v11607_v47 = vld [vmem:[%s16181_s10 + $0x264] ss:$8 sps:$4 sm:$0xff]  }
 0xd09   :  { %8471 = vmatprep.subr.bf16.mxu0 %v11562_v4  ;;  %8244 = vmatpush1.bf16.msra.mxu1 %v11557_v43  ;;  %v4864_v61 = vsel %vm2535_vm14, %v4863_v16, %v4862_v63  ;;  %v11596_v4 = vld [vmem:[%s16181_s10 + $0x7b0] ss:$8 sps:$4 sm:$0xff]   ;;  %v11604_v43 = vld [vmem:[%s16181_s10 + $0x7c4] ss:$8 sps:$4 sm:$0xff]   ;;  %vm2596_vm14 = vcmask 867328  }
 0xd0a   :  { %8245 = vmatprep.subr.bf16.mxu1 %v11565_v3  ;;  %v4850_v39 = vpop.permute.xlu1 %4849  ;;  %v4844_v37 = vpop.permute.xlu0 %4843  ;;  %v11610_v16 = vld [vmem:[%s16181_s10 + $0x7d4] ss:$8 sps:$4 sm:$0xff]  }
 0xd0b   :  { %4846 = vst.msk [vmem:[#allocation3 + $0x29] sm:$0x1] %vm2515_vm0, %v4844_v37  ;;  %vm2590_vm0 = vcmask 860520   ;;  %v11613_v37 = vld [vmem:[%s16181_s10 + $0x274] ss:$8 sps:$4 sm:$0xff]  }
 0xd0c   :  { %8472 = vmatpush1.bf16.msra.mxu0 %v11560_v23  ;;  %4852 = vst.msk [vmem:[#allocation3 + $0x29] sm:$0x1] %vm2522_vm15, %v4850_v39  ;;  %vm14742_vm15 = vmor %vm2600_vm8, %vm2599_vm6  ;;  %vm2668_vm6 = vcmask 165890   ;;  %vm2664_vm8 = vcmask 719872  }
 0xd0d   :  { %8473 = vmatprep.subr.bf16.mxu0 %v11568_v25  ;;  %8246 = vmatpush1.bf16.msra.mxu1 %v11563_v34  ;;  %4866 = vst.msk [vmem:[#allocation3 + $0x29] sm:$0x5] %vm14617_vm13, %v4864_v61  ;;  %v11602_v25 = vld [vmem:[%s16181_s10 + $0x7c0] ss:$8 sps:$4 sm:$0xff]   ;;  %vm2624_vm13 = vcmask 1041184  }
 0xd0e   :  { %8256 = vmatprep.subr.bf16.mxu1 %v11571_v35  ;;  %v2545_v52 = vpop.permute.xlu1 %2544  ;;  %v2551_v1 = vpop.permute.xlu0 %2550 }
 0xd0f   :  { %2548 = vst.msk [vmem:[#allocation3 + $0x2a] sm:$0x1] %vm2547_vm3, %v2545_v52  ;;  %v2552_v41 = vrot.slane %v2551_v1, 6 }
 0xd10   :  { %8474 = vmatpush1.bf16.msra.mxu0 %v11566_v32  ;;  %8248 = vmatmul.mubr.bf16.vlgmr.msra.gmra.mrb[72].mxu1 %v5202_v54  ;;  %v11616_v54 = vld [vmem:[%s16181_s10 + $0x7e4] ss:$8 sps:$4 sm:$0xff]  }
 0xd11   :  { %8475 = vmatprep.subr.bf16.mxu0 %v11574_v50  ;;  %8257 = vmatpush1.bf16.msra.mxu1 %v11569_v6  ;;  %v2554_v7 = vsel %vm2553_vm1, %v2552_v41, %v2551_v1  ;;  %v11605_v50 = vld [vmem:[%s16181_s10 + $0x260] ss:$8 sps:$4 sm:$0xff]   ;;  %v11619_v41 = vld [vmem:[%s16181_s10 + $0x284] ss:$8 sps:$4 sm:$0xff]  }
 0xd12   :  { %8288 = vmatprep.mubr.bf16.mxu1 %v5205_v55  ;;  %8258 = vmatprep.subr.bf16.mxu1 %v11577_v12  ;;  %v4870_v42 = vpop.permute.xlu1 %4869  ;;  %v4875_v0 = vpop.permute.xlu0 %4874  ;;  %2559 = vst.msk [vmem:[#allocation3 + $0x2a] sm:$0x5] %vm14670_vm12, %v2554_v7  ;;  %v11611_v55 = vld [vmem:[%s16181_s10 + $0x270] ss:$8 sps:$4 sm:$0xff]   ;;  %v11614_v1 = vld [vmem:[%s16181_s10 + $0x7e0] ss:$8 sps:$4 sm:$0xff]  }
 0xd13   :  { %4872 = vst.msk [vmem:[#allocation3 + $0x2b] sm:$0x1] %vm2547_vm3, %v4870_v42  ;;  %v4876_v38 = vrot.slane %v4875_v0, 6  ;;  %vm2625_vm3 = vcmask 264194   ;;  %v11617_v42 = vld [vmem:[%s16181_s10 + $0x280] ss:$8 sps:$4 sm:$0xff]  }
 0xd14   :  { %8476 = vmatpush1.bf16.msra.mxu0 %v11572_v20 }
 0xd15   :  { %8477 = vmatprep.subr.bf16.mxu0 %v11580_v10  ;;  %8259 = vmatpush1.bf16.msra.mxu1 %v11575_v33  ;;  %v4877_v56 = vsel %vm2553_vm1, %v4876_v38, %v4875_v0  ;;  %vm14767_vm1 = vmor %vm2625_vm3, %vm2624_vm13  ;;  %v14783_v10 = vld [vmem:[#allocation3 + $0x20] sm:$0xff]  ;;  %vm2685_vm13 = vcmask 1041040   ;;  %vm2686_vm3 = vcmask 116738  }
 0xd16   :  { %8260 = vmatprep.subr.bf16.mxu1 %v11583_v22  ;;  %v2563_v49 = vpop.permute.xlu1 %2562  ;;  %v2576_v53 = vpop.permute.xlu0 %2575  ;;  %4879 = vst.msk [vmem:[#allocation3 + $0x2b] sm:$0x5] %vm14670_vm12, %v4877_v56  ;;  %v14799_v22 = vrot.slane %v14783_v10, %v13555_v24  ;;  %vm2633_vm12 = vcmask 762120   ;;  %v11625_v0 = vld [vmem:[%s16181_s10 + $0x294] ss:$8 sps:$4 sm:$0xff]  }
 0xd17   :  { %2566 = vst.msk [vmem:[#allocation3 + $0x2c] sm:$0x1] %vm2565_vm11, %v2563_v49  ;;  %v2577_v11 = vrot.slane %v2576_v53, 6 }
 0xd18   :  { %8478 = vmatpush1.bf16.msra.mxu0 %v11578_v59  ;;  %v5117_v56 = vcombine.high %v14799_v22, %v14799_v22 }
 0xd19   :  { %8479 = vmatprep.subr.bf16.mxu0 %v11586_v30  ;;  %8261 = vmatpush1.bf16.msra.mxu1 %v11581_v45  ;;  %v2579_v19 = vsel %vm2578_vm9, %v2577_v11, %v2576_v53  ;;  %v11620_v30 = vld [vmem:[%s16181_s10 + $0x7f0] ss:$8 sps:$4 sm:$0xff]   ;;  %v11626_v11 = vld [vmem:[%s16181_s10 + $0x800] ss:$8 sps:$4 sm:$0xff]  }
 0xd1a   :  { %8262 = vmatprep.subr.bf16.mxu1 %v11589_v27  ;;  %v4883_v60 = vpop.permute.xlu1 %4882  ;;  %v4895_v18 = vpop.permute.xlu0 %4894  ;;  %2584 = vst.msk [vmem:[#allocation3 + $0x2c] sm:$0x5] %vm14706_vm10, %v2579_v19  ;;  %v11634_v19 = vld [vmem:[%s16181_s10 + $0x814] ss:$8 sps:$4 sm:$0xff]   ;;  %v11662_v53 = vld [vmem:[%s16181_s10 + $0x860] ss:$8 sps:$4 sm:$0xff]  }
 0xd1b   :  { %4885 = vst.msk [vmem:[#allocation3 + $0x2d] sm:$0x1] %vm2565_vm11, %v4883_v60  ;;  %v4896_v21 = vrot.slane %v4895_v18, 6  ;;  %vm2642_vm11 = vcmask 1041136  }
 0xd1c   :  { %8480 = vmatpush1.bf16.msra.mxu0 %v11584_v26  ;;  %v11628_v26 = vld [vmem:[%s16181_s10 + $0x804] ss:$8 sps:$4 sm:$0xff]  }
 0xd1d   :  { %8481 = vmatprep.subr.bf16.mxu0 %v11592_v29  ;;  %8263 = vmatpush1.bf16.msra.mxu1 %v11587_v28  ;;  %v4897_v9 = vsel %vm2578_vm9, %v4896_v21, %v4895_v18  ;;  %v11623_v29 = vld [vmem:[%s16181_s10 + $0x290] ss:$8 sps:$4 sm:$0xff]   ;;  %vm14822_vm9 = vmor %vm2643_vm2, %vm2642_vm11  ;;  %vm2707_vm11 = vcmask 621568   ;;  %vm2694_vm2 = vcmask 614520  }
 0xd1e   :  { %8264 = vmatprep.subr.bf16.mxu1 %v11595_v48  ;;  %v2588_v58 = vpop.permute.xlu1 %2587  ;;  %v2594_v23 = vpop.permute.xlu0 %2593  ;;  %4899 = vst.msk [vmem:[#allocation3 + $0x2d] sm:$0x5] %vm14706_vm10, %v4897_v9  ;;  %v11631_v48 = vld [vmem:[%s16181_s10 + $0x2a4] ss:$8 sps:$4 sm:$0xff]   ;;  %vm2651_vm10 = vcmask 712920  }
 0xd1f   :  { %2591 = vst.msk [vmem:[#allocation3 + $0x2e] sm:$0x1] %vm2590_vm0, %v2588_v58  ;;  %v2595_v3 = vrot.slane %v2594_v23, 6  ;;  %v11632_v21 = vld [vmem:[%s16181_s10 + $0x810] ss:$8 sps:$4 sm:$0xff]  }
 0xd20   :  { %8482 = vmatpush1.bf16.msra.mxu0 %v11590_v40  ;;  %v11640_v9 = vld [vmem:[%s16181_s10 + $0x824] ss:$8 sps:$4 sm:$0xff]  }
 0xd21   :  { %8483 = vmatprep.subr.bf16.mxu0 %v11598_v15  ;;  %8265 = vmatpush1.bf16.msra.mxu1 %v11593_v51  ;;  %v2597_v63 = vsel %vm2596_vm14, %v2595_v3, %v2594_v23  ;;  %v5217_v15 = vpack.c.bf16 %v5117_v56, %v5117_v56  ;;  %v11637_v51 = vld [vmem:[%s16181_s10 + $0x2b4] ss:$8 sps:$4 sm:$0xff]   ;;  %v11635_v23 = vld [vmem:[%s16181_s10 + $0x2b0] ss:$8 sps:$4 sm:$0xff]   ;;  %v11679_v3 = vld [vmem:[%s16181_s10 + $0x324] ss:$8 sps:$4 sm:$0xff]  }
 0xd22   :  { %8266 = vmatprep.subr.bf16.mxu1 %v11601_v8  ;;  %v2619_v34 = vpop.permute.xlu1 %2618  ;;  %v4908_v32 = vpop.permute.xlu0 %4907  ;;  %2602 = vst.msk [vmem:[#allocation3 + $0x2e] sm:$0x5] %vm14742_vm15, %v2597_v63  ;;  %v11646_v63 = vld [vmem:[%s16181_s10 + $0x834] ss:$8 sps:$4 sm:$0xff]  }
 0xd23   :  { %v2620_v35 = vrot.slane %v2619_v34, 6  ;;  %v4909_v39 = vrot.slane %v4908_v32, 6 }
 0xd24   :  { %8484 = vmatpush1.bf16.msra.mxu0 %v11596_v4 }
 0xd25   :  { %8485 = vmatprep.subr.bf16.mxu0 %v11604_v43  ;;  %8267 = vmatpush1.bf16.msra.mxu1 %v11599_v14  ;;  %v2622_v20 = vsel %vm2621_vm5, %v2620_v35, %v2619_v34  ;;  %v4910_v52 = vsel %vm2596_vm14, %v4909_v39, %v4908_v32  ;;  %v11638_v14 = vld [vmem:[%s16181_s10 + $0x820] ss:$8 sps:$4 sm:$0xff]   ;;  %v11644_v35 = vld [vmem:[%s16181_s10 + $0x830] ss:$8 sps:$4 sm:$0xff]   ;;  %v11649_v39 = vld [vmem:[%s16181_s10 + $0x2d4] ss:$8 sps:$4 sm:$0xff]  }
 0xd26   :  { %8268 = vmatprep.subr.bf16.mxu1 %v11607_v47  ;;  %v2606_v61 = vpop.permute.xlu1 %2605  ;;  %v4903_v12 = vpop.permute.xlu0 %4902  ;;  %v11641_v32 = vld [vmem:[%s16181_s10 + $0x2c0] ss:$8 sps:$4 sm:$0xff]  }
 0xd27   :  { %2609 = vst.msk [vmem:[#allocation3 + $0x30] sm:$0x1] %vm2608_vm4, %v2606_v61 }
 0xd28   :  { %8486 = vmatpush1.bf16.msra.mxu0 %v11602_v25  ;;  %4905 = vst.msk [vmem:[#allocation3 + $0x2f] sm:$0x1] %vm2590_vm0, %v4903_v12  ;;  %vm2667_vm0 = vcmask 1041088   ;;  %v11650_v12 = vld [vmem:[%s16181_s10 + $0x840] ss:$8 sps:$4 sm:$0xff]  }
 0xd29   :  { %8487 = vmatprep.subr.bf16.mxu0 %v11610_v16  ;;  %8269 = vmatpush1.bf16.msra.mxu1 %v11605_v50  ;;  %2627 = vst.msk [vmem:[#allocation3 + $0x30] sm:$0x5] %vm14767_vm1, %v2622_v20  ;;  %vm14860_vm14 = vmor %vm2668_vm6, %vm2667_vm0  ;;  %vm2729_vm0 = vcmask 18434   ;;  %vm2725_vm6 = vcmask 572416   ;;  %v11689_v20 = vld [vmem:[%s16181_s10 + $0x340] ss:$8 sps:$4 sm:$0xff]  }
 0xd2a   :  { %4912 = vst.msk [vmem:[#allocation3 + $0x2f] sm:$0x5] %vm14742_vm15, %v4910_v52  ;;  %8270 = vmatprep.subr.bf16.mxu1 %v11613_v37  ;;  %v4916_v33 = vpop.permute.xlu1 %4915  ;;  %v4928_v59 = vpop.permute.xlu0 %4927  ;;  %vm2676_vm15 = vcmask 663720   ;;  %v11652_v37 = vld [vmem:[%s16181_s10 + $0x844] ss:$8 sps:$4 sm:$0xff]  }
 0xd2b   :  { %4918 = vst.msk [vmem:[#allocation3 + $0x31] sm:$0x1] %vm2608_vm4, %v4916_v33  ;;  %v4929_v7 = vrot.slane %v4928_v59, 6  ;;  %vm14896_vm4 = vmor %vm2686_vm3, %vm2685_vm13  ;;  %v11655_v52 = vld [vmem:[%s16181_s10 + $0x2e4] ss:$8 sps:$4 sm:$0xff]   ;;  %v5051_v33 = vcombine.high %v14600_v44, %v14600_v44  ;;  %vm9285_vm13 = vcmask 24576  }
 0xd2c   :  { %8488 = vmatpush1.bf16.msra.mxu0 %v11608_v5  ;;  %v11661_v44 = vld [vmem:[%s16181_s10 + $0x2f4] ss:$8 sps:$4 sm:$0xff]  }
 0xd2d   :  { %8489 = vmatprep.subr.bf16.mxu0 %v11616_v54  ;;  %8271 = vmatpush1.bf16.msra.mxu1 %v11611_v55  ;;  %v4930_v38 = vsel %vm2621_vm5, %v4929_v7, %v4928_v59  ;;  %vm2682_vm5 = vcmask 670720   ;;  %v11647_v54 = vld [vmem:[%s16181_s10 + $0x2d0] ss:$8 sps:$4 sm:$0xff]  }
 0xd2e   :  { %8272 = vmatprep.subr.bf16.mxu1 %v11619_v41  ;;  %v2631_v45 = vpop.permute.xlu1 %2630  ;;  %v2637_v27 = vpop.permute.xlu0 %2636  ;;  %4932 = vst.msk [vmem:[#allocation3 + $0x31] sm:$0x5] %vm14767_vm1, %v4930_v38  ;;  %v11658_v41 = vld [vmem:[%s16181_s10 + $0x854] ss:$8 sps:$4 sm:$0xff]   ;;  %vm2710_vm1 = vcmask 1040992  }
 0xd2f   :  { %2634 = vst.msk [vmem:[#allocation3 + $0x32] sm:$0x1] %vm2633_vm12, %v2631_v45  ;;  %v2638_v49 = vrot.slane %v2637_v27, 6  ;;  %v11664_v45 = vld [vmem:[%s16181_s10 + $0x864] ss:$8 sps:$4 sm:$0xff]  }
 0xd30   :  { %8490 = vmatpush1.bf16.msra.mxu0 %v11614_v1 }
 0xd31   :  { %8491 = vmatprep.subr.bf16.mxu0 %v11622_v57  ;;  %8273 = vmatpush1.bf16.msra.mxu1 %v11617_v42  ;;  %v2640_v28 = vsel %vm2639_vm7, %v2638_v49, %v2637_v27  ;;  %v11653_v42 = vld [vmem:[%s16181_s10 + $0x2e0] ss:$8 sps:$4 sm:$0xff]  }
 0xd32   :  { %8274 = vmatprep.subr.bf16.mxu1 %v11625_v0  ;;  %v4936_v40 = vpop.permute.xlu1 %4935  ;;  %v4941_v60 = vpop.permute.xlu0 %4940  ;;  %2645 = vst.msk [vmem:[#allocation3 + $0x32] sm:$0x5] %vm14822_vm9, %v2640_v28  ;;  %v11707_v0 = vld [vmem:[%s16181_s10 + $0x370] ss:$8 sps:$4 sm:$0xff]  }
 0xd33   :  { %4938 = vst.msk [vmem:[#allocation3 + $0x33] sm:$0x1] %vm2633_vm12, %v4936_v40  ;;  %v4942_v18 = vrot.slane %v4941_v60, 6  ;;  %vm2711_vm12 = vcmask 67586  }
 0xd34   :  { %8492 = vmatpush1.bf16.msra.mxu0 %v11620_v30  ;;  %v11656_v30 = vld [vmem:[%s16181_s10 + $0x850] ss:$8 sps:$4 sm:$0xff]  }
 0xd35   :  { %8502 = vmatprep.subr.bf16.mxu0 %v11628_v26  ;;  %8275 = vmatpush1.bf16.msra.mxu1 %v11623_v29  ;;  %v4943_v4 = vsel %vm2639_vm7, %v4942_v18, %v4941_v60  ;;  %vm14924_vm7 = vmor %vm2711_vm12, %vm2710_vm1  ;;  %v14932_v26 = vrot.slane %v5051_v33, %v13555_v24  ;;  %v11659_v29 = vld [vmem:[%s16181_s10 + $0x2f0] ss:$8 sps:$4 sm:$0xff]   ;;  %v11665_v60 = vld [vmem:[%s16181_s10 + $0x300] ss:$8 sps:$4 sm:$0xff]  }
 0xd36   :  { %8276 = vmatprep.subr.bf16.mxu1 %v11631_v48  ;;  %v2649_v8 = vpop.permute.xlu1 %2648  ;;  %v2662_v58 = vpop.permute.xlu0 %2661  ;;  %4945 = vst.msk [vmem:[#allocation3 + $0x33] sm:$0x5] %vm14822_vm9, %v4943_v4  ;;  %vm2719_vm9 = vcmask 565320   ;;  %v11668_v18 = vld [vmem:[%s16181_s10 + $0x870] ss:$8 sps:$4 sm:$0xff]  }
 0xd37   :  { %8494 = vmatmul.mubr.bf16.vlgmr.msra.gmra.mrb[16].mxu0 %v5214_v17  ;;  %2652 = vst.msk [vmem:[#allocation3 + $0x34] sm:$0x1] %vm2651_vm10, %v2649_v8  ;;  %v2663_v43 = vrot.slane %v2662_v58, 6  ;;  %v11670_v17 = vld [vmem:[%s16181_s10 + $0x874] ss:$8 sps:$4 sm:$0xff]   ;;  %v5067_v40 = vcombine.high %v14932_v26, %v14932_v26 }
 0xd38   :  { %8503 = vmatpush1.bf16.msra.mxu0 %v11626_v11  ;;  %8534 = vmatprep.mubr.bf16.mxu0 %v5217_v15  ;;  %v11667_v11 = vld [vmem:[%s16181_s10 + $0x304] ss:$8 sps:$4 sm:$0xff]   ;;  %v5204_v15 = vpack.c.bf16 %v14626_v62, %v14626_v62 }
 0xd39   :  { %8504 = vmatprep.subr.bf16.mxu0 %v11634_v19  ;;  %8277 = vmatpush1.bf16.msra.mxu1 %v11629_v13  ;;  %v2665_v25 = vsel %vm2664_vm8, %v2663_v43, %v2662_v58  ;;  %v11673_v13 = vld [vmem:[%s16181_s10 + $0x314] ss:$8 sps:$4 sm:$0xff]   ;;  %v5207_v4 = vpack.c.bf16 %v5067_v40, %v5067_v40  ;;  %v11676_v62 = vld [vmem:[%s16181_s10 + $0x884] ss:$8 sps:$4 sm:$0xff]   ;;  %v11671_v58 = vld [vmem:[%s16181_s10 + $0x310] ss:$8 sps:$4 sm:$0xff]   ;;  %v5216_v40 = vpack.c.bf16 %v14799_v22, %v14799_v22 }
 0xd3a   :  { %8278 = vmatprep.subr.bf16.mxu1 %v11637_v51  ;;  %v4949_v47 = vpop.permute.xlu1 %4948  ;;  %v4961_v34 = vpop.permute.xlu0 %4960  ;;  %2670 = vst.msk [vmem:[#allocation3 + $0x34] sm:$0x5] %vm14860_vm14, %v2665_v25  ;;  %v11682_v25 = vld [vmem:[%s16181_s10 + $0x894] ss:$8 sps:$4 sm:$0xff]   ;;  %v11703_v33 = vld [vmem:[%s16181_s10 + $0x364] ss:$8 sps:$4 sm:$0xff]  }
 0xd3b   :  { %4951 = vst.msk [vmem:[#allocation3 + $0x35] sm:$0x1] %vm2651_vm10, %v4949_v47  ;;  %v4962_v16 = vrot.slane %v4961_v34, 6  ;;  %vm2728_vm10 = vcmask 1040944   ;;  %v11728_v22 = vld [vmem:[%s16181_s10 + $0x910] ss:$8 sps:$4 sm:$0xff]  }
 0xd3c   :  { %8505 = vmatpush1.bf16.msra.mxu0 %v11632_v21  ;;  %v11748_v43 = vld [vmem:[%s16181_s10 + $0x944] ss:$8 sps:$4 sm:$0xff]  }
 0xd3d   :  { %8506 = vmatprep.subr.bf16.mxu0 %v11640_v9  ;;  %8279 = vmatpush1.bf16.msra.mxu1 %v11635_v23  ;;  %v4963_v50 = vsel %vm2664_vm8, %v4962_v16, %v4961_v34  ;;  %vm14980_vm8 = vmor %vm2729_vm0, %vm2728_vm10  ;;  %v11674_v23 = vld [vmem:[%s16181_s10 + $0x880] ss:$8 sps:$4 sm:$0xff]   ;;  %v11680_v16 = vld [vmem:[%s16181_s10 + $0x890] ss:$8 sps:$4 sm:$0xff]  }
 0xd3e   :  { %8280 = vmatprep.subr.bf16.mxu1 %v11643_v36  ;;  %v2674_v5 = vpop.permute.xlu1 %2673  ;;  %v2680_v6 = vpop.permute.xlu0 %2679  ;;  %4965 = vst.msk [vmem:[#allocation3 + $0x35] sm:$0x5] %vm14860_vm14, %v4963_v50  ;;  %vm2737_vm14 = vcmask 516120   ;;  %v11677_v34 = vld [vmem:[%s16181_s10 + $0x320] ss:$8 sps:$4 sm:$0xff]  }
 0xd3f   :  { %2677 = vst.msk [vmem:[#allocation3 + $0x36] sm:$0x1] %vm2676_vm15, %v2674_v5  ;;  %v2681_v61 = vrot.slane %v2680_v6, 6  ;;  %v11683_v5 = vld [vmem:[%s16181_s10 + $0x330] ss:$8 sps:$4 sm:$0xff]  }
 0xd40   :  { %8507 = vmatpush1.bf16.msra.mxu0 %v11638_v14 }
 0xd41   :  { %8508 = vmatprep.subr.bf16.mxu0 %v11646_v63  ;;  %8281 = vmatpush1.bf16.msra.mxu1 %v11641_v32  ;;  %v2683_v55 = vsel %vm2682_vm5, %v2681_v61, %v2680_v6  ;;  %v11685_v32 = vld [vmem:[%s16181_s10 + $0x334] ss:$8 sps:$4 sm:$0xff]   ;;  %v11691_v6 = vld [vmem:[%s16181_s10 + $0x344] ss:$8 sps:$4 sm:$0xff]  }
 0xd42   :  { %8282 = vmatprep.subr.bf16.mxu1 %v11649_v39  ;;  %v2705_v1 = vpop.permute.xlu1 %2704  ;;  %2688 = vst.msk [vmem:[#allocation3 + $0x36] sm:$0x5] %vm14896_vm4, %v2683_v55  ;;  %v11694_v61 = vld [vmem:[%s16181_s10 + $0x8b4] ss:$8 sps:$4 sm:$0xff]   ;;  %v11700_v55 = vld [vmem:[%s16181_s10 + $0x8c4] ss:$8 sps:$4 sm:$0xff]  }
 0xd43   :  { %v4974_v57 = vpop.permute.xlu0 %4973  ;;  %v2706_v59 = vrot.slane %v2705_v1, 6 }
 0xd44   :  { %8509 = vmatpush1.bf16.msra.mxu0 %v11644_v35  ;;  %v4975_v7 = vrot.slane %v4974_v57, 6  ;;  %v11688_v35 = vld [vmem:[%s16181_s10 + $0x8a4] ss:$8 sps:$4 sm:$0xff]  }
 0xd45   :  { %8510 = vmatprep.subr.bf16.mxu0 %v11652_v37  ;;  %8283 = vmatpush1.bf16.msra.mxu1 %v11647_v54  ;;  %v2708_v27 = vsel %vm2707_vm11, %v2706_v59, %v2705_v1  ;;  %v11686_v37 = vld [vmem:[%s16181_s10 + $0x8a0] ss:$8 sps:$4 sm:$0xff]   ;;  %v11695_v1 = vld [vmem:[%s16181_s10 + $0x350] ss:$8 sps:$4 sm:$0xff]  }
 0xd46   :  { %8284 = vmatprep.subr.bf16.mxu1 %v11655_v52  ;;  %v2692_v38 = vpop.permute.xlu1 %2691  ;;  %v4976_v49 = vsel %vm2682_vm5, %v4975_v7, %v4974_v57  ;;  %v11697_v52 = vld [vmem:[%s16181_s10 + $0x354] ss:$8 sps:$4 sm:$0xff]   ;;  %v11701_v59 = vld [vmem:[%s16181_s10 + $0x360] ss:$8 sps:$4 sm:$0xff]   ;;  %v11704_v7 = vld [vmem:[%s16181_s10 + $0x8d0] ss:$8 sps:$4 sm:$0xff]  }
 0xd47   :  { %v4969_v56 = vpop.permute.xlu0 %4968  ;;  %2695 = vst.msk [vmem:[#allocation3 + $0x38] sm:$0x1] %vm2694_vm2, %v2692_v38  ;;  %v11706_v57 = vld [vmem:[%s16181_s10 + $0x8d4] ss:$8 sps:$4 sm:$0xff]   ;;  %v11710_v38 = vld [vmem:[%s16181_s10 + $0x8e0] ss:$8 sps:$4 sm:$0xff]  }
 0xd48   :  { %8511 = vmatpush1.bf16.msra.mxu0 %v11650_v12  ;;  %4971 = vst.msk [vmem:[#allocation3 + $0x37] sm:$0x1] %vm2676_vm15, %v4969_v56  ;;  %v11692_v12 = vld [vmem:[%s16181_s10 + $0x8b0] ss:$8 sps:$4 sm:$0xff]   ;;  %v11713_v56 = vld [vmem:[%s16181_s10 + $0x380] ss:$8 sps:$4 sm:$0xff]  }
 0xd49   :  { %8512 = vmatprep.subr.bf16.mxu0 %v11658_v41  ;;  %8285 = vmatpush1.bf16.msra.mxu1 %v11653_v42  ;;  %2713 = vst.msk [vmem:[#allocation3 + $0x38] sm:$0x5] %vm14924_vm7, %v2708_v27  ;;  %v11698_v41 = vld [vmem:[%s16181_s10 + $0x8c0] ss:$8 sps:$4 sm:$0xff]   ;;  %v11709_v42 = vld [vmem:[%s16181_s10 + $0x374] ss:$8 sps:$4 sm:$0xff]  }
 0xd4a   :  { %4978 = vst.msk [vmem:[#allocation3 + $0x37] sm:$0x5] %vm14896_vm4, %v4976_v49  ;;  %8286 = vmatprep.subr.bf16.mxu1 %v11661_v44  ;;  %v4982_v28 = vpop.permute.xlu1 %4981  ;;  %v5102_v44 = vcombine.high %v14783_v10, %v14783_v10  ;;  %v11718_v10 = vld [vmem:[%s16181_s10 + $0x8f4] ss:$8 sps:$4 sm:$0xff]   ;;  %v11716_v49 = vld [vmem:[%s16181_s10 + $0x8f0] ss:$8 sps:$4 sm:$0xff]  }
 0xd4b   :  { %v4994_v48 = vpop.permute.xlu0 %4993  ;;  %4984 = vst.msk [vmem:[#allocation3 + $0x39] sm:$0x1] %vm2694_vm2, %v4982_v28  ;;  %v11719_v28 = vld [vmem:[%s16181_s10 + $0x390] ss:$8 sps:$4 sm:$0xff]   ;;  %vm16359_vm15 = vcmask 523264  }
 0xd4c   :  { %8513 = vmatpush1.bf16.msra.mxu0 %v11656_v30  ;;  %v4995_v19 = vrot.slane %v4994_v48, 6  ;;  %v11712_v30 = vld [vmem:[%s16181_s10 + $0x8e4] ss:$8 sps:$4 sm:$0xff]   ;;  %v15077_v27 = vrot.slane %v5102_v44, %v13555_v24 }
 0xd4d   :  { %8514 = vmatprep.subr.bf16.mxu0 %v11664_v45  ;;  %8287 = vmatpush1.bf16.msra.mxu1 %v11659_v29  ;;  %v11715_v45 = vld [vmem:[%s16181_s10 + $0x384] ss:$8 sps:$4 sm:$0xff]   ;;  %v11721_v29 = vld [vmem:[%s16181_s10 + $0x394] ss:$8 sps:$4 sm:$0xff]  }
 0xd4e   :  { %8297 = vmatprep.subr.bf16.mxu1 %v11667_v11  ;;  %v4996_v21 = vsel %vm2707_vm11, %v4995_v19, %v4994_v48  ;;  %v2717_v51 = vpop.permute.xlu1 %2716  ;;  %v5118_v11 = vcombine.high %v15077_v27, %v15077_v27  ;;  %v11727_v48 = vld [vmem:[%s16181_s10 + $0x3a4] ss:$8 sps:$4 sm:$0xff]   ;;  %v11730_v19 = vld [vmem:[%s16181_s10 + $0x914] ss:$8 sps:$4 sm:$0xff]  }
 0xd4f   :  { %v2723_v8 = vpop.permute.xlu0 %2722  ;;  %2720 = vst.msk [vmem:[#allocation3 + $0x3a] sm:$0x1] %vm2719_vm9, %v2717_v51  ;;  %v11734_v51 = vld [vmem:[%s16181_s10 + $0x920] ss:$8 sps:$4 sm:$0xff]   ;;  %v11787_v44 = vld [vmem:[%s16181_s10 + $0x444] ss:$8 sps:$4 sm:$0xff]  }
 0xd50   :  { %8515 = vmatpush1.bf16.msra.mxu0 %v11662_v53  ;;  %8289 = vmatmul.mubr.bf16.vlgmr.msra.gmra.mrb[72].mxu1 %v5204_v15  ;;  %4998 = vst.msk [vmem:[#allocation3 + $0x39] sm:$0x5] %vm14924_vm7, %v4996_v21  ;;  %v2724_v9 = vrot.slane %v2723_v8, 6  ;;  %v11724_v53 = vld [vmem:[%s16181_s10 + $0x904] ss:$8 sps:$4 sm:$0xff]  }
 0xd51   :  { %8516 = vmatprep.subr.bf16.mxu0 %v11670_v17  ;;  %8298 = vmatpush1.bf16.msra.mxu1 %v11665_v60  ;;  %v11722_v17 = vld [vmem:[%s16181_s10 + $0x900] ss:$8 sps:$4 sm:$0xff]   ;;  %v5219_v60 = vpack.c.bf16 %v5118_v11, %v5118_v11  ;;  %v11731_v21 = vld [vmem:[%s16181_s10 + $0x3b0] ss:$8 sps:$4 sm:$0xff]   ;;  %v11802_v11 = vld [vmem:[%s16181_s10 + $0x9d4] ss:$8 sps:$4 sm:$0xff]  }
 0xd52   :  { %8329 = vmatprep.mubr.bf16.mxu1 %v5207_v4  ;;  %8299 = vmatprep.subr.bf16.mxu1 %v11673_v13  ;;  %v2726_v14 = vsel %vm2725_vm6, %v2724_v9, %v2723_v8  ;;  %v2735_v36 = vpop.permute.xlu1 %2734  ;;  %v11725_v15 = vld [vmem:[%s16181_s10 + $0x3a0] ss:$8 sps:$4 sm:$0xff]   ;;  %v11736_v13 = vld [vmem:[%s16181_s10 + $0x924] ss:$8 sps:$4 sm:$0xff]   ;;  %v11740_v9 = vld [vmem:[%s16181_s10 + $0x930] ss:$8 sps:$4 sm:$0xff]  }
 0xd53   :  { %v5007_v47 = vpop.permute.xlu0 %5006  ;;  %2731 = vst.msk [vmem:[#allocation3 + $0x3a] sm:$0x5] %vm14980_vm8, %v2726_v14  ;;  %v11739_v4 = vld [vmem:[%s16181_s10 + $0x3c4] ss:$8 sps:$4 sm:$0xff]   ;;  %v11737_v8 = vld [vmem:[%s16181_s10 + $0x3c0] ss:$8 sps:$4 sm:$0xff]  }
 0xd54   :  { %8517 = vmatpush1.bf16.msra.mxu0 %v11668_v18  ;;  %v5008_v63 = vrot.slane %v5007_v47, 6  ;;  %2738 = vst.msk [vmem:[#allocation3 + $0x3c] sm:$0x1] %vm2737_vm14, %v2735_v36  ;;  %v11733_v18 = vld [vmem:[%s16181_s10 + $0x3b4] ss:$8 sps:$4 sm:$0xff]  }
 0xd55   :  { %8518 = vmatprep.subr.bf16.mxu0 %v11676_v62  ;;  %8300 = vmatpush1.bf16.msra.mxu1 %v11671_v58  ;;  %v11742_v62 = vld [vmem:[%s16181_s10 + $0x934] ss:$8 sps:$4 sm:$0xff]   ;;  %v11751_v14 = vld [vmem:[%s16181_s10 + $0x3e4] ss:$8 sps:$4 sm:$0xff]  }
 0xd56   :  { %8301 = vmatprep.subr.bf16.mxu1 %v11679_v3  ;;  %v5009_v50 = vsel %vm2725_vm6, %v5008_v63, %v5007_v47  ;;  %v11745_v58 = vld [vmem:[%s16181_s10 + $0x3d4] ss:$8 sps:$4 sm:$0xff]   ;;  %v11746_v3 = vld [vmem:[%s16181_s10 + $0x940] ss:$8 sps:$4 sm:$0xff]   ;;  %v11752_v63 = vld [vmem:[%s16181_s10 + $0x950] ss:$8 sps:$4 sm:$0xff]  }
 0xd57   :  { %v5002_v39 = vpop.permute.xlu0 %5001  ;;  %v11754_v36 = vld [vmem:[%s16181_s10 + $0x954] ss:$8 sps:$4 sm:$0xff]   ;;  %v11749_v47 = vld [vmem:[%s16181_s10 + $0x3e0] ss:$8 sps:$4 sm:$0xff]  }
 0xd58   :  { %8519 = vmatpush1.bf16.msra.mxu0 %v11674_v23  ;;  %5004 = vst.msk [vmem:[#allocation3 + $0x3b] sm:$0x1] %vm2719_vm9, %v5002_v39  ;;  %v11743_v23 = vld [vmem:[%s16181_s10 + $0x3d0] ss:$8 sps:$4 sm:$0xff]   ;;  %v11758_v39 = vld [vmem:[%s16181_s10 + $0x960] ss:$8 sps:$4 sm:$0xff]  }
 0xd59   :  { %8520 = vmatprep.subr.bf16.mxu0 %v11682_v25  ;;  %8302 = vmatpush1.bf16.msra.mxu1 %v11677_v34  ;;  %5011 = vst.msk [vmem:[#allocation3 + $0x3b] sm:$0x5] %vm14980_vm8, %v5009_v50  ;;  %v15155_v25 = vld [vmem:[#allocation3 + $0x10] sm:$0xff]  ;;  %v11757_v34 = vld [vmem:[%s16181_s10 + $0x3f4] ss:$8 sps:$4 sm:$0xff]  }
 0xd5a   :  { %8303 = vmatprep.subr.bf16.mxu1 %v11685_v32  ;;  %v15171_v32 = vrot.slane %v15155_v25, %v13555_v24  ;;  %v11763_v50 = vld [vmem:[%s16181_s10 + $0x404] ss:$8 sps:$4 sm:$0xff]  }
 0xd5b   :  { %v5015_v54 = vpop.permute.xlu0 %5014 }
 0xd5c   :  { %8521 = vmatpush1.bf16.msra.mxu0 %v11680_v16  ;;  %5017 = vst.msk [vmem:[#allocation3 + $0x3d] sm:$0x1] %vm2737_vm14, %v5015_v54  ;;  %v11760_v16 = vld [vmem:[%s16181_s10 + $0x964] ss:$8 sps:$4 sm:$0xff]   ;;  %v11764_v54 = vld [vmem:[%s16181_s10 + $0x970] ss:$8 sps:$4 sm:$0xff]  }
 0xd5d   :  { %8522 = vmatprep.subr.bf16.mxu0 %v11688_v35  ;;  %8304 = vmatpush1.bf16.msra.mxu1 %v11683_v5  ;;  %v11755_v35 = vld [vmem:[%s16181_s10 + $0x3f0] ss:$8 sps:$4 sm:$0xff]   ;;  %v11766_v5 = vld [vmem:[%s16181_s10 + $0x974] ss:$8 sps:$4 sm:$0xff]  }
 0xd5e   :  { %8305 = vmatprep.subr.bf16.mxu1 %v11691_v6  ;;  %v11761_v6 = vld [vmem:[%s16181_s10 + $0x400] ss:$8 sps:$4 sm:$0xff]  }
 0xd60   :  { %8523 = vmatpush1.bf16.msra.mxu0 %v11686_v37  ;;  %v5083_v37 = vcombine.high %v15171_v32, %v15171_v32 }
 0xd61   :  { %8524 = vmatprep.subr.bf16.mxu0 %v11694_v61  ;;  %8306 = vmatpush1.bf16.msra.mxu1 %v11689_v20  ;;  %v5206_v61 = vpack.c.bf16 %v14932_v26, %v14932_v26  ;;  %v11769_v20 = vld [vmem:[%s16181_s10 + $0x414] ss:$8 sps:$4 sm:$0xff]   ;;  %v11767_v26 = vld [vmem:[%s16181_s10 + $0x410] ss:$8 sps:$4 sm:$0xff]  }
 0xd62   :  { %8307 = vmatprep.subr.bf16.mxu1 %v11697_v52  ;;  %v11772_v52 = vld [vmem:[%s16181_s10 + $0x984] ss:$8 sps:$4 sm:$0xff]  }
 0xd64   :  { %8525 = vmatpush1.bf16.msra.mxu0 %v11692_v12  ;;  %v5209_v12 = vpack.c.bf16 %v5083_v37, %v5083_v37  ;;  %v11841_v37 = vld [vmem:[%s16181_s10 + $0x4d4] ss:$8 sps:$4 sm:$0xff]  }
 0xd65   :  { %8526 = vmatprep.subr.bf16.mxu0 %v11700_v55  ;;  %8308 = vmatpush1.bf16.msra.mxu1 %v11695_v1  ;;  %v11770_v55 = vld [vmem:[%s16181_s10 + $0x980] ss:$8 sps:$4 sm:$0xff]   ;;  %v11775_v1 = vld [vmem:[%s16181_s10 + $0x424] ss:$8 sps:$4 sm:$0xff]  }
 0xd66   :  { %8309 = vmatprep.subr.bf16.mxu1 %v11703_v33  ;;  %v11773_v33 = vld [vmem:[%s16181_s10 + $0x420] ss:$8 sps:$4 sm:$0xff]  }
 0xd68   :  { %8527 = vmatpush1.bf16.msra.mxu0 %v11698_v41  ;;  %v11778_v41 = vld [vmem:[%s16181_s10 + $0x994] ss:$8 sps:$4 sm:$0xff]  }
 0xd69   :  { %8528 = vmatprep.subr.bf16.mxu0 %v11706_v57  ;;  %8310 = vmatpush1.bf16.msra.mxu1 %v11701_v59  ;;  %v11776_v57 = vld [vmem:[%s16181_s10 + $0x990] ss:$8 sps:$4 sm:$0xff]   ;;  %v11781_v59 = vld [vmem:[%s16181_s10 + $0x434] ss:$8 sps:$4 sm:$0xff]  }
 0xd6a   :  { %8311 = vmatprep.subr.bf16.mxu1 %v11709_v42  ;;  %v11779_v42 = vld [vmem:[%s16181_s10 + $0x430] ss:$8 sps:$4 sm:$0xff]  }
 0xd6c   :  { %8529 = vmatpush1.bf16.msra.mxu0 %v11704_v7  ;;  %v11784_v7 = vld [vmem:[%s16181_s10 + $0x9a4] ss:$8 sps:$4 sm:$0xff]  }
 0xd6d   :  { %8530 = vmatprep.subr.bf16.mxu0 %v11712_v30  ;;  %8312 = vmatpush1.bf16.msra.mxu1 %v11707_v0  ;;  %v11782_v30 = vld [vmem:[%s16181_s10 + $0x9a0] ss:$8 sps:$4 sm:$0xff]   ;;  %v11790_v0 = vld [vmem:[%s16181_s10 + $0x9b4] ss:$8 sps:$4 sm:$0xff]  }
 0xd6e   :  { %8313 = vmatprep.subr.bf16.mxu1 %v11715_v45  ;;  %v11788_v45 = vld [vmem:[%s16181_s10 + $0x9b0] ss:$8 sps:$4 sm:$0xff]  }
 0xd70   :  { %8531 = vmatpush1.bf16.msra.mxu0 %v11710_v38  ;;  %v11785_v38 = vld [vmem:[%s16181_s10 + $0x440] ss:$8 sps:$4 sm:$0xff]  }
 0xd71   :  { %8532 = vmatprep.subr.bf16.mxu0 %v11718_v10  ;;  %8314 = vmatpush1.bf16.msra.mxu1 %v11713_v56  ;;  %v11793_v10 = vld [vmem:[%s16181_s10 + $0x454] ss:$8 sps:$4 sm:$0xff]   ;;  %v11796_v56 = vld [vmem:[%s16181_s10 + $0x9c4] ss:$8 sps:$4 sm:$0xff]  }
 0xd72   :  { %8315 = vmatprep.subr.bf16.mxu1 %v11721_v29  ;;  %v11794_v29 = vld [vmem:[%s16181_s10 + $0x9c0] ss:$8 sps:$4 sm:$0xff]  }
 0xd74   :  { %8533 = vmatpush1.bf16.msra.mxu0 %v11716_v49  ;;  %v11791_v49 = vld [vmem:[%s16181_s10 + $0x450] ss:$8 sps:$4 sm:$0xff]  }
 0xd75   :  { %8543 = vmatprep.subr.bf16.mxu0 %v11724_v53  ;;  %8316 = vmatpush1.bf16.msra.mxu1 %v11719_v28  ;;  %v11799_v53 = vld [vmem:[%s16181_s10 + $0x464] ss:$8 sps:$4 sm:$0xff]   ;;  %v11797_v28 = vld [vmem:[%s16181_s10 + $0x460] ss:$8 sps:$4 sm:$0xff]  }
 0xd76   :  { %8317 = vmatprep.subr.bf16.mxu1 %v11727_v48  ;;  %v11808_v48 = vld [vmem:[%s16181_s10 + $0x9e4] ss:$8 sps:$4 sm:$0xff]  }
 0xd77   :  { %8535 = vmatmul.mubr.bf16.vlgmr.msra.gmra.mrb[16].mxu0 %v5216_v40  ;;  %v11805_v40 = vld [vmem:[%s16181_s10 + $0x474] ss:$8 sps:$4 sm:$0xff]  }
 0xd78   :  { %8544 = vmatpush1.bf16.msra.mxu0 %v11722_v17  ;;  %8575 = vmatprep.mubr.bf16.mxu0 %v5219_v60  ;;  %v11800_v17 = vld [vmem:[%s16181_s10 + $0x9d0] ss:$8 sps:$4 sm:$0xff]  }
 0xd79   :  { %8545 = vmatprep.subr.bf16.mxu0 %v11730_v19  ;;  %8318 = vmatpush1.bf16.msra.mxu1 %v11725_v15  ;;  %v11803_v19 = vld [vmem:[%s16181_s10 + $0x470] ss:$8 sps:$4 sm:$0xff]   ;;  %v11806_v15 = vld [vmem:[%s16181_s10 + $0x9e0] ss:$8 sps:$4 sm:$0xff]  }
 0xd7a   :  { %8319 = vmatprep.subr.bf16.mxu1 %v11733_v18  ;;  %v15276_v60 = vld [vmem:[#allocation3 + $0x28] sm:$0xff] }
 0xd7b   :  { %v11814_v18 = vld [vmem:[%s16181_s10 + $0x9f4] ss:$8 sps:$4 sm:$0xff]  }
 0xd7c   :  { %8546 = vmatpush1.bf16.msra.mxu0 %v11728_v22  ;;  %v11811_v22 = vld [vmem:[%s16181_s10 + $0x484] ss:$8 sps:$4 sm:$0xff]  }
 0xd7d   :  { %8547 = vmatprep.subr.bf16.mxu0 %v11736_v13  ;;  %8320 = vmatpush1.bf16.msra.mxu1 %v11731_v21  ;;  %v15289_v13 = vrot.slane %v15276_v60, %v13555_v24  ;;  %v11809_v21 = vld [vmem:[%s16181_s10 + $0x480] ss:$8 sps:$4 sm:$0xff]  }
 0xd7e   :  { %8321 = vmatprep.subr.bf16.mxu1 %v11739_v4  ;;  %v11817_v4 = vld [vmem:[%s16181_s10 + $0x494] ss:$8 sps:$4 sm:$0xff]  }
 0xd80   :  { %8548 = vmatpush1.bf16.msra.mxu0 %v11734_v51  ;;  %v11812_v51 = vld [vmem:[%s16181_s10 + $0x9f0] ss:$8 sps:$4 sm:$0xff]  }
 0xd81   :  { %8549 = vmatprep.subr.bf16.mxu0 %v11742_v62  ;;  %8322 = vmatpush1.bf16.msra.mxu1 %v11737_v8  ;;  %v11820_v62 = vld [vmem:[%s16181_s10 + $0xa04] ss:$8 sps:$4 sm:$0xff]   ;;  %v5134_v8 = vcombine.high %v15289_v13, %v15289_v13 }
 0xd82   :  { %8323 = vmatprep.subr.bf16.mxu1 %v11745_v58  ;;  %v11818_v58 = vld [vmem:[%s16181_s10 + $0xa00] ss:$8 sps:$4 sm:$0xff]  }
 0xd84   :  { %8550 = vmatpush1.bf16.msra.mxu0 %v11740_v9  ;;  %v11815_v9 = vld [vmem:[%s16181_s10 + $0x490] ss:$8 sps:$4 sm:$0xff]  }
 0xd85   :  { %8551 = vmatprep.subr.bf16.mxu0 %v11748_v43  ;;  %8324 = vmatpush1.bf16.msra.mxu1 %v11743_v23  ;;  %v5218_v43 = vpack.c.bf16 %v15077_v27, %v15077_v27  ;;  %v11823_v23 = vld [vmem:[%s16181_s10 + $0x4a4] ss:$8 sps:$4 sm:$0xff]   ;;  %v11824_v27 = vld [vmem:[%s16181_s10 + $0xa10] ss:$8 sps:$4 sm:$0xff]  }
 0xd86   :  { %8325 = vmatprep.subr.bf16.mxu1 %v11751_v14  ;;  %v5221_v14 = vpack.c.bf16 %v5134_v8, %v5134_v8  ;;  %v11896_v8 = vld [vmem:[%s16181_s10 + $0x564] ss:$8 sps:$4 sm:$0xff]  }
 0xd88   :  { %8552 = vmatpush1.bf16.msra.mxu0 %v11746_v3  ;;  %v11826_v3 = vld [vmem:[%s16181_s10 + $0xa14] ss:$8 sps:$4 sm:$0xff]  }
 0xd89   :  { %8553 = vmatprep.subr.bf16.mxu0 %v11754_v36  ;;  %8326 = vmatpush1.bf16.msra.mxu1 %v11749_v47  ;;  %v11821_v36 = vld [vmem:[%s16181_s10 + $0x4a0] ss:$8 sps:$4 sm:$0xff]   ;;  %v11829_v47 = vld [vmem:[%s16181_s10 + $0x4b4] ss:$8 sps:$4 sm:$0xff]  }
 0xd8a   :  { %8327 = vmatprep.subr.bf16.mxu1 %v11757_v34  ;;  %v11827_v34 = vld [vmem:[%s16181_s10 + $0x4b0] ss:$8 sps:$4 sm:$0xff]  }
 0xd8c   :  { %8554 = vmatpush1.bf16.msra.mxu0 %v11752_v63  ;;  %v11832_v63 = vld [vmem:[%s16181_s10 + $0xa24] ss:$8 sps:$4 sm:$0xff]  }
 0xd8d   :  { %8555 = vmatprep.subr.bf16.mxu0 %v11760_v16  ;;  %8328 = vmatpush1.bf16.msra.mxu1 %v11755_v35  ;;  %v11830_v16 = vld [vmem:[%s16181_s10 + $0xa20] ss:$8 sps:$4 sm:$0xff]   ;;  %v11835_v35 = vld [vmem:[%s16181_s10 + $0x4c4] ss:$8 sps:$4 sm:$0xff]  }
 0xd8e   :  { %8338 = vmatprep.subr.bf16.mxu1 %v11763_v50  ;;  %v11833_v50 = vld [vmem:[%s16181_s10 + $0x4c0] ss:$8 sps:$4 sm:$0xff]  }
 0xd90   :  { %8556 = vmatpush1.bf16.msra.mxu0 %v11758_v39  ;;  %8330 = vmatmul.mubr.bf16.vlgmr.msra.gmra.mrb[72].mxu1 %v5206_v61  ;;  %v11838_v39 = vld [vmem:[%s16181_s10 + $0xa34] ss:$8 sps:$4 sm:$0xff]   ;;  %v11839_v61 = vld [vmem:[%s16181_s10 + $0x4d0] ss:$8 sps:$4 sm:$0xff]  }
 0xd91   :  { %8557 = vmatprep.subr.bf16.mxu0 %v11766_v5  ;;  %8339 = vmatpush1.bf16.msra.mxu1 %v11761_v6  ;;  %v11836_v5 = vld [vmem:[%s16181_s10 + $0xa30] ss:$8 sps:$4 sm:$0xff]   ;;  %v11844_v6 = vld [vmem:[%s16181_s10 + $0xa44] ss:$8 sps:$4 sm:$0xff]  }
 0xd92   :  { %8370 = vmatprep.mubr.bf16.mxu1 %v5209_v12  ;;  %8340 = vmatprep.subr.bf16.mxu1 %v11769_v20  ;;  %v11847_v20 = vld [vmem:[%s16181_s10 + $0x4e4] ss:$8 sps:$4 sm:$0xff]   ;;  %v11850_v12 = vld [vmem:[%s16181_s10 + $0xa54] ss:$8 sps:$4 sm:$0xff]  }
 0xd94   :  { %8558 = vmatpush1.bf16.msra.mxu0 %v11764_v54  ;;  %v11842_v54 = vld [vmem:[%s16181_s10 + $0xa40] ss:$8 sps:$4 sm:$0xff]  }
 0xd95   :  { %8559 = vmatprep.subr.bf16.mxu0 %v11772_v52  ;;  %8341 = vmatpush1.bf16.msra.mxu1 %v11767_v26  ;;  %v5068_v52 = vcombine.high %v15155_v25, %v15155_v25  ;;  %v11845_v26 = vld [vmem:[%s16181_s10 + $0x4e0] ss:$8 sps:$4 sm:$0xff]   ;;  %v11856_v25 = vld [vmem:[%s16181_s10 + $0xa64] ss:$8 sps:$4 sm:$0xff]  }
 0xd96   :  { %8342 = vmatprep.subr.bf16.mxu1 %v11775_v1  ;;  %v11853_v1 = vld [vmem:[%s16181_s10 + $0x4f4] ss:$8 sps:$4 sm:$0xff]  }
 0xd98   :  { %8560 = vmatpush1.bf16.msra.mxu0 %v11770_v55  ;;  %v11848_v55 = vld [vmem:[%s16181_s10 + $0xa50] ss:$8 sps:$4 sm:$0xff]  }
 0xd99   :  { %8561 = vmatprep.subr.bf16.mxu0 %v11778_v41  ;;  %8343 = vmatpush1.bf16.msra.mxu1 %v11773_v33  ;;  %v15382_v41 = vrot.slane %v5068_v52, %v13555_v24  ;;  %v11851_v33 = vld [vmem:[%s16181_s10 + $0x4f0] ss:$8 sps:$4 sm:$0xff]   ;;  %v11927_v52 = vld [vmem:[%s16181_s10 + $0x5b4] ss:$8 sps:$4 sm:$0xff]  }
 0xd9a   :  { %8344 = vmatprep.subr.bf16.mxu1 %v11781_v59  ;;  %v11859_v59 = vld [vmem:[%s16181_s10 + $0x504] ss:$8 sps:$4 sm:$0xff]  }
 0xd9c   :  { %8562 = vmatpush1.bf16.msra.mxu0 %v11776_v57  ;;  %v11854_v57 = vld [vmem:[%s16181_s10 + $0xa60] ss:$8 sps:$4 sm:$0xff]  }
 0xd9d   :  { %8563 = vmatprep.subr.bf16.mxu0 %v11784_v7  ;;  %8345 = vmatpush1.bf16.msra.mxu1 %v11779_v42  ;;  %v11862_v7 = vld [vmem:[%s16181_s10 + $0xa74] ss:$8 sps:$4 sm:$0xff]   ;;  %v5084_v42 = vcombine.high %v15382_v41, %v15382_v41 }
 0xd9e   :  { %8346 = vmatprep.subr.bf16.mxu1 %v11787_v44  ;;  %v5208_v44 = vpack.c.bf16 %v15171_v32, %v15171_v32  ;;  %v11864_v32 = vld [vmem:[%s16181_s10 + $0x510] ss:$8 sps:$4 sm:$0xff]  }
 0xda0   :  { %8564 = vmatpush1.bf16.msra.mxu0 %v11782_v30  ;;  %v11857_v30 = vld [vmem:[%s16181_s10 + $0x500] ss:$8 sps:$4 sm:$0xff]  }
 0xda1   :  { %8565 = vmatprep.subr.bf16.mxu0 %v11790_v0  ;;  %8347 = vmatpush1.bf16.msra.mxu1 %v11785_v38  ;;  %v11860_v0 = vld [vmem:[%s16181_s10 + $0xa70] ss:$8 sps:$4 sm:$0xff]   ;;  %v11866_v38 = vld [vmem:[%s16181_s10 + $0x514] ss:$8 sps:$4 sm:$0xff]  }
 0xda2   :  { %8348 = vmatprep.subr.bf16.mxu1 %v11793_v10  ;;  %v11869_v10 = vld [vmem:[%s16181_s10 + $0xa84] ss:$8 sps:$4 sm:$0xff]  }
 0xda4   :  { %8566 = vmatpush1.bf16.msra.mxu0 %v11788_v45  ;;  %v5211_v45 = vpack.c.bf16 %v5084_v42, %v5084_v42  ;;  %v11942_v42 = vld [vmem:[%s16181_s10 + $0xb44] ss:$8 sps:$4 sm:$0xff]  }
 0xda5   :  { %8567 = vmatprep.subr.bf16.mxu0 %v11796_v56  ;;  %8349 = vmatpush1.bf16.msra.mxu1 %v11791_v49  ;;  %v11867_v56 = vld [vmem:[%s16181_s10 + $0xa80] ss:$8 sps:$4 sm:$0xff]   ;;  %v11872_v49 = vld [vmem:[%s16181_s10 + $0x524] ss:$8 sps:$4 sm:$0xff]  }
 0xda6   :  { %8350 = vmatprep.subr.bf16.mxu1 %v11799_v53  ;;  %v11870_v53 = vld [vmem:[%s16181_s10 + $0x520] ss:$8 sps:$4 sm:$0xff]  }
 0xda8   :  { %8568 = vmatpush1.bf16.msra.mxu0 %v11794_v29  ;;  %v11875_v29 = vld [vmem:[%s16181_s10 + $0xa94] ss:$8 sps:$4 sm:$0xff]  }
 0xda9   :  { %8569 = vmatprep.subr.bf16.mxu0 %v11802_v11  ;;  %8351 = vmatpush1.bf16.msra.mxu1 %v11797_v28  ;;  %v11873_v11 = vld [vmem:[%s16181_s10 + $0xa90] ss:$8 sps:$4 sm:$0xff]   ;;  %v11878_v28 = vld [vmem:[%s16181_s10 + $0x534] ss:$8 sps:$4 sm:$0xff]  }
 0xdaa   :  { %8352 = vmatprep.subr.bf16.mxu1 %v11805_v40  ;;  %v11876_v40 = vld [vmem:[%s16181_s10 + $0x530] ss:$8 sps:$4 sm:$0xff]  }
 0xdac   :  { %8570 = vmatpush1.bf16.msra.mxu0 %v11800_v17  ;;  %v11881_v17 = vld [vmem:[%s16181_s10 + $0xaa4] ss:$8 sps:$4 sm:$0xff]  }
 0xdad   :  { %8571 = vmatprep.subr.bf16.mxu0 %v11808_v48  ;;  %8353 = vmatpush1.bf16.msra.mxu1 %v11803_v19  ;;  %v11879_v48 = vld [vmem:[%s16181_s10 + $0xaa0] ss:$8 sps:$4 sm:$0xff]   ;;  %v11884_v19 = vld [vmem:[%s16181_s10 + $0x544] ss:$8 sps:$4 sm:$0xff]  }
 0xdae   :  { %8354 = vmatprep.subr.bf16.mxu1 %v11811_v22  ;;  %v11882_v22 = vld [vmem:[%s16181_s10 + $0x540] ss:$8 sps:$4 sm:$0xff]  }
 0xdb0   :  { %8572 = vmatpush1.bf16.msra.mxu0 %v11806_v15  ;;  %v11887_v15 = vld [vmem:[%s16181_s10 + $0xab4] ss:$8 sps:$4 sm:$0xff]  }
 0xdb1   :  { %8573 = vmatprep.subr.bf16.mxu0 %v11814_v18  ;;  %8355 = vmatpush1.bf16.msra.mxu1 %v11809_v21  ;;  %v11885_v18 = vld [vmem:[%s16181_s10 + $0xab0] ss:$8 sps:$4 sm:$0xff]   ;;  %v11890_v21 = vld [vmem:[%s16181_s10 + $0x554] ss:$8 sps:$4 sm:$0xff]  }
 0xdb2   :  { %8356 = vmatprep.subr.bf16.mxu1 %v11817_v4  ;;  %v11888_v4 = vld [vmem:[%s16181_s10 + $0x550] ss:$8 sps:$4 sm:$0xff]  }
 0xdb4   :  { %8574 = vmatpush1.bf16.msra.mxu0 %v11812_v51  ;;  %v11893_v51 = vld [vmem:[%s16181_s10 + $0xac4] ss:$8 sps:$4 sm:$0xff]  }
 0xdb5   :  { %8584 = vmatprep.subr.bf16.mxu0 %v11820_v62  ;;  %8357 = vmatpush1.bf16.msra.mxu1 %v11815_v9  ;;  %v11891_v62 = vld [vmem:[%s16181_s10 + $0xac0] ss:$8 sps:$4 sm:$0xff]   ;;  %v11899_v9 = vld [vmem:[%s16181_s10 + $0xad4] ss:$8 sps:$4 sm:$0xff]  }
 0xdb6   :  { %8358 = vmatprep.subr.bf16.mxu1 %v11823_v23  ;;  %v11902_v23 = vld [vmem:[%s16181_s10 + $0x574] ss:$8 sps:$4 sm:$0xff]  }
 0xdb7   :  { %8576 = vmatmul.mubr.bf16.vlgmr.msra.gmra.mrb[16].mxu0 %v5218_v43  ;;  %v11897_v43 = vld [vmem:[%s16181_s10 + $0xad0] ss:$8 sps:$4 sm:$0xff]  }
 0xdb8   :  { %8585 = vmatpush1.bf16.msra.mxu0 %v11818_v58  ;;  %8616 = vmatprep.mubr.bf16.mxu0 %v5221_v14  ;;  %v11894_v58 = vld [vmem:[%s16181_s10 + $0x560] ss:$8 sps:$4 sm:$0xff]   ;;  %v5119_v14 = vcombine.high %v15276_v60, %v15276_v60  ;;  %v11911_v60 = vld [vmem:[%s16181_s10 + $0xaf4] ss:$8 sps:$4 sm:$0xff]  }
 0xdb9   :  { %8586 = vmatprep.subr.bf16.mxu0 %v11826_v3  ;;  %8359 = vmatpush1.bf16.msra.mxu1 %v11821_v36  ;;  %v11905_v3 = vld [vmem:[%s16181_s10 + $0xae4] ss:$8 sps:$4 sm:$0xff]   ;;  %v11900_v36 = vld [vmem:[%s16181_s10 + $0x570] ss:$8 sps:$4 sm:$0xff]  }
 0xdba   :  { %8360 = vmatprep.subr.bf16.mxu1 %v11829_v47  ;;  %v11908_v47 = vld [vmem:[%s16181_s10 + $0x584] ss:$8 sps:$4 sm:$0xff]  }
 0xdbc   :  { %8587 = vmatpush1.bf16.msra.mxu0 %v11824_v27  ;;  %v11903_v27 = vld [vmem:[%s16181_s10 + $0xae0] ss:$8 sps:$4 sm:$0xff]  }
 0xdbd   :  { %8588 = vmatprep.subr.bf16.mxu0 %v11832_v63  ;;  %8361 = vmatpush1.bf16.msra.mxu1 %v11827_v34  ;;  %v15499_v63 = vrot.slane %v5119_v14, %v13555_v24  ;;  %v11906_v34 = vld [vmem:[%s16181_s10 + $0x580] ss:$8 sps:$4 sm:$0xff]   ;;  %v11984_v14 = vld [vmem:[%s16181_s10 + $0xc04] ss:$8 sps:$4 sm:$0xff]  }
 0xdbe   :  { %8362 = vmatprep.subr.bf16.mxu1 %v11835_v35  ;;  %v11914_v35 = vld [vmem:[%s16181_s10 + $0x594] ss:$8 sps:$4 sm:$0xff]  }
 0xdc0   :  { %8589 = vmatpush1.bf16.msra.mxu0 %v11830_v16  ;;  %v11909_v16 = vld [vmem:[%s16181_s10 + $0xaf0] ss:$8 sps:$4 sm:$0xff]  }
 0xdc1   :  { %8590 = vmatprep.subr.bf16.mxu0 %v11838_v39  ;;  %8363 = vmatpush1.bf16.msra.mxu1 %v11833_v50  ;;  %v11917_v39 = vld [vmem:[%s16181_s10 + $0xb04] ss:$8 sps:$4 sm:$0xff]   ;;  %v5135_v50 = vcombine.high %v15499_v63, %v15499_v63 }
 0xdc2   :  { %8364 = vmatprep.subr.bf16.mxu1 %v11841_v37  ;;  %v11915_v37 = vld [vmem:[%s16181_s10 + $0xb00] ss:$8 sps:$4 sm:$0xff]  }
 0xdc4   :  { %8591 = vmatpush1.bf16.msra.mxu0 %v11836_v5  ;;  %v11912_v5 = vld [vmem:[%s16181_s10 + $0x590] ss:$8 sps:$4 sm:$0xff]  }
 0xdc5   :  { %8592 = vmatprep.subr.bf16.mxu0 %v11844_v6  ;;  %8365 = vmatpush1.bf16.msra.mxu1 %v11839_v61  ;;  %v5220_v6 = vpack.c.bf16 %v15289_v13, %v15289_v13  ;;  %v11921_v61 = vld [vmem:[%s16181_s10 + $0x5a4] ss:$8 sps:$4 sm:$0xff]   ;;  %v11922_v13 = vld [vmem:[%s16181_s10 + $0xb10] ss:$8 sps:$4 sm:$0xff]  }
 0xdc6   :  { %8366 = vmatprep.subr.bf16.mxu1 %v11847_v20  ;;  %v5223_v20 = vpack.c.bf16 %v5135_v50, %v5135_v50  ;;  %v11991_v50 = vld [vmem:[%s16181_s10 + $0xc30] ss:$8 sps:$4 sm:$0xff]  }
 0xdc8   :  { %8593 = vmatpush1.bf16.msra.mxu0 %v11842_v54  ;;  %v11924_v54 = vld [vmem:[%s16181_s10 + $0xb14] ss:$8 sps:$4 sm:$0xff]  }
 0xdc9   :  { %8594 = vmatprep.subr.bf16.mxu0 %v11850_v12  ;;  %8367 = vmatpush1.bf16.msra.mxu1 %v11845_v26  ;;  %v11919_v12 = vld [vmem:[%s16181_s10 + $0x5a0] ss:$8 sps:$4 sm:$0xff]   ;;  %v11930_v26 = vld [vmem:[%s16181_s10 + $0xb24] ss:$8 sps:$4 sm:$0xff]  }
 0xdca   :  { %8368 = vmatprep.subr.bf16.mxu1 %v11853_v1  ;;  %v11928_v1 = vld [vmem:[%s16181_s10 + $0xb20] ss:$8 sps:$4 sm:$0xff]  }
 0xdcc   :  { %8595 = vmatpush1.bf16.msra.mxu0 %v11848_v55  ;;  %v11925_v55 = vld [vmem:[%s16181_s10 + $0x5b0] ss:$8 sps:$4 sm:$0xff]  }
 0xdcd   :  { %8596 = vmatprep.subr.bf16.mxu0 %v11856_v25  ;;  %8369 = vmatpush1.bf16.msra.mxu1 %v11851_v33  ;;  %v11933_v25 = vld [vmem:[%s16181_s10 + $0x5c4] ss:$8 sps:$4 sm:$0xff]   ;;  %v11936_v33 = vld [vmem:[%s16181_s10 + $0xb34] ss:$8 sps:$4 sm:$0xff]  }
 0xdce   :  { %8379 = vmatprep.subr.bf16.mxu1 %v11859_v59  ;;  %v11934_v59 = vld [vmem:[%s16181_s10 + $0xb30] ss:$8 sps:$4 sm:$0xff]  }
 0xdd0   :  { %8597 = vmatpush1.bf16.msra.mxu0 %v11854_v57  ;;  %8371 = vmatmul.mubr.bf16.vlgmr.msra.gmra.mrb[72].mxu1 %v5208_v44  ;;  %v11931_v57 = vld [vmem:[%s16181_s10 + $0x5c0] ss:$8 sps:$4 sm:$0xff]  }
 0xdd1   :  { %8598 = vmatprep.subr.bf16.mxu0 %v11862_v7  ;;  %8380 = vmatpush1.bf16.msra.mxu1 %v11857_v30  ;;  %v11939_v7 = vld [vmem:[%s16181_s10 + $0x5d4] ss:$8 sps:$4 sm:$0xff]   ;;  %v11937_v30 = vld [vmem:[%s16181_s10 + $0x5d0] ss:$8 sps:$4 sm:$0xff]   ;;  %v11940_v44 = vld [vmem:[%s16181_s10 + $0xb40] ss:$8 sps:$4 sm:$0xff]  }
 0xdd2   :  { %8411 = vmatprep.mubr.bf16.mxu1 %v5211_v45  ;;  %8381 = vmatprep.subr.bf16.mxu1 %v11866_v38  ;;  %v11948_v38 = vld [vmem:[%s16181_s10 + $0xb54] ss:$8 sps:$4 sm:$0xff]   ;;  %v11943_v45 = vld [vmem:[%s16181_s10 + $0x5e0] ss:$8 sps:$4 sm:$0xff]  }
 0xdd4   :  { %8599 = vmatpush1.bf16.msra.mxu0 %v11860_v0  ;;  %v11945_v0 = vld [vmem:[%s16181_s10 + $0x5e4] ss:$8 sps:$4 sm:$0xff]  }
 0xdd5   :  { %8600 = vmatprep.subr.bf16.mxu0 %v11869_v10  ;;  %8382 = vmatpush1.bf16.msra.mxu1 %v11864_v32  ;;  %v11946_v10 = vld [vmem:[%s16181_s10 + $0xb50] ss:$8 sps:$4 sm:$0xff]   ;;  %v11951_v32 = vld [vmem:[%s16181_s10 + $0x5f4] ss:$8 sps:$4 sm:$0xff]  }
 0xdd6   :  { %8383 = vmatprep.subr.bf16.mxu1 %v11872_v49  ;;  %v11949_v49 = vld [vmem:[%s16181_s10 + $0x5f0] ss:$8 sps:$4 sm:$0xff]  }
 0xdd8   :  { %8601 = vmatpush1.bf16.msra.mxu0 %v11867_v56  ;;  %v11954_v56 = vld [vmem:[%s16181_s10 + $0xb64] ss:$8 sps:$4 sm:$0xff]  }
 0xdd9   :  { %8602 = vmatprep.subr.bf16.mxu0 %v11875_v29  ;;  %8384 = vmatpush1.bf16.msra.mxu1 %v11870_v53  ;;  %v11952_v29 = vld [vmem:[%s16181_s10 + $0xb60] ss:$8 sps:$4 sm:$0xff]   ;;  %v11957_v53 = vld [vmem:[%s16181_s10 + $0xb74] ss:$8 sps:$4 sm:$0xff]  }
 0xdda   :  { %8385 = vmatprep.subr.bf16.mxu1 %v11878_v28  ;;  %v11955_v28 = vld [vmem:[%s16181_s10 + $0xb70] ss:$8 sps:$4 sm:$0xff]  }
 0xddc   :  { %8603 = vmatpush1.bf16.msra.mxu0 %v11873_v11  ;;  %v5210_v11 = vpack.c.bf16 %v15382_v41, %v15382_v41  ;;  %v11963_v41 = vld [vmem:[%s16181_s10 + $0xb94] ss:$8 sps:$4 sm:$0xff]  }
 0xddd   :  { %8604 = vmatprep.subr.bf16.mxu0 %v11881_v17  ;;  %8386 = vmatpush1.bf16.msra.mxu1 %v11876_v40  ;;  %v11960_v17 = vld [vmem:[%s16181_s10 + $0xb84] ss:$8 sps:$4 sm:$0xff]   ;;  %v11958_v40 = vld [vmem:[%s16181_s10 + $0xb80] ss:$8 sps:$4 sm:$0xff]  }
 0xdde   :  { %8387 = vmatprep.subr.bf16.mxu1 %v11884_v19  ;;  %v11966_v19 = vld [vmem:[%s16181_s10 + $0xba4] ss:$8 sps:$4 sm:$0xff]  }
 0xde0   :  { %8605 = vmatpush1.bf16.msra.mxu0 %v11879_v48  ;;  %v11961_v48 = vld [vmem:[%s16181_s10 + $0xb90] ss:$8 sps:$4 sm:$0xff]  }
 0xde1   :  { %8606 = vmatprep.subr.bf16.mxu0 %v11887_v15  ;;  %8388 = vmatpush1.bf16.msra.mxu1 %v11882_v22  ;;  %v11964_v15 = vld [vmem:[%s16181_s10 + $0xba0] ss:$8 sps:$4 sm:$0xff]   ;;  %v11969_v22 = vld [vmem:[%s16181_s10 + $0xbb4] ss:$8 sps:$4 sm:$0xff]  }
 0xde2   :  { %8389 = vmatprep.subr.bf16.mxu1 %v11890_v21  ;;  %v11972_v21 = vld [vmem:[%s16181_s10 + $0xbc4] ss:$8 sps:$4 sm:$0xff]  }
 0xde4   :  { %8607 = vmatpush1.bf16.msra.mxu0 %v11885_v18  ;;  %v11967_v18 = vld [vmem:[%s16181_s10 + $0xbb0] ss:$8 sps:$4 sm:$0xff]  }
 0xde5   :  { %8608 = vmatprep.subr.bf16.mxu0 %v11893_v51  ;;  %8390 = vmatpush1.bf16.msra.mxu1 %v11888_v4  ;;  %v11970_v51 = vld [vmem:[%s16181_s10 + $0xbc0] ss:$8 sps:$4 sm:$0xff]   ;;  %v11975_v4 = vld [vmem:[%s16181_s10 + $0xbd4] ss:$8 sps:$4 sm:$0xff]  }
 0xde6   :  { %8391 = vmatprep.subr.bf16.mxu1 %v11896_v8  ;;  %v11978_v8 = vld [vmem:[%s16181_s10 + $0xbe4] ss:$8 sps:$4 sm:$0xff]  }
 0xde8   :  { %8609 = vmatpush1.bf16.msra.mxu0 %v11891_v62  ;;  %v11973_v62 = vld [vmem:[%s16181_s10 + $0xbd0] ss:$8 sps:$4 sm:$0xff]  }
 0xde9   :  { %8610 = vmatprep.subr.bf16.mxu0 %v11899_v9  ;;  %8392 = vmatpush1.bf16.msra.mxu1 %v11894_v58  ;;  %v15642_v9 = vld [vmem:[#allocation3 + $0x30] sm:$0xff] }
 0xdea   :  { %8393 = vmatprep.subr.bf16.mxu1 %v11902_v23  ;;  %v11976_v58 = vld [vmem:[%s16181_s10 + $0xbe0] ss:$8 sps:$4 sm:$0xff]   ;;  %v15652_v23 = vrot.slane %v15642_v9, %v13555_v24 }
 0xdec   :  { %8611 = vmatpush1.bf16.msra.mxu0 %v11897_v43  ;;  %v11981_v43 = vld [vmem:[%s16181_s10 + $0xbf4] ss:$8 sps:$4 sm:$0xff]  }
 0xded   :  { %8612 = vmatprep.subr.bf16.mxu0 %v11905_v3  ;;  %8394 = vmatpush1.bf16.msra.mxu1 %v11900_v36  ;;  %v11979_v3 = vld [vmem:[%s16181_s10 + $0xbf0] ss:$8 sps:$4 sm:$0xff]   ;;  %v5151_v36 = vcombine.high %v15652_v23, %v15652_v23 }
 0xdee   :  { %8395 = vmatprep.subr.bf16.mxu1 %v11908_v47  ;;  %v5222_v47 = vpack.c.bf16 %v15499_v63, %v15499_v63  ;;  %v11988_v63 = vld [vmem:[%s16181_s10 + $0xc20] ss:$8 sps:$4 sm:$0xff]  }
 0xdf0   :  { %8613 = vmatpush1.bf16.msra.mxu0 %v11903_v27  ;;  %v11982_v27 = vld [vmem:[%s16181_s10 + $0xc00] ss:$8 sps:$4 sm:$0xff]  }
 0xdf1   :  { %8614 = vmatprep.subr.bf16.mxu0 %v11911_v60  ;;  %8396 = vmatpush1.bf16.msra.mxu1 %v11906_v34  ;;  %v11987_v60 = vld [vmem:[%s16181_s10 + $0xc14] ss:$8 sps:$4 sm:$0xff]   ;;  %v5225_v34 = vpack.c.bf16 %v5151_v36, %v5151_v36 }
 0xdf2   :  { %8397 = vmatprep.subr.bf16.mxu1 %v11914_v35  ;;  %v11990_v35 = vld [vmem:[%s16181_s10 + $0xc24] ss:$8 sps:$4 sm:$0xff]   ;;  %v12151_v36 = vld [vmem:[%s16183_s12 + $0x34] ss:$8 sps:$4 sm:$0xff]  }
 0xdf4   :  { %8615 = vmatpush1.bf16.msra.mxu0 %v11909_v16  ;;  %v11985_v16 = vld [vmem:[%s16181_s10 + $0xc10] ss:$8 sps:$4 sm:$0xff]  }
 0xdf5   :  { %8625 = vmatprep.subr.bf16.mxu0 %v11917_v39  ;;  %8398 = vmatpush1.bf16.msra.mxu1 %v11912_v5  ;;  %v11993_v39 = vld [vmem:[%s16181_s10 + $0xc34] ss:$8 sps:$4 sm:$0xff]   ;;  %v11996_v5 = vld [vmem:[%s16181_s10 + $0xc44] ss:$8 sps:$4 sm:$0xff]  }
 0xdf6   :  { %8399 = vmatprep.subr.bf16.mxu1 %v11921_v61  ;;  %v11997_v61 = vld [vmem:[%s16181_s10 + $0xc50] ss:$8 sps:$4 sm:$0xff]  }
 0xdf7   :  { %8617 = vmatmul.mubr.bf16.vlgmr.msra.gmra.mrb[16].mxu0 %v5220_v6  ;;  %v11999_v6 = vld [vmem:[%s16181_s10 + $0xc54] ss:$8 sps:$4 sm:$0xff]  }
 0xdf8   :  { %8626 = vmatpush1.bf16.msra.mxu0 %v11915_v37  ;;  %8657 = vmatprep.mubr.bf16.mxu0 %v5223_v20  ;;  %v11994_v37 = vld [vmem:[%s16181_s10 + $0xc40] ss:$8 sps:$4 sm:$0xff]  }
 0xdf9   :  { %8627 = vmatprep.subr.bf16.mxu0 %v11924_v54  ;;  %8400 = vmatpush1.bf16.msra.mxu1 %v11919_v12  ;;  %v12002_v54 = vld [vmem:[%s16181_s10 + $0xc64] ss:$8 sps:$4 sm:$0xff]   ;;  %v12000_v20 = vld [vmem:[%s16181_s10 + $0xc60] ss:$8 sps:$4 sm:$0xff]   ;;  %v12005_v12 = vld [vmem:[%s16181_s10 + $0xc74] ss:$8 sps:$4 sm:$0xff]  }
 0xdfa   :  { %8401 = vmatprep.subr.bf16.mxu1 %v11927_v52  ;;  %v12008_v52 = vld [vmem:[%s16181_s10 + $0xc84] ss:$8 sps:$4 sm:$0xff]  }
 0xdfc   :  { %8628 = vmatpush1.bf16.msra.mxu0 %v11922_v13  ;;  %v12003_v13 = vld [vmem:[%s16181_s10 + $0xc70] ss:$8 sps:$4 sm:$0xff]  }
 0xdfd   :  { %8629 = vmatprep.subr.bf16.mxu0 %v11930_v26  ;;  %8402 = vmatpush1.bf16.msra.mxu1 %v11925_v55  ;;  %v12006_v26 = vld [vmem:[%s16181_s10 + $0xc80] ss:$8 sps:$4 sm:$0xff]   ;;  %v12011_v55 = vld [vmem:[%s16181_s10 + $0xc94] ss:$8 sps:$4 sm:$0xff]  }
 0xdfe   :  { %8403 = vmatprep.subr.bf16.mxu1 %v11933_v25  ;;  %v12014_v25 = vld [vmem:[%s16181_s10 + $0xca4] ss:$8 sps:$4 sm:$0xff]  }
 0xe00   :  { %8630 = vmatpush1.bf16.msra.mxu0 %v11928_v1  ;;  %v12009_v1 = vld [vmem:[%s16181_s10 + $0xc90] ss:$8 sps:$4 sm:$0xff]  }
 0xe01   :  { %8631 = vmatprep.subr.bf16.mxu0 %v11936_v33  ;;  %8404 = vmatpush1.bf16.msra.mxu1 %v11931_v57  ;;  %v12012_v33 = vld [vmem:[%s16181_s10 + $0xca0] ss:$8 sps:$4 sm:$0xff]   ;;  %v12017_v57 = vld [vmem:[%s16181_s10 + $0xcb4] ss:$8 sps:$4 sm:$0xff]  }
 0xe02   :  { %8405 = vmatprep.subr.bf16.mxu1 %v11939_v7  ;;  %v12020_v7 = vld [vmem:[%s16181_s10 + $0xcc4] ss:$8 sps:$4 sm:$0xff]  }
 0xe04   :  { %8632 = vmatpush1.bf16.msra.mxu0 %v11934_v59  ;;  %v12015_v59 = vld [vmem:[%s16181_s10 + $0xcb0] ss:$8 sps:$4 sm:$0xff]  }
 0xe05   :  { %8633 = vmatprep.subr.bf16.mxu0 %v11942_v42  ;;  %8406 = vmatpush1.bf16.msra.mxu1 %v11937_v30  ;;  %v12018_v42 = vld [vmem:[%s16181_s10 + $0xcc0] ss:$8 sps:$4 sm:$0xff]   ;;  %v12023_v30 = vld [vmem:[%s16181_s10 + $0xcd4] ss:$8 sps:$4 sm:$0xff]  }
 0xe06   :  { %8407 = vmatprep.subr.bf16.mxu1 %v11945_v0  ;;  %v12026_v0 = vld [vmem:[%s16181_s10 + $0xce4] ss:$8 sps:$4 sm:$0xff]  }
 0xe08   :  { %8634 = vmatpush1.bf16.msra.mxu0 %v11940_v44  ;;  %v12021_v44 = vld [vmem:[%s16181_s10 + $0xcd0] ss:$8 sps:$4 sm:$0xff]  }
 0xe09   :  { %8635 = vmatprep.subr.bf16.mxu0 %v11948_v38  ;;  %8408 = vmatpush1.bf16.msra.mxu1 %v11943_v45  ;;  %v5136_v38 = vcombine.high %v15642_v9, %v15642_v9  ;;  %v12024_v45 = vld [vmem:[%s16181_s10 + $0xce0] ss:$8 sps:$4 sm:$0xff]   ;;  %v12051_v9 = vld [vmem:[%s16181_s10 + $0xd64] ss:$8 sps:$4 sm:$0xff]  }
 0xe0a   :  { %8409 = vmatprep.subr.bf16.mxu1 %v11951_v32 }
 0xe0b   :  { %v15757_v32 = vrot.slane %v5136_v38, %v13555_v24  ;;  %v12078_v38 = vld [vmem:[%s16181_s10 + $0xdf4] ss:$8 sps:$4 sm:$0xff]  }
 0xe0c   :  { %8636 = vmatpush1.bf16.msra.mxu0 %v11946_v10  ;;  %v12029_v10 = vld [vmem:[%s16181_s10 + $0xcf4] ss:$8 sps:$4 sm:$0xff]  }
 0xe0d   :  { %8637 = vmatprep.subr.bf16.mxu0 %v11954_v56  ;;  %8410 = vmatpush1.bf16.msra.mxu1 %v11949_v49  ;;  %v12027_v56 = vld [vmem:[%s16181_s10 + $0xcf0] ss:$8 sps:$4 sm:$0xff]   ;;  %v12032_v49 = vld [vmem:[%s16181_s10 + $0xd04] ss:$8 sps:$4 sm:$0xff]  }
 0xe10   :  { %8638 = vmatpush1.bf16.msra.mxu0 %v11952_v29  ;;  %8412 = vmatmul.mubr.bf16.vlgmr.msra.gmra.mrb[72].mxu1 %v5210_v11  ;;  %v5152_v29 = vcombine.high %v15757_v32, %v15757_v32  ;;  %v5224_v11 = vpack.c.bf16 %v15652_v23, %v15652_v23  ;;  %v12049_v23 = vld [vmem:[%s16181_s10 + $0xd60] ss:$8 sps:$4 sm:$0xff]  }
 0xe11   :  { %8639 = vmatprep.subr.bf16.mxu0 %v11957_v53  ;;  %v12030_v53 = vld [vmem:[%s16181_s10 + $0xd00] ss:$8 sps:$4 sm:$0xff]  }
 0xe14   :  { %8640 = vmatpush1.bf16.msra.mxu0 %v11955_v28  ;;  %v12036_v28 = vld [vmem:[%s16181_s10 + $0xd14] ss:$8 sps:$4 sm:$0xff]  }
 0xe15   :  { %8641 = vmatprep.subr.bf16.mxu0 %v11960_v17  ;;  %v5227_v17 = vpack.c.bf16 %v5152_v29, %v5152_v29  ;;  %v12081_v29 = vld [vmem:[%s16181_s10 + $0xe04] ss:$8 sps:$4 sm:$0xff]  }
 0xe18   :  { %8642 = vmatpush1.bf16.msra.mxu0 %v11958_v40  ;;  %v12034_v40 = vld [vmem:[%s16181_s10 + $0xd10] ss:$8 sps:$4 sm:$0xff]  }
 0xe19   :  { %8643 = vmatprep.subr.bf16.mxu0 %v11963_v41  ;;  %v12039_v41 = vld [vmem:[%s16181_s10 + $0xd24] ss:$8 sps:$4 sm:$0xff]  }
 0xe1c   :  { %8644 = vmatpush1.bf16.msra.mxu0 %v11961_v48  ;;  %v12037_v48 = vld [vmem:[%s16181_s10 + $0xd20] ss:$8 sps:$4 sm:$0xff]  }
 0xe1d   :  { %8645 = vmatprep.subr.bf16.mxu0 %v11966_v19  ;;  %v12042_v19 = vld [vmem:[%s16181_s10 + $0xd34] ss:$8 sps:$4 sm:$0xff]  }
 0xe20   :  { %8646 = vmatpush1.bf16.msra.mxu0 %v11964_v15  ;;  %v12040_v15 = vld [vmem:[%s16181_s10 + $0xd30] ss:$8 sps:$4 sm:$0xff]  }
 0xe21   :  { %8647 = vmatprep.subr.bf16.mxu0 %v11969_v22  ;;  %v12045_v22 = vld [vmem:[%s16181_s10 + $0xd44] ss:$8 sps:$4 sm:$0xff]  }
 0xe24   :  { %8648 = vmatpush1.bf16.msra.mxu0 %v11967_v18  ;;  %v12043_v18 = vld [vmem:[%s16181_s10 + $0xd40] ss:$8 sps:$4 sm:$0xff]  }
 0xe25   :  { %8649 = vmatprep.subr.bf16.mxu0 %v11972_v21  ;;  %v12048_v21 = vld [vmem:[%s16181_s10 + $0xd54] ss:$8 sps:$4 sm:$0xff]  }
 0xe28   :  { %8650 = vmatpush1.bf16.msra.mxu0 %v11970_v51  ;;  %v12140_v51 = vld [vmem:[%s16183_s12] ss:$8 sps:$4 sm:$0xff]  }
 0xe29   :  { %8651 = vmatprep.subr.bf16.mxu0 %v11975_v4  ;;  %v12142_v4 = vld [vmem:[%s16183_s12 + $0x4] ss:$8 sps:$4 sm:$0xff]  }
 0xe2a   :  { %9038 = vmatprep.subr.bf16.mxu1 %v12142_v4  ;;  %v12089_v4 = vld [vmem:[%s16181_s10 + $0xe30] ss:$8 sps:$4 sm:$0xff]  }
 0xe2b   :  { %9039 = vmatpush1.bf16.msra.mxu1 %v12140_v51  ;;  %v12091_v51 = vld [vmem:[%s16181_s10 + $0xe34] ss:$8 sps:$4 sm:$0xff]  }
 0xe2c   :  { %8652 = vmatpush1.bf16.msra.mxu0 %v11973_v62  ;;  %v12046_v62 = vld [vmem:[%s16181_s10 + $0xd50] ss:$8 sps:$4 sm:$0xff]  }
 0xe2d   :  { %8653 = vmatprep.subr.bf16.mxu0 %v11978_v8  ;;  %v12145_v8 = vld [vmem:[%s16183_s12 + $0x14] ss:$8 sps:$4 sm:$0xff]  }
 0xe2e   :  { %9040 = vmatprep.subr.bf16.mxu1 %v12145_v8  ;;  %v12092_v8 = vld [vmem:[%s16181_s10 + $0xe40] ss:$8 sps:$4 sm:$0xff]  }
 0xe30   :  { %8654 = vmatpush1.bf16.msra.mxu0 %v11976_v58  ;;  %v12143_v58 = vld [vmem:[%s16183_s12 + $0x10] ss:$8 sps:$4 sm:$0xff]  }
 0xe31   :  { %8655 = vmatprep.subr.bf16.mxu0 %v11981_v43  ;;  %v12148_v43 = vld [vmem:[%s16183_s12 + $0x24] ss:$8 sps:$4 sm:$0xff]   ;;  %9041 = vmatpush1.bf16.msra.mxu1 %v12143_v58  ;;  %v12095_v58 = vld [vmem:[%s16181_s10 + $0xe50] ss:$8 sps:$4 sm:$0xff]  }
 0xe32   :  { %9042 = vmatprep.subr.bf16.mxu1 %v12148_v43  ;;  %v12100_v43 = vld [vmem:[%s16181_s10 + $0xe64] ss:$8 sps:$4 sm:$0xff]  }
 0xe34   :  { %8656 = vmatpush1.bf16.msra.mxu0 %v11979_v3  ;;  %v12054_v3 = vld [vmem:[%s16181_s10 + $0xd74] ss:$8 sps:$4 sm:$0xff]  }
 0xe35   :  { %8666 = vmatprep.subr.bf16.mxu0 %v11984_v14  ;;  %v12146_v14 = vld [vmem:[%s16183_s12 + $0x20] ss:$8 sps:$4 sm:$0xff]  }
 0xe36   :  { %9043 = vmatpush1.bf16.msra.mxu1 %v12146_v14  ;;  %v12101_v14 = vld [vmem:[%s16181_s10 + $0xe70] ss:$8 sps:$4 sm:$0xff]  }
 0xe37   :  { %8658 = vmatmul.mubr.bf16.vlgmr.msra.gmra.mrb[16].mxu0 %v5222_v47  ;;  %v12057_v47 = vld [vmem:[%s16181_s10 + $0xd84] ss:$8 sps:$4 sm:$0xff]   ;;  %9044 = vmatprep.subr.bf16.mxu1 %v12151_v36 }
 0xe38   :  { %8667 = vmatpush1.bf16.msra.mxu0 %v11982_v27  ;;  %8698 = vmatprep.mubr.bf16.mxu0 %v5225_v34  ;;  %v12052_v27 = vld [vmem:[%s16181_s10 + $0xd70] ss:$8 sps:$4 sm:$0xff]   ;;  %v12154_v34 = vld [vmem:[%s16183_s12 + $0x44] ss:$8 sps:$4 sm:$0xff]  }
 0xe39   :  { %8668 = vmatprep.subr.bf16.mxu0 %v11987_v60  ;;  %v12149_v60 = vld [vmem:[%s16183_s12 + $0x30] ss:$8 sps:$4 sm:$0xff]   ;;  %v12106_v36 = vld [vmem:[%s16181_s10 + $0xe84] ss:$8 sps:$4 sm:$0xff]  }
 0xe3a   :  { %9045 = vmatpush1.bf16.msra.mxu1 %v12149_v60  ;;  %v12107_v60 = vld [vmem:[%s16181_s10 + $0xe90] ss:$8 sps:$4 sm:$0xff]  }
 0xe3b   :  { %9046 = vmatprep.subr.bf16.mxu1 %v12154_v34  ;;  %v12112_v34 = vld [vmem:[%s16181_s10 + $0xea4] ss:$8 sps:$4 sm:$0xff]  }
 0xe3c   :  { %8669 = vmatpush1.bf16.msra.mxu0 %v11985_v16  ;;  %v12055_v16 = vld [vmem:[%s16181_s10 + $0xd80] ss:$8 sps:$4 sm:$0xff]  }
 0xe3d   :  { %8670 = vmatprep.subr.bf16.mxu0 %v11990_v35  ;;  %v12060_v35 = vld [vmem:[%s16181_s10 + $0xd94] ss:$8 sps:$4 sm:$0xff]  }
 0xe40   :  { %8671 = vmatpush1.bf16.msra.mxu0 %v11988_v63  ;;  %v12152_v63 = vld [vmem:[%s16183_s12 + $0x40] ss:$8 sps:$4 sm:$0xff]  }
 0xe41   :  { %8672 = vmatprep.subr.bf16.mxu0 %v11993_v39  ;;  %v12157_v39 = vld [vmem:[%s16183_s12 + $0x54] ss:$8 sps:$4 sm:$0xff]   ;;  %9047 = vmatpush1.bf16.msra.mxu1 %v12152_v63  ;;  %v12113_v63 = vld [vmem:[%s16181_s10 + $0xeb0] ss:$8 sps:$4 sm:$0xff]  }
 0xe42   :  { %9048 = vmatprep.subr.bf16.mxu1 %v12157_v39  ;;  %v12118_v39 = vld [vmem:[%s16181_s10 + $0xec4] ss:$8 sps:$4 sm:$0xff]  }
 0xe44   :  { %8673 = vmatpush1.bf16.msra.mxu0 %v11991_v50  ;;  %v12058_v50 = vld [vmem:[%s16181_s10 + $0xd90] ss:$8 sps:$4 sm:$0xff]  }
 0xe45   :  { %8674 = vmatprep.subr.bf16.mxu0 %v11996_v5  ;;  %v12063_v5 = vld [vmem:[%s16181_s10 + $0xda4] ss:$8 sps:$4 sm:$0xff]  }
 0xe48   :  { %8675 = vmatpush1.bf16.msra.mxu0 %v11994_v37  ;;  %v12155_v37 = vld [vmem:[%s16183_s12 + $0x50] ss:$8 sps:$4 sm:$0xff]  }
 0xe49   :  { %8676 = vmatprep.subr.bf16.mxu0 %v11999_v6  ;;  %v12160_v6 = vld [vmem:[%s16183_s12 + $0x64] ss:$8 sps:$4 sm:$0xff]   ;;  %9049 = vmatpush1.bf16.msra.mxu1 %v12155_v37  ;;  %v12121_v37 = vld [vmem:[%s16181_s10 + $0xed4] ss:$8 sps:$4 sm:$0xff]  }
 0xe4a   :  { %9050 = vmatprep.subr.bf16.mxu1 %v12160_v6 }
 0xe4c   :  { %8677 = vmatpush1.bf16.msra.mxu0 %v11997_v61  ;;  %v12061_v61 = vld [vmem:[%s16181_s10 + $0xda0] ss:$8 sps:$4 sm:$0xff]  }
 0xe4d   :  { %8678 = vmatprep.subr.bf16.mxu0 %v12002_v54  ;;  %v12066_v54 = vld [vmem:[%s16181_s10 + $0xdb4] ss:$8 sps:$4 sm:$0xff]  }
 0xe50   :  { %8679 = vmatpush1.bf16.msra.mxu0 %v12000_v20  ;;  %v12158_v20 = vld [vmem:[%s16183_s12 + $0x60] ss:$8 sps:$4 sm:$0xff]  }
 0xe51   :  { %8680 = vmatprep.subr.bf16.mxu0 %v12005_v12  ;;  %v12163_v12 = vld [vmem:[%s16183_s12 + $0x74] ss:$8 sps:$4 sm:$0xff]   ;;  %9051 = vmatpush1.bf16.msra.mxu1 %v12158_v20  ;;  %v12119_v20 = vld [vmem:[%s16181_s10 + $0xed0] ss:$8 sps:$4 sm:$0xff]  }
 0xe52   :  { %9052 = vmatprep.subr.bf16.mxu1 %v12163_v12  ;;  %v12124_v12 = vld [vmem:[%s16181_s10 + $0xee4] ss:$8 sps:$4 sm:$0xff]  }
 0xe54   :  { %8681 = vmatpush1.bf16.msra.mxu0 %v12003_v13  ;;  %v12064_v13 = vld [vmem:[%s16181_s10 + $0xdb0] ss:$8 sps:$4 sm:$0xff]  }
 0xe55   :  { %8682 = vmatprep.subr.bf16.mxu0 %v12008_v52  ;;  %v12069_v52 = vld [vmem:[%s16181_s10 + $0xdc4] ss:$8 sps:$4 sm:$0xff]  }
 0xe58   :  { %8683 = vmatpush1.bf16.msra.mxu0 %v12006_v26  ;;  %v12161_v26 = vld [vmem:[%s16183_s12 + $0x70] ss:$8 sps:$4 sm:$0xff]  }
 0xe59   :  { %8684 = vmatprep.subr.bf16.mxu0 %v12011_v55  ;;  %v12166_v55 = vld [vmem:[%s16183_s12 + $0x84] ss:$8 sps:$4 sm:$0xff]   ;;  %9053 = vmatpush1.bf16.msra.mxu1 %v12161_v26  ;;  %v12125_v26 = vld [vmem:[%s16181_s10 + $0xef0] ss:$8 sps:$4 sm:$0xff]  }
 0xe5a   :  { %9054 = vmatprep.subr.bf16.mxu1 %v12166_v55  ;;  %v12130_v55 = vld [vmem:[%s16181_s10 + $0xf04] ss:$8 sps:$4 sm:$0xff]  }
 0xe5c   :  { %8685 = vmatpush1.bf16.msra.mxu0 %v12009_v1  ;;  %v12067_v1 = vld [vmem:[%s16181_s10 + $0xdc0] ss:$8 sps:$4 sm:$0xff]  }
 0xe5d   :  { %8686 = vmatprep.subr.bf16.mxu0 %v12014_v25  ;;  %v12072_v25 = vld [vmem:[%s16181_s10 + $0xdd4] ss:$8 sps:$4 sm:$0xff]  }
 0xe60   :  { %8687 = vmatpush1.bf16.msra.mxu0 %v12012_v33  ;;  %v12164_v33 = vld [vmem:[%s16183_s12 + $0x80] ss:$8 sps:$4 sm:$0xff]  }
 0xe61   :  { %8688 = vmatprep.subr.bf16.mxu0 %v12017_v57  ;;  %v12169_v57 = vld [vmem:[%s16183_s12 + $0x94] ss:$8 sps:$4 sm:$0xff]   ;;  %9055 = vmatpush1.bf16.msra.mxu1 %v12164_v33 }
 0xe62   :  { %9056 = vmatprep.subr.bf16.mxu1 %v12169_v57  ;;  %v12133_v33 = vld [vmem:[%s16181_s10 + $0xf14] ss:$8 sps:$4 sm:$0xff]   ;;  %v12131_v57 = vld [vmem:[%s16181_s10 + $0xf10] ss:$8 sps:$4 sm:$0xff]  }
 0xe64   :  { %8689 = vmatpush1.bf16.msra.mxu0 %v12015_v59  ;;  %v12070_v59 = vld [vmem:[%s16181_s10 + $0xdd0] ss:$8 sps:$4 sm:$0xff]  }
 0xe65   :  { %8690 = vmatprep.subr.bf16.mxu0 %v12020_v7  ;;  %v12075_v7 = vld [vmem:[%s16181_s10 + $0xde4] ss:$8 sps:$4 sm:$0xff]  }
 0xe68   :  { %8691 = vmatpush1.bf16.msra.mxu0 %v12018_v42  ;;  %v12167_v42 = vld [vmem:[%s16183_s12 + $0x90] ss:$8 sps:$4 sm:$0xff]  }
 0xe69   :  { %8692 = vmatprep.subr.bf16.mxu0 %v12023_v30  ;;  %v15913_v30 = vld [vmem:[#allocation3 + $0x38] sm:$0x3f]  ;;  %9057 = vmatpush1.bf16.msra.mxu1 %v12167_v42 }
 0xe6a   :  { %v5153_v42 = vcombine.high %v15913_v30, %v15913_v30 }
 0xe6c   :  { %8693 = vmatpush1.bf16.msra.mxu0 %v12021_v44  ;;  %v12172_v44 = vld [vmem:[%s16183_s12 + $0xa4] ss:$8 sps:$4 sm:$0xff]  }
 0xe6d   :  { %8694 = vmatprep.subr.bf16.mxu0 %v12026_v0  ;;  %v12073_v0 = vld [vmem:[%s16181_s10 + $0xde0] ss:$8 sps:$4 sm:$0xff]   ;;  %9058 = vmatprep.subr.bf16.mxu1 %v12172_v44  ;;  %v12139_v44 = vld [vmem:[%s16181_s10 + $0xf34] ss:$8 sps:$4 sm:$0xff]  }
 0xe70   :  { %8695 = vmatpush1.bf16.msra.mxu0 %v12024_v45  ;;  %v15926_v45 = vrot.slane %v15913_v30, %v13555_v24  ;;  %v12182_v30 = vld [vmem:[%s16183_s12 + $0xe0] ss:$8 sps:$4 sm:$0xff]  }
 0xe71   :  { %8696 = vmatprep.subr.bf16.mxu0 %v12029_v10  ;;  %v12170_v10 = vld [vmem:[%s16183_s12 + $0xa0] ss:$8 sps:$4 sm:$0xff]  }
 0xe72   :  { %9059 = vmatpush1.bf16.msra.mxu1 %v12170_v10  ;;  %v12187_v10 = vld [vmem:[%s16183_s12 + $0xf4] ss:$8 sps:$4 sm:$0xff]  }
 0xe74   :  { %8697 = vmatpush1.bf16.msra.mxu0 %v12027_v56  ;;  %v12175_v56 = vld [vmem:[%s16183_s12 + $0xb4] ss:$8 sps:$4 sm:$0xff]  }
 0xe75   :  { %8707 = vmatprep.subr.bf16.mxu0 %v12032_v49  ;;  %v12076_v49 = vld [vmem:[%s16181_s10 + $0xdf0] ss:$8 sps:$4 sm:$0xff]   ;;  %9060 = vmatprep.subr.bf16.mxu1 %v12175_v56  ;;  %v12188_v56 = vld [vmem:[%s16185_s14 + $0x40] sm:$0xff]  }
 0xe77   :  { %8699 = vmatmul.mubr.bf16.vlgmr.msra.gmra.mrb[16].mxu0 %v5224_v11  ;;  %v12173_v11 = vld [vmem:[%s16183_s12 + $0xb0] ss:$8 sps:$4 sm:$0xff]  }
 0xe78   :  { %8708 = vmatpush1.bf16.msra.mxu0 %v12030_v53  ;;  %8739 = vmatprep.mubr.bf16.mxu0 %v5227_v17  ;;  %v5168_v53 = vcombine.high %v15926_v45, %v15926_v45  ;;  %v12079_v17 = vld [vmem:[%s16181_s10 + $0xe00] ss:$8 sps:$4 sm:$0xff]  }
 0xe79   :  { %8709 = vmatprep.subr.bf16.mxu0 %v12036_v28  ;;  %v12178_v28 = vld [vmem:[%s16183_s12 + $0xc4] ss:$8 sps:$4 sm:$0xff]   ;;  %9061 = vmatpush1.bf16.msra.mxu1 %v12173_v11 }
 0xe7a   :  { %9062 = vmatprep.subr.bf16.mxu1 %v12178_v28 }
 0xe7c   :  { %8710 = vmatpush1.bf16.msra.mxu0 %v12034_v40  ;;  %v5226_v40 = vpack.c.bf16 %v15757_v32, %v15757_v32  ;;  %v12083_v32 = vld [vmem:[%s16181_s10 + $0xe10] ss:$8 sps:$4 sm:$0xff]  }
 0xe7d   :  { %8711 = vmatprep.subr.bf16.mxu0 %v12039_v41  ;;  %v12085_v41 = vld [vmem:[%s16181_s10 + $0xe14] ss:$8 sps:$4 sm:$0xff]  }
 0xe80   :  { %8712 = vmatpush1.bf16.msra.mxu0 %v12037_v48  ;;  %v5229_v48 = vpack.c.bf16 %v5168_v53, %v5168_v53 }
 0xe81   :  { %8713 = vmatprep.subr.bf16.mxu0 %v12042_v19  ;;  %v12176_v19 = vld [vmem:[%s16183_s12 + $0xc0] ss:$8 sps:$4 sm:$0xff]  }
 0xe82   :  { %9063 = vmatpush1.bf16.msra.mxu1 %v12176_v19 }
 0xe84   :  { %8714 = vmatpush1.bf16.msra.mxu0 %v12040_v15  ;;  %v12181_v15 = vld [vmem:[%s16183_s12 + $0xd4] ss:$8 sps:$4 sm:$0xff]  }
 0xe85   :  { %8715 = vmatprep.subr.bf16.mxu0 %v12045_v22  ;;  %v12088_v22 = vld [vmem:[%s16181_s10 + $0xe24] ss:$8 sps:$4 sm:$0xff]   ;;  %9064 = vmatprep.subr.bf16.mxu1 %v12181_v15 }
 0xe88   :  { %8716 = vmatpush1.bf16.msra.mxu0 %v12043_v18  ;;  %v12179_v18 = vld [vmem:[%s16183_s12 + $0xd0] ss:$8 sps:$4 sm:$0xff]  }
 0xe89   :  { %8717 = vmatprep.subr.bf16.mxu0 %v12048_v21  ;;  %v12086_v21 = vld [vmem:[%s16181_s10 + $0xe20] ss:$8 sps:$4 sm:$0xff]   ;;  %9065 = vmatpush1.bf16.msra.mxu1 %v12179_v18 }
 0xe8c   :  { %8718 = vmatpush1.bf16.msra.mxu0 %v12046_v62  ;;  %v12094_v62 = vld [vmem:[%s16181_s10 + $0xe44] ss:$8 sps:$4 sm:$0xff]  }
 0xe8d   :  { %8719 = vmatprep.subr.bf16.mxu0 %v12051_v9  ;;  %v12097_v9 = vld [vmem:[%s16181_s10 + $0xe54] ss:$8 sps:$4 sm:$0xff]  }
 0xe90   :  { %8720 = vmatpush1.bf16.msra.mxu0 %v12049_v23  ;;  %v12098_v23 = vld [vmem:[%s16181_s10 + $0xe60] ss:$8 sps:$4 sm:$0xff]  }
 0xe91   :  { %8721 = vmatprep.subr.bf16.mxu0 %v12054_v3  ;;  %v12103_v3 = vld [vmem:[%s16181_s10 + $0xe74] ss:$8 sps:$4 sm:$0xff]  }
 0xe94   :  { %8722 = vmatpush1.bf16.msra.mxu0 %v12052_v27  ;;  %v12104_v27 = vld [vmem:[%s16181_s10 + $0xe80] ss:$8 sps:$4 sm:$0xff]  }
 0xe95   :  { %8723 = vmatprep.subr.bf16.mxu0 %v12057_v47  ;;  %v12109_v47 = vld [vmem:[%s16181_s10 + $0xe94] ss:$8 sps:$4 sm:$0xff]  }
 0xe98   :  { %8724 = vmatpush1.bf16.msra.mxu0 %v12055_v16  ;;  %v12110_v16 = vld [vmem:[%s16181_s10 + $0xea0] ss:$8 sps:$4 sm:$0xff]  }
 0xe99   :  { %8725 = vmatprep.subr.bf16.mxu0 %v12060_v35  ;;  %v12115_v35 = vld [vmem:[%s16181_s10 + $0xeb4] ss:$8 sps:$4 sm:$0xff]  }
 0xe9c   :  { %8726 = vmatpush1.bf16.msra.mxu0 %v12058_v50  ;;  %v12116_v50 = vld [vmem:[%s16181_s10 + $0xec0] ss:$8 sps:$4 sm:$0xff]  }
 0xe9d   :  { %8727 = vmatprep.subr.bf16.mxu0 %v12063_v5 }
 0xea0   :  { %8728 = vmatpush1.bf16.msra.mxu0 %v12061_v61 }
 0xea1   :  { %8729 = vmatprep.subr.bf16.mxu0 %v12066_v54 }
 0xea4   :  { %8730 = vmatpush1.bf16.msra.mxu0 %v12064_v13  ;;  %v12122_v13 = vld [vmem:[%s16181_s10 + $0xee0] ss:$8 sps:$4 sm:$0xff]  }
 0xea5   :  { %8731 = vmatprep.subr.bf16.mxu0 %v12069_v52  ;;  %v12127_v52 = vld [vmem:[%s16181_s10 + $0xef4] ss:$8 sps:$4 sm:$0xff]  }
 0xea8   :  { %8732 = vmatpush1.bf16.msra.mxu0 %v12067_v1  ;;  %v12128_v1 = vld [vmem:[%s16181_s10 + $0xf00] ss:$8 sps:$4 sm:$0xff]  }
 0xea9   :  { %8733 = vmatprep.subr.bf16.mxu0 %v12072_v25  ;;  %v5228_v25 = vpack.c.bf16 %v15926_v45, %v15926_v45  ;;  %v12184_v45 = vld [vmem:[%s16183_s12 + $0xe4] ss:$8 sps:$4 sm:$0xff]  }
 0xeaa   :  { %9066 = vmatprep.subr.bf16.mxu1 %v12184_v45 }
 0xeab   :  { %9067 = vmatpush1.bf16.msra.mxu1 %v12182_v30 }
 0xeac   :  { %8734 = vmatpush1.bf16.msra.mxu0 %v12070_v59  ;;  %v12136_v59 = vld [vmem:[%s16181_s10 + $0xf24] ss:$8 sps:$4 sm:$0xff]   ;;  %9068 = vmatprep.subr.bf16.mxu1 %v12187_v10 }
 0xead   :  { %8735 = vmatprep.subr.bf16.mxu0 %v12075_v7  ;;  %v12134_v7 = vld [vmem:[%s16181_s10 + $0xf20] ss:$8 sps:$4 sm:$0xff]  }
 0xeb0   :  { %8736 = vmatpush1.bf16.msra.mxu0 %v12073_v0  ;;  %v5167_v0 = vrot.slane %v5153_v42, %v13555_v24  ;;  %v12185_v24 = vld [vmem:[%s16183_s12 + $0xf0] ss:$8 sps:$4 sm:$0xff]  }
 0xeb1   :  { %8737 = vmatprep.subr.bf16.mxu0 %v12078_v38  ;;  %9069 = vmatpush1.bf16.msra.mxu1 %v12185_v24 }
 0xeb2   :  { %v5230_v38 = vpack.c.bf16 %v5167_v0, %v5167_v0  ;;  %10626 = vmatprep.subr.bf16.mxu1 %v12188_v56 }
 0xeb4   :  { %8738 = vmatpush1.bf16.msra.mxu0 %v12076_v49  ;;  %v5719_v49 = vld [vmem:[%s16182_s11] sm:$0x3] }
 0xeb5   :  { %8748 = vmatprep.subr.bf16.mxu0 %v12081_v29  ;;  %v5727_v29 = vsub.s32 1, %v13115_v31  ;;  %v5724_v53 = vrot.slane %v5719_v49, %v1936_v46 }
 0xeb7   :  { %8740 = vmatmul.mubr.bf16.vlgmr.msra.gmra.mrb[16].mxu0 %v5226_v40  ;;  %v5728_v11 = vrot.slane %v5719_v49, %v5727_v29 }
 0xeb8   :  { %8749 = vmatpush1.bf16.msra.mxu0 %v12079_v17  ;;  %8780 = vmatprep.mubr.bf16.mxu0 %v5229_v48 }
 0xeb9   :  { %8750 = vmatprep.subr.bf16.mxu0 %v12085_v41 }
 0xebc   :  { %8751 = vmatpush1.bf16.msra.mxu0 %v12083_v32 }
 0xebd   :  { %8752 = vmatprep.subr.bf16.mxu0 %v12088_v22 }
 0xec0   :  { %8753 = vmatpush1.bf16.msra.mxu0 %v12086_v21 }
 0xec1   :  { %8754 = vmatprep.subr.bf16.mxu0 %v12091_v51  ;;  %v12189_v51 = vld [vmem:[%s16185_s14] sm:$0xff]  }
 0xec4   :  { %8755 = vmatpush1.bf16.msra.mxu0 %v12089_v4 }
 0xec5   :  { %8756 = vmatprep.subr.bf16.mxu0 %v12094_v62  ;;  %v12190_v62 = vld [vmem:[%s16185_s14 + $0x48] sm:$0xff]  }
 0xec8   :  { %8757 = vmatpush1.bf16.msra.mxu0 %v12092_v8  ;;  %v12191_v8 = vld [vmem:[%s16185_s14 + $0x8] sm:$0xff]  }
 0xec9   :  { %8758 = vmatprep.subr.bf16.mxu0 %v12097_v9  ;;  %v12192_v9 = vld [vmem:[%s16185_s14 + $0x50] sm:$0xff]  }
 0xecc   :  { %8759 = vmatpush1.bf16.msra.mxu0 %v12095_v58  ;;  %v12193_v58 = vld [vmem:[%s16185_s14 + $0x10] sm:$0xff]  }
 0xecd   :  { %8760 = vmatprep.subr.bf16.mxu0 %v12100_v43  ;;  %v12194_v43 = vld [vmem:[%s16185_s14 + $0x58] sm:$0xff]  }
 0xed0   :  { %8761 = vmatpush1.bf16.msra.mxu0 %v12098_v23  ;;  %v12195_v23 = vld [vmem:[%s16185_s14 + $0x18] sm:$0xff]  }
 0xed1   :  { %8762 = vmatprep.subr.bf16.mxu0 %v12103_v3  ;;  %v12196_v3 = vld [vmem:[%s16185_s14 + $0x60] sm:$0xff]  }
 0xed4   :  { %8763 = vmatpush1.bf16.msra.mxu0 %v12101_v14  ;;  %v12197_v14 = vld [vmem:[%s16185_s14 + $0x20] sm:$0xff]  }
 0xed5   :  { %8764 = vmatprep.subr.bf16.mxu0 %v12106_v36  ;;  %v12198_v36 = vld [vmem:[%s16185_s14 + $0x68] sm:$0xff]  }
 0xed8   :  { %8765 = vmatpush1.bf16.msra.mxu0 %v12104_v27  ;;  %v12199_v27 = vld [vmem:[%s16185_s14 + $0x28] sm:$0xff]  }
 0xed9   :  { %8766 = vmatprep.subr.bf16.mxu0 %v12109_v47  ;;  %v12200_v47 = vld [vmem:[%s16185_s14 + $0x70] sm:$0xff]  }
 0xedc   :  { %8767 = vmatpush1.bf16.msra.mxu0 %v12107_v60  ;;  %v12201_v60 = vld [vmem:[%s16185_s14 + $0x30] sm:$0xff]  }
 0xedd   :  { %8768 = vmatprep.subr.bf16.mxu0 %v12112_v34  ;;  %v12202_v34 = vld [vmem:[%s16185_s14 + $0x78] sm:$0xff]  }
 0xee0   :  { %8769 = vmatpush1.bf16.msra.mxu0 %v12110_v16  ;;  %v12203_v16 = vld [vmem:[%s16185_s14 + $0x38] sm:$0xff]  }
 0xee1   :  { %8770 = vmatprep.subr.bf16.mxu0 %v12115_v35  ;;  %v8866_v35 = vld [vmem:[%s16184_s13] sm:$0x3]  ;;  %s12328_s13 = smov [#allocation4]  }
 0xee2   :  { %s9293_s4 = sshll.u32 %s12328_s13, 4  ;;  %s9294_s4 = int_to_ptr.vmem [resolvable:$true] %s9293_s4 }
 0xee3   :  { %v8413_v5 = vpop.f32.mrb[72].mxu1  ;;  %p12238_p1 = scmp.lt.s32.totalorder %s9294_s4, %s9294_s4 }
 0xee4   :  { %8771 = vmatpush1.bf16.msra.mxu0 %v12113_v63  ;;  %v8415_v6 = vpop.f32.mrb[73].mxu1  ;;  %v10960_v28 = vadd.f32 %v8413_v5, %v5724_v53  ;;  %v8871_v63 = vrot.slane %v8866_v35, %v1936_v46 }
 0xee5   :  { %8772 = vmatprep.subr.bf16.mxu0 %v12118_v39  ;;  %v8417_v61 = vpop.f32.mrb[74].mxu1  ;;  %v10962_v17 = vadd.f32 %v8415_v6, %v5728_v11  ;;  %v8875_v39 = vrot.slane %v8866_v35, %v5727_v29 }
 0xee6   :  { %v8418_v54 = vpop.f32.mrb[75].mxu1 }
 0xee8   :  { %8773 = vmatpush1.bf16.msra.mxu0 %v12116_v50 }
 0xee9   :  { %8774 = vmatprep.subr.bf16.mxu0 %v12121_v37 }
 0xeec   :  { %8775 = vmatpush1.bf16.msra.mxu0 %v12119_v20 }
 0xeed   :  { %8776 = vmatprep.subr.bf16.mxu0 %v12124_v12 }
 0xef0   :  { %8777 = vmatpush1.bf16.msra.mxu0 %v12122_v13 }
 0xef1   :  { %8778 = vmatprep.subr.bf16.mxu0 %v12127_v52 }
 0xef4   :  { %8779 = vmatpush1.bf16.msra.mxu0 %v12125_v26 }
 0xef5   :  { %8789 = vmatprep.subr.bf16.mxu0 %v12130_v55  ;;  %v10305_v55 = vld [vmem:[%s16186_s15] ss:$0 sm:$0xff]  ;;  %s12233_s15 = scalar_lea.vmem %s9294_s4, 32 }
 0xef6   :  { %p12234_p0 = scmp.ne.s32.totalorder %s9294_s4, %s12233_s15  ;;  %p12239_p2 = scmp.lt.s32.totalorder %s12233_s15, %s12233_s15 }
 0xef7   :  { %8781 = vmatmul.mubr.bf16.vlgmr.msra.gmra.mrb[16].mxu0 %v5228_v25 }
 0xef8   :  { %8790 = vmatpush1.bf16.msra.mxu0 %v12128_v1  ;;  %8821 = vmatprep.mubr.bf16.mxu0 %v12257_v2  ;;  %v12137_v2 = vld [vmem:[%s16181_s10 + $0xf30] ss:$8 sps:$4 sm:$0xff]   ;;  %p12240_p3 = por %p12239_p2, %p12238_p1 }
 0xef9   :  { %8791 = vmatprep.subr.bf16.mxu0 %v12133_v33 }
 0xefa   :  { %p12241_p4 = pnand %p12240_p3, %p12234_p0 }
 0xefc   :  { %8792 = vmatpush1.bf16.msra.mxu0 %v12131_v57 }
 0xefd   :  { %8793 = vmatprep.subr.bf16.mxu0 %v12136_v59  ;;  %v12327_v59 = vmov 1966171168  }
 0xf00   :  { %8794 = vmatpush1.bf16.msra.mxu0 %v12134_v7  ;;  %v9262_v7 = vunpack.c.l.s4 %v12327_v59 }
 0xf01   :  { %8795 = vmatprep.subr.bf16.mxu0 %v12139_v44 }
 0xf02   :  { %v9263_v42 = vunpack.c.0.s8 %v9262_v7 }
 0xf04   :  { %8796 = vmatpush1.bf16.msra.mxu0 %v12137_v2  ;;  %v9266_v44 = vsub.s32 %v9263_v42, %v13115_v31 }
 0xf07   :  { %10272 = vmatmul.mubr.msk.bf16.vlgmr.msra.gmra.mrb[16].mxu0 %vm16359_vm15, %v5230_v38 }
 0xfda   :  { %v8823_v40 = vpop.f32.mrb[16].mxu0 }
 0xfdb   :  { %v10961_v41 = vadd.f32 %v10960_v28, %v8823_v40  ;;  %v8825_v48 = vpop.f32.mrb[17].mxu0 }
 0xfdc   :  { %v10963_v19 = vadd.f32 %v10962_v17, %v8825_v48  ;;  %v8827_v15 = vpop.f32.mrb[18].mxu0 }
 0xfdd   :  { %v8830_v32 = vmax.f32 %v10961_v41, 0.0  ;;  %v8828_v22 = vpop.f32.mrb[19].mxu0 }
 0xfde   :  { %v8831_v18 = vmax.f32 %v10963_v19, 0.0 }
 0xfdf   :  { %v8832_v4 = vpack.c.bf16 %v8830_v32, %v8830_v32 }
 0xfe0   :  { %v8833_v21 = vpack.c.bf16 %v8831_v18, %v8831_v18 }
 0xfe2   :  { %9070 = vmatprep.mubr.bf16.mxu1 %v8833_v21 }
 0xfe3   :  { %9071 = vmatmul.mubr.bf16.vlgmr.msra.gmra.mrb[76].mxu1 %v8832_v4 }
 0xfe4   :  { %10627 = vmatpush3.bf16.msra.mxu1 %v12189_v51 }
 0xfe5   :  { %10628 = vmatprep.subr.bf16.mxu1 %v12190_v62 }
 0xfe8   :  { %10629 = vmatpush3.bf16.msra.mxu1 %v12191_v8 }
 0xfe9   :  { %10630 = vmatprep.subr.bf16.mxu1 %v12192_v9 }
 0xfec   :  { %10631 = vmatpush3.bf16.msra.mxu1 %v12193_v58 }
 0xfed   :  { %10632 = vmatprep.subr.bf16.mxu1 %v12194_v43 }
 0xff0   :  { %10633 = vmatpush3.bf16.msra.mxu1 %v12195_v23 }
 0xff1   :  { %10634 = vmatprep.subr.bf16.mxu1 %v12196_v3 }
 0xff4   :  { %10635 = vmatpush3.bf16.msra.mxu1 %v12197_v14 }
 0xff5   :  { %10636 = vmatprep.subr.bf16.mxu1 %v12198_v36 }
 0xff8   :  { %10637 = vmatpush3.bf16.msra.mxu1 %v12199_v27 }
 0xff9   :  { %10638 = vmatprep.subr.bf16.mxu1 %v12200_v47 }
 0xffc   :  { %10639 = vmatpush3.bf16.msra.mxu1 %v12201_v60 }
 0xffd   :  { %10640 = vmatprep.subr.bf16.mxu1 %v12202_v34 }
0x1000   :  { %10641 = vmatpush3.bf16.msra.mxu1 %v12203_v16 }
0x10b6   :  { %v9072_v50 = vpop.f32.mrb[76].mxu1 }
0x10b7   :  { %v9073_v5 = vadd.f32 %v9072_v50, %v8871_v63  ;;  %v9074_v37 = vpop.f32.mrb[77].mxu1 }
0x10b8   :  { %v9075_v6 = vadd.f32 %v9074_v37, %v8875_v39  ;;  %v9076_v61 = vpop.f32.mrb[78].mxu1 }
0x10b9   :  { %v9079_v54 = vmax.f32 %v9073_v5, 0.0  ;;  %v9077_v20 = vpop.f32.mrb[79].mxu1 }
0x10ba   :  { %v9080_v12 = vmax.f32 %v9075_v6, 0.0 }
0x10bb   :  { %v9081_v52 = vpack.c.bf16 %v9079_v54, %v9079_v54 }
0x10bc   :  { %v9082_v13 = vpack.c.bf16 %v9080_v12, %v9080_v12 }
0x10be   :  { %9250 = vmatprep.mubr.bf16.mxu1 %v9082_v13 }
0x10bf   :  { %9251 = vmatmul.mubr.bf16.vlgmr.msra.gmra.mrb[80].mxu1 %v9081_v52 }
0x1192   :  { %v10642_v26 = vpop.f32.mrb[80].mxu1 }
0x1193   :  { %v10643_v1 = vpop.f32.mrb[81].mxu1 }
0x1194   :  { %v10644_v46 = vadd.f32 %v10643_v1, %v10642_v26  ;;  %v10645_v25 = vpop.f32.mrb[82].mxu1 }
0x1195   :  { %v10646_v33 = vpop.f32.mrb[83].mxu1 }
0x1196   :  { %v9253_v57 = vadd.f32 %v10644_v46, %v10305_v55 }
0x1198   :  { %12214 = vtanh.f32 %v9253_v57 }
0x11a2   :  { %v12215_v2 = vpop.eup %12214 }
0x11a3   :  { %v9259_v0 = vmul.f32 0.8, %v12215_v2 }
0x11a5   :  { %v9267_v38 = vrot.slane %v9259_v0, %v9266_v44 }
0x11a7   :  { %v9268_v30 = vcombine.high %v9267_v38, %v9267_v38  ;;  %v9275_v45 = vrot.slane %v9267_v38, %v9266_v44 }
0x11a9   :  { %v9282_v10 = vrot.slane %v9268_v30, %v9266_v44  ;;  %9286 = vst.msk [vmem:[#allocation4] sm:$0x1] %vm9285_vm13, %v9275_v45 }
0x11ab   :  { %9287 = vst.msk [vmem:[#allocation4 + $0x1] sm:$0x1] %vm9285_vm13, %v9282_v10 }
0x11ac   :  { %12244 = shalt.err (!%p12241_p4)
}
0x11ad   :  { %s12245_s30 = scalar_lea.hbm %s16187_s16, 32 }
0x11ae   :  { %p12246_p5 = scmp.ne.s32.totalorder %s16187_s16, %s12245_s30  ;;  %p12249_p6 = scmp.lt.u32.totalorder %s12245_s30, %s16187_s16 }
0x11b0   :  { %p12251_p7 = pnand %p12249_p6, %p12246_p5 }
0x11b2   :  { %12254 = shalt.err (!%p12251_p7)
}
0x11b3   :  { %s12329_s28 = smov 16  }
0x11b4   :  { %9299 = dma.vmem_to_hbm [thread:$0]  %s9294_s4, 32, %s16187_s16, [#allocation5], %s12329_s28, %s12329_s28, %s16287_s9  }
0x11b5   :  { %12255 = dma.done.wait [#allocation5], 32  }
0x11b6   :  { %12256 = vsyncadd [#allocation5], 4294967264 }
0x11b7   :  { %9303 = vsyncpa [#allocation5], 1 }

</bundles_post_ra>
